<compile_context>
chip_gen: v7x
topology: tpu7x:2x2x1
jax: 0.10.0
libtpu: 0.0.40
codegen_flags: <defaults>
</compile_context>

<pallas_src>
import math
import functools

import jax
import jax.numpy as jnp
from jax.experimental import pallas as pl
from jax.experimental.pallas import tpu as pltpu


_VMEM_LIMIT = 32 * 1024 * 1024  # safe on v5e/v6e/v7x, raises v5e's 16 MiB default


def _pick_row_tile(dim, prefer=(512, 256, 128, 64, 32, 16, 8)):
    for t in prefer:
        if t <= dim and dim % t == 0:
            return t
    return dim


def _pick_lane_tile(dim, prefer=(512, 256, 128)):
    for t in prefer:
        if t <= dim and dim % t == 0:
            return t
    return dim


def _pick_head_block(heads, dh):
    # smallest head block whose lane width is a multiple of 128 (lane-dense stores)
    for hb in range(1, heads + 1):
        if heads % hb == 0 and (hb * dh) % 128 == 0:
            return hb
    return heads  # tiny-model fallback (not lane-dense, still correct)


# ----------------------------------------------------------------------------
# Pallas kernels
# ----------------------------------------------------------------------------

def layer_norm(x, gamma, beta, eps, out_dtype=jnp.bfloat16):
    """Row-tiled LayerNorm over last dim. x: (M, H)."""
    M, H = x.shape
    tm = _pick_row_tile(M)
    g2 = gamma.reshape(1, H).astype(jnp.float32)
    b2 = beta.reshape(1, H).astype(jnp.float32)

    def kernel(x_ref, g_ref, b_ref, o_ref):
        xv = x_ref[...].astype(jnp.float32)
        mu = jnp.mean(xv, axis=-1, keepdims=True)
        var = jnp.mean((xv - mu) ** 2, axis=-1, keepdims=True)
        yn = (xv - mu) * jax.lax.rsqrt(var + eps)
        o_ref[...] = (yn * g_ref[...] + b_ref[...]).astype(o_ref.dtype)

    return pl.pallas_call(
        kernel,
        out_shape=jax.ShapeDtypeStruct((M, H), out_dtype),
        grid=(M // tm,),
        in_specs=[
            pl.BlockSpec((tm, H), lambda i: (i, 0)),
            pl.BlockSpec((1, H), lambda i: (0, 0)),
            pl.BlockSpec((1, H), lambda i: (0, 0)),
        ],
        out_specs=pl.BlockSpec((tm, H), lambda i: (i, 0)),
        compiler_params=pltpu.CompilerParams(
            dimension_semantics=("parallel",),
            vmem_limit_bytes=_VMEM_LIMIT),
    )(x, g2, b2)


def dense_tiled(x, w, b, out_dtype=jnp.bfloat16):
    """y = x @ w + b, tiled (M,N,K) grid, bf16 MXU operands, f32 accumulator."""
    M, K = x.shape
    N = w.shape[1]
    tm = _pick_row_tile(M)
    tn = _pick_lane_tile(N)
    tk = _pick_lane_tile(K)
    b2 = b.reshape(1, N).astype(jnp.float32)

    def kernel(x_ref, w_ref, b_ref, o_ref, acc_ref):
        @pl.when(pl.program_id(2) == 0)
        def _():
            acc_ref[...] = jnp.zeros_like(acc_ref)
        acc_ref[...] += jnp.dot(x_ref[...], w_ref[...],
                                preferred_element_type=jnp.float32)

        @pl.when(pl.program_id(2) == pl.num_programs(2) - 1)
        def _():
            o_ref[...] = (acc_ref[...] + b_ref[...]).astype(o_ref.dtype)

    return pl.pallas_call(
        kernel,
        out_shape=jax.ShapeDtypeStruct((M, N), out_dtype),
        grid=(M // tm, N // tn, K // tk),
        in_specs=[
            pl.BlockSpec((tm, tk), lambda i, j, k: (i, k)),
            pl.BlockSpec((tk, tn), lambda i, j, k: (k, j)),
            pl.BlockSpec((1, tn), lambda i, j, k: (0, j)),
        ],
        out_specs=pl.BlockSpec((tm, tn), lambda i, j, k: (i, j)),
        scratch_shapes=[pltpu.VMEM((tm, tn), jnp.float32)],
        compiler_params=pltpu.CompilerParams(
            dimension_semantics=("parallel", "parallel", "arbitrary"),
            vmem_limit_bytes=_VMEM_LIMIT),
    )(x.astype(jnp.bfloat16), w.astype(jnp.bfloat16), b2)


def matmul_residual_ln(x, w, b, res, gamma, beta, eps, out_dtype=jnp.bfloat16):
    """out = LayerNorm(x @ w + b + res). K-tiled with fused finalize (post-LN)."""
    M, K = x.shape
    N = w.shape[1]
    tm = _pick_row_tile(M)
    tk = _pick_lane_tile(K)
    b2 = b.reshape(1, N).astype(jnp.float32)
    g2 = gamma.reshape(1, N).astype(jnp.float32)
    bt2 = beta.reshape(1, N).astype(jnp.float32)

    def kernel(x_ref, w_ref, b_ref, r_ref, g_ref, bt_ref, o_ref, acc_ref):
        k = pl.program_id(1)

        @pl.when(k == 0)
        def _():
            acc_ref[...] = jnp.zeros_like(acc_ref)
        acc_ref[...] += jnp.dot(x_ref[...], w_ref[...],
                                preferred_element_type=jnp.float32)

        @pl.when(k == pl.num_programs(1) - 1)
        def _():
            y = acc_ref[...] + b_ref[...] + r_ref[...].astype(jnp.float32)
            mu = jnp.mean(y, axis=-1, keepdims=True)
            var = jnp.mean((y - mu) ** 2, axis=-1, keepdims=True)
            yn = (y - mu) * jax.lax.rsqrt(var + eps)
            o_ref[...] = (yn * g_ref[...] + bt_ref[...]).astype(o_ref.dtype)

    return pl.pallas_call(
        kernel,
        out_shape=jax.ShapeDtypeStruct((M, N), out_dtype),
        grid=(M // tm, K // tk),
        in_specs=[
            pl.BlockSpec((tm, tk), lambda i, k: (i, k)),
            pl.BlockSpec((tk, N), lambda i, k: (k, 0)),
            pl.BlockSpec((1, N), lambda i, k: (0, 0)),
            pl.BlockSpec((tm, N), lambda i, k: (i, 0)),
            pl.BlockSpec((1, N), lambda i, k: (0, 0)),
            pl.BlockSpec((1, N), lambda i, k: (0, 0)),
        ],
        out_specs=pl.BlockSpec((tm, N), lambda i, k: (i, 0)),
        scratch_shapes=[pltpu.VMEM((tm, N), jnp.float32)],
        compiler_params=pltpu.CompilerParams(
            dimension_semantics=("parallel", "arbitrary"),
            vmem_limit_bytes=_VMEM_LIMIT),
    )(x.astype(jnp.bfloat16), w.astype(jnp.bfloat16), b2,
      res.astype(jnp.bfloat16), g2, bt2)


def ffn_residual_ln(x, w1, b1, w2, b2, res, gamma, beta, eps,
                    out_dtype=jnp.bfloat16):
    """out = LayerNorm(gelu(x@w1+b1)@w2 + b2 + res). FF dim is the reduction
    grid axis, so the (M, FF) intermediate never hits HBM."""
    M, H = x.shape
    F = w1.shape[1]
    tm = _pick_row_tile(M)
    tf = _pick_lane_tile(F)
    b1r = b1.reshape(1, F).astype(jnp.float32)
    b2r = b2.reshape(1, H).astype(jnp.float32)
    g2 = gamma.reshape(1, H).astype(jnp.float32)
    bt2 = beta.reshape(1, H).astype(jnp.float32)

    def kernel(x_ref, w1_ref, b1_ref, w2_ref, b2_ref, r_ref, g_ref, bt_ref,
               o_ref, acc_ref):
        f = pl.program_id(1)

        @pl.when(f == 0)
        def _():
            acc_ref[...] = jnp.zeros_like(acc_ref)

        mid = jnp.dot(x_ref[...], w1_ref[...], preferred_element_type=jnp.float32)
        mid = mid + b1_ref[...]
        # TODO(synk): HF XLM-R uses erf-GELU; tanh approximation used here.
        mid = jax.nn.gelu(mid, approximate=True)
        acc_ref[...] += jnp.dot(mid.astype(w2_ref.dtype), w2_ref[...],
                                preferred_element_type=jnp.float32)

        @pl.when(f == pl.num_programs(1) - 1)
        def _():
            y = acc_ref[...] + b2_ref[...] + r_ref[...].astype(jnp.float32)
            mu = jnp.mean(y, axis=-1, keepdims=True)
            var = jnp.mean((y - mu) ** 2, axis=-1, keepdims=True)
            yn = (y - mu) * jax.lax.rsqrt(var + eps)
            o_ref[...] = (yn * g_ref[...] + bt_ref[...]).astype(o_ref.dtype)

    return pl.pallas_call(
        kernel,
        out_shape=jax.ShapeDtypeStruct((M, H), out_dtype),
        grid=(M // tm, F // tf),
        in_specs=[
            pl.BlockSpec((tm, H), lambda i, f: (i, 0)),
            pl.BlockSpec((H, tf), lambda i, f: (0, f)),
            pl.BlockSpec((1, tf), lambda i, f: (0, f)),
            pl.BlockSpec((tf, H), lambda i, f: (f, 0)),
            pl.BlockSpec((1, H), lambda i, f: (0, 0)),
            pl.BlockSpec((tm, H), lambda i, f: (i, 0)),
            pl.BlockSpec((1, H), lambda i, f: (0, 0)),
            pl.BlockSpec((1, H), lambda i, f: (0, 0)),
        ],
        out_specs=pl.BlockSpec((tm, H), lambda i, f: (i, 0)),
        scratch_shapes=[pltpu.VMEM((tm, H), jnp.float32)],
        compiler_params=pltpu.CompilerParams(
            dimension_semantics=("parallel", "arbitrary"),
            vmem_limit_bytes=_VMEM_LIMIT),
    )(x.astype(jnp.bfloat16), w1.astype(jnp.bfloat16), b1r,
      w2.astype(jnp.bfloat16), b2r, res.astype(jnp.bfloat16), g2, bt2)


def attention(qkv, attn_bias, heads):
    """Multi-head self-attention directly from the fused QKV tensor.

    qkv:       (B, S, 3H) bf16, layout [Wq|Wk|Wv], 1/sqrt(Dh) already folded
               into the Q projection weights.
    attn_bias: (B, 1, S) f32 additive key mask (0 or -1e9), shared across heads.
    returns    (B, S, H) bf16 context, heads already merged along the lane dim.
    """
    B, S, threeH = qkv.shape
    H = threeH // 3
    Dh = H // heads
    Hb = _pick_head_block(heads, Dh)     # heads per grid step (Hb*Dh >= 128)
    nqb = heads // Hb
    W = Hb * Dh

    # TODO(synk): for long sequences switch to flash-style Sk tiling with
    #             online-softmax scratch; full (S,S) scores are fine at this scale.
    def kernel(q_ref, k_ref, v_ref, bias_ref, o_ref):
        bias = bias_ref[0]                               # (1, S) f32
        outs = []
        for h in range(Hb):                              # static unrolled loop
            lo = h * Dh
            qh = q_ref[0, :, lo:lo + Dh]                 # (S, Dh) bf16
            kh = k_ref[0, :, lo:lo + Dh]
            vh = v_ref[0, :, lo:lo + Dh]
            s = jax.lax.dot_general(                     # q @ k^T
                qh, kh, (((1,), (1,)), ((), ())),
                preferred_element_type=jnp.float32)      # (S, S) f32
            s = s + bias                                 # broadcast over queries
            s = s - jnp.max(s, axis=-1, keepdims=True)
            p = jnp.exp(s)
            p = p * pl.reciprocal(jnp.sum(p, axis=-1, keepdims=True), approx=True)
            outs.append(jnp.dot(p.astype(vh.dtype), vh,
                                preferred_element_type=jnp.float32))
        ctx = outs[0] if Hb == 1 else jnp.concatenate(outs, axis=-1)  # (S, W)
        o_ref[0] = ctx.astype(o_ref.dtype)               # single lane-dense store

    return pl.pallas_call(
        kernel,
        out_shape=jax.ShapeDtypeStruct((B, S, H), jnp.bfloat16),
        grid=(B, nqb),
        in_specs=[
            pl.BlockSpec((1, S, W), lambda b, hb: (b, 0, hb)),            # Q heads
            pl.BlockSpec((1, S, W), lambda b, hb: (b, 0, nqb + hb)),      # K heads
            pl.BlockSpec((1, S, W), lambda b, hb: (b, 0, 2 * nqb + hb)),  # V heads
            pl.BlockSpec((1, 1, S), lambda b, hb: (b, 0, 0)),             # key mask
        ],
        out_specs=pl.BlockSpec((1, S, W), lambda b, hb: (b, 0, hb)),
        compiler_params=pltpu.CompilerParams(
            dimension_semantics=("parallel", "parallel"),
            vmem_limit_bytes=_VMEM_LIMIT),
    )(qkv, qkv, qkv, attn_bias)


# ----------------------------------------------------------------------------
# XLM_R forward (glue: embedding gathers + mask build in plain JAX)
# ----------------------------------------------------------------------------

def xlm_r_forward(params, input_ids, segs, mask, language_ids, *, heads,
                  pad_idx=1):
    del segs  # XLM_R.forward does not pass token_type_ids (defaults to zeros)
    B, S = input_ids.shape
    H = params["word_emb"].shape[1]
    eps = 1e-5

    # --- embeddings (gathers have no clean Pallas equivalent; plain JAX) ---
    not_pad = (input_ids != pad_idx).astype(jnp.int32)
    position_ids = jnp.cumsum(not_pad, axis=1) * not_pad + pad_idx  # XLM-R style
    emb = (params["word_emb"][input_ids]
           + params["pos_emb"][position_ids]
           + params["tok_type_emb"][0][None, None, :])
    h = layer_norm(emb.reshape(B * S, H),
                   params["emb_ln_g"], params["emb_ln_b"], eps)     # (B*S, H) bf16

    # additive key mask, shared across heads (never broadcast to (B,heads,S,S))
    attn_bias = jnp.where(mask.astype(bool), 0.0, -1e9).astype(jnp.float32)
    attn_bias = attn_bias.reshape(B, 1, S)

    # --- post-LN transformer encoder layers ---
    for lp in params["layers"]:
        qkv = dense_tiled(h, lp["w_qkv"], lp["b_qkv"])               # (B*S, 3H)
        ctx = attention(qkv.reshape(B, S, 3 * H), attn_bias, heads)  # (B, S, H)
        h = matmul_residual_ln(ctx.reshape(B * S, H), lp["wo"], lp["bo"], h,
                               lp["ln1_g"], lp["ln1_b"], eps)
        h = ffn_residual_ln(h, lp["ff_w1"], lp["ff_b1"],
                            lp["ff_w2"], lp["ff_b2"], h,
                            lp["ln2_g"], lp["ln2_b"], eps)

    last_hidden = h.reshape(B, S, H).astype(jnp.float32)

    if language_ids is not None:
        lang_emb = params["lang_emb"][language_ids]                  # (B, H)
        last_hidden = last_hidden + lang_emb[:, None, :]
    return last_hidden


# ----------------------------------------------------------------------------
# Deterministic synthetic parameters
# ----------------------------------------------------------------------------

def build_params(key, vocab, H, ff, heads, layers, num_languages, max_pos):
    Dh = H // heads
    q_scale = 1.0 / math.sqrt(Dh)       # folded into the Q projection
    ones_h = jnp.ones((H,), jnp.float32)
    zeros_h = jnp.zeros((H,), jnp.float32)

    def normal(k, shape):
        return jax.random.normal(k, shape, jnp.float32) * 0.02

    keys = iter(jax.random.split(key, 16 + 8 * layers))

    layer_params = []
    for _ in range(layers):
        wq = normal(next(keys), (H, H)) * q_scale
        wk = normal(next(keys), (H, H))
        wv = normal(next(keys), (H, H))
        wo = normal(next(keys), (H, H))
        w1 = normal(next(keys), (H, ff))
        w2 = normal(next(keys), (ff, H))
        layer_params.append(dict(
            w_qkv=jnp.concatenate([wq, wk, wv], axis=1).astype(jnp.bfloat16),
            b_qkv=jnp.zeros((3 * H,), jnp.float32),
            wo=wo.astype(jnp.bfloat16), bo=zeros_h,
            ln1_g=ones_h, ln1_b=zeros_h,
            ff_w1=w1.astype(jnp.bfloat16), ff_b1=jnp.zeros((ff,), jnp.float32),
            ff_w2=w2.astype(jnp.bfloat16), ff_b2=zeros_h,
            ln2_g=ones_h, ln2_b=zeros_h))

    params = dict(
        word_emb=normal(next(keys), (vocab, H)).at[1].set(0.0),   # padding_idx=1
        pos_emb=normal(next(keys), (max_pos, H)),
        tok_type_emb=normal(next(keys), (1, H)),
        lang_emb=normal(next(keys), (num_languages, H)),
        emb_ln_g=ones_h, emb_ln_b=zeros_h,
        layers=layer_params)
    return params


# ----------------------------------------------------------------------------

if __name__ == "__main__":
    B, S = 2, 128
    HIDDEN, HEADS, FF = 256, 4, 512
    VOCAB, NUM_LANG, MAX_POS = 512, 3, S + 4
    LAYERS = 2

    root = jax.random.PRNGKey(0)
    kp, kx, kl = jax.random.split(root, 3)

    params = build_params(kp, VOCAB, HIDDEN, FF, HEADS, LAYERS, NUM_LANG, MAX_POS)

    mask = jnp.ones((B, S), jnp.int32).at[1, -16:].set(0)           # some padding
    x = jax.random.randint(kx, (B, S), 2, VOCAB, dtype=jnp.int32)
    x = jnp.where(mask.astype(bool), x, 1)                          # pad_idx = 1
    segs = jnp.zeros((B, S), jnp.int32)                             # unused by forward
    language_ids = jax.random.randint(kl, (B,), 0, NUM_LANG, dtype=jnp.int32)

    fwd = jax.jit(functools.partial(xlm_r_forward, heads=HEADS))
    out = fwd(params, x, segs, mask, language_ids)
    out = jax.block_until_ready(out)

    assert out.shape == (B, S, HIDDEN), out.shape
    assert bool(jnp.all(jnp.isfinite(out)))
    print("KERNEL_OK")
</pallas_src>

<mosaic_0001>
module attributes {stable_mosaic.version = 11 : i64} {
  func.func @kernel(%arg0: i32, %arg1: memref<256x256xf32, #tpu.memory_space<vmem>>, %arg2: memref<1x256xf32, #tpu.memory_space<vmem>>, %arg3: memref<1x256xf32, #tpu.memory_space<vmem>>, %arg4: memref<256x256xbf16, #tpu.memory_space<vmem>>) attributes {dimension_semantics = [#tpu.dimension_semantics<parallel>], iteration_bounds = array<i64: 1>, scalar_prefetch = 0 : i64, scratch_operands = 0 : i64, tpu.core_type = #tpu.core_type<tc>, window_params = [{transform_indices = @transform_0, window_bounds = array<i64: 256, 256>}, {pipeline_mode = #tpu.pipeline_mode<synchronous>, transform_indices = @transform_1, window_bounds = array<i64: 1, 256>}, {pipeline_mode = #tpu.pipeline_mode<synchronous>, transform_indices = @transform_2, window_bounds = array<i64: 1, 256>}, {transform_indices = @transform_3, window_bounds = array<i64: 256, 256>}]} {
    %c0 = arith.constant 0 : index
    %c0_0 = arith.constant 0 : index
    %0 = vector.load %arg1[%c0, %c0_0] : memref<256x256xf32, #tpu.memory_space<vmem>>, vector<256x256xf32>
    %cst = arith.constant dense<0.000000e+00> : vector<256xf32>
    %1 = vector.multi_reduction <add>, %0, %cst [1] : vector<256x256xf32> to vector<256xf32>
    %2 = vector.shape_cast %1 : vector<256xf32> to vector<256x1xf32>
    %cst_1 = arith.constant 2.560000e+02 : f32
    %3 = vector.broadcast %cst_1 : f32 to vector<256x1xf32>
    %4 = arith.divf %2, %3 : vector<256x1xf32>
    %5 = vector.broadcast %4 : vector<256x1xf32> to vector<256x256xf32>
    %6 = arith.subf %0, %5 : vector<256x256xf32>
    %7 = arith.mulf %6, %6 : vector<256x256xf32>
    %cst_2 = arith.constant dense<0.000000e+00> : vector<256xf32>
    %8 = vector.multi_reduction <add>, %7, %cst_2 [1] : vector<256x256xf32> to vector<256xf32>
    %9 = vector.shape_cast %8 : vector<256xf32> to vector<256x1xf32>
    %cst_3 = arith.constant 2.560000e+02 : f32
    %10 = vector.broadcast %cst_3 : f32 to vector<256x1xf32>
    %11 = arith.divf %9, %10 : vector<256x1xf32>
    %12 = vector.broadcast %4 : vector<256x1xf32> to vector<256x256xf32>
    %13 = arith.subf %0, %12 : vector<256x256xf32>
    %cst_4 = arith.constant 9.99999974E-6 : f32
    %14 = vector.broadcast %cst_4 : f32 to vector<256x1xf32>
    %15 = arith.addf %11, %14 : vector<256x1xf32>
    %16 = math.rsqrt %15 : vector<256x1xf32>
    %17 = vector.broadcast %16 : vector<256x1xf32> to vector<256x256xf32>
    %18 = arith.mulf %13, %17 : vector<256x256xf32>
    %c0_5 = arith.constant 0 : index
    %c0_6 = arith.constant 0 : index
    %19 = vector.load %arg2[%c0_5, %c0_6] : memref<1x256xf32, #tpu.memory_space<vmem>>, vector<1x256xf32>
    %20 = vector.broadcast %19 : vector<1x256xf32> to vector<256x256xf32>
    %21 = arith.mulf %18, %20 : vector<256x256xf32>
    %c0_7 = arith.constant 0 : index
    %c0_8 = arith.constant 0 : index
    %22 = vector.load %arg3[%c0_7, %c0_8] : memref<1x256xf32, #tpu.memory_space<vmem>>, vector<1x256xf32>
    %23 = vector.broadcast %22 : vector<1x256xf32> to vector<256x256xf32>
    %24 = arith.addf %21, %23 : vector<256x256xf32>
    %25 = arith.truncf %24 : vector<256x256xf32> to vector<256x256xbf16>
    %c0_9 = arith.constant 0 : index
    %c0_10 = arith.constant 0 : index
    %26 = vector.load %arg4[%c0_9, %c0_10] : memref<256x256xbf16, #tpu.memory_space<vmem>>, vector<256x256xbf16>
    tpu.vector_store %arg4[%c0_9, %c0_10], %25 {strides = array<i32>} : memref<256x256xbf16, #tpu.memory_space<vmem>>, vector<256x256xbf16>,
    return
  }
  func.func @transform_0(%arg0: i32) -> (i32, i32) {
    %c0_i32 = arith.constant 0 : i32
    %c0_i32_0 = arith.constant 0 : i32
    return %arg0, %c0_i32 : i32, i32
  }
  func.func @transform_1(%arg0: i32) -> (i32, i32) {
    %c0_i32 = arith.constant 0 : i32
    %c0_i32_0 = arith.constant 0 : i32
    %c0_i32_1 = arith.constant 0 : i32
    return %c0_i32, %c0_i32_0 : i32, i32
  }
  func.func @transform_2(%arg0: i32) -> (i32, i32) {
    %c0_i32 = arith.constant 0 : i32
    %c0_i32_0 = arith.constant 0 : i32
    %c0_i32_1 = arith.constant 0 : i32
    return %c0_i32, %c0_i32_0 : i32, i32
  }
  func.func @transform_3(%arg0: i32) -> (i32, i32) {
    %c0_i32 = arith.constant 0 : i32
    %c0_i32_0 = arith.constant 0 : i32
    return %arg0, %c0_i32 : i32, i32
  }
}

module attributes {stable_mosaic.version = 11 : i64} {
  func.func @kernel(%arg0: i32, %arg1: i32, %arg2: i32, %arg3: memref<256x256xbf16, #tpu.memory_space<vmem>>, %arg4: memref<256x256xbf16, #tpu.memory_space<vmem>>, %arg5: memref<1x256xf32, #tpu.memory_space<vmem>>, %arg6: memref<256x256xbf16, #tpu.memory_space<vmem>>, %arg7: memref<256x256xf32, #tpu.memory_space<vmem>>) attributes {dimension_semantics = [#tpu.dimension_semantics<parallel>, #tpu.dimension_semantics<parallel>, #tpu.dimension_semantics<arbitrary>], iteration_bounds = array<i64: 1, 3, 1>, scalar_prefetch = 0 : i64, scratch_operands = 1 : i64, tpu.core_type = #tpu.core_type<tc>, window_params = [{transform_indices = @transform_0, window_bounds = array<i64: 256, 256>}, {transform_indices = @transform_1, window_bounds = array<i64: 256, 256>}, {transform_indices = @transform_2, window_bounds = array<i64: 1, 256>}, {transform_indices = @transform_3, window_bounds = array<i64: 256, 256>}]} {
    %c0_i32 = arith.constant 0 : i32
    %0 = arith.cmpi eq, %arg2, %c0_i32 : i32
    %1 = arith.extui %0 : i1 to i32
    %c0_i32_0 = arith.constant 0 : i32
    %2 = arith.cmpi ne, %1, %c0_i32_0 : i32
    scf.if %2 {
      %cst_10 = arith.constant 0.000000e+00 : f32
      %12 = vector.broadcast %cst_10 : f32 to vector<256x256xf32>
      %c0_11 = arith.constant 0 : index
      %c0_12 = arith.constant 0 : index
      %13 = vector.load %arg7[%c0_11, %c0_12] : memref<256x256xf32, #tpu.memory_space<vmem>>, vector<256x256xf32>
      tpu.vector_store %arg7[%c0_11, %c0_12], %12 {strides = array<i32>} : memref<256x256xf32, #tpu.memory_space<vmem>>, vector<256x256xf32>,
    } else {
    }
    %c0 = arith.constant 0 : index
    %c0_1 = arith.constant 0 : index
    %3 = vector.load %arg7[%c0, %c0_1] : memref<256x256xf32, #tpu.memory_space<vmem>>, vector<256x256xf32>
    %c0_2 = arith.constant 0 : index
    %c0_3 = arith.constant 0 : index
    %4 = vector.load %arg3[%c0_2, %c0_3] : memref<256x256xbf16, #tpu.memory_space<vmem>>, vector<256x256xbf16>
    %c0_4 = arith.constant 0 : index
    %c0_5 = arith.constant 0 : index
    %5 = vector.load %arg4[%c0_4, %c0_5] : memref<256x256xbf16, #tpu.memory_space<vmem>>, vector<256x256xbf16>
    %cst = arith.constant dense<0.000000e+00> : vector<256x256xf32>
    %6 = tpu.matmul %4, %5, %cst {dimension_numbers = #tpu.dot_dimension_numbers<[1], [0], [0], [1], [0, 0, 1, 1], [], []>} : vector<256x256xbf16>, vector<256x256xbf16>, vector<256x256xf32> -> vector<256x256xf32>
    %7 = arith.addf %3, %6 : vector<256x256xf32>
    %c0_6 = arith.constant 0 : index
    %c0_7 = arith.constant 0 : index
    %8 = vector.load %arg7[%c0_6, %c0_7] : memref<256x256xf32, #tpu.memory_space<vmem>>, vector<256x256xf32>
    tpu.vector_store %arg7[%c0_6, %c0_7], %7 {strides = array<i32>} : memref<256x256xf32, #tpu.memory_space<vmem>>, vector<256x256xf32>,
    %c0_i32_8 = arith.constant 0 : i32
    %9 = arith.cmpi eq, %arg2, %c0_i32_8 : i32
    %10 = arith.extui %9 : i1 to i32
    %c0_i32_9 = arith.constant 0 : i32
    %11 = arith.cmpi ne, %10, %c0_i32_9 : i32
    scf.if %11 {
      %c0_10 = arith.constant 0 : index
      %c0_11 = arith.constant 0 : index
      %12 = vector.load %arg7[%c0_10, %c0_11] : memref<256x256xf32, #tpu.memory_space<vmem>>, vector<256x256xf32>
      %c0_12 = arith.constant 0 : index
      %c0_13 = arith.constant 0 : index
      %13 = vector.load %arg5[%c0_12, %c0_13] : memref<1x256xf32, #tpu.memory_space<vmem>>, vector<1x256xf32>
      %14 = vector.broadcast %13 : vector<1x256xf32> to vector<256x256xf32>
      %15 = arith.addf %12, %14 : vector<256x256xf32>
      %16 = arith.truncf %15 : vector<256x256xf32> to vector<256x256xbf16>
      %c0_14 = arith.constant 0 : index
      %c0_15 = arith.constant 0 : index
      %17 = vector.load %arg6[%c0_14, %c0_15] : memref<256x256xbf16, #tpu.memory_space<vmem>>, vector<256x256xbf16>
      tpu.vector_store %arg6[%c0_14, %c0_15], %16 {strides = array<i32>} : memref<256x256xbf16, #tpu.memory_space<vmem>>, vector<256x256xbf16>,
    } else {
    }
    return
  }
  func.func @transform_0(%arg0: i32, %arg1: i32, %arg2: i32) -> (i32, i32) {
    %c0_i32 = arith.constant 0 : i32
    return %arg0, %arg2 : i32, i32
  }
  func.func @transform_1(%arg0: i32, %arg1: i32, %arg2: i32) -> (i32, i32) {
    %c0_i32 = arith.constant 0 : i32
    return %arg2, %arg1 : i32, i32
  }
  func.func @transform_2(%arg0: i32, %arg1: i32, %arg2: i32) -> (i32, i32) {
    %c0_i32 = arith.constant 0 : i32
    %c0_i32_0 = arith.constant 0 : i32
    return %c0_i32, %arg1 : i32, i32
  }
  func.func @transform_3(%arg0: i32, %arg1: i32, %arg2: i32) -> (i32, i32) {
    %c0_i32 = arith.constant 0 : i32
    return %arg0, %arg1 : i32, i32
  }
}

module attributes {stable_mosaic.version = 11 : i64} {
  func.func @kernel(%arg0: i32, %arg1: i32, %arg2: memref<1x128x128xbf16, #tpu.memory_space<vmem>>, %arg3: memref<1x128x128xbf16, #tpu.memory_space<vmem>>, %arg4: memref<1x128x128xbf16, #tpu.memory_space<vmem>>, %arg5: memref<1x1x128xf32, #tpu.memory_space<vmem>>, %arg6: memref<1x128x128xbf16, #tpu.memory_space<vmem>>) attributes {dimension_semantics = [#tpu.dimension_semantics<parallel>, #tpu.dimension_semantics<parallel>], iteration_bounds = array<i64: 2, 2>, scalar_prefetch = 0 : i64, scratch_operands = 0 : i64, tpu.core_type = #tpu.core_type<tc>, window_params = [{transform_indices = @transform_0, window_bounds = array<i64: 1, 128, 128>}, {transform_indices = @transform_1, window_bounds = array<i64: 1, 128, 128>}, {transform_indices = @transform_2, window_bounds = array<i64: 1, 128, 128>}, {transform_indices = @transform_3, window_bounds = array<i64: 1, 1, 128>}, {transform_indices = @transform_4, window_bounds = array<i64: 1, 128, 128>}]} {
    %c0 = arith.constant 0 : index
    %c0_0 = arith.constant 0 : index
    %c0_1 = arith.constant 0 : index
    %0 = vector.load %arg5[%c0, %c0_0, %c0_1] : memref<1x1x128xf32, #tpu.memory_space<vmem>>, vector<1x1x128xf32>
    %1 = vector.shape_cast %0 : vector<1x1x128xf32> to vector<1x128xf32>
    %c0_2 = arith.constant 0 : index
    %c0_3 = arith.constant 0 : index
    %c0_4 = arith.constant 0 : index
    %2 = vector.load %arg2[%c0_2, %c0_3, %c0_4] : memref<1x128x128xbf16, #tpu.memory_space<vmem>>, vector<1x128x64xbf16>
    %3 = vector.shape_cast %2 : vector<1x128x64xbf16> to vector<128x64xbf16>
    %c0_5 = arith.constant 0 : index
    %c0_6 = arith.constant 0 : index
    %c0_7 = arith.constant 0 : index
    %4 = vector.load %arg3[%c0_5, %c0_6, %c0_7] : memref<1x128x128xbf16, #tpu.memory_space<vmem>>, vector<1x128x64xbf16>
    %5 = vector.shape_cast %4 : vector<1x128x64xbf16> to vector<128x64xbf16>
    %c0_8 = arith.constant 0 : index
    %c0_9 = arith.constant 0 : index
    %c0_10 = arith.constant 0 : index
    %6 = vector.load %arg4[%c0_8, %c0_9, %c0_10] : memref<1x128x128xbf16, #tpu.memory_space<vmem>>, vector<1x128x64xbf16>
    %7 = vector.shape_cast %6 : vector<1x128x64xbf16> to vector<128x64xbf16>
    %cst = arith.constant dense<0.000000e+00> : vector<128x128xf32>
    %8 = tpu.matmul %3, %5, %cst {dimension_numbers = #tpu.dot_dimension_numbers<[1], [1], [0], [0], [0, 0, 1, 0], [], []>} : vector<128x64xbf16>, vector<128x64xbf16>, vector<128x128xf32> -> vector<128x128xf32>
    %9 = vector.broadcast %1 : vector<1x128xf32> to vector<128x128xf32>
    %10 = arith.addf %8, %9 : vector<128x128xf32>
    %cst_11 = arith.constant dense<0xFF800000> : vector<128xf32>
    %11 = vector.multi_reduction <maximumf>, %10, %cst_11 [1] : vector<128x128xf32> to vector<128xf32>
    %12 = vector.shape_cast %11 : vector<128xf32> to vector<128x1xf32>
    %13 = vector.broadcast %12 : vector<128x1xf32> to vector<128x128xf32>
    %14 = arith.subf %10, %13 : vector<128x128xf32>
    %15 = math.exp %14 : vector<128x128xf32>
    %cst_12 = arith.constant dense<0.000000e+00> : vector<128xf32>
    %16 = vector.multi_reduction <add>, %15, %cst_12 [1] : vector<128x128xf32> to vector<128xf32>
    %17 = vector.shape_cast %16 : vector<128xf32> to vector<128x1xf32>
    %18 = tpu.reciprocal %17 {approx = true} : vector<128x1xf32> -> vector<128x1xf32>
    %19 = vector.broadcast %18 : vector<128x1xf32> to vector<128x128xf32>
    %20 = arith.mulf %15, %19 : vector<128x128xf32>
    %21 = arith.truncf %20 : vector<128x128xf32> to vector<128x128xbf16>
    %cst_13 = arith.constant dense<0.000000e+00> : vector<128x64xf32>
    %22 = tpu.matmul %21, %7, %cst_13 {dimension_numbers = #tpu.dot_dimension_numbers<[1], [0], [0], [1], [0, 0, 1, 1], [], []>} : vector<128x128xbf16>, vector<128x64xbf16>, vector<128x64xf32> -> vector<128x64xf32>
    %c0_14 = arith.constant 0 : index
    %c0_15 = arith.constant 0 : index
    %c64 = arith.constant 64 : index
    %23 = vector.load %arg2[%c0_14, %c0_15, %c64] : memref<1x128x128xbf16, #tpu.memory_space<vmem>>, vector<1x128x64xbf16>
    %24 = vector.shape_cast %23 : vector<1x128x64xbf16> to vector<128x64xbf16>
    %c0_16 = arith.constant 0 : index
    %c0_17 = arith.constant 0 : index
    %c64_18 = arith.constant 64 : index
    %25 = vector.load %arg3[%c0_16, %c0_17, %c64_18] : memref<1x128x128xbf16, #tpu.memory_space<vmem>>, vector<1x128x64xbf16>
    %26 = vector.shape_cast %25 : vector<1x128x64xbf16> to vector<128x64xbf16>
    %c0_19 = arith.constant 0 : index
    %c0_20 = arith.constant 0 : index
    %c64_21 = arith.constant 64 : index
    %27 = vector.load %arg4[%c0_19, %c0_20, %c64_21] : memref<1x128x128xbf16, #tpu.memory_space<vmem>>, vector<1x128x64xbf16>
    %28 = vector.shape_cast %27 : vector<1x128x64xbf16> to vector<128x64xbf16>
    %cst_22 = arith.constant dense<0.000000e+00> : vector<128x128xf32>
    %29 = tpu.matmul %24, %26, %cst_22 {dimension_numbers = #tpu.dot_dimension_numbers<[1], [1], [0], [0], [0, 0, 1, 0], [], []>} : vector<128x64xbf16>, vector<128x64xbf16>, vector<128x128xf32> -> vector<128x128xf32>
    %30 = vector.broadcast %1 : vector<1x128xf32> to vector<128x128xf32>
    %31 = arith.addf %29, %30 : vector<128x128xf32>
    %cst_23 = arith.constant dense<0xFF800000> : vector<128xf32>
    %32 = vector.multi_reduction <maximumf>, %31, %cst_23 [1] : vector<128x128xf32> to vector<128xf32>
    %33 = vector.shape_cast %32 : vector<128xf32> to vector<128x1xf32>
    %34 = vector.broadcast %33 : vector<128x1xf32> to vector<128x128xf32>
    %35 = arith.subf %31, %34 : vector<128x128xf32>
    %36 = math.exp %35 : vector<128x128xf32>
    %cst_24 = arith.constant dense<0.000000e+00> : vector<128xf32>
    %37 = vector.multi_reduction <add>, %36, %cst_24 [1] : vector<128x128xf32> to vector<128xf32>
    %38 = vector.shape_cast %37 : vector<128xf32> to vector<128x1xf32>
    %39 = tpu.reciprocal %38 {approx = true} : vector<128x1xf32> -> vector<128x1xf32>
    %40 = vector.broadcast %39 : vector<128x1xf32> to vector<128x128xf32>
    %41 = arith.mulf %36, %40 : vector<128x128xf32>
    %42 = arith.truncf %41 : vector<128x128xf32> to vector<128x128xbf16>
    %cst_25 = arith.constant dense<0.000000e+00> : vector<128x64xf32>
    %43 = tpu.matmul %42, %28, %cst_25 {dimension_numbers = #tpu.dot_dimension_numbers<[1], [0], [0], [1], [0, 0, 1, 1], [], []>} : vector<128x128xbf16>, vector<128x64xbf16>, vector<128x64xf32> -> vector<128x64xf32>
    %44 = tpu.concatenate %22, %43 in 1 : vector<128x64xf32>, vector<128x64xf32> -> vector<128x128xf32>
    %45 = arith.truncf %44 : vector<128x128xf32> to vector<128x128xbf16>
    %c0_26 = arith.constant 0 : index
    %c0_27 = arith.constant 0 : index
    %c0_28 = arith.constant 0 : index
    %46 = vector.load %arg6[%c0_26, %c0_27, %c0_28] : memref<1x128x128xbf16, #tpu.memory_space<vmem>>, vector<1x128x128xbf16>
    %47 = vector.shape_cast %46 : vector<1x128x128xbf16> to vector<128x128xbf16>
    %48 = vector.shape_cast %45 : vector<128x128xbf16> to vector<1x128x128xbf16>
    tpu.vector_store %arg6[%c0_26, %c0_27, %c0_28], %48 {strides = array<i32>} : memref<1x128x128xbf16, #tpu.memory_space<vmem>>, vector<1x128x128xbf16>,
    return
  }
  func.func @transform_0(%arg0: i32, %arg1: i32) -> (i32, i32, i32) {
    %c0_i32 = arith.constant 0 : i32
    %c0_i32_0 = arith.constant 0 : i32
    return %arg0, %c0_i32, %arg1 : i32, i32, i32
  }
  func.func @transform_1(%arg0: i32, %arg1: i32) -> (i32, i32, i32) {
    %c2_i32 = arith.constant 2 : i32
    %0 = arith.addi %c2_i32, %arg1 : i32
    %c0_i32 = arith.constant 0 : i32
    %c0_i32_0 = arith.constant 0 : i32
    return %arg0, %c0_i32, %0 : i32, i32, i32
  }
  func.func @transform_2(%arg0: i32, %arg1: i32) -> (i32, i32, i32) {
    %c4_i32 = arith.constant 4 : i32
    %0 = arith.addi %c4_i32, %arg1 : i32
    %c0_i32 = arith.constant 0 : i32
    %c0_i32_0 = arith.constant 0 : i32
    return %arg0, %c0_i32, %0 : i32, i32, i32
  }
  func.func @transform_3(%arg0: i32, %arg1: i32) -> (i32, i32, i32) {
    %c0_i32 = arith.constant 0 : i32
    %c0_i32_0 = arith.constant 0 : i32
    %c0_i32_1 = arith.constant 0 : i32
    return %arg0, %c0_i32, %c0_i32_0 : i32, i32, i32
  }
  func.func @transform_4(%arg0: i32, %arg1: i32) -> (i32, i32, i32) {
    %c0_i32 = arith.constant 0 : i32
    %c0_i32_0 = arith.constant 0 : i32
    return %arg0, %c0_i32, %arg1 : i32, i32, i32
  }
}

module attributes {stable_mosaic.version = 11 : i64} {
  func.func @kernel(%arg0: i32, %arg1: i32, %arg2: memref<256x256xbf16, #tpu.memory_space<vmem>>, %arg3: memref<256x256xbf16, #tpu.memory_space<vmem>>, %arg4: memref<1x256xf32, #tpu.memory_space<vmem>>, %arg5: memref<256x256xbf16, #tpu.memory_space<vmem>>, %arg6: memref<1x256xf32, #tpu.memory_space<vmem>>, %arg7: memref<1x256xf32, #tpu.memory_space<vmem>>, %arg8: memref<256x256xbf16, #tpu.memory_space<vmem>>, %arg9: memref<256x256xf32, #tpu.memory_space<vmem>>) attributes {dimension_semantics = [#tpu.dimension_semantics<parallel>, #tpu.dimension_semantics<arbitrary>], iteration_bounds = array<i64: 1, 1>, scalar_prefetch = 0 : i64, scratch_operands = 1 : i64, tpu.core_type = #tpu.core_type<tc>, window_params = [{transform_indices = @transform_0, window_bounds = array<i64: 256, 256>}, {transform_indices = @transform_1, window_bounds = array<i64: 256, 256>}, {pipeline_mode = #tpu.pipeline_mode<synchronous>, transform_indices = @transform_2, window_bounds = array<i64: 1, 256>}, {transform_indices = @transform_3, window_bounds = array<i64: 256, 256>}, {pipeline_mode = #tpu.pipeline_mode<synchronous>, transform_indices = @transform_4, window_bounds = array<i64: 1, 256>}, {pipeline_mode = #tpu.pipeline_mode<synchronous>, transform_indices = @transform_5, window_bounds = array<i64: 1, 256>}, {transform_indices = @transform_6, window_bounds = array<i64: 256, 256>}]} {
    %c0_i32 = arith.constant 0 : i32
    %0 = arith.cmpi eq, %arg1, %c0_i32 : i32
    %1 = arith.extui %0 : i1 to i32
    %c0_i32_0 = arith.constant 0 : i32
    %2 = arith.cmpi ne, %1, %c0_i32_0 : i32
    scf.if %2 {
      %cst_10 = arith.constant 0.000000e+00 : f32
      %12 = vector.broadcast %cst_10 : f32 to vector<256x256xf32>
      %c0_11 = arith.constant 0 : index
      %c0_12 = arith.constant 0 : index
      %13 = vector.load %arg9[%c0_11, %c0_12] : memref<256x256xf32, #tpu.memory_space<vmem>>, vector<256x256xf32>
      tpu.vector_store %arg9[%c0_11, %c0_12], %12 {strides = array<i32>} : memref<256x256xf32, #tpu.memory_space<vmem>>, vector<256x256xf32>,
    } else {
    }
    %c0 = arith.constant 0 : index
    %c0_1 = arith.constant 0 : index
    %3 = vector.load %arg9[%c0, %c0_1] : memref<256x256xf32, #tpu.memory_space<vmem>>, vector<256x256xf32>
    %c0_2 = arith.constant 0 : index
    %c0_3 = arith.constant 0 : index
    %4 = vector.load %arg2[%c0_2, %c0_3] : memref<256x256xbf16, #tpu.memory_space<vmem>>, vector<256x256xbf16>
    %c0_4 = arith.constant 0 : index
    %c0_5 = arith.constant 0 : index
    %5 = vector.load %arg3[%c0_4, %c0_5] : memref<256x256xbf16, #tpu.memory_space<vmem>>, vector<256x256xbf16>
    %cst = arith.constant dense<0.000000e+00> : vector<256x256xf32>
    %6 = tpu.matmul %4, %5, %cst {dimension_numbers = #tpu.dot_dimension_numbers<[1], [0], [0], [1], [0, 0, 1, 1], [], []>} : vector<256x256xbf16>, vector<256x256xbf16>, vector<256x256xf32> -> vector<256x256xf32>
    %7 = arith.addf %3, %6 : vector<256x256xf32>
    %c0_6 = arith.constant 0 : index
    %c0_7 = arith.constant 0 : index
    %8 = vector.load %arg9[%c0_6, %c0_7] : memref<256x256xf32, #tpu.memory_space<vmem>>, vector<256x256xf32>
    tpu.vector_store %arg9[%c0_6, %c0_7], %7 {strides = array<i32>} : memref<256x256xf32, #tpu.memory_space<vmem>>, vector<256x256xf32>,
    %c0_i32_8 = arith.constant 0 : i32
    %9 = arith.cmpi eq, %arg1, %c0_i32_8 : i32
    %10 = arith.extui %9 : i1 to i32
    %c0_i32_9 = arith.constant 0 : i32
    %11 = arith.cmpi ne, %10, %c0_i32_9 : i32
    scf.if %11 {
      %c0_10 = arith.constant 0 : index
      %c0_11 = arith.constant 0 : index
      %12 = vector.load %arg9[%c0_10, %c0_11] : memref<256x256xf32, #tpu.memory_space<vmem>>, vector<256x256xf32>
      %c0_12 = arith.constant 0 : index
      %c0_13 = arith.constant 0 : index
      %13 = vector.load %arg4[%c0_12, %c0_13] : memref<1x256xf32, #tpu.memory_space<vmem>>, vector<1x256xf32>
      %14 = vector.broadcast %13 : vector<1x256xf32> to vector<256x256xf32>
      %15 = arith.addf %12, %14 : vector<256x256xf32>
      %c0_14 = arith.constant 0 : index
      %c0_15 = arith.constant 0 : index
      %16 = vector.load %arg5[%c0_14, %c0_15] : memref<256x256xbf16, #tpu.memory_space<vmem>>, vector<256x256xbf16>
      %17 = arith.extf %16 : vector<256x256xbf16> to vector<256x256xf32>
      %18 = arith.addf %15, %17 : vector<256x256xf32>
      %cst_16 = arith.constant dense<0.000000e+00> : vector<256xf32>
      %19 = vector.multi_reduction <add>, %18, %cst_16 [1] : vector<256x256xf32> to vector<256xf32>
      %20 = vector.shape_cast %19 : vector<256xf32> to vector<256x1xf32>
      %cst_17 = arith.constant 2.560000e+02 : f32
      %21 = vector.broadcast %cst_17 : f32 to vector<256x1xf32>
      %22 = arith.divf %20, %21 : vector<256x1xf32>
      %23 = vector.broadcast %22 : vector<256x1xf32> to vector<256x256xf32>
      %24 = arith.subf %18, %23 : vector<256x256xf32>
      %25 = arith.mulf %24, %24 : vector<256x256xf32>
      %cst_18 = arith.constant dense<0.000000e+00> : vector<256xf32>
      %26 = vector.multi_reduction <add>, %25, %cst_18 [1] : vector<256x256xf32> to vector<256xf32>
      %27 = vector.shape_cast %26 : vector<256xf32> to vector<256x1xf32>
      %cst_19 = arith.constant 2.560000e+02 : f32
      %28 = vector.broadcast %cst_19 : f32 to vector<256x1xf32>
      %29 = arith.divf %27, %28 : vector<256x1xf32>
      %30 = vector.broadcast %22 : vector<256x1xf32> to vector<256x256xf32>
      %31 = arith.subf %18, %30 : vector<256x256xf32>
      %cst_20 = arith.constant 9.99999974E-6 : f32
      %32 = vector.broadcast %cst_20 : f32 to vector<256x1xf32>
      %33 = arith.addf %29, %32 : vector<256x1xf32>
      %34 = math.rsqrt %33 : vector<256x1xf32>
      %35 = vector.broadcast %34 : vector<256x1xf32> to vector<256x256xf32>
      %36 = arith.mulf %31, %35 : vector<256x256xf32>
      %c0_21 = arith.constant 0 : index
      %c0_22 = arith.constant 0 : index
      %37 = vector.load %arg6[%c0_21, %c0_22] : memref<1x256xf32, #tpu.memory_space<vmem>>, vector<1x256xf32>
      %38 = vector.broadcast %37 : vector<1x256xf32> to vector<256x256xf32>
      %39 = arith.mulf %36, %38 : vector<256x256xf32>
      %c0_23 = arith.constant 0 : index
      %c0_24 = arith.constant 0 : index
      %40 = vector.load %arg7[%c0_23, %c0_24] : memref<1x256xf32, #tpu.memory_space<vmem>>, vector<1x256xf32>
      %41 = vector.broadcast %40 : vector<1x256xf32> to vector<256x256xf32>
      %42 = arith.addf %39, %41 : vector<256x256xf32>
      %43 = arith.truncf %42 : vector<256x256xf32> to vector<256x256xbf16>
      %c0_25 = arith.constant 0 : index
      %c0_26 = arith.constant 0 : index
      %44 = vector.load %arg8[%c0_25, %c0_26] : memref<256x256xbf16, #tpu.memory_space<vmem>>, vector<256x256xbf16>
      tpu.vector_store %arg8[%c0_25, %c0_26], %43 {strides = array<i32>} : memref<256x256xbf16, #tpu.memory_space<vmem>>, vector<256x256xbf16>,
    } else {
    }
    return
  }
  func.func @transform_0(%arg0: i32, %arg1: i32) -> (i32, i32) {
    %c0_i32 = arith.constant 0 : i32
    return %arg0, %arg1 : i32, i32
  }
  func.func @transform_1(%arg0: i32, %arg1: i32) -> (i32, i32) {
    %c0_i32 = arith.constant 0 : i32
    %c0_i32_0 = arith.constant 0 : i32
    return %arg1, %c0_i32 : i32, i32
  }
  func.func @transform_2(%arg0: i32, %arg1: i32) -> (i32, i32) {
    %c0_i32 = arith.constant 0 : i32
    %c0_i32_0 = arith.constant 0 : i32
    %c0_i32_1 = arith.constant 0 : i32
    return %c0_i32, %c0_i32_0 : i32, i32
  }
  func.func @transform_3(%arg0: i32, %arg1: i32) -> (i32, i32) {
    %c0_i32 = arith.constant 0 : i32
    %c0_i32_0 = arith.constant 0 : i32
    return %arg0, %c0_i32 : i32, i32
  }
  func.func @transform_4(%arg0: i32, %arg1: i32) -> (i32, i32) {
    %c0_i32 = arith.constant 0 : i32
    %c0_i32_0 = arith.constant 0 : i32
    %c0_i32_1 = arith.constant 0 : i32
    return %c0_i32, %c0_i32_0 : i32, i32
  }
  func.func @transform_5(%arg0: i32, %arg1: i32) -> (i32, i32) {
    %c0_i32 = arith.constant 0 : i32
    %c0_i32_0 = arith.constant 0 : i32
    %c0_i32_1 = arith.constant 0 : i32
    return %c0_i32, %c0_i32_0 : i32, i32
  }
  func.func @transform_6(%arg0: i32, %arg1: i32) -> (i32, i32) {
    %c0_i32 = arith.constant 0 : i32
    %c0_i32_0 = arith.constant 0 : i32
    return %arg0, %c0_i32 : i32, i32
  }
}

module attributes {stable_mosaic.version = 11 : i64} {
  func.func @kernel(%arg0: i32, %arg1: i32, %arg2: memref<256x256xbf16, #tpu.memory_space<vmem>>, %arg3: memref<256x512xbf16, #tpu.memory_space<vmem>>, %arg4: memref<1x512xf32, #tpu.memory_space<vmem>>, %arg5: memref<512x256xbf16, #tpu.memory_space<vmem>>, %arg6: memref<1x256xf32, #tpu.memory_space<vmem>>, %arg7: memref<256x256xbf16, #tpu.memory_space<vmem>>, %arg8: memref<1x256xf32, #tpu.memory_space<vmem>>, %arg9: memref<1x256xf32, #tpu.memory_space<vmem>>, %arg10: memref<256x256xbf16, #tpu.memory_space<vmem>>, %arg11: memref<256x256xf32, #tpu.memory_space<vmem>>) attributes {dimension_semantics = [#tpu.dimension_semantics<parallel>, #tpu.dimension_semantics<arbitrary>], iteration_bounds = array<i64: 1, 1>, scalar_prefetch = 0 : i64, scratch_operands = 1 : i64, tpu.core_type = #tpu.core_type<tc>, window_params = [{transform_indices = @transform_0, window_bounds = array<i64: 256, 256>}, {transform_indices = @transform_1, window_bounds = array<i64: 256, 512>}, {transform_indices = @transform_2, window_bounds = array<i64: 1, 512>}, {transform_indices = @transform_3, window_bounds = array<i64: 512, 256>}, {pipeline_mode = #tpu.pipeline_mode<synchronous>, transform_indices = @transform_4, window_bounds = array<i64: 1, 256>}, {transform_indices = @transform_5, window_bounds = array<i64: 256, 256>}, {pipeline_mode = #tpu.pipeline_mode<synchronous>, transform_indices = @transform_6, window_bounds = array<i64: 1, 256>}, {pipeline_mode = #tpu.pipeline_mode<synchronous>, transform_indices = @transform_7, window_bounds = array<i64: 1, 256>}, {transform_indices = @transform_8, window_bounds = array<i64: 256, 256>}]} {
    %c0_i32 = arith.constant 0 : i32
    %0 = arith.cmpi eq, %arg1, %c0_i32 : i32
    %1 = arith.extui %0 : i1 to i32
    %c0_i32_0 = arith.constant 0 : i32
    %2 = arith.cmpi ne, %1, %c0_i32_0 : i32
    scf.if %2 {
      %cst_19 = arith.constant 0.000000e+00 : f32
      %31 = vector.broadcast %cst_19 : f32 to vector<256x256xf32>
      %c0_20 = arith.constant 0 : index
      %c0_21 = arith.constant 0 : index
      %32 = vector.load %arg11[%c0_20, %c0_21] : memref<256x256xf32, #tpu.memory_space<vmem>>, vector<256x256xf32>
      tpu.vector_store %arg11[%c0_20, %c0_21], %31 {strides = array<i32>} : memref<256x256xf32, #tpu.memory_space<vmem>>, vector<256x256xf32>,
    } else {
    }
    %c0 = arith.constant 0 : index
    %c0_1 = arith.constant 0 : index
    %3 = vector.load %arg2[%c0, %c0_1] : memref<256x256xbf16, #tpu.memory_space<vmem>>, vector<256x256xbf16>
    %c0_2 = arith.constant 0 : index
    %c0_3 = arith.constant 0 : index
    %4 = vector.load %arg3[%c0_2, %c0_3] : memref<256x512xbf16, #tpu.memory_space<vmem>>, vector<256x512xbf16>
    %cst = arith.constant dense<0.000000e+00> : vector<256x512xf32>
    %5 = tpu.matmul %3, %4, %cst {dimension_numbers = #tpu.dot_dimension_numbers<[1], [0], [0], [1], [0, 0, 1, 1], [], []>} : vector<256x256xbf16>, vector<256x512xbf16>, vector<256x512xf32> -> vector<256x512xf32>
    %c0_4 = arith.constant 0 : index
    %c0_5 = arith.constant 0 : index
    %6 = vector.load %arg4[%c0_4, %c0_5] : memref<1x512xf32, #tpu.memory_space<vmem>>, vector<1x512xf32>
    %7 = vector.broadcast %6 : vector<1x512xf32> to vector<256x512xf32>
    %8 = arith.addf %5, %7 : vector<256x512xf32>
    %9 = arith.mulf %8, %8 : vector<256x512xf32>
    %10 = arith.mulf %8, %9 : vector<256x512xf32>
    %cst_6 = arith.constant 4.471500e-02 : f32
    %11 = vector.broadcast %cst_6 : f32 to vector<256x512xf32>
    %12 = arith.mulf %11, %10 : vector<256x512xf32>
    %13 = arith.addf %8, %12 : vector<256x512xf32>
    %cst_7 = arith.constant 0.797884583 : f32
    %14 = vector.broadcast %cst_7 : f32 to vector<256x512xf32>
    %15 = arith.mulf %14, %13 : vector<256x512xf32>
    %16 = math.tanh %15 : vector<256x512xf32>
    %cst_8 = arith.constant 1.000000e+00 : f32
    %17 = vector.broadcast %cst_8 : f32 to vector<256x512xf32>
    %18 = arith.addf %17, %16 : vector<256x512xf32>
    %cst_9 = arith.constant 5.000000e-01 : f32
    %19 = vector.broadcast %cst_9 : f32 to vector<256x512xf32>
    %20 = arith.mulf %19, %18 : vector<256x512xf32>
    %21 = arith.mulf %8, %20 : vector<256x512xf32>
    %c0_10 = arith.constant 0 : index
    %c0_11 = arith.constant 0 : index
    %22 = vector.load %arg11[%c0_10, %c0_11] : memref<256x256xf32, #tpu.memory_space<vmem>>, vector<256x256xf32>
    %23 = arith.truncf %21 : vector<256x512xf32> to vector<256x512xbf16>
    %c0_12 = arith.constant 0 : index
    %c0_13 = arith.constant 0 : index
    %24 = vector.load %arg5[%c0_12, %c0_13] : memref<512x256xbf16, #tpu.memory_space<vmem>>, vector<512x256xbf16>
    %cst_14 = arith.constant dense<0.000000e+00> : vector<256x256xf32>
    %25 = tpu.matmul %23, %24, %cst_14 {dimension_numbers = #tpu.dot_dimension_numbers<[1], [0], [0], [1], [0, 0, 1, 1], [], []>} : vector<256x512xbf16>, vector<512x256xbf16>, vector<256x256xf32> -> vector<256x256xf32>
    %26 = arith.addf %22, %25 : vector<256x256xf32>
    %c0_15 = arith.constant 0 : index
    %c0_16 = arith.constant 0 : index
    %27 = vector.load %arg11[%c0_15, %c0_16] : memref<256x256xf32, #tpu.memory_space<vmem>>, vector<256x256xf32>
    tpu.vector_store %arg11[%c0_15, %c0_16], %26 {strides = array<i32>} : memref<256x256xf32, #tpu.memory_space<vmem>>, vector<256x256xf32>,
    %c0_i32_17 = arith.constant 0 : i32
    %28 = arith.cmpi eq, %arg1, %c0_i32_17 : i32
    %29 = arith.extui %28 : i1 to i32
    %c0_i32_18 = arith.constant 0 : i32
    %30 = arith.cmpi ne, %29, %c0_i32_18 : i32
    scf.if %30 {
      %c0_19 = arith.constant 0 : index
      %c0_20 = arith.constant 0 : index
      %31 = vector.load %arg11[%c0_19, %c0_20] : memref<256x256xf32, #tpu.memory_space<vmem>>, vector<256x256xf32>
      %c0_21 = arith.constant 0 : index
      %c0_22 = arith.constant 0 : index
      %32 = vector.load %arg6[%c0_21, %c0_22] : memref<1x256xf32, #tpu.memory_space<vmem>>, vector<1x256xf32>
      %33 = vector.broadcast %32 : vector<1x256xf32> to vector<256x256xf32>
      %34 = arith.addf %31, %33 : vector<256x256xf32>
      %c0_23 = arith.constant 0 : index
      %c0_24 = arith.constant 0 : index
      %35 = vector.load %arg7[%c0_23, %c0_24] : memref<256x256xbf16, #tpu.memory_space<vmem>>, vector<256x256xbf16>
      %36 = arith.extf %35 : vector<256x256xbf16> to vector<256x256xf32>
      %37 = arith.addf %34, %36 : vector<256x256xf32>
      %cst_25 = arith.constant dense<0.000000e+00> : vector<256xf32>
      %38 = vector.multi_reduction <add>, %37, %cst_25 [1] : vector<256x256xf32> to vector<256xf32>
      %39 = vector.shape_cast %38 : vector<256xf32> to vector<256x1xf32>
      %cst_26 = arith.constant 2.560000e+02 : f32
      %40 = vector.broadcast %cst_26 : f32 to vector<256x1xf32>
      %41 = arith.divf %39, %40 : vector<256x1xf32>
      %42 = vector.broadcast %41 : vector<256x1xf32> to vector<256x256xf32>
      %43 = arith.subf %37, %42 : vector<256x256xf32>
      %44 = arith.mulf %43, %43 : vector<256x256xf32>
      %cst_27 = arith.constant dense<0.000000e+00> : vector<256xf32>
      %45 = vector.multi_reduction <add>, %44, %cst_27 [1] : vector<256x256xf32> to vector<256xf32>
      %46 = vector.shape_cast %45 : vector<256xf32> to vector<256x1xf32>
      %cst_28 = arith.constant 2.560000e+02 : f32
      %47 = vector.broadcast %cst_28 : f32 to vector<256x1xf32>
      %48 = arith.divf %46, %47 : vector<256x1xf32>
      %49 = vector.broadcast %41 : vector<256x1xf32> to vector<256x256xf32>
      %50 = arith.subf %37, %49 : vector<256x256xf32>
      %cst_29 = arith.constant 9.99999974E-6 : f32
      %51 = vector.broadcast %cst_29 : f32 to vector<256x1xf32>
      %52 = arith.addf %48, %51 : vector<256x1xf32>
      %53 = math.rsqrt %52 : vector<256x1xf32>
      %54 = vector.broadcast %53 : vector<256x1xf32> to vector<256x256xf32>
      %55 = arith.mulf %50, %54 : vector<256x256xf32>
      %c0_30 = arith.constant 0 : index
      %c0_31 = arith.constant 0 : index
      %56 = vector.load %arg8[%c0_30, %c0_31] : memref<1x256xf32, #tpu.memory_space<vmem>>, vector<1x256xf32>
      %57 = vector.broadcast %56 : vector<1x256xf32> to vector<256x256xf32>
      %58 = arith.mulf %55, %57 : vector<256x256xf32>
      %c0_32 = arith.constant 0 : index
      %c0_33 = arith.constant 0 : index
      %59 = vector.load %arg9[%c0_32, %c0_33] : memref<1x256xf32, #tpu.memory_space<vmem>>, vector<1x256xf32>
      %60 = vector.broadcast %59 : vector<1x256xf32> to vector<256x256xf32>
      %61 = arith.addf %58, %60 : vector<256x256xf32>
      %62 = arith.truncf %61 : vector<256x256xf32> to vector<256x256xbf16>
      %c0_34 = arith.constant 0 : index
      %c0_35 = arith.constant 0 : index
      %63 = vector.load %arg10[%c0_34, %c0_35] : memref<256x256xbf16, #tpu.memory_space<vmem>>, vector<256x256xbf16>
      tpu.vector_store %arg10[%c0_34, %c0_35], %62 {strides = array<i32>} : memref<256x256xbf16, #tpu.memory_space<vmem>>, vector<256x256xbf16>,
    } else {
    }
    return
  }
  func.func @transform_0(%arg0: i32, %arg1: i32) -> (i32, i32) {
    %c0_i32 = arith.constant 0 : i32
    %c0_i32_0 = arith.constant 0 : i32
    return %arg0, %c0_i32 : i32, i32
  }
  func.func @transform_1(%arg0: i32, %arg1: i32) -> (i32, i32) {
    %c0_i32 = arith.constant 0 : i32
    %c0_i32_0 = arith.constant 0 : i32
    return %c0_i32, %arg1 : i32, i32
  }
  func.func @transform_2(%arg0: i32, %arg1: i32) -> (i32, i32) {
    %c0_i32 = arith.constant 0 : i32
    %c0_i32_0 = arith.constant 0 : i32
    return %c0_i32, %arg1 : i32, i32
  }
  func.func @transform_3(%arg0: i32, %arg1: i32) -> (i32, i32) {
    %c0_i32 = arith.constant 0 : i32
    %c0_i32_0 = arith.constant 0 : i32
    return %arg1, %c0_i32 : i32, i32
  }
  func.func @transform_4(%arg0: i32, %arg1: i32) -> (i32, i32) {
    %c0_i32 = arith.constant 0 : i32
    %c0_i32_0 = arith.constant 0 : i32
    %c0_i32_1 = arith.constant 0 : i32
    return %c0_i32, %c0_i32_0 : i32, i32
  }
  func.func @transform_5(%arg0: i32, %arg1: i32) -> (i32, i32) {
    %c0_i32 = arith.constant 0 : i32
    %c0_i32_0 = arith.constant 0 : i32
    return %arg0, %c0_i32 : i32, i32
  }
  func.func @transform_6(%arg0: i32, %arg1: i32) -> (i32, i32) {
    %c0_i32 = arith.constant 0 : i32
    %c0_i32_0 = arith.constant 0 : i32
    %c0_i32_1 = arith.constant 0 : i32
    return %c0_i32, %c0_i32_0 : i32, i32
  }
  func.func @transform_7(%arg0: i32, %arg1: i32) -> (i32, i32) {
    %c0_i32 = arith.constant 0 : i32
    %c0_i32_0 = arith.constant 0 : i32
    %c0_i32_1 = arith.constant 0 : i32
    return %c0_i32, %c0_i32_0 : i32, i32
  }
  func.func @transform_8(%arg0: i32, %arg1: i32) -> (i32, i32) {
    %c0_i32 = arith.constant 0 : i32
    %c0_i32_0 = arith.constant 0 : i32
    return %arg0, %c0_i32 : i32, i32
  }
}

</mosaic_0001>

<bundles_post_ra>
// kernel: xlm_r_forward.9
= control target key start
LH: loop header
LB: loop body
LE: loop exit
PB: predicated region body
PF: predicated region fallthrough
CT: control target
= control target key end

     0   :  { %s2137_s0 = inlined_call_operand.vmem [shape: f32[256,256], index: 0, kind: input, shape index: {}]   ;;  %s2138_s1 = inlined_call_operand.vmem [shape: f32[1,256], index: 1, kind: input, shape index: {}]   ;;  %s2139_s2 = inlined_call_operand.vmem [shape: f32[1,256], index: 2, kind: input, shape index: {}]   ;;  %s2140_s3 = inlined_call_operand.vmem [shape: bf16[256,256], index: 3, kind: output, shape index: {}]  }
   0x1   :  { %v1122_v0 = vld [vmem:[%s2137_s0] sm:$0xff]  ;;  %v1127_v1 = vld [vmem:[%s2137_s0 + $0x8] sm:$0xff]  ;;  %v1144_v5 = vld [vmem:[%s2137_s0 + $0x10] sm:$0xff] }
   0x2   :  { %v1132_v2 = vld [vmem:[%s2137_s0 + $0x20] sm:$0xff]  ;;  %v78_v3 = vadd.f32 %v1127_v1, %v1122_v0  ;;  %v1139_v4 = vld [vmem:[%s2137_s0 + $0x28] sm:$0xff]  ;;  %v1149_v6 = vld [vmem:[%s2137_s0 + $0x18] sm:$0xff] }
   0x3   :  { %v84_v7 = vadd.f32 %v1139_v4, %v1132_v2  ;;  %v1156_v8 = vld [vmem:[%s2137_s0 + $0x30] sm:$0xff]  ;;  %v1161_v9 = vld [vmem:[%s2137_s0 + $0x38] sm:$0xff]  ;;  %v81_v10 = vadd.f32 %v1149_v6, %v1144_v5  ;;  %v1170_v12 = vld [vmem:[%s2137_s0 + $0x40] sm:$0xff] }
   0x4   :  { %79 = vadd.xlane.f32.xlu0 %v78_v3  ;;  %v87_v11 = vadd.f32 %v1161_v9, %v1156_v8  ;;  %v1175_v13 = vld [vmem:[%s2137_s0 + $0x48] sm:$0xff]  ;;  %v1180_v14 = vld [vmem:[%s2137_s0 + $0x50] sm:$0xff]  ;;  %v1185_v15 = vld [vmem:[%s2137_s0 + $0x58] sm:$0xff] }
   0x5   :  { %85 = vadd.xlane.f32.xlu1 %v84_v7  ;;  %v90_v16 = vadd.f32 %v1175_v13, %v1170_v12  ;;  %v93_v17 = vadd.f32 %v1185_v15, %v1180_v14  ;;  %v1194_v18 = vld [vmem:[%s2137_s0 + $0x60] sm:$0xff]  ;;  %v1199_v19 = vld [vmem:[%s2137_s0 + $0x68] sm:$0xff]  ;;  %v1204_v20 = vld [vmem:[%s2137_s0 + $0x70] sm:$0xff] }
   0x6   :  { %v1209_v21 = vld [vmem:[%s2137_s0 + $0x78] sm:$0xff]  ;;  %v96_v22 = vadd.f32 %v1199_v19, %v1194_v18  ;;  %v1218_v24 = vld [vmem:[%s2137_s0 + $0x80] sm:$0xff]  ;;  %v1223_v25 = vld [vmem:[%s2137_s0 + $0x88] sm:$0xff] }
   0x7   :  { %v99_v23 = vadd.f32 %v1209_v21, %v1204_v20  ;;  %v1228_v26 = vld [vmem:[%s2137_s0 + $0x90] sm:$0xff]  ;;  %v1233_v27 = vld [vmem:[%s2137_s0 + $0x98] sm:$0xff]  ;;  %v102_v28 = vadd.f32 %v1223_v25, %v1218_v24  ;;  %v1242_v30 = vld [vmem:[%s2137_s0 + $0xa0] sm:$0xff] }
   0x8   :  { %82 = vadd.xlane.f32.xlu0 %v81_v10  ;;  %v105_v29 = vadd.f32 %v1233_v27, %v1228_v26  ;;  %v1247_v31 = vld [vmem:[%s2137_s0 + $0xa8] sm:$0xff]  ;;  %v1252_v32 = vld [vmem:[%s2137_s0 + $0xb0] sm:$0xff]  ;;  %v1257_v33 = vld [vmem:[%s2137_s0 + $0xb8] sm:$0xff] }
   0x9   :  { %88 = vadd.xlane.f32.xlu1 %v87_v11  ;;  %v108_v34 = vadd.f32 %v1247_v31, %v1242_v30  ;;  %v111_v35 = vadd.f32 %v1257_v33, %v1252_v32  ;;  %v1266_v36 = vld [vmem:[%s2137_s0 + $0xc0] sm:$0xff]  ;;  %v1271_v37 = vld [vmem:[%s2137_s0 + $0xc8] sm:$0xff]  ;;  %v1276_v38 = vld [vmem:[%s2137_s0 + $0xd0] sm:$0xff] }
   0xa   :  { %v1281_v39 = vld [vmem:[%s2137_s0 + $0xd8] sm:$0xff]  ;;  %v114_v40 = vadd.f32 %v1271_v37, %v1266_v36  ;;  %v1290_v42 = vld [vmem:[%s2137_s0 + $0xe0] sm:$0xff]  ;;  %v1295_v43 = vld [vmem:[%s2137_s0 + $0xe8] sm:$0xff] }
   0xb   :  { %v117_v41 = vadd.f32 %v1281_v39, %v1276_v38  ;;  %v1300_v44 = vld [vmem:[%s2137_s0 + $0xf0] sm:$0xff]  ;;  %v1305_v45 = vld [vmem:[%s2137_s0 + $0xf8] sm:$0xff]  ;;  %v120_v46 = vadd.f32 %v1295_v43, %v1290_v42  ;;  %v1314_v48 = vld [vmem:[%s2137_s0 + $0x100] sm:$0xff] }
   0xc   :  { %91 = vadd.xlane.f32.xlu0 %v90_v16  ;;  %v123_v47 = vadd.f32 %v1305_v45, %v1300_v44  ;;  %v1319_v49 = vld [vmem:[%s2137_s0 + $0x108] sm:$0xff]  ;;  %v1324_v50 = vld [vmem:[%s2137_s0 + $0x110] sm:$0xff]  ;;  %v1329_v51 = vld [vmem:[%s2137_s0 + $0x118] sm:$0xff] }
   0xd   :  { %94 = vadd.xlane.f32.xlu1 %v93_v17  ;;  %v126_v52 = vadd.f32 %v1319_v49, %v1314_v48  ;;  %v129_v53 = vadd.f32 %v1329_v51, %v1324_v50  ;;  %v1338_v54 = vld [vmem:[%s2137_s0 + $0x120] sm:$0xff]  ;;  %v1343_v55 = vld [vmem:[%s2137_s0 + $0x128] sm:$0xff]  ;;  %v1348_v56 = vld [vmem:[%s2137_s0 + $0x130] sm:$0xff] }
   0xe   :  { %v1353_v57 = vld [vmem:[%s2137_s0 + $0x138] sm:$0xff]  ;;  %v132_v58 = vadd.f32 %v1343_v55, %v1338_v54  ;;  %v1362_v60 = vld [vmem:[%s2137_s0 + $0x140] sm:$0xff]  ;;  %v1367_v61 = vld [vmem:[%s2137_s0 + $0x148] sm:$0xff] }
   0xf   :  { %v135_v59 = vadd.f32 %v1353_v57, %v1348_v56  ;;  %v1372_v62 = vld [vmem:[%s2137_s0 + $0x150] sm:$0xff]  ;;  %v1377_v63 = vld [vmem:[%s2137_s0 + $0x158] sm:$0xff]  ;;  %v138_v3 = vadd.f32 %v1367_v61, %v1362_v60  ;;  %v1386_v10 = vld [vmem:[%s2137_s0 + $0x160] sm:$0xff] }
  0x10   :  { %97 = vadd.xlane.f32.xlu0 %v96_v22  ;;  %v141_v7 = vadd.f32 %v1377_v63, %v1372_v62  ;;  %v1391_v11 = vld [vmem:[%s2137_s0 + $0x168] sm:$0xff]  ;;  %v1396_v16 = vld [vmem:[%s2137_s0 + $0x170] sm:$0xff]  ;;  %v1401_v17 = vld [vmem:[%s2137_s0 + $0x178] sm:$0xff] }
  0x11   :  { %100 = vadd.xlane.f32.xlu1 %v99_v23  ;;  %v144_v22 = vadd.f32 %v1391_v11, %v1386_v10  ;;  %v147_v23 = vadd.f32 %v1401_v17, %v1396_v16 }
  0x14   :  { %103 = vadd.xlane.f32.xlu0 %v102_v28  ;;  %v1410_v28 = vld [vmem:[%s2137_s0 + $0x180] sm:$0xff] }
  0x15   :  { %106 = vadd.xlane.f32.xlu1 %v105_v29  ;;  %v1415_v29 = vld [vmem:[%s2137_s0 + $0x188] sm:$0xff] }
  0x18   :  { %109 = vadd.xlane.f32.xlu0 %v108_v34  ;;  %v1420_v34 = vld [vmem:[%s2137_s0 + $0x190] sm:$0xff] }
  0x19   :  { %112 = vadd.xlane.f32.xlu1 %v111_v35  ;;  %2178 = vst [vmem:[#allocation2_spill] sm:$0xff] %v1420_v34  ;;  %v1425_v35 = vld [vmem:[%s2137_s0 + $0x198] sm:$0xff] }
  0x1a   :  { %2179 = vst [vmem:[#allocation3_spill] sm:$0xff] %v1425_v35 }
  0x1c   :  { %115 = vadd.xlane.f32.xlu0 %v114_v40  ;;  %v150_v40 = vadd.f32 %v1415_v29, %v1410_v28 }
  0x1d   :  { %118 = vadd.xlane.f32.xlu1 %v117_v41  ;;  %v153_v41 = vadd.f32 %v1425_v35, %v1420_v34 }
  0x20   :  { %121 = vadd.xlane.f32.xlu0 %v120_v46  ;;  %v1434_v46 = vld [vmem:[%s2137_s0 + $0x1a0] sm:$0xff] }
  0x21   :  { %124 = vadd.xlane.f32.xlu1 %v123_v47  ;;  %2180 = vst [vmem:[#allocation4_spill] sm:$0xff] %v1434_v46  ;;  %v1439_v47 = vld [vmem:[%s2137_s0 + $0x1a8] sm:$0xff] }
  0x22   :  { %2181 = vst [vmem:[#allocation5_spill] sm:$0xff] %v1439_v47 }
  0x24   :  { %127 = vadd.xlane.f32.xlu0 %v126_v52  ;;  %v1444_v52 = vld [vmem:[%s2137_s0 + $0x1b0] sm:$0xff] }
  0x25   :  { %130 = vadd.xlane.f32.xlu1 %v129_v53  ;;  %2182 = vst [vmem:[#allocation6_spill] sm:$0xff] %v1444_v52  ;;  %v1449_v53 = vld [vmem:[%s2137_s0 + $0x1b8] sm:$0xff] }
  0x26   :  { %2183 = vst [vmem:[#allocation7_spill] sm:$0xff] %v1449_v53 }
  0x28   :  { %133 = vadd.xlane.f32.xlu0 %v132_v58  ;;  %v156_v58 = vadd.f32 %v1439_v47, %v1434_v46 }
  0x29   :  { %136 = vadd.xlane.f32.xlu1 %v135_v59  ;;  %v159_v59 = vadd.f32 %v1449_v53, %v1444_v52  ;;  %v1482_v53 = vld [vmem:[%s2137_s0 + $0x1e0] sm:$0xff]  ;;  %v1487_v52 = vld [vmem:[%s2137_s0 + $0x1e8] sm:$0xff] }
  0x2a   :  { %2188 = vst [vmem:[#allocation12_spill] sm:$0xff] %v1487_v52 }
  0x2c   :  { %139 = vadd.xlane.f32.xlu0 %v138_v3  ;;  %v1458_v3 = vld [vmem:[%s2137_s0 + $0x1c0] sm:$0xff] }
  0x2d   :  { %142 = vadd.xlane.f32.xlu1 %v141_v7  ;;  %2184 = vst [vmem:[#allocation8_spill] sm:$0xff] %v1458_v3  ;;  %v1463_v7 = vld [vmem:[%s2137_s0 + $0x1c8] sm:$0xff] }
  0x2e   :  { %2185 = vst [vmem:[#allocation9_spill] sm:$0xff] %v1463_v7 }
  0x30   :  { %145 = vadd.xlane.f32.xlu0 %v144_v22  ;;  %v1468_v22 = vld [vmem:[%s2137_s0 + $0x1d0] sm:$0xff] }
  0x31   :  { %148 = vadd.xlane.f32.xlu1 %v147_v23  ;;  %2186 = vst [vmem:[#allocation10_spill] sm:$0xff] %v1468_v22  ;;  %v1473_v23 = vld [vmem:[%s2137_s0 + $0x1d8] sm:$0xff] }
  0x32   :  { %2187 = vst [vmem:[#allocation11_spill] sm:$0xff] %v1473_v23 }
  0x34   :  { %151 = vadd.xlane.f32.xlu0 %v150_v40  ;;  %v162_v40 = vadd.f32 %v1463_v7, %v1458_v3 }
  0x35   :  { %154 = vadd.xlane.f32.xlu1 %v153_v41  ;;  %v165_v41 = vadd.f32 %v1473_v23, %v1468_v22  ;;  %v168_v23 = vadd.f32 %v1487_v52, %v1482_v53 }
  0x38   :  { %157 = vadd.xlane.f32.xlu0 %v156_v58  ;;  %v1492_v58 = vld [vmem:[%s2137_s0 + $0x1f0] sm:$0xff] }
  0x39   :  { %160 = vadd.xlane.f32.xlu1 %v159_v59  ;;  %v1497_v59 = vld [vmem:[%s2137_s0 + $0x1f8] sm:$0xff] }
  0x3a   :  { %2189 = vst [vmem:[#allocation13_spill] sm:$0xff] %v1497_v59  ;;  %v171_v22 = vadd.f32 %v1497_v59, %v1492_v58 }
  0x3c   :  { %163 = vadd.xlane.f32.xlu0 %v162_v40 }
  0x3d   :  { %166 = vadd.xlane.f32.xlu1 %v165_v41 }
  0x40   :  { %169 = vadd.xlane.f32.xlu0 %v168_v23 }
  0x41   :  { %172 = vadd.xlane.f32.xlu1 %v171_v22 }
  0x91   :  { %v80_v7 = vpop.xlane.xlu0 %79 }
  0x92   :  { %v175_v3 = vmul.f32 0.00390625, %v80_v7  ;;  %v86_v47 = vpop.xlane.xlu1 %85 }
  0x93   :  { %v177_v46 = vmul.f32 0.00390625, %v86_v47 }
  0x94   :  { %v1504_v35 = vsub.f32 %v1122_v0, %v175_v3  ;;  %v1507_v34 = vsub.f32 %v1127_v1, %v175_v3 }
  0x95   :  { %v1510_v40 = vsub.f32 %v1132_v2, %v177_v46  ;;  %v1513_v41 = vsub.f32 %v1139_v4, %v177_v46  ;;  %v83_v52 = vpop.xlane.xlu0 %82 }
  0x96   :  { %2190 = vst [vmem:[#allocation14_spill] sm:$0xff] %v1504_v35  ;;  %2191 = vst [vmem:[#allocation15_spill] sm:$0xff] %v1507_v34  ;;  %v176_v59 = vmul.f32 0.00390625, %v83_v52  ;;  %v89_v23 = vpop.xlane.xlu1 %88  ;;  %v271_v7 = vmul.f32 %v1504_v35, %v1504_v35  ;;  %v272_v47 = vmul.f32 %v1507_v34, %v1507_v34 }
  0x97   :  { %2192 = vst [vmem:[#allocation16_spill] sm:$0xff] %v1510_v40  ;;  %2193 = vst [vmem:[#allocation17_spill] sm:$0xff] %v1513_v41  ;;  %v178_v0 = vmul.f32 0.00390625, %v89_v23  ;;  %v275_v1 = vmul.f32 %v1510_v40, %v1510_v40  ;;  %v276_v2 = vmul.f32 %v1513_v41, %v1513_v41 }
  0x98   :  { %v1524_v3 = vsub.f32 %v1144_v5, %v176_v59  ;;  %v1527_v4 = vsub.f32 %v1149_v6, %v176_v59  ;;  %v335_v46 = vadd.f32 %v272_v47, %v271_v7 }
  0x99   :  { %v1530_v52 = vsub.f32 %v1156_v8, %v178_v0  ;;  %v1533_v22 = vsub.f32 %v1161_v9, %v178_v0  ;;  %v92_v23 = vpop.xlane.xlu0 %91  ;;  %v341_v35 = vadd.f32 %v276_v2, %v275_v1 }
  0x9a   :  { %v179_v34 = vmul.f32 0.00390625, %v92_v23  ;;  %336 = vadd.xlane.f32.xlu0 %v335_v46  ;;  %v95_v40 = vpop.xlane.xlu1 %94  ;;  %v273_v41 = vmul.f32 %v1524_v3, %v1524_v3  ;;  %v274_v5 = vmul.f32 %v1527_v4, %v1527_v4 }
  0x9b   :  { %v180_v6 = vmul.f32 0.00390625, %v95_v40  ;;  %v277_v59 = vmul.f32 %v1530_v52, %v1530_v52  ;;  %v278_v8 = vmul.f32 %v1533_v22, %v1533_v22 }
  0x9c   :  { %v1544_v9 = vsub.f32 %v1170_v12, %v179_v34  ;;  %v1547_v7 = vsub.f32 %v1175_v13, %v179_v34  ;;  %v338_v47 = vadd.f32 %v274_v5, %v273_v41 }
  0x9d   :  { %v1550_v0 = vsub.f32 %v1180_v14, %v180_v6  ;;  %v1553_v1 = vsub.f32 %v1185_v15, %v180_v6  ;;  %v98_v40 = vpop.xlane.xlu0 %97  ;;  %v344_v23 = vadd.f32 %v278_v8, %v277_v59 }
  0x9e   :  { %v181_v2 = vmul.f32 0.00390625, %v98_v40  ;;  %342 = vadd.xlane.f32.xlu0 %v341_v35  ;;  %339 = vadd.xlane.f32.xlu1 %v338_v47  ;;  %v101_v46 = vpop.xlane.xlu1 %100  ;;  %v279_v12 = vmul.f32 %v1544_v9, %v1544_v9  ;;  %v280_v13 = vmul.f32 %v1547_v7, %v1547_v7 }
  0x9f   :  { %v182_v34 = vmul.f32 0.00390625, %v101_v46  ;;  %v281_v14 = vmul.f32 %v1550_v0, %v1550_v0  ;;  %v282_v15 = vmul.f32 %v1553_v1, %v1553_v1 }
  0xa0   :  { %v1564_v41 = vsub.f32 %v1194_v18, %v181_v2  ;;  %v1567_v35 = vsub.f32 %v1199_v19, %v181_v2  ;;  %v347_v5 = vadd.f32 %v280_v13, %v279_v12 }
  0xa1   :  { %v1570_v6 = vsub.f32 %v1204_v20, %v182_v34  ;;  %v1573_v59 = vsub.f32 %v1209_v21, %v182_v34  ;;  %v104_v8 = vpop.xlane.xlu0 %103  ;;  %v350_v46 = vadd.f32 %v282_v15, %v281_v14 }
  0xa2   :  { %v183_v47 = vmul.f32 0.00390625, %v104_v8  ;;  %345 = vadd.xlane.f32.xlu1 %v344_v23  ;;  %348 = vadd.xlane.f32.xlu0 %v347_v5  ;;  %v107_v40 = vpop.xlane.xlu1 %106  ;;  %v283_v18 = vmul.f32 %v1564_v41, %v1564_v41  ;;  %v284_v19 = vmul.f32 %v1567_v35, %v1567_v35 }
  0xa3   :  { %v184_v2 = vmul.f32 0.00390625, %v107_v40  ;;  %v285_v20 = vmul.f32 %v1570_v6, %v1570_v6  ;;  %v286_v21 = vmul.f32 %v1573_v59, %v1573_v59 }
  0xa4   :  { %v1584_v12 = vsub.f32 %v1218_v24, %v183_v47  ;;  %v1587_v23 = vsub.f32 %v1223_v25, %v183_v47  ;;  %v353_v13 = vadd.f32 %v284_v19, %v283_v18 }
  0xa5   :  { %v1590_v34 = vsub.f32 %v1228_v26, %v184_v2  ;;  %v1593_v14 = vsub.f32 %v1233_v27, %v184_v2  ;;  %v110_v15 = vpop.xlane.xlu0 %109  ;;  %v356_v40 = vadd.f32 %v286_v21, %v285_v20 }
  0xa6   :  { %v185_v5 = vmul.f32 0.00390625, %v110_v15  ;;  %351 = vadd.xlane.f32.xlu1 %v350_v46  ;;  %354 = vadd.xlane.f32.xlu0 %v353_v13  ;;  %v113_v8 = vpop.xlane.xlu1 %112  ;;  %v287_v24 = vmul.f32 %v1584_v12, %v1584_v12  ;;  %v288_v25 = vmul.f32 %v1587_v23, %v1587_v23 }
  0xa7   :  { %v186_v47 = vmul.f32 0.00390625, %v113_v8  ;;  %v289_v26 = vmul.f32 %v1590_v34, %v1590_v34  ;;  %v290_v27 = vmul.f32 %v1593_v14, %v1593_v14 }
  0xa8   :  { %v1604_v18 = vsub.f32 %v1242_v30, %v185_v5  ;;  %v1607_v46 = vsub.f32 %v1247_v31, %v185_v5  ;;  %v359_v19 = vadd.f32 %v288_v25, %v287_v24 }
  0xa9   :  { %v1610_v2 = vsub.f32 %v1252_v32, %v186_v47  ;;  %v1613_v20 = vsub.f32 %v1257_v33, %v186_v47  ;;  %v116_v21 = vpop.xlane.xlu0 %115  ;;  %v362_v8 = vadd.f32 %v290_v27, %v289_v26 }
  0xaa   :  { %v187_v13 = vmul.f32 0.00390625, %v116_v21  ;;  %357 = vadd.xlane.f32.xlu1 %v356_v40  ;;  %360 = vadd.xlane.f32.xlu0 %v359_v19  ;;  %v119_v15 = vpop.xlane.xlu1 %118  ;;  %v291_v30 = vmul.f32 %v1604_v18, %v1604_v18  ;;  %v292_v31 = vmul.f32 %v1607_v46, %v1607_v46 }
  0xab   :  { %v188_v5 = vmul.f32 0.00390625, %v119_v15  ;;  %v293_v32 = vmul.f32 %v1610_v2, %v1610_v2  ;;  %v294_v33 = vmul.f32 %v1613_v20, %v1613_v20 }
  0xac   :  { %v1624_v24 = vsub.f32 %v1266_v36, %v187_v13  ;;  %v1627_v40 = vsub.f32 %v1271_v37, %v187_v13  ;;  %v365_v25 = vadd.f32 %v292_v31, %v291_v30 }
  0xad   :  { %v1630_v47 = vsub.f32 %v1276_v38, %v188_v5  ;;  %v1633_v26 = vsub.f32 %v1281_v39, %v188_v5  ;;  %v122_v27 = vpop.xlane.xlu0 %121  ;;  %v368_v15 = vadd.f32 %v294_v33, %v293_v32 }
  0xae   :  { %v189_v19 = vmul.f32 0.00390625, %v122_v27  ;;  %363 = vadd.xlane.f32.xlu1 %v362_v8  ;;  %366 = vadd.xlane.f32.xlu0 %v365_v25  ;;  %v125_v21 = vpop.xlane.xlu1 %124  ;;  %v295_v36 = vmul.f32 %v1624_v24, %v1624_v24  ;;  %v296_v37 = vmul.f32 %v1627_v40, %v1627_v40 }
  0xaf   :  { %v190_v13 = vmul.f32 0.00390625, %v125_v21  ;;  %v297_v38 = vmul.f32 %v1630_v47, %v1630_v47  ;;  %v298_v39 = vmul.f32 %v1633_v26, %v1633_v26 }
  0xb0   :  { %v1644_v30 = vsub.f32 %v1290_v42, %v189_v19  ;;  %v1647_v8 = vsub.f32 %v1295_v43, %v189_v19  ;;  %v371_v31 = vadd.f32 %v296_v37, %v295_v36 }
  0xb1   :  { %v1650_v5 = vsub.f32 %v1300_v44, %v190_v13  ;;  %v1653_v32 = vsub.f32 %v1305_v45, %v190_v13  ;;  %v128_v33 = vpop.xlane.xlu0 %127  ;;  %v374_v21 = vadd.f32 %v298_v39, %v297_v38 }
  0xb2   :  { %v191_v25 = vmul.f32 0.00390625, %v128_v33  ;;  %369 = vadd.xlane.f32.xlu1 %v368_v15  ;;  %372 = vadd.xlane.f32.xlu0 %v371_v31  ;;  %v131_v27 = vpop.xlane.xlu1 %130  ;;  %v299_v42 = vmul.f32 %v1644_v30, %v1644_v30  ;;  %v300_v43 = vmul.f32 %v1647_v8, %v1647_v8 }
  0xb3   :  { %v192_v19 = vmul.f32 0.00390625, %v131_v27  ;;  %v301_v44 = vmul.f32 %v1650_v5, %v1650_v5  ;;  %v302_v45 = vmul.f32 %v1653_v32, %v1653_v32 }
  0xb4   :  { %v1664_v36 = vsub.f32 %v1314_v48, %v191_v25  ;;  %v1667_v15 = vsub.f32 %v1319_v49, %v191_v25  ;;  %v377_v37 = vadd.f32 %v300_v43, %v299_v42 }
  0xb5   :  { %v1670_v13 = vsub.f32 %v1324_v50, %v192_v19  ;;  %v1673_v38 = vsub.f32 %v1329_v51, %v192_v19  ;;  %v134_v39 = vpop.xlane.xlu0 %133  ;;  %v380_v27 = vadd.f32 %v302_v45, %v301_v44 }
  0xb6   :  { %v193_v31 = vmul.f32 0.00390625, %v134_v39  ;;  %375 = vadd.xlane.f32.xlu1 %v374_v21  ;;  %378 = vadd.xlane.f32.xlu0 %v377_v37  ;;  %v137_v33 = vpop.xlane.xlu1 %136  ;;  %v303_v48 = vmul.f32 %v1664_v36, %v1664_v36  ;;  %v304_v49 = vmul.f32 %v1667_v15, %v1667_v15 }
  0xb7   :  { %v194_v25 = vmul.f32 0.00390625, %v137_v33  ;;  %v305_v50 = vmul.f32 %v1670_v13, %v1670_v13  ;;  %v306_v51 = vmul.f32 %v1673_v38, %v1673_v38 }
  0xb8   :  { %v1684_v42 = vsub.f32 %v1338_v54, %v193_v31  ;;  %v1687_v21 = vsub.f32 %v1343_v55, %v193_v31  ;;  %v383_v43 = vadd.f32 %v304_v49, %v303_v48 }
  0xb9   :  { %v1690_v19 = vsub.f32 %v1348_v56, %v194_v25  ;;  %v1693_v44 = vsub.f32 %v1353_v57, %v194_v25  ;;  %v140_v45 = vpop.xlane.xlu0 %139  ;;  %v386_v33 = vadd.f32 %v306_v51, %v305_v50 }
  0xba   :  { %v195_v37 = vmul.f32 0.00390625, %v140_v45  ;;  %381 = vadd.xlane.f32.xlu1 %v380_v27  ;;  %384 = vadd.xlane.f32.xlu0 %v383_v43  ;;  %v143_v39 = vpop.xlane.xlu1 %142  ;;  %v307_v54 = vmul.f32 %v1684_v42, %v1684_v42  ;;  %v308_v55 = vmul.f32 %v1687_v21, %v1687_v21 }
  0xbb   :  { %v196_v31 = vmul.f32 0.00390625, %v143_v39  ;;  %v309_v56 = vmul.f32 %v1690_v19, %v1690_v19  ;;  %v310_v57 = vmul.f32 %v1693_v44, %v1693_v44 }
  0xbc   :  { %v1704_v48 = vsub.f32 %v1362_v60, %v195_v37  ;;  %v1707_v27 = vsub.f32 %v1367_v61, %v195_v37  ;;  %v389_v49 = vadd.f32 %v308_v55, %v307_v54 }
  0xbd   :  { %v1710_v25 = vsub.f32 %v1372_v62, %v196_v31  ;;  %v1713_v50 = vsub.f32 %v1377_v63, %v196_v31  ;;  %v146_v51 = vpop.xlane.xlu0 %145  ;;  %v392_v39 = vadd.f32 %v310_v57, %v309_v56 }
  0xbe   :  { %v197_v43 = vmul.f32 0.00390625, %v146_v51  ;;  %387 = vadd.xlane.f32.xlu1 %v386_v33  ;;  %390 = vadd.xlane.f32.xlu0 %v389_v49  ;;  %v149_v45 = vpop.xlane.xlu1 %148  ;;  %v311_v60 = vmul.f32 %v1704_v48, %v1704_v48  ;;  %v312_v61 = vmul.f32 %v1707_v27, %v1707_v27 }
  0xbf   :  { %2194 = vst [vmem:[#allocation18_spill] sm:$0xff] %v1713_v50  ;;  %v198_v37 = vmul.f32 0.00390625, %v149_v45  ;;  %v313_v62 = vmul.f32 %v1710_v25, %v1710_v25  ;;  %v314_v63 = vmul.f32 %v1713_v50, %v1713_v50 }
  0xc0   :  { %v1724_v54 = vsub.f32 %v1386_v10, %v197_v43  ;;  %v1727_v33 = vsub.f32 %v1391_v11, %v197_v43  ;;  %v395_v55 = vadd.f32 %v312_v61, %v311_v60 }
  0xc1   :  { %v1730_v31 = vsub.f32 %v1396_v16, %v198_v37  ;;  %v1733_v56 = vsub.f32 %v1401_v17, %v198_v37  ;;  %v152_v57 = vpop.xlane.xlu0 %151  ;;  %v398_v45 = vadd.f32 %v314_v63, %v313_v62  ;;  %v2201_v37 = vld [vmem:[#allocation2_spill] sm:$0xff]  ;;  %v2203_v63 = vld [vmem:[#allocation3_spill] sm:$0xff] }
  0xc2   :  { %2195 = vst [vmem:[#allocation19_spill] sm:$0xff] %v1724_v54  ;;  %2196 = vst [vmem:[#allocation20_spill] sm:$0xff] %v1727_v33  ;;  %v199_v49 = vmul.f32 0.00390625, %v152_v57  ;;  %393 = vadd.xlane.f32.xlu1 %v392_v39  ;;  %396 = vadd.xlane.f32.xlu0 %v395_v55  ;;  %v155_v51 = vpop.xlane.xlu1 %154  ;;  %v315_v10 = vmul.f32 %v1724_v54, %v1724_v54  ;;  %v316_v11 = vmul.f32 %v1727_v33, %v1727_v33 }
  0xc3   :  { %2197 = vst [vmem:[#allocation21_spill] sm:$0xff] %v1730_v31  ;;  %2198 = vst [vmem:[#allocation22_spill] sm:$0xff] %v1733_v56  ;;  %v200_v43 = vmul.f32 0.00390625, %v155_v51  ;;  %v317_v16 = vmul.f32 %v1730_v31, %v1730_v31  ;;  %v318_v17 = vmul.f32 %v1733_v56, %v1733_v56 }
  0xc4   :  { %v1744_v60 = vsub.f32 %v1410_v28, %v199_v49  ;;  %v1747_v39 = vsub.f32 %v1415_v29, %v199_v49  ;;  %v401_v61 = vadd.f32 %v316_v11, %v315_v10 }
  0xc5   :  { %v1750_v62 = vsub.f32 %v2201_v37, %v200_v43  ;;  %v1753_v55 = vsub.f32 %v2203_v63, %v200_v43  ;;  %v158_v57 = vpop.xlane.xlu0 %157  ;;  %v404_v33 = vadd.f32 %v318_v17, %v317_v16  ;;  %v2205_v43 = vld [vmem:[#allocation4_spill] sm:$0xff]  ;;  %v2209_v17 = vld [vmem:[#allocation6_spill] sm:$0xff] }
  0xc6   :  { %2199 = vst [vmem:[#allocation23_spill] sm:$0xff] %v1744_v60  ;;  %2200 = vst [vmem:[#allocation24_spill] sm:$0xff] %v1747_v39  ;;  %v201_v51 = vmul.f32 0.00390625, %v158_v57  ;;  %399 = vadd.xlane.f32.xlu1 %v398_v45  ;;  %402 = vadd.xlane.f32.xlu0 %v401_v61  ;;  %v161_v31 = vpop.xlane.xlu1 %160  ;;  %v319_v28 = vmul.f32 %v1744_v60, %v1744_v60  ;;  %v320_v29 = vmul.f32 %v1747_v39, %v1747_v39  ;;  %v2207_v45 = vld [vmem:[#allocation5_spill] sm:$0xff]  ;;  %v2211_v57 = vld [vmem:[#allocation7_spill] sm:$0xff] }
  0xc7   :  { %2202 = vst [vmem:[#allocation2_spill] sm:$0xff] %v1750_v62  ;;  %2204 = vst [vmem:[#allocation3_spill] sm:$0xff] %v1753_v55  ;;  %v202_v49 = vmul.f32 0.00390625, %v161_v31  ;;  %v321_v10 = vmul.f32 %v1750_v62, %v1750_v62  ;;  %v322_v11 = vmul.f32 %v1753_v55, %v1753_v55 }
  0xc8   :  { %v1764_v37 = vsub.f32 %v2205_v43, %v201_v51  ;;  %v1767_v61 = vsub.f32 %v2207_v45, %v201_v51  ;;  %v407_v16 = vadd.f32 %v320_v29, %v319_v28 }
  0xc9   :  { %v1770_v63 = vsub.f32 %v2209_v17, %v202_v49  ;;  %v1773_v60 = vsub.f32 %v2211_v57, %v202_v49  ;;  %v164_v31 = vpop.xlane.xlu0 %163  ;;  %v410_v56 = vadd.f32 %v322_v11, %v321_v10  ;;  %v2213_v49 = vld [vmem:[#allocation8_spill] sm:$0xff]  ;;  %v2217_v11 = vld [vmem:[#allocation10_spill] sm:$0xff] }
  0xca   :  { %2206 = vst [vmem:[#allocation4_spill] sm:$0xff] %v1764_v37  ;;  %2208 = vst [vmem:[#allocation5_spill] sm:$0xff] %v1767_v61  ;;  %v203_v39 = vmul.f32 0.00390625, %v164_v31  ;;  %405 = vadd.xlane.f32.xlu1 %v404_v33  ;;  %408 = vadd.xlane.f32.xlu0 %v407_v16  ;;  %v167_v62 = vpop.xlane.xlu1 %166  ;;  %v323_v43 = vmul.f32 %v1764_v37, %v1764_v37  ;;  %v324_v51 = vmul.f32 %v1767_v61, %v1767_v61  ;;  %v2215_v33 = vld [vmem:[#allocation9_spill] sm:$0xff]  ;;  %v2219_v31 = vld [vmem:[#allocation11_spill] sm:$0xff] }
  0xcb   :  { %2210 = vst [vmem:[#allocation6_spill] sm:$0xff] %v1770_v63  ;;  %2212 = vst [vmem:[#allocation7_spill] sm:$0xff] %v1773_v60  ;;  %v204_v45 = vmul.f32 0.00390625, %v167_v62  ;;  %v325_v28 = vmul.f32 %v1770_v63, %v1770_v63  ;;  %v326_v29 = vmul.f32 %v1773_v60, %v1773_v60 }
  0xcc   :  { %v1784_v17 = vsub.f32 %v2213_v49, %v203_v39  ;;  %v1787_v16 = vsub.f32 %v2215_v33, %v203_v39  ;;  %v413_v10 = vadd.f32 %v324_v51, %v323_v43 }
  0xcd   :  { %v1790_v57 = vsub.f32 %v2217_v11, %v204_v45  ;;  %v1793_v37 = vsub.f32 %v2219_v31, %v204_v45  ;;  %v170_v62 = vpop.xlane.xlu0 %169  ;;  %v416_v55 = vadd.f32 %v326_v29, %v325_v28  ;;  %v2225_v11 = vld [vmem:[#allocation13_spill] sm:$0xff] }
  0xce   :  { %2214 = vst [vmem:[#allocation8_spill] sm:$0xff] %v1784_v17  ;;  %2216 = vst [vmem:[#allocation9_spill] sm:$0xff] %v1787_v16  ;;  %v205_v61 = vmul.f32 0.00390625, %v170_v62  ;;  %411 = vadd.xlane.f32.xlu1 %v410_v56  ;;  %414 = vadd.xlane.f32.xlu0 %v413_v10  ;;  %v173_v63 = vpop.xlane.xlu1 %172  ;;  %v327_v49 = vmul.f32 %v1784_v17, %v1784_v17  ;;  %v328_v39 = vmul.f32 %v1787_v16, %v1787_v16  ;;  %v2222_v56 = vld [vmem:[#allocation12_spill] sm:$0xff] }
  0xcf   :  { %2218 = vst [vmem:[#allocation10_spill] sm:$0xff] %v1790_v57  ;;  %2220 = vst [vmem:[#allocation11_spill] sm:$0xff] %v1793_v37  ;;  %v206_v33 = vmul.f32 0.00390625, %v173_v63  ;;  %v329_v43 = vmul.f32 %v1790_v57, %v1790_v57  ;;  %v330_v51 = vmul.f32 %v1793_v37, %v1793_v37 }
  0xd0   :  { %v1804_v45 = vsub.f32 %v1482_v53, %v205_v61  ;;  %v1807_v10 = vsub.f32 %v2222_v56, %v205_v61  ;;  %v419_v28 = vadd.f32 %v328_v39, %v327_v49 }
  0xd1   :  { %v1810_v29 = vsub.f32 %v1492_v58, %v206_v33  ;;  %v1813_v31 = vsub.f32 %v2225_v11, %v206_v33  ;;  %v422_v63 = vadd.f32 %v330_v51, %v329_v43  ;;  %v593_v43 = vlaneseq }
  0xd2   :  { %2221 = vst [vmem:[#allocation25_spill] sm:$0xff] %v1804_v45  ;;  %2223 = vst [vmem:[#allocation12_spill] sm:$0xff] %v1807_v10  ;;  %417 = vadd.xlane.f32.xlu1 %v416_v55  ;;  %420 = vadd.xlane.f32.xlu0 %v419_v28  ;;  %v331_v62 = vmul.f32 %v1804_v45, %v1804_v45  ;;  %v332_v53 = vmul.f32 %v1807_v10, %v1807_v10 }
  0xd3   :  { %2224 = vst [vmem:[#allocation26_spill] sm:$0xff] %v1810_v29  ;;  %2226 = vst [vmem:[#allocation13_spill] sm:$0xff] %v1813_v31  ;;  %v333_v61 = vmul.f32 %v1810_v29, %v1810_v29  ;;  %v334_v49 = vmul.f32 %v1813_v31, %v1813_v31  ;;  %v594_v45 = vshrl.u32 %v593_v43, 7 }
  0xd4   :  { %v425_v58 = vadd.f32 %v332_v53, %v331_v62 }
  0xd5   :  { %v428_v39 = vadd.f32 %v334_v49, %v333_v61  ;;  %v595_v53 = vsub.s32 0, %v594_v45  ;;  %v599_v61 = vsub.s32 1, %v594_v45  ;;  %v591_v49 = vld [vmem:[%s2138_s1] sm:$0x3] }
  0xd6   :  { %423 = vadd.xlane.f32.xlu1 %v422_v63  ;;  %426 = vadd.xlane.f32.xlu0 %v425_v58 }
  0xda   :  { %429 = vadd.xlane.f32.xlu1 %v428_v39 }
 0x127   :  { %v337_v55 = vpop.xlane.xlu0 %336 }
 0x128   :  { %v431_v33 = vmul.f32 0.00390625, %v337_v55 }
 0x12a   :  { %v463_v51 = vadd.f32 1e-05, %v431_v33 }
 0x12b   :  { %v340_v56 = vpop.xlane.xlu1 %339  ;;  %v343_v28 = vpop.xlane.xlu0 %342 }
 0x12c   :  { %1035 = vrsqrt.f32 %v463_v51  ;;  %v432_v11 = vmul.f32 0.00390625, %v340_v56  ;;  %v433_v10 = vmul.f32 0.00390625, %v343_v28 }
 0x12e   :  { %v464_v37 = vadd.f32 1e-05, %v432_v11  ;;  %v465_v29 = vadd.f32 1e-05, %v433_v10  ;;  %v667_v10 = vld [vmem:[%s2139_s2] sm:$0x3] }
 0x12f   :  { %v346_v57 = vpop.xlane.xlu1 %345  ;;  %v349_v16 = vpop.xlane.xlu0 %348  ;;  %v1833_v56 = vrot.slane %v667_v10, %v595_v53  ;;  %v1835_v28 = vrot.slane %v667_v10, %v599_v61  ;;  %v2227_v11 = vld [vmem:[#allocation14_spill] sm:$0xff] }
 0x130   :  { %1037 = vrsqrt.f32 %v464_v37  ;;  %v434_v62 = vmul.f32 0.00390625, %v346_v57  ;;  %v435_v63 = vmul.f32 0.00390625, %v349_v16  ;;  %v1829_v57 = vrot.slane %v591_v49, %v595_v53 }
 0x131   :  { %1039 = vrsqrt.f32 %v465_v29  ;;  %v1831_v16 = vrot.slane %v591_v49, %v599_v61 }
 0x132   :  { %v466_v58 = vadd.f32 1e-05, %v434_v62  ;;  %v467_v39 = vadd.f32 1e-05, %v435_v63  ;;  %v2228_v63 = vld [vmem:[#allocation15_spill] sm:$0xff] }
 0x133   :  { %v352_v55 = vpop.xlane.xlu1 %351  ;;  %v355_v33 = vpop.xlane.xlu0 %354 }
 0x134   :  { %1041 = vrsqrt.f32 %v466_v58  ;;  %v436_v43 = vmul.f32 0.00390625, %v352_v55  ;;  %v437_v37 = vmul.f32 0.00390625, %v355_v33 }
 0x135   :  { %1043 = vrsqrt.f32 %v467_v39 }
 0x136   :  { %v1036_v45 = vpop.eup %1035  ;;  %v468_v29 = vadd.f32 1e-05, %v436_v43  ;;  %v469_v51 = vadd.f32 1e-05, %v437_v37 }
 0x137   :  { %v527_v62 = vmul.f32 %v1036_v45, %v2227_v11  ;;  %v528_v31 = vmul.f32 %v1036_v45, %v2228_v63  ;;  %v358_v17 = vpop.xlane.xlu1 %357  ;;  %v361_v58 = vpop.xlane.xlu0 %360  ;;  %v2229_v63 = vld [vmem:[#allocation16_spill] sm:$0xff] }
 0x138   :  { %1045 = vrsqrt.f32 %v468_v29  ;;  %v438_v55 = vmul.f32 0.00390625, %v358_v17  ;;  %v439_v33 = vmul.f32 0.00390625, %v361_v58 }
 0x139   :  { %v603_v49 = vmul.f32 %v1829_v57, %v527_v62  ;;  %v604_v39 = vmul.f32 %v1831_v16, %v528_v31  ;;  %1047 = vrsqrt.f32 %v469_v51  ;;  %v2230_v62 = vld [vmem:[#allocation17_spill] sm:$0xff] }
 0x13a   :  { %v1038_v43 = vpop.eup %1037  ;;  %v470_v37 = vadd.f32 1e-05, %v438_v55  ;;  %v471_v53 = vadd.f32 1e-05, %v439_v33 }
 0x13b   :  { %v1040_v60 = vpop.eup %1039  ;;  %v679_v61 = vadd.f32 %v1833_v56, %v603_v49  ;;  %v680_v10 = vadd.f32 %v1835_v28, %v604_v39  ;;  %v529_v45 = vmul.f32 %v1038_v43, %v1524_v3  ;;  %v530_v11 = vmul.f32 %v1038_v43, %v1527_v4  ;;  %v364_v29 = vpop.xlane.xlu1 %363 }
 0x13c   :  { %v367_v17 = vpop.xlane.xlu0 %366  ;;  %v531_v58 = vmul.f32 %v1040_v60, %v2229_v63  ;;  %v532_v54 = vmul.f32 %v1040_v60, %v2230_v62  ;;  %1049 = vrsqrt.f32 %v470_v37  ;;  %v440_v31 = vmul.f32 0.00390625, %v364_v29 }
 0x13d   :  { %v1003_v51 = vpack.c.bf16 %v680_v10, %v679_v61  ;;  %v605_v55 = vmul.f32 %v1829_v57, %v529_v45  ;;  %v606_v33 = vmul.f32 %v1831_v16, %v530_v11  ;;  %1051 = vrsqrt.f32 %v471_v53 }
 0x13e   :  { %v1042_v49 = vpop.eup %1041  ;;  %v607_v39 = vmul.f32 %v1829_v57, %v531_v58  ;;  %v608_v3 = vmul.f32 %v1831_v16, %v532_v54  ;;  %v472_v4 = vadd.f32 1e-05, %v440_v31  ;;  %v441_v43 = vmul.f32 0.00390625, %v367_v17 }
 0x13f   :  { %v1044_v50 = vpop.eup %1043  ;;  %935 = vst [vmem:[%s2140_s3] sm:$0xff] %v1003_v51  ;;  %v681_v60 = vadd.f32 %v1833_v56, %v605_v55  ;;  %v682_v37 = vadd.f32 %v1835_v28, %v606_v33  ;;  %v533_v61 = vmul.f32 %v1042_v49, %v1530_v52  ;;  %v534_v53 = vmul.f32 %v1042_v49, %v1533_v22  ;;  %v370_v10 = vpop.xlane.xlu1 %369 }
 0x140   :  { %v373_v45 = vpop.xlane.xlu0 %372  ;;  %v683_v11 = vadd.f32 %v1833_v56, %v607_v39  ;;  %v684_v54 = vadd.f32 %v1835_v28, %v608_v3  ;;  %v535_v29 = vmul.f32 %v1044_v50, %v1544_v9  ;;  %v536_v17 = vmul.f32 %v1044_v50, %v1547_v7 }
 0x141   :  { %v1004_v63 = vpack.c.bf16 %v682_v37, %v681_v60  ;;  %v609_v58 = vmul.f32 %v1829_v57, %v533_v61  ;;  %v610_v62 = vmul.f32 %v1831_v16, %v534_v53  ;;  %1053 = vrsqrt.f32 %v472_v4 }
 0x142   :  { %v1046_v31 = vpop.eup %1045  ;;  %v1005_v52 = vpack.c.bf16 %v684_v54, %v683_v11  ;;  %v611_v22 = vmul.f32 %v1829_v57, %v535_v29  ;;  %v612_v51 = vmul.f32 %v1831_v16, %v536_v17  ;;  %v473_v55 = vadd.f32 1e-05, %v441_v43 }
 0x143   :  { %v1048_v33 = vpop.eup %1047  ;;  %936 = vst [vmem:[%s2140_s3 + $0x8] sm:$0xff] %v1004_v63  ;;  %v685_v9 = vadd.f32 %v1833_v56, %v609_v58  ;;  %v686_v7 = vadd.f32 %v1835_v28, %v610_v62  ;;  %v537_v50 = vmul.f32 %v1046_v31, %v1550_v0  ;;  %v538_v49 = vmul.f32 %v1046_v31, %v1553_v1  ;;  %v376_v39 = vpop.xlane.xlu1 %375 }
 0x144   :  { %v379_v3 = vpop.xlane.xlu0 %378  ;;  %937 = vst [vmem:[%s2140_s3 + $0x10] sm:$0xff] %v1005_v52  ;;  %v687_v4 = vadd.f32 %v1833_v56, %v611_v22  ;;  %v688_v43 = vadd.f32 %v1835_v28, %v612_v51  ;;  %v539_v60 = vmul.f32 %v1048_v33, %v1564_v41  ;;  %v540_v37 = vmul.f32 %v1048_v33, %v1567_v35 }
 0x145   :  { %v1006_v61 = vpack.c.bf16 %v686_v7, %v685_v9  ;;  %v613_v53 = vmul.f32 %v1829_v57, %v537_v50  ;;  %v614_v0 = vmul.f32 %v1831_v16, %v538_v49  ;;  %1055 = vrsqrt.f32 %v473_v55 }
 0x146   :  { %v1050_v1 = vpop.eup %1049  ;;  %v1007_v11 = vpack.c.bf16 %v688_v43, %v687_v4  ;;  %v615_v54 = vmul.f32 %v1829_v57, %v539_v60  ;;  %v616_v29 = vmul.f32 %v1831_v16, %v540_v37  ;;  %v442_v17 = vmul.f32 0.00390625, %v370_v10 }
 0x147   :  { %v1052_v63 = vpop.eup %1051  ;;  %938 = vst [vmem:[%s2140_s3 + $0x18] sm:$0xff] %v1006_v61  ;;  %v689_v41 = vadd.f32 %v1833_v56, %v613_v53  ;;  %v690_v35 = vadd.f32 %v1835_v28, %v614_v0  ;;  %v541_v58 = vmul.f32 %v1050_v1, %v1570_v6  ;;  %v542_v62 = vmul.f32 %v1050_v1, %v1573_v59  ;;  %v382_v31 = vpop.xlane.xlu1 %381 }
 0x148   :  { %v385_v52 = vpop.xlane.xlu0 %384  ;;  %939 = vst [vmem:[%s2140_s3 + $0x20] sm:$0xff] %v1007_v11  ;;  %v691_v10 = vadd.f32 %v1833_v56, %v615_v54  ;;  %v692_v22 = vadd.f32 %v1835_v28, %v616_v29  ;;  %v543_v51 = vmul.f32 %v1052_v63, %v1584_v12  ;;  %v544_v55 = vmul.f32 %v1052_v63, %v1587_v23 }
 0x149   :  { %v1008_v33 = vpack.c.bf16 %v690_v35, %v689_v41  ;;  %v617_v9 = vmul.f32 %v1829_v57, %v541_v58  ;;  %v618_v6 = vmul.f32 %v1831_v16, %v542_v62  ;;  %v474_v59 = vadd.f32 1e-05, %v442_v17 }
 0x14a   :  { %v1009_v7 = vpack.c.bf16 %v692_v22, %v691_v10  ;;  %v619_v50 = vmul.f32 %v1829_v57, %v543_v51  ;;  %v620_v49 = vmul.f32 %v1831_v16, %v544_v55  ;;  %v443_v4 = vmul.f32 0.00390625, %v373_v45 }
 0x14b   :  { %v1054_v43 = vpop.eup %1053  ;;  %940 = vst [vmem:[%s2140_s3 + $0x28] sm:$0xff] %v1008_v33  ;;  %v693_v12 = vadd.f32 %v1833_v56, %v617_v9  ;;  %v694_v23 = vadd.f32 %v1835_v28, %v618_v6  ;;  %1057 = vrsqrt.f32 %v474_v59  ;;  %v444_v60 = vmul.f32 0.00390625, %v376_v39  ;;  %v388_v37 = vpop.xlane.xlu1 %387 }
 0x14c   :  { %v391_v61 = vpop.xlane.xlu0 %390  ;;  %941 = vst [vmem:[%s2140_s3 + $0x30] sm:$0xff] %v1009_v7  ;;  %v695_v53 = vadd.f32 %v1833_v56, %v619_v50  ;;  %v696_v45 = vadd.f32 %v1835_v28, %v620_v49  ;;  %v545_v0 = vmul.f32 %v1054_v43, %v1590_v34  ;;  %v546_v1 = vmul.f32 %v1054_v43, %v1593_v14 }
 0x14d   :  { %v1010_v11 = vpack.c.bf16 %v694_v23, %v693_v12  ;;  %v475_v54 = vadd.f32 1e-05, %v443_v4  ;;  %v476_v29 = vadd.f32 1e-05, %v444_v60  ;;  %v445_v17 = vmul.f32 0.00390625, %v379_v3 }
 0x14e   :  { %v1011_v63 = vpack.c.bf16 %v696_v45, %v695_v53  ;;  %v621_v39 = vmul.f32 %v1829_v57, %v545_v0  ;;  %v622_v41 = vmul.f32 %v1831_v16, %v546_v1  ;;  %v446_v35 = vmul.f32 0.00390625, %v382_v31 }
 0x14f   :  { %v1056_v58 = vpop.eup %1055  ;;  %942 = vst [vmem:[%s2140_s3 + $0x38] sm:$0xff] %v1010_v11  ;;  %1059 = vrsqrt.f32 %v475_v54  ;;  %v477_v62 = vadd.f32 1e-05, %v445_v17  ;;  %v447_v34 = vmul.f32 0.00390625, %v385_v52  ;;  %v448_v10 = vmul.f32 0.00390625, %v388_v37  ;;  %v394_v14 = vpop.xlane.xlu1 %393 }
 0x150   :  { %v397_v22 = vpop.xlane.xlu0 %396  ;;  %943 = vst [vmem:[%s2140_s3 + $0x40] sm:$0xff] %v1011_v63  ;;  %v697_v3 = vadd.f32 %v1833_v56, %v621_v39  ;;  %v698_v51 = vadd.f32 %v1835_v28, %v622_v41  ;;  %v547_v31 = vmul.f32 %v1056_v58, %v1604_v18  ;;  %v548_v55 = vmul.f32 %v1056_v58, %v1607_v46 }
 0x151   :  { %1061 = vrsqrt.f32 %v476_v29  ;;  %v478_v33 = vadd.f32 1e-05, %v446_v35  ;;  %v479_v9 = vadd.f32 1e-05, %v447_v34  ;;  %v480_v6 = vadd.f32 1e-05, %v448_v10 }
 0x152   :  { %v1012_v52 = vpack.c.bf16 %v698_v51, %v697_v3  ;;  %v623_v59 = vmul.f32 %v1829_v57, %v547_v31  ;;  %v624_v7 = vmul.f32 %v1831_v16, %v548_v55  ;;  %1063 = vrsqrt.f32 %v477_v62 }
 0x153   :  { %1065 = vrsqrt.f32 %v478_v33  ;;  %v449_v50 = vmul.f32 0.00390625, %v391_v61  ;;  %v450_v49 = vmul.f32 0.00390625, %v394_v14  ;;  %v451_v4 = vmul.f32 0.00390625, %v397_v22  ;;  %v400_v43 = vpop.xlane.xlu1 %399 }
 0x154   :  { %v403_v12 = vpop.xlane.xlu0 %402  ;;  %944 = vst [vmem:[%s2140_s3 + $0x48] sm:$0xff] %v1012_v52  ;;  %v699_v18 = vadd.f32 %v1833_v56, %v623_v59  ;;  %v700_v46 = vadd.f32 %v1835_v28, %v624_v7  ;;  %1067 = vrsqrt.f32 %v479_v9  ;;  %v452_v23 = vmul.f32 0.00390625, %v400_v43 }
 0x155   :  { %v1058_v60 = vpop.eup %1057  ;;  %1069 = vrsqrt.f32 %v480_v6  ;;  %v481_v37 = vadd.f32 1e-05, %v449_v50  ;;  %v482_v53 = vadd.f32 1e-05, %v450_v49  ;;  %v483_v45 = vadd.f32 1e-05, %v451_v4 }
 0x156   :  { %v1013_v61 = vpack.c.bf16 %v700_v46, %v699_v18  ;;  %v549_v0 = vmul.f32 %v1058_v60, %v1610_v2  ;;  %v550_v1 = vmul.f32 %v1058_v60, %v1613_v20  ;;  %v484_v11 = vadd.f32 1e-05, %v452_v23 }
 0x157   :  { %1071 = vrsqrt.f32 %v481_v37  ;;  %v453_v54 = vmul.f32 0.00390625, %v403_v12  ;;  %v406_v29 = vpop.xlane.xlu1 %405 }
 0x158   :  { %v409_v17 = vpop.xlane.xlu0 %408  ;;  %945 = vst [vmem:[%s2140_s3 + $0x50] sm:$0xff] %v1013_v61  ;;  %v625_v63 = vmul.f32 %v1829_v57, %v549_v0  ;;  %v626_v39 = vmul.f32 %v1831_v16, %v550_v1  ;;  %1073 = vrsqrt.f32 %v482_v53  ;;  %v454_v41 = vmul.f32 0.00390625, %v406_v29 }
 0x159   :  { %v1060_v35 = vpop.eup %1059  ;;  %1075 = vrsqrt.f32 %v483_v45  ;;  %v485_v2 = vadd.f32 1e-05, %v453_v54  ;;  %v455_v58 = vmul.f32 0.00390625, %v409_v17 }
 0x15a   :  { %v701_v20 = vadd.f32 %v1833_v56, %v625_v63  ;;  %v702_v62 = vadd.f32 %v1835_v28, %v626_v39  ;;  %v551_v34 = vmul.f32 %v1060_v35, %v1624_v24  ;;  %v552_v10 = vmul.f32 %v1060_v35, %v1627_v40 }
 0x15b   :  { %v1062_v14 = vpop.eup %1061  ;;  %1077 = vrsqrt.f32 %v484_v11  ;;  %v1944_v22 = vadd.f32 1e-05, %v454_v41  ;;  %v1946_v3 = vadd.f32 1e-05, %v455_v58  ;;  %v1961_v4 = vpop.xlane.xlu1 %411 }
 0x15c   :  { %v1064_v51 = vpop.eup %1063  ;;  %v1014_v31 = vpack.c.bf16 %v702_v62, %v701_v20  ;;  %v627_v55 = vmul.f32 %v1829_v57, %v551_v34  ;;  %v628_v33 = vmul.f32 %v1831_v16, %v552_v10  ;;  %v553_v9 = vmul.f32 %v1062_v14, %v1630_v47  ;;  %v1981_v54 = vpop.xlane.xlu0 %414 }
 0x15d   :  { %v1066_v6 = vpop.eup %1065  ;;  %v554_v52 = vmul.f32 %v1062_v14, %v1633_v26  ;;  %v555_v24 = vmul.f32 %v1064_v51, %v1644_v30  ;;  %v556_v40 = vmul.f32 %v1064_v51, %v1647_v8  ;;  %1079 = vrsqrt.f32 %v485_v2 }
 0x15e   :  { %v1068_v59 = vpop.eup %1067  ;;  %946 = vst [vmem:[%s2140_s3 + $0x58] sm:$0xff] %v1014_v31  ;;  %v703_v7 = vadd.f32 %v1833_v56, %v627_v55  ;;  %v704_v50 = vadd.f32 %v1835_v28, %v628_v33  ;;  %v629_v49 = vmul.f32 %v1829_v57, %v553_v9  ;;  %v557_v47 = vmul.f32 %v1066_v6, %v1650_v5 }
 0x15f   :  { %v1070_v26 = vpop.eup %1069  ;;  %v630_v30 = vmul.f32 %v1831_v16, %v554_v52  ;;  %v631_v8 = vmul.f32 %v1829_v57, %v555_v24  ;;  %v632_v43 = vmul.f32 %v1831_v16, %v556_v40  ;;  %v558_v12 = vmul.f32 %v1066_v6, %v1653_v32  ;;  %v418_v20 = vpop.xlane.xlu1 %417 }
 0x160   :  { %v1015_v18 = vpack.c.bf16 %v704_v50, %v703_v7  ;;  %v705_v46 = vadd.f32 %v1833_v56, %v629_v49  ;;  %v633_v23 = vmul.f32 %v1829_v57, %v557_v47  ;;  %v559_v60 = vmul.f32 %v1068_v59, %v1664_v36  ;;  %v421_v40 = vpop.xlane.xlu0 %420 }
 0x161   :  { %v1072_v37 = vpop.eup %1071  ;;  %v706_v5 = vadd.f32 %v1835_v28, %v630_v30  ;;  %v707_v53 = vadd.f32 %v1833_v56, %v631_v8  ;;  %v708_v45 = vadd.f32 %v1835_v28, %v632_v43  ;;  %v634_v61 = vmul.f32 %v1831_v16, %v558_v12  ;;  %v2231_v30 = vld [vmem:[#allocation18_spill] sm:$0xff] }
 0x162   :  { %v1074_v0 = vpop.eup %1073  ;;  %947 = vst [vmem:[%s2140_s3 + $0x60] sm:$0xff] %v1015_v18  ;;  %v709_v32 = vadd.f32 %v1833_v56, %v633_v23  ;;  %v560_v1 = vmul.f32 %v1068_v59, %v1667_v15  ;;  %v635_v36 = vmul.f32 %v1829_v57, %v559_v60  ;;  %v561_v11 = vmul.f32 %v1070_v26, %v1670_v13  ;;  %v2232_v18 = vld [vmem:[#allocation19_spill] sm:$0xff]  ;;  %v2233_v23 = vld [vmem:[#allocation20_spill] sm:$0xff] }
 0x163   :  { %v1076_v29 = vpop.eup %1075  ;;  %v1016_v17 = vpack.c.bf16 %v706_v5, %v705_v46  ;;  %v1017_v63 = vpack.c.bf16 %v708_v45, %v707_v53  ;;  %v710_v39 = vadd.f32 %v1835_v28, %v634_v61  ;;  %v562_v41 = vmul.f32 %v1070_v26, %v1673_v38  ;;  %v424_v8 = vpop.xlane.xlu1 %423 }
 0x164   :  { %v636_v35 = vmul.f32 %v1831_v16, %v560_v1  ;;  %v711_v2 = vadd.f32 %v1833_v56, %v635_v36  ;;  %v637_v58 = vmul.f32 %v1829_v57, %v561_v11  ;;  %v563_v15 = vmul.f32 %v1072_v37, %v1684_v42  ;;  %v427_v11 = vpop.xlane.xlu0 %426 }
 0x165   :  { %v1078_v62 = vpop.eup %1077  ;;  %948 = vst [vmem:[%s2140_s3 + $0x68] sm:$0xff] %v1016_v17  ;;  %949 = vst [vmem:[%s2140_s3 + $0x70] sm:$0xff] %v1017_v63  ;;  %v1018_v13 = vpack.c.bf16 %v710_v39, %v709_v32  ;;  %v638_v38 = vmul.f32 %v1831_v16, %v562_v41  ;;  %v564_v34 = vmul.f32 %v1072_v37, %v1687_v21  ;;  %1081 = vrsqrt.f32 %v1944_v22 }
 0x166   :  { %v565_v10 = vmul.f32 %v1074_v0, %v1690_v19  ;;  %v712_v14 = vadd.f32 %v1835_v28, %v636_v35  ;;  %v713_v42 = vadd.f32 %v1833_v56, %v637_v58  ;;  %v639_v51 = vmul.f32 %v1829_v57, %v563_v15 }
 0x167   :  { %v566_v31 = vmul.f32 %v1074_v0, %v1693_v44  ;;  %v1080_v55 = vpop.eup %1079  ;;  %950 = vst [vmem:[%s2140_s3 + $0x78] sm:$0xff] %v1018_v13  ;;  %v714_v33 = vadd.f32 %v1835_v28, %v638_v38  ;;  %v640_v9 = vmul.f32 %v1831_v16, %v564_v34  ;;  %v567_v19 = vmul.f32 %v1076_v29, %v1704_v48 }
 0x168   :  { %v641_v21 = vmul.f32 %v1829_v57, %v565_v10  ;;  %v1019_v6 = vpack.c.bf16 %v712_v14, %v711_v2  ;;  %v715_v52 = vadd.f32 %v1833_v56, %v639_v51  ;;  %v568_v44 = vmul.f32 %v1076_v29, %v1707_v27  ;;  %v430_v2 = vpop.xlane.xlu1 %429 }
 0x169   :  { %v642_v24 = vmul.f32 %v1831_v16, %v566_v31  ;;  %v1020_v59 = vpack.c.bf16 %v714_v33, %v713_v42  ;;  %v716_v7 = vadd.f32 %v1835_v28, %v640_v9  ;;  %v643_v49 = vmul.f32 %v1829_v57, %v567_v19  ;;  %v2234_v42 = vld [vmem:[#allocation21_spill] sm:$0xff]  ;;  %v2235_v31 = vld [vmem:[#allocation22_spill] sm:$0xff]  ;;  %v2236_v33 = vld [vmem:[#allocation23_spill] sm:$0xff] }
 0x16a   :  { %v717_v50 = vadd.f32 %v1833_v56, %v641_v21  ;;  %951 = vst [vmem:[%s2140_s3 + $0x80] sm:$0xff] %v1019_v6  ;;  %v644_v47 = vmul.f32 %v1831_v16, %v568_v44  ;;  %v569_v26 = vmul.f32 %v1078_v62, %v1710_v25  ;;  %v570_v27 = vmul.f32 %v1078_v62, %v2231_v30  ;;  %v2237_v21 = vld [vmem:[#allocation24_spill] sm:$0xff] }
 0x16b   :  { %v718_v48 = vadd.f32 %v1835_v28, %v642_v24  ;;  %952 = vst [vmem:[%s2140_s3 + $0x88] sm:$0xff] %v1020_v59  ;;  %v1021_v43 = vpack.c.bf16 %v716_v7, %v715_v52  ;;  %v719_v12 = vadd.f32 %v1833_v56, %v643_v49  ;;  %v571_v46 = vmul.f32 %v1080_v55, %v2232_v18 }
 0x16c   :  { %v572_v60 = vmul.f32 %v1080_v55, %v2233_v23  ;;  %v720_v5 = vadd.f32 %v1835_v28, %v644_v47  ;;  %v645_v53 = vmul.f32 %v1829_v57, %v569_v26  ;;  %v646_v25 = vmul.f32 %v1831_v16, %v570_v27 }
 0x16d   :  { %v1022_v37 = vpack.c.bf16 %v718_v48, %v717_v50  ;;  %953 = vst [vmem:[%s2140_s3 + $0x90] sm:$0xff] %v1021_v43  ;;  %v647_v45 = vmul.f32 %v1829_v57, %v571_v46  ;;  %v456_v0 = vmul.f32 0.00390625, %v1961_v4  ;;  %1083 = vrsqrt.f32 %v1946_v3  ;;  %v2238_v50 = vld [vmem:[#allocation2_spill] sm:$0xff]  ;;  %v2239_v48 = vld [vmem:[#allocation3_spill] sm:$0xff]  ;;  %v2240_v46 = vld [vmem:[#allocation4_spill] sm:$0xff] }
 0x16e   :  { %v648_v61 = vmul.f32 %v1831_v16, %v572_v60  ;;  %v1023_v32 = vpack.c.bf16 %v720_v5, %v719_v12  ;;  %v721_v1 = vadd.f32 %v1833_v56, %v645_v53  ;;  %v722_v36 = vadd.f32 %v1835_v28, %v646_v25  ;;  %v2241_v5 = vld [vmem:[#allocation5_spill] sm:$0xff]  ;;  %v2242_v25 = vld [vmem:[#allocation6_spill] sm:$0xff] }
 0x16f   :  { %954 = vst [vmem:[%s2140_s3 + $0x98] sm:$0xff] %v1022_v37  ;;  %v723_v29 = vadd.f32 %v1833_v56, %v647_v45  ;;  %v488_v63 = vadd.f32 1e-05, %v456_v0  ;;  %v457_v22 = vmul.f32 0.00390625, %v1981_v54  ;;  %v458_v39 = vmul.f32 0.00390625, %v418_v20  ;;  %v1082_v10 = vpop.eup %1081 }
 0x170   :  { %v724_v17 = vadd.f32 %v1835_v28, %v648_v61  ;;  %955 = vst [vmem:[%s2140_s3 + $0xa0] sm:$0xff] %v1023_v32  ;;  %v1024_v4 = vpack.c.bf16 %v722_v36, %v721_v1  ;;  %v459_v41 = vmul.f32 0.00390625, %v421_v40  ;;  %v460_v35 = vmul.f32 0.00390625, %v424_v8  ;;  %v2243_v61 = vld [vmem:[#allocation7_spill] sm:$0xff] }
 0x171   :  { %1085 = vrsqrt.f32 %v488_v63  ;;  %v489_v3 = vadd.f32 1e-05, %v457_v22  ;;  %v461_v15 = vmul.f32 0.00390625, %v427_v11  ;;  %v490_v62 = vadd.f32 1e-05, %v458_v39 }
 0x172   :  { %v1025_v58 = vpack.c.bf16 %v724_v17, %v723_v29  ;;  %956 = vst [vmem:[%s2140_s3 + $0xa8] sm:$0xff] %v1024_v4  ;;  %v491_v13 = vadd.f32 1e-05, %v459_v41  ;;  %v492_v54 = vadd.f32 1e-05, %v460_v35  ;;  %v462_v38 = vmul.f32 0.00390625, %v430_v2 }
 0x173   :  { %1087 = vrsqrt.f32 %v489_v3  ;;  %v493_v20 = vadd.f32 1e-05, %v461_v15  ;;  %v573_v51 = vmul.f32 %v1082_v10, %v2234_v42  ;;  %v574_v55 = vmul.f32 %v1082_v10, %v2235_v31  ;;  %v2244_v29 = vld [vmem:[#allocation8_spill] sm:$0xff]  ;;  %v2245_v41 = vld [vmem:[#allocation9_spill] sm:$0xff]  ;;  %v2246_v15 = vld [vmem:[#allocation10_spill] sm:$0xff] }
 0x174   :  { %957 = vst [vmem:[%s2140_s3 + $0xb0] sm:$0xff] %v1025_v58  ;;  %1089 = vrsqrt.f32 %v490_v62  ;;  %v494_v34 = vadd.f32 1e-05, %v462_v38  ;;  %v2248_v31 = vld [vmem:[#allocation25_spill] sm:$0xff] }
 0x175   :  { %1091 = vrsqrt.f32 %v491_v13  ;;  %v649_v6 = vmul.f32 %v1829_v57, %v573_v51  ;;  %v650_v52 = vmul.f32 %v1831_v16, %v574_v55 }
 0x176   :  { %1093 = vrsqrt.f32 %v492_v54 }
 0x177   :  { %1095 = vrsqrt.f32 %v493_v20  ;;  %v1084_v14 = vpop.eup %1083  ;;  %v725_v59 = vadd.f32 %v1833_v56, %v649_v6  ;;  %v726_v7 = vadd.f32 %v1835_v28, %v650_v52 }
 0x178   :  { %v575_v9 = vmul.f32 %v1084_v14, %v2236_v33  ;;  %v576_v19 = vmul.f32 %v1084_v14, %v2237_v21  ;;  %1097 = vrsqrt.f32 %v494_v34  ;;  %v2247_v14 = vld [vmem:[#allocation11_spill] sm:$0xff] }
 0x179   :  { %v1026_v43 = vpack.c.bf16 %v726_v7, %v725_v59 }
 0x17a   :  { %v651_v44 = vmul.f32 %v1829_v57, %v575_v9  ;;  %v652_v40 = vmul.f32 %v1831_v16, %v576_v19  ;;  %v2249_v19 = vld [vmem:[#allocation12_spill] sm:$0xff] }
 0x17b   :  { %v1086_v24 = vpop.eup %1085  ;;  %958 = vst [vmem:[%s2140_s3 + $0xb8] sm:$0xff] %v1026_v43 }
 0x17c   :  { %v577_v49 = vmul.f32 %v1086_v24, %v2238_v50  ;;  %v578_v47 = vmul.f32 %v1086_v24, %v2239_v48  ;;  %v727_v30 = vadd.f32 %v1833_v56, %v651_v44  ;;  %v728_v27 = vadd.f32 %v1835_v28, %v652_v40  ;;  %v2250_v40 = vld [vmem:[#allocation26_spill] sm:$0xff] }
 0x17d   :  { %v1088_v26 = vpop.eup %1087 }
 0x17e   :  { %v1090_v8 = vpop.eup %1089  ;;  %v653_v12 = vmul.f32 %v1829_v57, %v577_v49  ;;  %v654_v18 = vmul.f32 %v1831_v16, %v578_v47  ;;  %v579_v23 = vmul.f32 %v1088_v26, %v2240_v46  ;;  %v1027_v37 = vpack.c.bf16 %v728_v27, %v727_v30  ;;  %v2251_v49 = vld [vmem:[#allocation13_spill] sm:$0xff] }
 0x17f   :  { %v1092_v60 = vpop.eup %1091  ;;  %v580_v53 = vmul.f32 %v1088_v26, %v2241_v5  ;;  %v581_v45 = vmul.f32 %v1090_v8, %v2242_v25  ;;  %v582_v0 = vmul.f32 %v1090_v8, %v2243_v61 }
 0x180   :  { %v1094_v32 = vpop.eup %1093  ;;  %v729_v1 = vadd.f32 %v1833_v56, %v653_v12  ;;  %v730_v36 = vadd.f32 %v1835_v28, %v654_v18  ;;  %v655_v11 = vmul.f32 %v1829_v57, %v579_v23  ;;  %v583_v17 = vmul.f32 %v1092_v60, %v2244_v29  ;;  %959 = vst [vmem:[%s2140_s3 + $0xc0] sm:$0xff] %v1027_v37 }
 0x181   :  { %v1096_v63 = vpop.eup %1095  ;;  %v656_v22 = vmul.f32 %v1831_v16, %v580_v53  ;;  %v657_v4 = vmul.f32 %v1829_v57, %v581_v45  ;;  %v658_v39 = vmul.f32 %v1831_v16, %v582_v0  ;;  %v584_v35 = vmul.f32 %v1092_v60, %v2245_v41 }
 0x182   :  { %v1028_v2 = vpack.c.bf16 %v730_v36, %v729_v1  ;;  %v731_v58 = vadd.f32 %v1833_v56, %v655_v11  ;;  %v659_v3 = vmul.f32 %v1829_v57, %v583_v17  ;;  %v585_v62 = vmul.f32 %v1094_v32, %v2246_v15  ;;  %v1098_v13 = vpop.eup %1097 }
 0x183   :  { %v732_v54 = vadd.f32 %v1835_v28, %v656_v22  ;;  %v733_v20 = vadd.f32 %v1833_v56, %v657_v4  ;;  %v734_v38 = vadd.f32 %v1835_v28, %v658_v39  ;;  %v660_v34 = vmul.f32 %v1831_v16, %v584_v35 }
 0x184   :  { %960 = vst [vmem:[%s2140_s3 + $0xc8] sm:$0xff] %v1028_v2  ;;  %v735_v10 = vadd.f32 %v1833_v56, %v659_v3  ;;  %v586_v42 = vmul.f32 %v1094_v32, %v2247_v14  ;;  %v661_v51 = vmul.f32 %v1829_v57, %v585_v62  ;;  %v587_v55 = vmul.f32 %v1096_v63, %v2248_v31 }
 0x185   :  { %v1029_v33 = vpack.c.bf16 %v732_v54, %v731_v58  ;;  %v1030_v9 = vpack.c.bf16 %v734_v38, %v733_v20  ;;  %v736_v21 = vadd.f32 %v1835_v28, %v660_v34  ;;  %v588_v6 = vmul.f32 %v1096_v63, %v2249_v19 }
 0x186   :  { %v662_v52 = vmul.f32 %v1831_v16, %v586_v42  ;;  %v737_v24 = vadd.f32 %v1833_v56, %v661_v51  ;;  %v663_v44 = vmul.f32 %v1829_v57, %v587_v55  ;;  %v589_v59 = vmul.f32 %v1098_v13, %v2250_v40 }
 0x187   :  { %961 = vst [vmem:[%s2140_s3 + $0xd0] sm:$0xff] %v1029_v33  ;;  %962 = vst [vmem:[%s2140_s3 + $0xd8] sm:$0xff] %v1030_v9  ;;  %v1031_v7 = vpack.c.bf16 %v736_v21, %v735_v10  ;;  %v664_v50 = vmul.f32 %v1831_v16, %v588_v6  ;;  %v590_v48 = vmul.f32 %v1098_v13, %v2251_v49 }
 0x188   :  { %v738_v47 = vadd.f32 %v1835_v28, %v662_v52  ;;  %v739_v26 = vadd.f32 %v1833_v56, %v663_v44  ;;  %v665_v30 = vmul.f32 %v1829_v57, %v589_v59 }
 0x189   :  { %963 = vst [vmem:[%s2140_s3 + $0xe0] sm:$0xff] %v1031_v7  ;;  %v740_v27 = vadd.f32 %v1835_v28, %v664_v50  ;;  %v666_v8 = vmul.f32 %v1831_v16, %v590_v48 }
 0x18a   :  { %v1032_v43 = vpack.c.bf16 %v738_v47, %v737_v24  ;;  %v741_v12 = vadd.f32 %v1833_v56, %v665_v30 }
 0x18b   :  { %v1033_v18 = vpack.c.bf16 %v740_v27, %v739_v26  ;;  %v742_v46 = vadd.f32 %v1835_v28, %v666_v8 }
 0x18c   :  { %964 = vst [vmem:[%s2140_s3 + $0xe8] sm:$0xff] %v1032_v43 }
 0x18d   :  { %965 = vst [vmem:[%s2140_s3 + $0xf0] sm:$0xff] %v1033_v18  ;;  %v1034_v57 = vpack.c.bf16 %v742_v46, %v741_v12 }
 0x18f   :  { %966 = vst [vmem:[%s2140_s3 + $0xf8] sm:$0xff] %v1034_v57 }

// kernel: xlm_r_forward.10
= control target key start
LH: loop header
LB: loop body
LE: loop exit
PB: predicated region body
PF: predicated region fallthrough
CT: control target
= control target key end

     0   :  { %s2266_s12 = smov 0   ;;  %s2268_s13 = smov 0   ;;  %s2712_s0 = inlined_call_operand.vmem [shape: bf16[256,256], index: 0, kind: input, shape index: {}]   ;;  %s2713_s1 = inlined_call_operand.vmem [shape: bf16[256,768], index: 1, kind: input, shape index: {}]   ;;  %s2714_s2 = inlined_call_operand.vmem [shape: f32[1,768], index: 2, kind: input, shape index: {}]   ;;  %s2715_s3 = inlined_call_operand.vmem [shape: bf16[256,768], index: 3, kind: output, shape index: {}]  }
   0x1   :  { %s2270_s14 = smov 0   ;;  %s2272_s15 = smov 0  }
   0x2   :  { %s2274_s16 = smov 0  }
   0x3 LB: > { %s28_s17 = sadd.s32 1, %s2240_s15  ;;  %s1891_s18 = sadd.s32 4294967295, %s2244_s16   ;;  %s2244_s16 = sphi %s2274_s16, %s13_s16   ;;  %s2240_s15 = sphi %s2272_s15, %s2720_s15   ;;  %s2236_s14 = sphi %s2270_s14, %s2719_s14   ;;  %s2232_s13 = sphi %s2268_s13, %s2718_s13   ;;  %s2228_s12 = sphi %s2266_s12, %s2717_s12  }
   0x4   : > { %p30_p0 = scmp.ge.s32.totalorder %s28_s17, 3  ;;  %p76_p1 = scmp.ne.s32.totalorder %s2232_s13, %s2228_s12 }
   0x5   : > { %p77_p2 = scmp.eq.s32.totalorder %s2244_s16, 0  ;;  %p134_p4 = scmp.eq.s32.totalorder %s1891_s18, 2 }
   0x6   : > { %s2722_s17 = smov (%p30_p0, %s28_s17), 0  ;;  %s69_s20 = sadd.s32 1, %s2232_s13 }
   0x7   : > { %p78_p3 = por %p77_p2, %p76_p1  ;;  %s65_s19 = ssub.s32 %s2240_s15, %s2722_s17 }
   0x8   : > { %p67_p5 = scmp.eq.s32.totalorder %s65_s19, 0  ;;  %p2301_p6 = por %p134_p4, %p76_p1 }
   0x9   : > { %p1895_p7 = scmp.ge.s32.totalorder %s2244_s16, 3 }
   0xa   : > { %s2306_s22 = scalar_select %p67_p5, %s2232_s13, %s69_s20  }
   0xb   : > { %171 = sbr.rel (%p1895_p7) target bundleno = 38 (0x26), region = 20 }
  0x12   : > { %174 = sbr.rel (!%p78_p3) target bundleno = 38 (0x26), region = 24  ;;  %s176_s23 = sand.u32 (%p78_p3), 1, %s2232_s13  }
  0x13   : > { %s2004_s24 = sshll.u32 (%p78_p3), %s2240_s15, 3  ;;  %s1896_s25 = sshll.u32 (%p78_p3), %s176_s23, 8 }
  0x14   : > { %s2314_s28 = scalar_lea.vmem (%p78_p3), %s2713_s1, %s2004_s24  ;;  %s2319_s29 = scalar_lea.vmem (%p78_p3), [#allocation3], %s1896_s25 }
  0x15   : > { %v274_v0 = vld [vmem:[%s2314_s28] sm:$0xff] (%p78_p3)  ;;  %v276_v1 = vld [vmem:[%s2314_s28 + $0x18] sm:$0xff] (%p78_p3)  ;;  %v278_v2 = vld [vmem:[%s2314_s28 + $0x30] sm:$0xff] (%p78_p3) }
  0x16   : > { %275 = vst [vmem:[%s2319_s29] sm:$0xff] (%p78_p3), %v274_v0  ;;  %277 = vst [vmem:[%s2319_s29 + $0x8] sm:$0xff] (%p78_p3), %v276_v1  ;;  %v280_v3 = vld [vmem:[%s2314_s28 + $0x48] sm:$0xff] (%p78_p3)  ;;  %v282_v4 = vld [vmem:[%s2314_s28 + $0x60] sm:$0xff] (%p78_p3) }
  0x17   : > { %279 = vst [vmem:[%s2319_s29 + $0x10] sm:$0xff] (%p78_p3), %v278_v2  ;;  %v284_v5 = vld [vmem:[%s2314_s28 + $0x78] sm:$0xff] (%p78_p3)  ;;  %281 = vst [vmem:[%s2319_s29 + $0x18] sm:$0xff] (%p78_p3), %v280_v3  ;;  %v286_v6 = vld [vmem:[%s2314_s28 + $0x90] sm:$0xff] (%p78_p3) }
  0x18   : > { %283 = vst [vmem:[%s2319_s29 + $0x20] sm:$0xff] (%p78_p3), %v282_v4  ;;  %285 = vst [vmem:[%s2319_s29 + $0x28] sm:$0xff] (%p78_p3), %v284_v5  ;;  %v288_v7 = vld [vmem:[%s2314_s28 + $0xa8] sm:$0xff] (%p78_p3)  ;;  %v290_v8 = vld [vmem:[%s2314_s28 + $0xc0] sm:$0xff] (%p78_p3) }
  0x19   : > { %287 = vst [vmem:[%s2319_s29 + $0x30] sm:$0xff] %v286_v6  ;;  %289 = vst [vmem:[%s2319_s29 + $0x38] sm:$0xff] %v288_v7  ;;  %v292_v9 = vld [vmem:[%s2314_s28 + $0xd8] sm:$0xff]  ;;  %v294_v10 = vld [vmem:[%s2314_s28 + $0xf0] sm:$0xff] }
  0x1a   : > { %291 = vst [vmem:[%s2319_s29 + $0x40] sm:$0xff] %v290_v8  ;;  %v296_v11 = vld [vmem:[%s2314_s28 + $0x108] sm:$0xff]  ;;  %293 = vst [vmem:[%s2319_s29 + $0x48] sm:$0xff] %v292_v9  ;;  %v298_v12 = vld [vmem:[%s2314_s28 + $0x120] sm:$0xff] }
  0x1b   : > { %295 = vst [vmem:[%s2319_s29 + $0x50] sm:$0xff] %v294_v10  ;;  %297 = vst [vmem:[%s2319_s29 + $0x58] sm:$0xff] %v296_v11  ;;  %v300_v13 = vld [vmem:[%s2314_s28 + $0x138] sm:$0xff]  ;;  %v302_v14 = vld [vmem:[%s2314_s28 + $0x150] sm:$0xff] }
  0x1c   : > { %299 = vst [vmem:[%s2319_s29 + $0x60] sm:$0xff] %v298_v12  ;;  %301 = vst [vmem:[%s2319_s29 + $0x68] sm:$0xff] %v300_v13  ;;  %v304_v15 = vld [vmem:[%s2314_s28 + $0x168] sm:$0xff]  ;;  %v306_v16 = vld [vmem:[%s2314_s28 + $0x180] sm:$0xff] }
  0x1d   : > { %303 = vst [vmem:[%s2319_s29 + $0x70] sm:$0xff] %v302_v14  ;;  %v308_v17 = vld [vmem:[%s2314_s28 + $0x198] sm:$0xff]  ;;  %305 = vst [vmem:[%s2319_s29 + $0x78] sm:$0xff] %v304_v15  ;;  %v310_v18 = vld [vmem:[%s2314_s28 + $0x1b0] sm:$0xff] }
  0x1e   : > { %307 = vst [vmem:[%s2319_s29 + $0x80] sm:$0xff] %v306_v16  ;;  %309 = vst [vmem:[%s2319_s29 + $0x88] sm:$0xff] %v308_v17  ;;  %v312_v19 = vld [vmem:[%s2314_s28 + $0x1c8] sm:$0xff]  ;;  %v314_v20 = vld [vmem:[%s2314_s28 + $0x1e0] sm:$0xff] }
  0x1f   : > { %311 = vst [vmem:[%s2319_s29 + $0x90] sm:$0xff] %v310_v18  ;;  %313 = vst [vmem:[%s2319_s29 + $0x98] sm:$0xff] %v312_v19  ;;  %v316_v21 = vld [vmem:[%s2314_s28 + $0x1f8] sm:$0xff]  ;;  %v318_v22 = vld [vmem:[%s2314_s28 + $0x210] sm:$0xff] }
  0x20   : > { %315 = vst [vmem:[%s2319_s29 + $0xa0] sm:$0xff] %v314_v20  ;;  %v320_v23 = vld [vmem:[%s2314_s28 + $0x228] sm:$0xff]  ;;  %317 = vst [vmem:[%s2319_s29 + $0xa8] sm:$0xff] %v316_v21  ;;  %v322_v24 = vld [vmem:[%s2314_s28 + $0x240] sm:$0xff] }
  0x21   : > { %319 = vst [vmem:[%s2319_s29 + $0xb0] sm:$0xff] %v318_v22  ;;  %321 = vst [vmem:[%s2319_s29 + $0xb8] sm:$0xff] %v320_v23  ;;  %v324_v25 = vld [vmem:[%s2314_s28 + $0x258] sm:$0xff]  ;;  %v326_v26 = vld [vmem:[%s2314_s28 + $0x270] sm:$0xff] }
  0x22   : > { %323 = vst [vmem:[%s2319_s29 + $0xc0] sm:$0xff] %v322_v24  ;;  %325 = vst [vmem:[%s2319_s29 + $0xc8] sm:$0xff] %v324_v25  ;;  %v328_v27 = vld [vmem:[%s2314_s28 + $0x288] sm:$0xff]  ;;  %v330_v28 = vld [vmem:[%s2314_s28 + $0x2a0] sm:$0xff] }
  0x23   : > { %327 = vst [vmem:[%s2319_s29 + $0xd0] sm:$0xff] %v326_v26  ;;  %v332_v29 = vld [vmem:[%s2314_s28 + $0x2b8] sm:$0xff]  ;;  %329 = vst [vmem:[%s2319_s29 + $0xd8] sm:$0xff] %v328_v27  ;;  %v334_v30 = vld [vmem:[%s2314_s28 + $0x2d0] sm:$0xff] }
  0x24   : > { %331 = vst [vmem:[%s2319_s29 + $0xe0] sm:$0xff] %v330_v28  ;;  %333 = vst [vmem:[%s2319_s29 + $0xe8] sm:$0xff] %v332_v29  ;;  %v336_v31 = vld [vmem:[%s2314_s28 + $0x2e8] sm:$0xff] }
  0x25   : > { %335 = vst [vmem:[%s2319_s29 + $0xf0] sm:$0xff] %v334_v30  ;;  %337 = vst [vmem:[%s2319_s29 + $0xf8] sm:$0xff] %v336_v31 }
  0x26 PF: > { %p1899_p8 = scmp.ge.s32.totalorder %s2244_s16, 1  ;;  %p350_p9 = scmp.lt.s32.totalorder %s2244_s16, 4 }
  0x28   : > { %p351_p10 = pnand %p1899_p8, %p350_p9 }
  0x29   : > { %s357_s30 = sand.u32 (!%p351_p10), 1, %s2228_s12   ;;  %v2160_v32 = vld [vmem:[%s2712_s0 + $0x4] ss:$8 sps:$4 sm:$0xff] (!%p351_p10)   ;;  %v2158_v2 = vld [vmem:[%s2712_s0] ss:$8 sps:$4 sm:$0xff] (!%p351_p10)   ;;  %s1902_s18 = sshll.u32 (!%p351_p10), %s2236_s14, 1 }
  0x2a   : > { %354 = sbr.rel (%p351_p10) target bundleno = 394 (0x18a), region = 66  ;;  %s2385_s4 = sshll.u32 (!%p351_p10), %s357_s30, 8  ;;  %v2163_v33 = vld [vmem:[%s2712_s0 + $0x84] ss:$8 sps:$4 sm:$0xff] (!%p351_p10)   ;;  %962 = vmatprep.mubr.bf16.mxu0 (!%p351_p10), %v2160_v32  ;;  %v2161_v3 = vld [vmem:[%s2712_s0 + $0x80] ss:$8 sps:$4 sm:$0xff] (!%p351_p10)   ;;  %v1320_v32 = vlaneseq (!%p351_p10) }
  0x2b   : > { %s2394_s9 = scalar_lea.vmem (!%p351_p10), [#allocation3], %s2385_s4  ;;  %1042 = vmatprep.mubr.bf16.mxu1 (!%p351_p10), %v2163_v33  ;;  %v2164_v4 = vld [vmem:[%s2712_s0 + $0x14] ss:$8 sps:$4 sm:$0xff] (!%p351_p10)   ;;  %v2168_v6 = vld [vmem:[%s2712_s0 + $0x10] ss:$8 sps:$4 sm:$0xff] (!%p351_p10)   ;;  %p408_p11 = scmp.lt.s32.totalorder (!%p351_p10), %s1902_s18, 5 }
  0x2c   : > { %v2110_v34 = vld [vmem:[%s2394_s9 + $0x4] ss:$8 sps:$4 sm:$0xff] (!%p351_p10)   ;;  %v2112_v35 = vld [vmem:[%s2394_s9] ss:$8 sps:$4 sm:$0xff] (!%p351_p10)   ;;  %v2113_v36 = vld [vmem:[%s2394_s9 + $0x14] ss:$8 sps:$4 sm:$0xff] (!%p351_p10)  }
  0x2d   : > { %930 = vmatprep.subr.bf16.mxu0 (!%p351_p10), %v2110_v34  ;;  %2038 = vmatprep.subr.bf16.mxu1 (!%p351_p10), %v2110_v34  ;;  %v2115_v37 = vld [vmem:[%s2394_s9 + $0x10] ss:$8 sps:$4 sm:$0xff] (!%p351_p10)   ;;  %v2116_v38 = vld [vmem:[%s2394_s9 + $0x24] ss:$8 sps:$4 sm:$0xff] (!%p351_p10)   ;;  %v2118_v39 = vld [vmem:[%s2394_s9 + $0x20] ss:$8 sps:$4 sm:$0xff] (!%p351_p10)  }
  0x2e   : > { %931 = vmatpush1.bf16.msra.mxu0 (!%p351_p10), %v2112_v35  ;;  %2054 = vmatpush1.bf16.msra.mxu1 (!%p351_p10), %v2112_v35  ;;  %v2119_v40 = vld [vmem:[%s2394_s9 + $0x34] ss:$8 sps:$4 sm:$0xff] (!%p351_p10)   ;;  %v2121_v41 = vld [vmem:[%s2394_s9 + $0x30] ss:$8 sps:$4 sm:$0xff] (!%p351_p10)   ;;  %v2122_v42 = vld [vmem:[%s2394_s9 + $0x44] ss:$8 sps:$4 sm:$0xff] (!%p351_p10)  }
  0x2f   : > { %932 = vmatprep.subr.bf16.mxu0 (!%p351_p10), %v2113_v36  ;;  %2039 = vmatprep.subr.bf16.mxu1 (!%p351_p10), %v2113_v36  ;;  %v2124_v43 = vld [vmem:[%s2394_s9 + $0x40] ss:$8 sps:$4 sm:$0xff] (!%p351_p10)   ;;  %v2125_v44 = vld [vmem:[%s2394_s9 + $0x54] ss:$8 sps:$4 sm:$0xff] (!%p351_p10)   ;;  %v2127_v45 = vld [vmem:[%s2394_s9 + $0x50] ss:$8 sps:$4 sm:$0xff] (!%p351_p10)  }
  0x30   : > { %v2128_v46 = vld [vmem:[%s2394_s9 + $0x64] ss:$8 sps:$4 sm:$0xff] (!%p351_p10)   ;;  %v2130_v47 = vld [vmem:[%s2394_s9 + $0x60] ss:$8 sps:$4 sm:$0xff] (!%p351_p10)   ;;  %v2131_v48 = vld [vmem:[%s2394_s9 + $0x74] ss:$8 sps:$4 sm:$0xff] (!%p351_p10)  }
  0x31   : > { %v2133_v49 = vld [vmem:[%s2394_s9 + $0x70] ss:$8 sps:$4 sm:$0xff]   ;;  %v2134_v50 = vld [vmem:[%s2394_s9 + $0x84] ss:$8 sps:$4 sm:$0xff]   ;;  %v2136_v51 = vld [vmem:[%s2394_s9 + $0x80] ss:$8 sps:$4 sm:$0xff]  }
  0x32   : > { %933 = vmatpush1.bf16.msra.mxu0 %v2115_v37  ;;  %2055 = vmatpush1.bf16.msra.mxu1 %v2115_v37  ;;  %v2137_v52 = vld [vmem:[%s2394_s9 + $0x94] ss:$8 sps:$4 sm:$0xff]   ;;  %v2139_v53 = vld [vmem:[%s2394_s9 + $0x90] ss:$8 sps:$4 sm:$0xff]   ;;  %v2140_v54 = vld [vmem:[%s2394_s9 + $0xa4] ss:$8 sps:$4 sm:$0xff]  }
  0x33   : > { %934 = vmatprep.subr.bf16.mxu0 %v2116_v38  ;;  %2040 = vmatprep.subr.bf16.mxu1 %v2116_v38  ;;  %v2142_v55 = vld [vmem:[%s2394_s9 + $0xa0] ss:$8 sps:$4 sm:$0xff]   ;;  %v2143_v56 = vld [vmem:[%s2394_s9 + $0xb4] ss:$8 sps:$4 sm:$0xff]   ;;  %v2145_v57 = vld [vmem:[%s2394_s9 + $0xb0] ss:$8 sps:$4 sm:$0xff]  }
  0x34   : > { %v2146_v58 = vld [vmem:[%s2394_s9 + $0xc4] ss:$8 sps:$4 sm:$0xff]   ;;  %v2148_v59 = vld [vmem:[%s2394_s9 + $0xc0] ss:$8 sps:$4 sm:$0xff]   ;;  %v2149_v60 = vld [vmem:[%s2394_s9 + $0xd4] ss:$8 sps:$4 sm:$0xff]  }
  0x35   : > { %v2151_v61 = vld [vmem:[%s2394_s9 + $0xd0] ss:$8 sps:$4 sm:$0xff]   ;;  %v2152_v62 = vld [vmem:[%s2394_s9 + $0xe4] ss:$8 sps:$4 sm:$0xff]   ;;  %v2154_v63 = vld [vmem:[%s2394_s9 + $0xe0] ss:$8 sps:$4 sm:$0xff]  }
  0x36   : > { %935 = vmatpush1.bf16.msra.mxu0 %v2118_v39  ;;  %2056 = vmatpush1.bf16.msra.mxu1 %v2118_v39  ;;  %v2155_v0 = vld [vmem:[%s2394_s9 + $0xf4] ss:$8 sps:$4 sm:$0xff]   ;;  %v2157_v1 = vld [vmem:[%s2394_s9 + $0xf0] ss:$8 sps:$4 sm:$0xff]   ;;  %v2170_v8 = vld [vmem:[%s2712_s0 + $0x24] ss:$8 sps:$4 sm:$0xff]  }
  0x37   : > { %936 = vmatprep.subr.bf16.mxu0 %v2119_v40  ;;  %2041 = vmatprep.subr.bf16.mxu1 %v2119_v40  ;;  %v2166_v5 = vld [vmem:[%s2712_s0 + $0x94] ss:$8 sps:$4 sm:$0xff]   ;;  %v2169_v7 = vld [vmem:[%s2712_s0 + $0x90] ss:$8 sps:$4 sm:$0xff]   ;;  %v2172_v9 = vld [vmem:[%s2712_s0 + $0xa4] ss:$8 sps:$4 sm:$0xff]  }
  0x38   : > { %v2174_v10 = vld [vmem:[%s2712_s0 + $0x20] ss:$8 sps:$4 sm:$0xff]   ;;  %v2176_v12 = vld [vmem:[%s2712_s0 + $0x34] ss:$8 sps:$4 sm:$0xff]   ;;  %v2180_v14 = vld [vmem:[%s2712_s0 + $0x30] ss:$8 sps:$4 sm:$0xff]  }
  0x39   : > { %v2175_v11 = vld [vmem:[%s2712_s0 + $0xa0] ss:$8 sps:$4 sm:$0xff]   ;;  %v2178_v13 = vld [vmem:[%s2712_s0 + $0xb4] ss:$8 sps:$4 sm:$0xff]   ;;  %v2181_v15 = vld [vmem:[%s2712_s0 + $0xb0] ss:$8 sps:$4 sm:$0xff]  }
  0x3a   : > { %937 = vmatpush1.bf16.msra.mxu0 %v2121_v41  ;;  %2057 = vmatpush1.bf16.msra.mxu1 %v2121_v41  ;;  %v2182_v16 = vld [vmem:[%s2712_s0 + $0x44] ss:$8 sps:$4 sm:$0xff]   ;;  %v2186_v18 = vld [vmem:[%s2712_s0 + $0x40] ss:$8 sps:$4 sm:$0xff]   ;;  %v2188_v20 = vld [vmem:[%s2712_s0 + $0x54] ss:$8 sps:$4 sm:$0xff]  }
  0x3b   : > { %938 = vmatprep.subr.bf16.mxu0 %v2122_v42  ;;  %2042 = vmatprep.subr.bf16.mxu1 %v2122_v42  ;;  %v2184_v17 = vld [vmem:[%s2712_s0 + $0xc4] ss:$8 sps:$4 sm:$0xff]   ;;  %v2187_v19 = vld [vmem:[%s2712_s0 + $0xc0] ss:$8 sps:$4 sm:$0xff]   ;;  %v2190_v21 = vld [vmem:[%s2712_s0 + $0xd4] ss:$8 sps:$4 sm:$0xff]  }
  0x3c   : > { %v2192_v22 = vld [vmem:[%s2712_s0 + $0x50] ss:$8 sps:$4 sm:$0xff]   ;;  %v2194_v24 = vld [vmem:[%s2712_s0 + $0x64] ss:$8 sps:$4 sm:$0xff]   ;;  %v2198_v26 = vld [vmem:[%s2712_s0 + $0x60] ss:$8 sps:$4 sm:$0xff]  }
  0x3d   : > { %v2193_v23 = vld [vmem:[%s2712_s0 + $0xd0] ss:$8 sps:$4 sm:$0xff]   ;;  %v2196_v25 = vld [vmem:[%s2712_s0 + $0xe4] ss:$8 sps:$4 sm:$0xff]   ;;  %v2199_v27 = vld [vmem:[%s2712_s0 + $0xe0] ss:$8 sps:$4 sm:$0xff]  }
  0x3e   : > { %939 = vmatpush1.bf16.msra.mxu0 %v2124_v43  ;;  %2058 = vmatpush1.bf16.msra.mxu1 %v2124_v43  ;;  %v2200_v28 = vld [vmem:[%s2712_s0 + $0x74] ss:$8 sps:$4 sm:$0xff]   ;;  %v2204_v30 = vld [vmem:[%s2712_s0 + $0x70] ss:$8 sps:$4 sm:$0xff]   ;;  %s2724_s18 = smov (!%p408_p11, %s1902_s18), 5  ;;  %v1321_v33 = vshrl.u32 %v1320_v32, 7 }
  0x3f   : > { %940 = vmatprep.subr.bf16.mxu0 %v2125_v44  ;;  %2043 = vmatprep.subr.bf16.mxu1 %v2125_v44  ;;  %v2202_v29 = vld [vmem:[%s2712_s0 + $0xf4] ss:$8 sps:$4 sm:$0xff]   ;;  %v2205_v31 = vld [vmem:[%s2712_s0 + $0xf0] ss:$8 sps:$4 sm:$0xff]   ;;  %s410_s23 = scalar_lea.vmem %s2714_s2, %s2724_s18  ;;  %s2535_s24 = scalar_lea.vmem [#allocation4], %s2385_s4 }
  0x40   : > { %v1322_v34 = vsub.s32 0, %v1321_v33  ;;  %v1318_v35 = vld [vmem:[%s410_s23] sm:$0x3]  ;;  %v1326_v36 = vsub.s32 1, %v1321_v33  ;;  %s2037_s4 = sshll.u32 (%p2301_p6), %s2236_s14, 3 }
  0x41   : > { %s2634_s27 = scalar_lea.vmem (%p2301_p6), %s2715_s3, %s2037_s4 }
  0x42   : > { %941 = vmatpush1.bf16.msra.mxu0 %v2127_v45  ;;  %2059 = vmatpush1.bf16.msra.mxu1 %v2127_v45  ;;  %v2522_v37 = vrot.slane %v1318_v35, %v1322_v34  ;;  %v2524_v38 = vrot.slane %v1318_v35, %v1326_v36 }
  0x43   : > { %942 = vmatprep.subr.bf16.mxu0 %v2128_v46  ;;  %2044 = vmatprep.subr.bf16.mxu1 %v2128_v46 }
  0x46   : > { %943 = vmatpush1.bf16.msra.mxu0 %v2130_v47  ;;  %2060 = vmatpush1.bf16.msra.mxu1 %v2130_v47 }
  0x47   : > { %944 = vmatprep.subr.bf16.mxu0 %v2131_v48  ;;  %2045 = vmatprep.subr.bf16.mxu1 %v2131_v48 }
  0x4a   : > { %945 = vmatpush1.bf16.msra.mxu0 %v2133_v49  ;;  %2061 = vmatpush1.bf16.msra.mxu1 %v2133_v49 }
  0x4b   : > { %946 = vmatprep.subr.bf16.mxu0 %v2134_v50  ;;  %2046 = vmatprep.subr.bf16.mxu1 %v2134_v50 }
  0x4e   : > { %947 = vmatpush1.bf16.msra.mxu0 %v2136_v51  ;;  %2062 = vmatpush1.bf16.msra.mxu1 %v2136_v51 }
  0x4f   : > { %948 = vmatprep.subr.bf16.mxu0 %v2137_v52  ;;  %2047 = vmatprep.subr.bf16.mxu1 %v2137_v52 }
  0x52   : > { %949 = vmatpush1.bf16.msra.mxu0 %v2139_v53  ;;  %2063 = vmatpush1.bf16.msra.mxu1 %v2139_v53 }
  0x53   : > { %950 = vmatprep.subr.bf16.mxu0 %v2140_v54  ;;  %2048 = vmatprep.subr.bf16.mxu1 %v2140_v54 }
  0x56   : > { %951 = vmatpush1.bf16.msra.mxu0 %v2142_v55  ;;  %2064 = vmatpush1.bf16.msra.mxu1 %v2142_v55 }
  0x57   : > { %952 = vmatprep.subr.bf16.mxu0 %v2143_v56  ;;  %2049 = vmatprep.subr.bf16.mxu1 %v2143_v56 }
  0x5a   : > { %953 = vmatpush1.bf16.msra.mxu0 %v2145_v57  ;;  %2065 = vmatpush1.bf16.msra.mxu1 %v2145_v57 }
  0x5b   : > { %954 = vmatprep.subr.bf16.mxu0 %v2146_v58  ;;  %2050 = vmatprep.subr.bf16.mxu1 %v2146_v58 }
  0x5e   : > { %955 = vmatpush1.bf16.msra.mxu0 %v2148_v59  ;;  %2066 = vmatpush1.bf16.msra.mxu1 %v2148_v59 }
  0x5f   : > { %956 = vmatprep.subr.bf16.mxu0 %v2149_v60  ;;  %2051 = vmatprep.subr.bf16.mxu1 %v2149_v60 }
  0x62   : > { %957 = vmatpush1.bf16.msra.mxu0 %v2151_v61  ;;  %2067 = vmatpush1.bf16.msra.mxu1 %v2151_v61 }
  0x63   : > { %958 = vmatprep.subr.bf16.mxu0 %v2152_v62  ;;  %2052 = vmatprep.subr.bf16.mxu1 %v2152_v62 }
  0x66   : > { %959 = vmatpush1.bf16.msra.mxu0 %v2154_v63  ;;  %2068 = vmatpush1.bf16.msra.mxu1 %v2154_v63 }
  0x67   : > { %960 = vmatprep.subr.bf16.mxu0 %v2155_v0  ;;  %2053 = vmatprep.subr.bf16.mxu1 %v2155_v0 }
  0x6a   : > { %961 = vmatpush1.bf16.msra.mxu0 %v2157_v1  ;;  %2069 = vmatpush1.bf16.msra.mxu1 %v2157_v1 }
  0x6d   : > { %963 = vmatmul.mubr.bf16.vlgmr.msra.gmra.mrb[0].mxu0 %v2158_v2  ;;  %1043 = vmatmul.mubr.bf16.vlgmr.msra.gmra.mrb[0].mxu1 %v2161_v3 }
  0x6e   : > { %972 = vmatprep.mubr.bf16.mxu0 %v2164_v4  ;;  %1052 = vmatprep.mubr.bf16.mxu1 %v2166_v5 }
  0x75   : > { %973 = vmatmul.mubr.bf16.gmra.mrb[4].mxu0 %v2168_v6  ;;  %1053 = vmatmul.mubr.bf16.gmra.mrb[4].mxu1 %v2169_v7 }
  0x76   : > { %982 = vmatprep.mubr.bf16.mxu0 %v2170_v8  ;;  %1062 = vmatprep.mubr.bf16.mxu1 %v2172_v9 }
  0x7d   : > { %983 = vmatmul.mubr.bf16.gmra.mrb[8].mxu0 %v2174_v10  ;;  %1063 = vmatmul.mubr.bf16.gmra.mrb[8].mxu1 %v2175_v11 }
  0x7e   : > { %992 = vmatprep.mubr.bf16.mxu0 %v2176_v12  ;;  %1072 = vmatprep.mubr.bf16.mxu1 %v2178_v13 }
  0x85   : > { %993 = vmatmul.mubr.bf16.gmra.mrb[12].mxu0 %v2180_v14  ;;  %1073 = vmatmul.mubr.bf16.gmra.mrb[12].mxu1 %v2181_v15 }
  0x86   : > { %1002 = vmatprep.mubr.bf16.mxu0 %v2182_v16  ;;  %1082 = vmatprep.mubr.bf16.mxu1 %v2184_v17 }
  0x8d   : > { %1003 = vmatmul.mubr.bf16.gmra.mrb[16].mxu0 %v2186_v18  ;;  %1083 = vmatmul.mubr.bf16.gmra.mrb[16].mxu1 %v2187_v19 }
  0x8e   : > { %1012 = vmatprep.mubr.bf16.mxu0 %v2188_v20  ;;  %1092 = vmatprep.mubr.bf16.mxu1 %v2190_v21 }
  0x95   : > { %1013 = vmatmul.mubr.bf16.gmra.mrb[20].mxu0 %v2192_v22  ;;  %1093 = vmatmul.mubr.bf16.gmra.mrb[20].mxu1 %v2193_v23 }
  0x96   : > { %1022 = vmatprep.mubr.bf16.mxu0 %v2194_v24  ;;  %1102 = vmatprep.mubr.bf16.mxu1 %v2196_v25 }
  0x9d   : > { %1023 = vmatmul.mubr.bf16.gmra.mrb[24].mxu0 %v2198_v26  ;;  %1103 = vmatmul.mubr.bf16.gmra.mrb[24].mxu1 %v2199_v27 }
  0x9e   : > { %1032 = vmatprep.mubr.bf16.mxu0 %v2200_v28  ;;  %1112 = vmatprep.mubr.bf16.mxu1 %v2202_v29 }
  0xa5   : > { %1033 = vmatmul.mubr.bf16.gmra.mrb[28].mxu0 %v2204_v30  ;;  %1113 = vmatmul.mubr.bf16.gmra.mrb[28].mxu1 %v2205_v31 }
 0x140   : > { %v964_v39 = vpop.f32.mrb[0].mxu0  ;;  %v1044_v40 = vpop.f32.mrb[0].mxu1 }
 0x141   : > { %v1330_v41 = vadd.f32 %v2522_v37, %v964_v39  ;;  %v1362_v42 = vadd.f32 %v2522_v37, %v1044_v40  ;;  %v966_v43 = vpop.f32.mrb[1].mxu0  ;;  %v1046_v44 = vpop.f32.mrb[1].mxu1 }
 0x142   : > { %v1331_v45 = vadd.f32 %v2524_v38, %v966_v43  ;;  %v1363_v46 = vadd.f32 %v2524_v38, %v1046_v44  ;;  %v968_v47 = vpop.f32.mrb[2].mxu0  ;;  %v1048_v48 = vpop.f32.mrb[2].mxu1 }
 0x143   : > { %v1332_v49 = vadd.f32 %v2522_v37, %v968_v47  ;;  %v1364_v50 = vadd.f32 %v2522_v37, %v1048_v48  ;;  %v970_v51 = vpop.f32.mrb[3].mxu0  ;;  %v1050_v52 = vpop.f32.mrb[3].mxu1 }
 0x144   : > { %v2005_v53 = vpack.c.bf16 %v1331_v45, %v1330_v41  ;;  %v2021_v54 = vpack.c.bf16 %v1363_v46, %v1362_v42  ;;  %v1333_v55 = vadd.f32 %v2524_v38, %v970_v51  ;;  %v1365_v56 = vadd.f32 %v2524_v38, %v1050_v52 }
 0x146   : > { %1586 = vst [vmem:[%s2535_s24] sm:$0xff] %v2005_v53  ;;  %1602 = vst [vmem:[%s2535_s24 + $0x80] sm:$0xff] %v2021_v54  ;;  %v2006_v57 = vpack.c.bf16 %v1333_v55, %v1332_v49  ;;  %v2022_v58 = vpack.c.bf16 %v1365_v56, %v1364_v50 }
 0x148   : > { %1587 = vst [vmem:[%s2535_s24 + $0x8] sm:$0xff] %v2006_v57  ;;  %1603 = vst [vmem:[%s2535_s24 + $0x88] sm:$0xff] %v2022_v58  ;;  %v974_v59 = vpop.f32.mrb[4].mxu0  ;;  %v1054_v60 = vpop.f32.mrb[4].mxu1 }
 0x149   : > { %v1334_v61 = vadd.f32 %v2522_v37, %v974_v59  ;;  %v1366_v62 = vadd.f32 %v2522_v37, %v1054_v60  ;;  %v976_v63 = vpop.f32.mrb[5].mxu0  ;;  %v1056_v0 = vpop.f32.mrb[5].mxu1 }
 0x14a   : > { %v1335_v1 = vadd.f32 %v2524_v38, %v976_v63  ;;  %v1367_v2 = vadd.f32 %v2524_v38, %v1056_v0  ;;  %v978_v3 = vpop.f32.mrb[6].mxu0  ;;  %v1058_v4 = vpop.f32.mrb[6].mxu1 }
 0x14b   : > { %v1336_v5 = vadd.f32 %v2522_v37, %v978_v3  ;;  %v1368_v6 = vadd.f32 %v2522_v37, %v1058_v4  ;;  %v980_v7 = vpop.f32.mrb[7].mxu0  ;;  %v1060_v8 = vpop.f32.mrb[7].mxu1 }
 0x14c   : > { %v2007_v9 = vpack.c.bf16 %v1335_v1, %v1334_v61  ;;  %v2023_v10 = vpack.c.bf16 %v1367_v2, %v1366_v62  ;;  %v1337_v11 = vadd.f32 %v2524_v38, %v980_v7  ;;  %v1369_v12 = vadd.f32 %v2524_v38, %v1060_v8 }
 0x14e   : > { %1588 = vst [vmem:[%s2535_s24 + $0x10] sm:$0xff] %v2007_v9  ;;  %1604 = vst [vmem:[%s2535_s24 + $0x90] sm:$0xff] %v2023_v10  ;;  %v2008_v13 = vpack.c.bf16 %v1337_v11, %v1336_v5  ;;  %v2024_v14 = vpack.c.bf16 %v1369_v12, %v1368_v6 }
 0x150   : > { %1589 = vst [vmem:[%s2535_s24 + $0x18] sm:$0xff] %v2008_v13  ;;  %1605 = vst [vmem:[%s2535_s24 + $0x98] sm:$0xff] %v2024_v14  ;;  %v984_v15 = vpop.f32.mrb[8].mxu0  ;;  %v1064_v16 = vpop.f32.mrb[8].mxu1 }
 0x151   : > { %v1338_v17 = vadd.f32 %v2522_v37, %v984_v15  ;;  %v1370_v18 = vadd.f32 %v2522_v37, %v1064_v16  ;;  %v986_v19 = vpop.f32.mrb[9].mxu0  ;;  %v1066_v20 = vpop.f32.mrb[9].mxu1 }
 0x152   : > { %v1339_v21 = vadd.f32 %v2524_v38, %v986_v19  ;;  %v1371_v22 = vadd.f32 %v2524_v38, %v1066_v20  ;;  %v988_v23 = vpop.f32.mrb[10].mxu0  ;;  %v1068_v24 = vpop.f32.mrb[10].mxu1 }
 0x153   : > { %v1340_v25 = vadd.f32 %v2522_v37, %v988_v23  ;;  %v1372_v26 = vadd.f32 %v2522_v37, %v1068_v24  ;;  %v990_v27 = vpop.f32.mrb[11].mxu0  ;;  %v1070_v28 = vpop.f32.mrb[11].mxu1 }
 0x154   : > { %v2009_v29 = vpack.c.bf16 %v1339_v21, %v1338_v17  ;;  %v2025_v30 = vpack.c.bf16 %v1371_v22, %v1370_v18  ;;  %v1341_v31 = vadd.f32 %v2524_v38, %v990_v27  ;;  %v1373_v32 = vadd.f32 %v2524_v38, %v1070_v28 }
 0x156   : > { %1590 = vst [vmem:[%s2535_s24 + $0x20] sm:$0xff] %v2009_v29  ;;  %1606 = vst [vmem:[%s2535_s24 + $0xa0] sm:$0xff] %v2025_v30  ;;  %v2010_v33 = vpack.c.bf16 %v1341_v31, %v1340_v25  ;;  %v2026_v34 = vpack.c.bf16 %v1373_v32, %v1372_v26 }
 0x158   : > { %1591 = vst [vmem:[%s2535_s24 + $0x28] sm:$0xff] %v2010_v33  ;;  %1607 = vst [vmem:[%s2535_s24 + $0xa8] sm:$0xff] %v2026_v34  ;;  %v994_v35 = vpop.f32.mrb[12].mxu0  ;;  %v1074_v36 = vpop.f32.mrb[12].mxu1 }
 0x159   : > { %v1342_v39 = vadd.f32 %v2522_v37, %v994_v35  ;;  %v1374_v40 = vadd.f32 %v2522_v37, %v1074_v36  ;;  %v996_v41 = vpop.f32.mrb[13].mxu0  ;;  %v1076_v42 = vpop.f32.mrb[13].mxu1 }
 0x15a   : > { %v1343_v43 = vadd.f32 %v2524_v38, %v996_v41  ;;  %v1375_v44 = vadd.f32 %v2524_v38, %v1076_v42  ;;  %v998_v45 = vpop.f32.mrb[14].mxu0  ;;  %v1078_v46 = vpop.f32.mrb[14].mxu1 }
 0x15b   : > { %v1344_v47 = vadd.f32 %v2522_v37, %v998_v45  ;;  %v1376_v48 = vadd.f32 %v2522_v37, %v1078_v46  ;;  %v1000_v49 = vpop.f32.mrb[15].mxu0  ;;  %v1080_v50 = vpop.f32.mrb[15].mxu1 }
 0x15c   : > { %v2011_v51 = vpack.c.bf16 %v1343_v43, %v1342_v39  ;;  %v2027_v52 = vpack.c.bf16 %v1375_v44, %v1374_v40  ;;  %v1345_v53 = vadd.f32 %v2524_v38, %v1000_v49  ;;  %v1377_v54 = vadd.f32 %v2524_v38, %v1080_v50 }
 0x15e   : > { %1592 = vst [vmem:[%s2535_s24 + $0x30] sm:$0xff] %v2011_v51  ;;  %1608 = vst [vmem:[%s2535_s24 + $0xb0] sm:$0xff] %v2027_v52  ;;  %v2012_v55 = vpack.c.bf16 %v1345_v53, %v1344_v47  ;;  %v2028_v56 = vpack.c.bf16 %v1377_v54, %v1376_v48 }
 0x160   : > { %1593 = vst [vmem:[%s2535_s24 + $0x38] sm:$0xff] %v2012_v55  ;;  %1609 = vst [vmem:[%s2535_s24 + $0xb8] sm:$0xff] %v2028_v56  ;;  %v1004_v57 = vpop.f32.mrb[16].mxu0  ;;  %v1084_v58 = vpop.f32.mrb[16].mxu1 }
 0x161   : > { %v1346_v59 = vadd.f32 %v2522_v37, %v1004_v57  ;;  %v1378_v60 = vadd.f32 %v2522_v37, %v1084_v58  ;;  %v1006_v61 = vpop.f32.mrb[17].mxu0  ;;  %v1086_v62 = vpop.f32.mrb[17].mxu1 }
 0x162   : > { %v1347_v63 = vadd.f32 %v2524_v38, %v1006_v61  ;;  %v1379_v0 = vadd.f32 %v2524_v38, %v1086_v62  ;;  %v1008_v1 = vpop.f32.mrb[18].mxu0  ;;  %v1088_v2 = vpop.f32.mrb[18].mxu1 }
 0x163   : > { %v1348_v3 = vadd.f32 %v2522_v37, %v1008_v1  ;;  %v1380_v4 = vadd.f32 %v2522_v37, %v1088_v2  ;;  %v1010_v5 = vpop.f32.mrb[19].mxu0  ;;  %v1090_v6 = vpop.f32.mrb[19].mxu1 }
 0x164   : > { %v2013_v7 = vpack.c.bf16 %v1347_v63, %v1346_v59  ;;  %v2029_v8 = vpack.c.bf16 %v1379_v0, %v1378_v60  ;;  %v1349_v9 = vadd.f32 %v2524_v38, %v1010_v5  ;;  %v1381_v10 = vadd.f32 %v2524_v38, %v1090_v6 }
 0x166   : > { %1594 = vst [vmem:[%s2535_s24 + $0x40] sm:$0xff] %v2013_v7  ;;  %1610 = vst [vmem:[%s2535_s24 + $0xc0] sm:$0xff] %v2029_v8  ;;  %v2014_v11 = vpack.c.bf16 %v1349_v9, %v1348_v3  ;;  %v2030_v12 = vpack.c.bf16 %v1381_v10, %v1380_v4 }
 0x168   : > { %1595 = vst [vmem:[%s2535_s24 + $0x48] sm:$0xff] %v2014_v11  ;;  %1611 = vst [vmem:[%s2535_s24 + $0xc8] sm:$0xff] %v2030_v12  ;;  %v1014_v13 = vpop.f32.mrb[20].mxu0  ;;  %v1094_v14 = vpop.f32.mrb[20].mxu1  ;;  %v1724_v11 = vld [vmem:[%s2535_s24 + $0x10] sm:$0xff] (%p2301_p6)  ;;  %v1726_v12 = vld [vmem:[%s2535_s24 + $0x18] sm:$0xff] (%p2301_p6) }
 0x169   : > { %v1350_v15 = vadd.f32 %v2522_v37, %v1014_v13  ;;  %v1382_v16 = vadd.f32 %v2522_v37, %v1094_v14  ;;  %v1016_v17 = vpop.f32.mrb[21].mxu0  ;;  %v1096_v18 = vpop.f32.mrb[21].mxu1  ;;  %v1728_v13 = vld [vmem:[%s2535_s24 + $0x20] sm:$0xff] (%p2301_p6)  ;;  %v1730_v14 = vld [vmem:[%s2535_s24 + $0x28] sm:$0xff] (%p2301_p6)  ;;  %1725 = vst [vmem:[%s2634_s27 + $0x30] sm:$0xff] (%p2301_p6), %v1724_v11  ;;  %1727 = vst [vmem:[%s2634_s27 + $0x48] sm:$0xff] (%p2301_p6), %v1726_v12 }
 0x16a   : > { %v1351_v19 = vadd.f32 %v2524_v38, %v1016_v17  ;;  %v1383_v20 = vadd.f32 %v2524_v38, %v1096_v18  ;;  %v1018_v21 = vpop.f32.mrb[22].mxu0  ;;  %v1098_v22 = vpop.f32.mrb[22].mxu1  ;;  %1729 = vst [vmem:[%s2634_s27 + $0x60] sm:$0xff] (%p2301_p6), %v1728_v13  ;;  %1731 = vst [vmem:[%s2634_s27 + $0x78] sm:$0xff] (%p2301_p6), %v1730_v14 }
 0x16b   : > { %v1352_v23 = vadd.f32 %v2522_v37, %v1018_v21  ;;  %v1384_v24 = vadd.f32 %v2522_v37, %v1098_v22  ;;  %v1020_v25 = vpop.f32.mrb[23].mxu0  ;;  %v1100_v26 = vpop.f32.mrb[23].mxu1 }
 0x16c   : > { %v2015_v27 = vpack.c.bf16 %v1351_v19, %v1350_v15  ;;  %v2031_v28 = vpack.c.bf16 %v1383_v20, %v1382_v16  ;;  %v1353_v29 = vadd.f32 %v2524_v38, %v1020_v25  ;;  %v1385_v30 = vadd.f32 %v2524_v38, %v1100_v26  ;;  %v1732_v15 = vld [vmem:[%s2535_s24 + $0x30] sm:$0xff] (%p2301_p6)  ;;  %v1734_v16 = vld [vmem:[%s2535_s24 + $0x38] sm:$0xff] (%p2301_p6)  ;;  %v1752_v25 = vld [vmem:[%s2535_s24 + $0x80] sm:$0xff] (%p2301_p6) }
 0x16d   : > { %v1736_v17 = vld [vmem:[%s2535_s24 + $0x40] sm:$0xff] (%p2301_p6)  ;;  %1733 = vst [vmem:[%s2634_s27 + $0x90] sm:$0xff] (%p2301_p6), %v1732_v15  ;;  %1735 = vst [vmem:[%s2634_s27 + $0xa8] sm:$0xff] (%p2301_p6), %v1734_v16  ;;  %v1754_v26 = vld [vmem:[%s2535_s24 + $0x88] sm:$0xff] (%p2301_p6) }
 0x16e   : > { %1596 = vst [vmem:[%s2535_s24 + $0x50] sm:$0xff] %v2015_v27  ;;  %1612 = vst [vmem:[%s2535_s24 + $0xd0] sm:$0xff] %v2031_v28  ;;  %v2016_v31 = vpack.c.bf16 %v1353_v29, %v1352_v23  ;;  %v2032_v32 = vpack.c.bf16 %v1385_v30, %v1384_v24  ;;  %v1756_v27 = vld [vmem:[%s2535_s24 + $0x90] sm:$0xff] (%p2301_p6)  ;;  %v1758_v28 = vld [vmem:[%s2535_s24 + $0x98] sm:$0xff] (%p2301_p6) }
 0x16f   : > { %1737 = vst [vmem:[%s2634_s27 + $0xc0] sm:$0xff] (%p2301_p6), %v1736_v17  ;;  %v1738_v18 = vld [vmem:[%s2535_s24 + $0x48] sm:$0xff] (%p2301_p6)  ;;  %1753 = vst [vmem:[%s2634_s27 + $0x180] sm:$0xff] (%p2301_p6), %v1752_v25  ;;  %v1760_v29 = vld [vmem:[%s2535_s24 + $0xa0] sm:$0xff] (%p2301_p6) }
 0x170   : > { %1597 = vst [vmem:[%s2535_s24 + $0x58] sm:$0xff] %v2016_v31  ;;  %1613 = vst [vmem:[%s2535_s24 + $0xd8] sm:$0xff] %v2032_v32  ;;  %v1024_v33 = vpop.f32.mrb[24].mxu0  ;;  %v1104_v34 = vpop.f32.mrb[24].mxu1  ;;  %v1762_v30 = vld [vmem:[%s2535_s24 + $0xa8] sm:$0xff] (%p2301_p6)  ;;  %v1764_v31 = vld [vmem:[%s2535_s24 + $0xb0] sm:$0xff] (%p2301_p6) }
 0x171   : > { %v1354_v35 = vadd.f32 %v2522_v37, %v1024_v33  ;;  %v1386_v36 = vadd.f32 %v2522_v37, %v1104_v34  ;;  %v1026_v39 = vpop.f32.mrb[25].mxu0  ;;  %v1106_v40 = vpop.f32.mrb[25].mxu1  ;;  %1739 = vst [vmem:[%s2634_s27 + $0xd8] sm:$0xff] (%p2301_p6), %v1738_v18  ;;  %1755 = vst [vmem:[%s2634_s27 + $0x198] sm:$0xff] (%p2301_p6), %v1754_v26  ;;  %v1766_v32 = vld [vmem:[%s2535_s24 + $0xb8] sm:$0xff] (%p2301_p6)  ;;  %v1768_v33 = vld [vmem:[%s2535_s24 + $0xc0] sm:$0xff] (%p2301_p6) }
 0x172   : > { %v1355_v41 = vadd.f32 %v2524_v38, %v1026_v39  ;;  %v1387_v42 = vadd.f32 %v2524_v38, %v1106_v40  ;;  %v1028_v43 = vpop.f32.mrb[26].mxu0  ;;  %v1108_v44 = vpop.f32.mrb[26].mxu1  ;;  %1757 = vst [vmem:[%s2634_s27 + $0x1b0] sm:$0xff] (%p2301_p6), %v1756_v27  ;;  %1759 = vst [vmem:[%s2634_s27 + $0x1c8] sm:$0xff] (%p2301_p6), %v1758_v28  ;;  %v1770_v34 = vld [vmem:[%s2535_s24 + $0xc8] sm:$0xff] (%p2301_p6) }
 0x173   : > { %v1356_v45 = vadd.f32 %v2522_v37, %v1028_v43  ;;  %v1388_v46 = vadd.f32 %v2522_v37, %v1108_v44  ;;  %v1030_v47 = vpop.f32.mrb[27].mxu0  ;;  %v1110_v48 = vpop.f32.mrb[27].mxu1  ;;  %1761 = vst [vmem:[%s2634_s27 + $0x1e0] sm:$0xff] (%p2301_p6), %v1760_v29  ;;  %1763 = vst [vmem:[%s2634_s27 + $0x1f8] sm:$0xff] (%p2301_p6), %v1762_v30 }
 0x174   : > { %v2017_v49 = vpack.c.bf16 %v1355_v41, %v1354_v35  ;;  %v2033_v50 = vpack.c.bf16 %v1387_v42, %v1386_v36  ;;  %v1357_v51 = vadd.f32 %v2524_v38, %v1030_v47  ;;  %v1389_v52 = vadd.f32 %v2524_v38, %v1110_v48  ;;  %1765 = vst [vmem:[%s2634_s27 + $0x210] sm:$0xff] (%p2301_p6), %v1764_v31 }
 0x175   : > { %v1740_v19 = vld [vmem:[%s2535_s24 + $0x50] sm:$0xff] (%p2301_p6)  ;;  %1767 = vst [vmem:[%s2634_s27 + $0x228] sm:$0xff] (%p2301_p6), %v1766_v32  ;;  %1769 = vst [vmem:[%s2634_s27 + $0x240] sm:$0xff] (%p2301_p6), %v1768_v33 }
 0x176   : > { %1598 = vst [vmem:[%s2535_s24 + $0x60] sm:$0xff] %v2017_v49  ;;  %1614 = vst [vmem:[%s2535_s24 + $0xe0] sm:$0xff] %v2033_v50  ;;  %v2018_v53 = vpack.c.bf16 %v1357_v51, %v1356_v45  ;;  %v2034_v54 = vpack.c.bf16 %v1389_v52, %v1388_v46  ;;  %v1772_v35 = vld [vmem:[%s2535_s24 + $0xd0] sm:$0xff] (%p2301_p6) }
 0x177   : > { %v1742_v20 = vld [vmem:[%s2535_s24 + $0x58] sm:$0xff] (%p2301_p6)  ;;  %1741 = vst [vmem:[%s2634_s27 + $0xf0] sm:$0xff] (%p2301_p6), %v1740_v19  ;;  %1771 = vst [vmem:[%s2634_s27 + $0x258] sm:$0xff] (%p2301_p6), %v1770_v34 }
 0x178   : > { %1599 = vst [vmem:[%s2535_s24 + $0x68] sm:$0xff] %v2018_v53  ;;  %1615 = vst [vmem:[%s2535_s24 + $0xe8] sm:$0xff] %v2034_v54  ;;  %v1034_v55 = vpop.f32.mrb[28].mxu0  ;;  %v1114_v56 = vpop.f32.mrb[28].mxu1  ;;  %v1774_v36 = vld [vmem:[%s2535_s24 + $0xd8] sm:$0xff] (%p2301_p6) }
 0x179   : > { %v1358_v57 = vadd.f32 %v2522_v37, %v1034_v55  ;;  %v1390_v58 = vadd.f32 %v2522_v37, %v1114_v56  ;;  %v1036_v59 = vpop.f32.mrb[29].mxu0  ;;  %v1116_v60 = vpop.f32.mrb[29].mxu1  ;;  %1743 = vst [vmem:[%s2634_s27 + $0x108] sm:$0xff] (%p2301_p6), %v1742_v20  ;;  %1773 = vst [vmem:[%s2634_s27 + $0x270] sm:$0xff] (%p2301_p6), %v1772_v35 }
 0x17a   : > { %v1359_v61 = vadd.f32 %v2524_v38, %v1036_v59  ;;  %v1391_v62 = vadd.f32 %v2524_v38, %v1116_v60  ;;  %v1038_v63 = vpop.f32.mrb[30].mxu0  ;;  %v1118_v0 = vpop.f32.mrb[30].mxu1  ;;  %1624 = sbr.rel (!%p2301_p6) target bundleno = 394 (0x18a), region = 82  ;;  %1775 = vst [vmem:[%s2634_s27 + $0x288] sm:$0xff] (%p2301_p6), %v1774_v36 }
 0x17b   : > { %v1360_v1 = vadd.f32 %v2522_v37, %v1038_v63  ;;  %v1392_v2 = vadd.f32 %v2522_v37, %v1118_v0  ;;  %v1040_v3 = vpop.f32.mrb[31].mxu0  ;;  %v1120_v4 = vpop.f32.mrb[31].mxu1  ;;  %v1720_v37 = vld [vmem:[%s2535_s24] sm:$0xff] (%p2301_p6) }
 0x17c   : > { %v2019_v5 = vpack.c.bf16 %v1359_v61, %v1358_v57  ;;  %v2035_v6 = vpack.c.bf16 %v1391_v62, %v1390_v58  ;;  %v1361_v7 = vadd.f32 %v2524_v38, %v1040_v3  ;;  %v1393_v8 = vadd.f32 %v2524_v38, %v1120_v4  ;;  %v1722_v38 = vld [vmem:[%s2535_s24 + $0x8] sm:$0xff] (%p2301_p6)  ;;  %1721 = vst [vmem:[%s2634_s27] sm:$0xff] (%p2301_p6), %v1720_v37 }
 0x17d   : > { %1723 = vst [vmem:[%s2634_s27 + $0x18] sm:$0xff] (%p2301_p6), %v1722_v38  ;;  %v1744_v21 = vld [vmem:[%s2535_s24 + $0x60] sm:$0xff] (%p2301_p6) }
 0x17e   : > { %1600 = vst [vmem:[%s2535_s24 + $0x70] sm:$0xff] %v2019_v5  ;;  %1616 = vst [vmem:[%s2535_s24 + $0xf0] sm:$0xff] %v2035_v6  ;;  %v2020_v9 = vpack.c.bf16 %v1361_v7, %v1360_v1  ;;  %v2036_v10 = vpack.c.bf16 %v1393_v8, %v1392_v2  ;;  %v1776_v39 = vld [vmem:[%s2535_s24 + $0xe0] sm:$0xff] (%p2301_p6) }
 0x17f   : > { %v1746_v22 = vld [vmem:[%s2535_s24 + $0x68] sm:$0xff] (%p2301_p6)  ;;  %1745 = vst [vmem:[%s2634_s27 + $0x120] sm:$0xff] (%p2301_p6), %v1744_v21  ;;  %1777 = vst [vmem:[%s2634_s27 + $0x2a0] sm:$0xff] (%p2301_p6), %v1776_v39 }
 0x180   : > { %1601 = vst [vmem:[%s2535_s24 + $0x78] sm:$0xff] %v2020_v9  ;;  %1617 = vst [vmem:[%s2535_s24 + $0xf8] sm:$0xff] %v2036_v10  ;;  %v1778_v40 = vld [vmem:[%s2535_s24 + $0xe8] sm:$0xff] (%p2301_p6) }
 0x181   : > { %1747 = vst [vmem:[%s2634_s27 + $0x138] sm:$0xff] %v1746_v22  ;;  %1779 = vst [vmem:[%s2634_s27 + $0x2b8] sm:$0xff] %v1778_v40 }
 0x185   : > { %v1748_v23 = vld [vmem:[%s2535_s24 + $0x70] sm:$0xff] }
 0x186   : > { %1749 = vst [vmem:[%s2634_s27 + $0x150] sm:$0xff] %v1748_v23  ;;  %v1780_v41 = vld [vmem:[%s2535_s24 + $0xf0] sm:$0xff] }
 0x187   : > { %v1750_v24 = vld [vmem:[%s2535_s24 + $0x78] sm:$0xff]  ;;  %1781 = vst [vmem:[%s2634_s27 + $0x2d0] sm:$0xff] %v1780_v41 }
 0x188   : > { %1751 = vst [vmem:[%s2634_s27 + $0x168] sm:$0xff] %v1750_v24  ;;  %v1782_v42 = vld [vmem:[%s2535_s24 + $0xf8] sm:$0xff] }
 0x189   : > { %1783 = vst [vmem:[%s2634_s27 + $0x2e8] sm:$0xff] %v1782_v42 }
 0x18a PF: > { %s13_s16 = sadd.s32 1, %s2244_s16   ;;  %s2717_s12 = smov %s2232_s13 }
 0x18b   : > { %p10_p12 = scmp.ge.s32.totalorder %s13_s16, 5   ;;  %s2718_s13 = smov %s2306_s22 }
 0x18c   : > { %s2719_s14 = smov %s2240_s15  ;;  %s2720_s15 = smov %s2722_s17 }
 0x18d   :  { %12 = sbr.rel (!%p10_p12) target bundleno = 3 (0x3), region = 157 }

// kernel: xlm_r_forward.11
= control target key start
LH: loop header
LB: loop body
LE: loop exit
PB: predicated region body
PF: predicated region fallthrough
CT: control target
= control target key end

     0   :  { %s3584_s0 = inlined_call_operand.vmem [shape: bf16[2,128,768], index: 0, kind: input, shape index: {}, may-alias: {0,1,2}]   ;;  %s3585_s1 = inlined_call_operand.vmem [shape: bf16[2,128,768], index: 1, kind: input, shape index: {}, may-alias: {0,1,2}]   ;;  %s3586_s2 = inlined_call_operand.vmem [shape: bf16[2,128,768], index: 2, kind: input, shape index: {}, may-alias: {0,1,2}]   ;;  %s3587_s3 = inlined_call_operand.vmem [shape: f32[2,1,128], index: 3, kind: input, shape index: {}]   ;;  %s3588_s4 = inlined_call_operand.vmem [shape: bf16[2,128,256], index: 4, kind: output, shape index: {}]  }
   0x1   :  { %3590 = sst [smem:[#allocation8_spill]] %s3588_s4 }
   0x2   :  { %s2781_s15 = smov 0   ;;  %s2783_s16 = smov 0  }
   0x3   :  { %s2785_s17 = smov 0   ;;  %s2787_s18 = smov 0  }
   0x4   :  { %s2789_s19 = smov 0   ;;  %s2791_s20 = smov 0  }
   0x5   :  { %s2793_s21 = smov 0   ;;  %s2795_s22 = smov 0  }
   0x6   :  { %s2797_s23 = smov 0   ;;  %s2799_s24 = smov 0  }
   0x7   :  { %s2801_s25 = smov 0  }
   0x8 LB: > { %3591 = sst [smem:[#allocation6_spill]] %s2737_s21  ;;  %s23_s27 = sadd.s32 1, %s2745_s23  ;;  %s2753_s25 = sphi %s2801_s25, %s14_s25   ;;  %s2749_s24 = sphi %s2799_s24, %s3610_s24   ;;  %s2745_s23 = sphi %s2797_s23, %s3609_s23   ;;  %s2741_s22 = sphi %s2795_s22, %s3608_s22   ;;  %s2737_s21 = sphi %s2793_s21, %s3607_s21   ;;  %s2733_s20 = sphi %s2791_s20, %s3606_s20   ;;  %s2729_s19 = sphi %s2789_s19, %s3605_s19   ;;  %s2725_s18 = sphi %s2787_s18, %s3604_s18   ;;  %s2721_s17 = sphi %s2785_s17, %s3603_s17   ;;  %s2717_s16 = sphi %s2783_s16, %s3602_s16   ;;  %s2713_s15 = sphi %s2781_s15, %s3601_s15  }
   0x9   : > { %p24_p0 = scmp.ge.s32.totalorder %s23_s27, 2  ;;  %s26_s28 = sadd.s32 1, %s2749_s24 }
   0xa   : > { %s35_s29 = sadd.s32 1, %s2733_s20  ;;  %p42_p1 = scmp.ne.s32.totalorder %s2733_s20, %s2729_s19 }
   0xb   : > { %s3612_s27 = smov (%p24_p0, %s23_s27), 0  ;;  %s3614_s28 = smov (!%p24_p0, %s26_s28), %s2749_s24 }
   0xc   : > { %s31_s30 = ssub.s32 %s2745_s23, %s3612_s27  ;;  %p43_p2 = scmp.eq.s32.totalorder %s2753_s25, 0 }
   0xd   : > { %p28_p3 = scmp.ge.s32.totalorder %s3614_s28, 2  ;;  %s58_s5 = sadd.s32 2, %s2745_s23 }
   0xe   : > { %p2854_p4 = por %p43_p2, %p42_p1  ;;  %s59_s7 = sadd.s32 2, %s3612_s27 }
   0xf   : > { %s3616_s28 = smov (%p28_p3, %s3614_s28), 0  ;;  %s61_s8 = ssub.s32 %s58_s5, %s59_s7 }
  0x10   : > { %3593 = sst [smem:[#allocation7_spill]] %s3616_s28  ;;  %s65_s9 = sadd.s32 1, %s2725_s18 }
  0x11   : > { %s30_s10 = ssub.s32 %s2749_s24, %s3616_s28  ;;  %p72_p5 = scmp.ne.s32.totalorder %s2725_s18, %s2721_s17 }
  0x12   : > { %s32_s11 = sor.u32 %s31_s30, %s30_s10  ;;  %s62_s12 = sor.u32 %s61_s8, %s30_s10 }
  0x13   : > { %p33_p6 = scmp.eq.s32.totalorder %s32_s11, 0  ;;  %p63_p7 = scmp.eq.s32.totalorder %s62_s12, 0 }
  0x14   : > { %p2868_p8 = por %p72_p5, %p43_p2  ;;  %s88_s14 = sadd.s32 4, %s2745_s23 }
  0x15   : > { %s2874_s26 = scalar_select %p33_p6, %s2733_s20, %s35_s29  }
  0x16   : > { %s2877_s5 = scalar_select %p63_p7, %s2725_s18, %s65_s9  }
  0x17   : > { %s89_s7 = sadd.s32 4, %s3612_s27  ;;  %s95_s28 = sadd.s32 1, %s2717_s16 }
  0x18   : > { %s91_s4 = ssub.s32 %s88_s14, %s89_s7  ;;  %p102_p9 = scmp.ne.s32.totalorder %s2717_s16, %s2713_s15 }
  0x19   : > { %s92_s30 = sor.u32 %s91_s4, %s30_s10  ;;  %s3595_s21 = sadd.s32 4294967295, %s2753_s25  }
  0x1a   : > { %p160_p10 = scmp.eq.s32.totalorder %s3595_s21, 3  ;;  %p93_p11 = scmp.eq.s32.totalorder %s92_s30, 0 }
  0x1b   : > { %p2887_p12 = por %p102_p9, %p43_p2  ;;  %p2008_p0 = scmp.ge.s32.totalorder %s2753_s25, 4 }
  0x1c   : > { %p2894_p13 = por %p160_p10, %p42_p1 }
  0x1d   : > { %s2899_s29 = scalar_select %p93_p11, %s2717_s16, %s95_s28  }
  0x1e   : > { %182 = sbr.rel (%p2008_p0) target bundleno = 88 (0x58), region = 16 }
  0x25   : > { %185 = sbr.rel (!%p2854_p4) target bundleno = 54 (0x36), region = 20  ;;  %s187_s4 = sand.u32 (%p2854_p4), 1, %s2733_s20  }
  0x26   : > { %s2385_s21 = smul.u32 (%p2854_p4), 96, %s2749_s24  ;;  %s2009_s9 = sshll.u32 (%p2854_p4), %s187_s4, 6 }
  0x27   : > { %s189_s28 = scalar_lea.vmem (%p2854_p4), [#allocation2], %s2009_s9 }
  0x28   : > { %s191_s10 = sadd.s32 (%p2854_p4), %s2745_s23, %s2385_s21 }
  0x29   : > { %s2010_s12 = sshll.u32 (%p2854_p4), %s191_s10, 2 }
  0x2a   : > { %s2910_s30 = scalar_lea.vmem (%p2854_p4), %s3584_s0, %s2010_s12 }
  0x2b   : > { %v209_v0 = vld [vmem:[%s2910_s30] sm:$0xf] (%p2854_p4)  ;;  %v211_v1 = vld [vmem:[%s2910_s30 + $0x18] sm:$0xf] (%p2854_p4)  ;;  %v213_v2 = vld [vmem:[%s2910_s30 + $0x30] sm:$0xf] (%p2854_p4) }
  0x2c   : > { %210 = vst [vmem:[%s189_s28] sm:$0xf] %v209_v0  ;;  %212 = vst [vmem:[%s189_s28 + $0x4] sm:$0xf] %v211_v1  ;;  %v215_v3 = vld [vmem:[%s2910_s30 + $0x48] sm:$0xf] }
  0x2d   : > { %214 = vst [vmem:[%s189_s28 + $0x8] sm:$0xf] %v213_v2  ;;  %v217_v4 = vld [vmem:[%s2910_s30 + $0x60] sm:$0xf]  ;;  %v219_v5 = vld [vmem:[%s2910_s30 + $0x78] sm:$0xf] }
  0x2e   : > { %216 = vst [vmem:[%s189_s28 + $0xc] sm:$0xf] %v215_v3  ;;  %218 = vst [vmem:[%s189_s28 + $0x10] sm:$0xf] %v217_v4  ;;  %v221_v6 = vld [vmem:[%s2910_s30 + $0x90] sm:$0xf] }
  0x2f   : > { %220 = vst [vmem:[%s189_s28 + $0x14] sm:$0xf] %v219_v5  ;;  %v223_v7 = vld [vmem:[%s2910_s30 + $0xa8] sm:$0xf]  ;;  %v225_v8 = vld [vmem:[%s2910_s30 + $0xc0] sm:$0xf] }
  0x30   : > { %222 = vst [vmem:[%s189_s28 + $0x18] sm:$0xf] %v221_v6  ;;  %224 = vst [vmem:[%s189_s28 + $0x1c] sm:$0xf] %v223_v7  ;;  %v227_v9 = vld [vmem:[%s2910_s30 + $0xd8] sm:$0xf] }
  0x31   : > { %226 = vst [vmem:[%s189_s28 + $0x20] sm:$0xf] %v225_v8  ;;  %v229_v10 = vld [vmem:[%s2910_s30 + $0xf0] sm:$0xf]  ;;  %v231_v11 = vld [vmem:[%s2910_s30 + $0x108] sm:$0xf] }
  0x32   : > { %228 = vst [vmem:[%s189_s28 + $0x24] sm:$0xf] %v227_v9  ;;  %230 = vst [vmem:[%s189_s28 + $0x28] sm:$0xf] %v229_v10  ;;  %v233_v12 = vld [vmem:[%s2910_s30 + $0x120] sm:$0xf] }
  0x33   : > { %232 = vst [vmem:[%s189_s28 + $0x2c] sm:$0xf] %v231_v11  ;;  %v235_v13 = vld [vmem:[%s2910_s30 + $0x138] sm:$0xf]  ;;  %v237_v14 = vld [vmem:[%s2910_s30 + $0x150] sm:$0xf] }
  0x34   : > { %234 = vst [vmem:[%s189_s28 + $0x30] sm:$0xf] %v233_v12  ;;  %236 = vst [vmem:[%s189_s28 + $0x34] sm:$0xf] %v235_v13  ;;  %v239_v15 = vld [vmem:[%s2910_s30 + $0x168] sm:$0xf] }
  0x35   : > { %238 = vst [vmem:[%s189_s28 + $0x38] sm:$0xf] %v237_v14  ;;  %240 = vst [vmem:[%s189_s28 + $0x3c] sm:$0xf] %v239_v15 }
  0x36 PF: > { %295 = sbr.rel (!%p2868_p8) target bundleno = 71 (0x47), region = 61  ;;  %s297_s6 = sand.u32 (%p2868_p8), 1, %s2725_s18  }
  0x37   : > { %s1902_s4 = smul.u32 (%p2868_p8), 96, %s2749_s24  ;;  %s2011_s21 = sshll.u32 (%p2868_p8), %s297_s6, 6 }
  0x38   : > { %s299_s13 = scalar_lea.vmem (%p2868_p8), [#allocation3], %s2011_s21 }
  0x39   : > { %s1903_s9 = sadd.s32 (%p2868_p8), %s2745_s23, %s1902_s4 }
  0x3a   : > { %s2012_s10 = sshll.u32 (%p2868_p8), %s1903_s9, 2 }
  0x3b   : > { %s2936_s7 = scalar_lea.vmem (%p2868_p8), %s3585_s1, %s2012_s10 }
  0x3c   : > { %v2013_v16 = vld [vmem:[%s2936_s7 + $0x8] sm:$0xf] (%p2868_p8)  ;;  %v2014_v17 = vld [vmem:[%s2936_s7 + $0x20] sm:$0xf] (%p2868_p8)  ;;  %v2015_v18 = vld [vmem:[%s2936_s7 + $0x38] sm:$0xf] (%p2868_p8) }
  0x3d   : > { %321 = vst [vmem:[%s299_s13] sm:$0xf] %v2013_v16  ;;  %323 = vst [vmem:[%s299_s13 + $0x4] sm:$0xf] %v2014_v17  ;;  %v2016_v19 = vld [vmem:[%s2936_s7 + $0x50] sm:$0xf] }
  0x3e   : > { %325 = vst [vmem:[%s299_s13 + $0x8] sm:$0xf] %v2015_v18  ;;  %v2017_v20 = vld [vmem:[%s2936_s7 + $0x68] sm:$0xf]  ;;  %v2018_v21 = vld [vmem:[%s2936_s7 + $0x80] sm:$0xf] }
  0x3f   : > { %327 = vst [vmem:[%s299_s13 + $0xc] sm:$0xf] %v2016_v19  ;;  %329 = vst [vmem:[%s299_s13 + $0x10] sm:$0xf] %v2017_v20  ;;  %v2019_v22 = vld [vmem:[%s2936_s7 + $0x98] sm:$0xf] }
  0x40   : > { %331 = vst [vmem:[%s299_s13 + $0x14] sm:$0xf] %v2018_v21  ;;  %v2020_v23 = vld [vmem:[%s2936_s7 + $0xb0] sm:$0xf]  ;;  %v2021_v24 = vld [vmem:[%s2936_s7 + $0xc8] sm:$0xf] }
  0x41   : > { %333 = vst [vmem:[%s299_s13 + $0x18] sm:$0xf] %v2019_v22  ;;  %335 = vst [vmem:[%s299_s13 + $0x1c] sm:$0xf] %v2020_v23  ;;  %v2022_v25 = vld [vmem:[%s2936_s7 + $0xe0] sm:$0xf] }
  0x42   : > { %337 = vst [vmem:[%s299_s13 + $0x20] sm:$0xf] %v2021_v24  ;;  %v2023_v26 = vld [vmem:[%s2936_s7 + $0xf8] sm:$0xf]  ;;  %v2024_v27 = vld [vmem:[%s2936_s7 + $0x110] sm:$0xf] }
  0x43   : > { %339 = vst [vmem:[%s299_s13 + $0x24] sm:$0xf] %v2022_v25  ;;  %341 = vst [vmem:[%s299_s13 + $0x28] sm:$0xf] %v2023_v26  ;;  %v2025_v28 = vld [vmem:[%s2936_s7 + $0x128] sm:$0xf] }
  0x44   : > { %343 = vst [vmem:[%s299_s13 + $0x2c] sm:$0xf] %v2024_v27  ;;  %v2026_v29 = vld [vmem:[%s2936_s7 + $0x140] sm:$0xf]  ;;  %v2027_v30 = vld [vmem:[%s2936_s7 + $0x158] sm:$0xf] }
  0x45   : > { %345 = vst [vmem:[%s299_s13 + $0x30] sm:$0xf] %v2025_v28  ;;  %347 = vst [vmem:[%s299_s13 + $0x34] sm:$0xf] %v2026_v29  ;;  %v2028_v31 = vld [vmem:[%s2936_s7 + $0x170] sm:$0xf] }
  0x46   : > { %349 = vst [vmem:[%s299_s13 + $0x38] sm:$0xf] %v2027_v30  ;;  %351 = vst [vmem:[%s299_s13 + $0x3c] sm:$0xf] %v2028_v31 }
  0x47 PF: > { %406 = sbr.rel (!%p2887_p12) target bundleno = 88 (0x58), region = 102  ;;  %s408_s30 = sand.u32 (%p2887_p12), 1, %s2717_s16  }
  0x48   : > { %s1909_s28 = smul.u32 (%p2887_p12), 96, %s2749_s24  ;;  %s2029_s6 = sshll.u32 (%p2887_p12), %s408_s30, 6 }
  0x49   : > { %s410_s8 = scalar_lea.vmem (%p2887_p12), [#allocation4], %s2029_s6 }
  0x4a   : > { %s1910_s4 = sadd.s32 (%p2887_p12), %s2745_s23, %s1909_s28 }
  0x4b   : > { %s2030_s21 = sshll.u32 (%p2887_p12), %s1910_s4, 2 }
  0x4c   : > { %s2962_s12 = scalar_lea.vmem (%p2887_p12), %s3586_s2, %s2030_s21 }
  0x4d   : > { %v2031_v32 = vld [vmem:[%s2962_s12 + $0x10] sm:$0xf] (%p2887_p12)  ;;  %v2032_v33 = vld [vmem:[%s2962_s12 + $0x28] sm:$0xf] (%p2887_p12)  ;;  %v2033_v34 = vld [vmem:[%s2962_s12 + $0x40] sm:$0xf] (%p2887_p12) }
  0x4e   : > { %432 = vst [vmem:[%s410_s8] sm:$0xf] %v2031_v32  ;;  %434 = vst [vmem:[%s410_s8 + $0x4] sm:$0xf] %v2032_v33  ;;  %v2034_v35 = vld [vmem:[%s2962_s12 + $0x58] sm:$0xf] }
  0x4f   : > { %436 = vst [vmem:[%s410_s8 + $0x8] sm:$0xf] %v2033_v34  ;;  %v2035_v36 = vld [vmem:[%s2962_s12 + $0x70] sm:$0xf]  ;;  %v2036_v37 = vld [vmem:[%s2962_s12 + $0x88] sm:$0xf] }
  0x50   : > { %438 = vst [vmem:[%s410_s8 + $0xc] sm:$0xf] %v2034_v35  ;;  %440 = vst [vmem:[%s410_s8 + $0x10] sm:$0xf] %v2035_v36  ;;  %v2037_v38 = vld [vmem:[%s2962_s12 + $0xa0] sm:$0xf] }
  0x51   : > { %442 = vst [vmem:[%s410_s8 + $0x14] sm:$0xf] %v2036_v37  ;;  %v2038_v39 = vld [vmem:[%s2962_s12 + $0xb8] sm:$0xf]  ;;  %v2039_v40 = vld [vmem:[%s2962_s12 + $0xd0] sm:$0xf] }
  0x52   : > { %444 = vst [vmem:[%s410_s8 + $0x18] sm:$0xf] %v2037_v38  ;;  %446 = vst [vmem:[%s410_s8 + $0x1c] sm:$0xf] %v2038_v39  ;;  %v2040_v41 = vld [vmem:[%s2962_s12 + $0xe8] sm:$0xf] }
  0x53   : > { %448 = vst [vmem:[%s410_s8 + $0x20] sm:$0xf] %v2039_v40  ;;  %v2041_v42 = vld [vmem:[%s2962_s12 + $0x100] sm:$0xf]  ;;  %v2042_v43 = vld [vmem:[%s2962_s12 + $0x118] sm:$0xf] }
  0x54   : > { %450 = vst [vmem:[%s410_s8 + $0x24] sm:$0xf] %v2040_v41  ;;  %452 = vst [vmem:[%s410_s8 + $0x28] sm:$0xf] %v2041_v42  ;;  %v2043_v44 = vld [vmem:[%s2962_s12 + $0x130] sm:$0xf] }
  0x55   : > { %454 = vst [vmem:[%s410_s8 + $0x2c] sm:$0xf] %v2042_v43  ;;  %v2044_v45 = vld [vmem:[%s2962_s12 + $0x148] sm:$0xf]  ;;  %v2045_v46 = vld [vmem:[%s2962_s12 + $0x160] sm:$0xf] }
  0x56   : > { %456 = vst [vmem:[%s410_s8 + $0x30] sm:$0xf] %v2043_v44  ;;  %458 = vst [vmem:[%s410_s8 + $0x34] sm:$0xf] %v2044_v45  ;;  %v2046_v47 = vld [vmem:[%s2962_s12 + $0x178] sm:$0xf] }
  0x57   : > { %460 = vst [vmem:[%s410_s8 + $0x38] sm:$0xf] %v2045_v46  ;;  %462 = vst [vmem:[%s410_s8 + $0x3c] sm:$0xf] %v2046_v47 }
  0x58 PF: > { %p2047_p1 = scmp.ge.s32.totalorder %s2753_s25, 1  ;;  %p522_p2 = scmp.lt.s32.totalorder %s2753_s25, 5 }
  0x5a   : > { %p523_p3 = pnand %p2047_p1, %p522_p2 }
  0x5b   : > { %s536_s14 = sand.u32 (!%p523_p3), 1, %s2721_s17   ;;  %vm719_vm0 = vcmask (!%p523_p3), 523264   ;;  %s529_s13 = sand.u32 (!%p523_p3), 1, %s2729_s19  }
  0x5c   : > { %526 = sbr.rel (%p523_p3) target bundleno = 1749 (0x6d5), region = 147  ;;  %s2049_s7 = sshll.u32 (!%p523_p3), %s536_s14, 6 }
  0x5d   : > { %s2984_s30 = scalar_lea.vmem (!%p523_p3), [#allocation3], %s2049_s7  ;;  %s2990_s28 = sshll.u32 (!%p523_p3), %s529_s13, 6 }
  0x5e   : > { %v2515_v48 = vld [vmem:[%s2984_s30] sm:$0xff] (!%p523_p3)   ;;  %v2516_v49 = vld [vmem:[%s2984_s30 + $0x8] sm:$0xff] (!%p523_p3)   ;;  %s2755_s6 = smov (!%p523_p3), 64   ;;  %v2996_v51 = vld [vmem:[%s2984_s30 + $0x10] sm:$0xff] (!%p523_p3)   ;;  %s3000_s17 = scalar_lea.vmem (!%p523_p3), [#allocation2], %s2990_s28 }
  0x5f   : > { %2369 = vmatprep.subr.msk.bf16.mxu0 (!%p523_p3), %vm719_vm0, %v2515_v48  ;;  %v745_v50 = vsel (!%p523_p3), %vm719_vm0, %v2515_v48, 0  ;;  %1178 = vrot.lane.b32.xlu0 (!%p523_p3), %v2515_v48, %s2755_s6  ;;  %v748_v52 = vsel (!%p523_p3), %vm719_vm0, %v2516_v49, 0  ;;  %v3003_v53 = vld [vmem:[%s3000_s17] sm:$0xff] (!%p523_p3)   ;;  %v751_v54 = vsel (!%p523_p3), %vm719_vm0, %v2996_v51, 0  ;;  %v3012_v55 = vld [vmem:[%s2984_s30 + $0x18] sm:$0xff] (!%p523_p3)   ;;  %v3026_v59 = vld [vmem:[%s2984_s30 + $0x28] sm:$0xff] (!%p523_p3)  }
  0x60   : > { %2242 = vmatpush3.bf16.xpose.msra.mxu0 (!%p523_p3), %v745_v50  ;;  %1180 = vrot.lane.b32.xlu1 (!%p523_p3), %v2516_v49, %s2755_s6  ;;  %v754_v56 = vsel (!%p523_p3), %vm719_vm0, %v3012_v55, 0  ;;  %v3019_v57 = vld [vmem:[%s2984_s30 + $0x20] sm:$0xff] (!%p523_p3)   ;;  %v760_v60 = vsel (!%p523_p3), %vm719_vm0, %v3026_v59, 0  ;;  %v3033_v61 = vld [vmem:[%s2984_s30 + $0x30] sm:$0xff] (!%p523_p3)   ;;  %v3040_v63 = vld [vmem:[%s2984_s30 + $0x38] sm:$0xff] (!%p523_p3)   ;;  %s543_s19 = sand.u32 (!%p523_p3), 1, %s2713_s15  }
  0x61   : > { %2370 = vmatprep.subr.msk.bf16.mxu0 (!%p523_p3), %vm719_vm0, %v2516_v49  ;;  %2257 = vmatprep.mubr.msk.bf16.mxu0 (!%p523_p3), %vm719_vm0, %v3003_v53  ;;  %v757_v58 = vsel (!%p523_p3), %vm719_vm0, %v3019_v57, 0  ;;  %v763_v62 = vsel (!%p523_p3), %vm719_vm0, %v3033_v61, 0  ;;  %v766_v0 = vsel (!%p523_p3), %vm719_vm0, %v3040_v63, 0  ;;  %v3047_v1 = vld [vmem:[%s3000_s17 + $0x8] sm:$0xff] (!%p523_p3)   ;;  %v3050_v2 = vld [vmem:[%s3000_s17 + $0x10] sm:$0xff] (!%p523_p3)   ;;  %v3057_v3 = vld [vmem:[%s3000_s17 + $0x18] sm:$0xff] (!%p523_p3)  }
  0x62   : > { %v3060_v4 = vld [vmem:[%s3000_s17 + $0x20] sm:$0xff] (!%p523_p3)   ;;  %v3067_v5 = vld [vmem:[%s3000_s17 + $0x28] sm:$0xff] (!%p523_p3)   ;;  %v3070_v6 = vld [vmem:[%s3000_s17 + $0x30] sm:$0xff] (!%p523_p3)   ;;  %s2050_s4 = sshll.u32 (!%p523_p3), %s543_s19, 6  ;;  %p580_p4 = scmp.lt.s32.totalorder (!%p523_p3), %s2741_s22, 1 }
  0x63   : > { %v3077_v7 = vld [vmem:[%s3000_s17 + $0x38] sm:$0xff]   ;;  %s545_s21 = scalar_lea.vmem [#allocation4], %s2050_s4  ;;  %s3494_s8 = scalar_lea.vmem [#allocation5], %s2990_s28 }
  0x64   : > { %v3082_v8 = vld [vmem:[%s545_s21] sm:$0xff]   ;;  %v3084_v9 = vld [vmem:[%s545_s21 + $0x8] sm:$0xff]   ;;  %v3089_v10 = vld [vmem:[%s545_s21 + $0x10] sm:$0xff]   ;;  %s581_s15 = scalar_select %p580_p4, %s2741_s22, 1 }
  0x65   : > { %2273 = vmatprep.subr.bf16.mxu1 %v3082_v8  ;;  %v3093_v11 = vld [vmem:[%s545_s21 + $0x18] sm:$0xff]   ;;  %v3097_v12 = vld [vmem:[%s545_s21 + $0x20] sm:$0xff]   ;;  %v3102_v13 = vld [vmem:[%s545_s21 + $0x28] sm:$0xff]   ;;  %s3598_s14 = sld [smem:[#allocation6_spill]] (%p2894_p13)  ;;  %s2110_s7 = sshll.u32 (%p2894_p13), %s2741_s22, 5 }
  0x66   : > { %2274 = vmatpush3.bf16.msra.mxu1 %v3082_v8  ;;  %v3106_v14 = vld [vmem:[%s545_s21 + $0x30] sm:$0xff]   ;;  %v3108_v15 = vld [vmem:[%s545_s21 + $0x38] sm:$0xff]   ;;  %s582_s12 = scalar_lea.vmem %s3587_s3, %s581_s15 }
  0x67   : > { %2275 = vmatprep.subr.bf16.mxu1 %v3084_v9  ;;  %v3123_v17 = vld [vmem:[%s582_s12] ss:$0 sm:$0xff] }
  0x68   : > { %2244 = vmatpush3.bf16.xpose.msra.mxu0 %v748_v52 }
  0x69   : > { %2371 = vmatprep.subr.msk.bf16.mxu0 %vm719_vm0, %v2996_v51 }
  0x6a   : > { %2276 = vmatpush3.bf16.msra.mxu1 %v3084_v9 }
  0x6b   : > { %2277 = vmatprep.subr.bf16.mxu1 %v3089_v10  ;;  %s1780_s13 = sadd.s32 (%p2894_p13), %s3598_s14, %s2110_s7 }
  0x6c   : > { %s2111_s11 = sshll.u32 (%p2894_p13), %s1780_s13, 2 }
  0x6e   : > { %2278 = vmatpush3.bf16.msra.mxu1 %v3089_v10 }
  0x6f   : > { %2279 = vmatprep.subr.bf16.mxu1 %v3093_v11 }
  0x70   : > { %2246 = vmatpush3.bf16.xpose.msra.mxu0 %v751_v54 }
  0x71   : > { %2372 = vmatprep.subr.msk.bf16.mxu0 %vm719_vm0, %v3012_v55 }
  0x72   : > { %2280 = vmatpush3.bf16.msra.mxu1 %v3093_v11 }
  0x73   : > { %2281 = vmatprep.subr.bf16.mxu1 %v3097_v12 }
  0x76   : > { %2282 = vmatpush3.bf16.msra.mxu1 %v3097_v12 }
  0x77   : > { %2283 = vmatprep.subr.bf16.mxu1 %v3102_v13 }
  0x78   : > { %2248 = vmatpush3.bf16.xpose.msra.mxu0 %v754_v56 }
  0x79   : > { %2373 = vmatprep.subr.msk.bf16.mxu0 %vm719_vm0, %v3019_v57 }
  0x7a   : > { %2284 = vmatpush3.bf16.msra.mxu1 %v3102_v13 }
  0x7b   : > { %2285 = vmatprep.subr.bf16.mxu1 %v3106_v14 }
  0x7e   : > { %2286 = vmatpush3.bf16.msra.mxu1 %v3106_v14 }
  0x7f   : > { %2287 = vmatprep.subr.bf16.mxu1 %v3108_v15 }
  0x80   : > { %2250 = vmatpush3.bf16.xpose.msra.mxu0 %v757_v58 }
  0x81   : > { %2374 = vmatprep.subr.msk.bf16.mxu0 %vm719_vm0, %v3026_v59 }
  0x82   : > { %2288 = vmatpush3.bf16.msra.mxu1 %v3108_v15 }
  0x88   : > { %2252 = vmatpush3.bf16.xpose.msra.mxu0 %v760_v60 }
  0x89   : > { %2375 = vmatprep.subr.msk.bf16.mxu0 %vm719_vm0, %v3033_v61 }
  0x90   : > { %2254 = vmatpush3.bf16.xpose.msra.mxu0 %v763_v62 }
  0x91   : > { %2376 = vmatprep.subr.msk.bf16.mxu0 %vm719_vm0, %v3040_v63 }
  0x98   : > { %2256 = vmatpush3.bf16.xpose.msra.mxu0 %v766_v0 }
  0x9f   : > { %2258 = vmatmul.mubr.msk.bf16.vlgmr.msra.gmra.mrb[0].mxu0 %vm719_vm0, %v3047_v1 }
  0xa0   : > { %2261 = vmatprep.mubr.msk.bf16.mxu0 %vm719_vm0, %v3050_v2 }
  0xa7   : > { %2262 = vmatmul.mubr.msk.bf16.gmra.mrb[4].mxu0 %vm719_vm0, %v3057_v3 }
  0xa8   : > { %2265 = vmatprep.mubr.msk.bf16.mxu0 %vm719_vm0, %v3060_v4 }
  0xaf   : > { %2266 = vmatmul.mubr.msk.bf16.gmra.mrb[8].mxu0 %vm719_vm0, %v3067_v5 }
  0xb0   : > { %2269 = vmatprep.mubr.msk.bf16.mxu0 %vm719_vm0, %v3070_v6 }
  0xb7   : > { %2270 = vmatmul.mubr.msk.bf16.gmra.mrb[12].mxu0 %vm719_vm0, %v3077_v7 }
  0xd1   : > { %v3113_v16 = vpop.permute.xlu0 %1178 }
  0xd2   : > { %2377 = vmatprep.subr.msk.bf16.mxu1 %vm719_vm0, %v3113_v16  ;;  %v3181_v50 = vpop.permute.xlu1 %1180 }
 0x172   : > { %v2259_v18 = vpop.f32.mrb[0].mxu0 }
 0x173   : > { %v811_v19 = vadd.f32 %v2259_v18, %v3123_v17  ;;  %v802_v20 = vpop.f32.mrb[1].mxu0 }
 0x174   : > { %v803_v21 = vadd.f32 %v3123_v17, %v802_v20  ;;  %v2260_v22 = vpop.f32.mrb[2].mxu0 }
 0x175   : > { %869 = vmax.xlane.f32.xlu1 %v811_v19  ;;  %v805_v23 = vpop.f32.mrb[3].mxu0  ;;  %v814_v24 = vadd.f32 %v2260_v22, %v3123_v17 }
 0x176   : > { %865 = vmax.xlane.f32.xlu0 %v803_v21  ;;  %v806_v25 = vadd.f32 %v3123_v17, %v805_v23 }
 0x179   : > { %871 = vmax.xlane.f32.xlu1 %v814_v24 }
 0x17a   : > { %v2263_v26 = vpop.f32.mrb[4].mxu0  ;;  %867 = vmax.xlane.f32.xlu0 %v806_v25 }
 0x17b   : > { %v3130_v27 = vadd.f32 %v2263_v26, %v3123_v17  ;;  %v818_v28 = vpop.f32.mrb[5].mxu0 }
 0x17c   : > { %v2264_v29 = vpop.f32.mrb[6].mxu0  ;;  %v3136_v32 = vadd.f32 %v3123_v17, %v818_v28 }
 0x17d   : > { %v3133_v30 = vadd.f32 %v2264_v29, %v3123_v17  ;;  %v821_v31 = vpop.f32.mrb[7].mxu0 }
 0x17e   : > { %877 = vmax.xlane.f32.xlu0 %v3130_v27  ;;  %v3141_v33 = vadd.f32 %v3123_v17, %v821_v31 }
 0x17f   : > { %879 = vmax.xlane.f32.xlu1 %v3133_v30 }
 0x182   : > { %v2267_v34 = vpop.f32.mrb[8].mxu0  ;;  %873 = vmax.xlane.f32.xlu0 %v3136_v32 }
 0x183   : > { %v3145_v35 = vadd.f32 %v2267_v34, %v3123_v17  ;;  %v834_v36 = vpop.f32.mrb[9].mxu0  ;;  %875 = vmax.xlane.f32.xlu1 %v3141_v33 }
 0x184   : > { %v2268_v37 = vpop.f32.mrb[10].mxu0  ;;  %v3152_v40 = vadd.f32 %v3123_v17, %v834_v36 }
 0x185   : > { %v3149_v38 = vadd.f32 %v2268_v37, %v3123_v17  ;;  %v837_v39 = vpop.f32.mrb[11].mxu0 }
 0x186   : > { %885 = vmax.xlane.f32.xlu0 %v3145_v35  ;;  %v3157_v41 = vadd.f32 %v3123_v17, %v837_v39 }
 0x187   : > { %887 = vmax.xlane.f32.xlu1 %v3149_v38 }
 0x18a   : > { %881 = vmax.xlane.f32.xlu0 %v3152_v40  ;;  %v2271_v42 = vpop.f32.mrb[12].mxu0 }
 0x18b   : > { %v3161_v43 = vadd.f32 %v2271_v42, %v3123_v17  ;;  %883 = vmax.xlane.f32.xlu1 %v3157_v41  ;;  %v850_v44 = vpop.f32.mrb[13].mxu0 }
 0x18c   : > { %v2272_v45 = vpop.f32.mrb[14].mxu0  ;;  %v3166_v47 = vadd.f32 %v3123_v17, %v850_v44 }
 0x18d   : > { %v853_v46 = vpop.f32.mrb[15].mxu0  ;;  %v3174_v48 = vadd.f32 %v2272_v45, %v3123_v17 }
 0x18e   : > { %893 = vmax.xlane.f32.xlu0 %v3161_v43  ;;  %v3178_v49 = vadd.f32 %v3123_v17, %v853_v46 }
 0x192   : > { %889 = vmax.xlane.f32.xlu0 %v3166_v47 }
 0x19c   : > { %1184 = vrot.lane.b32.xlu1 %v3012_v55, %s2755_s6 }
 0x1a8   : > { %1182 = vrot.lane.b32.xlu0 %v2996_v51, %s2755_s6 }
 0x1c0   : > { %895 = vmax.xlane.f32.xlu1 %v3174_v48 }
 0x1c4   : > { %891 = vmax.xlane.f32.xlu1 %v3178_v49 }
 0x202   : > { %v870_v52 = vpop.xlane.xlu1 %869 }
 0x203   : > { %v899_v54 = vsub.f32 %v811_v19, %v870_v52  ;;  %v866_v56 = vpop.xlane.xlu0 %865 }
 0x204   : > { %v897_v58 = vsub.f32 %v803_v21, %v866_v56 }
 0x205   : > { %v917_v55 = vmul.f32 1.442695, %v899_v54 }
 0x206   : > { %v913_v60 = vmul.f32 1.442695, %v897_v58  ;;  %v872_v62 = vpop.xlane.xlu1 %871 }
 0x207   : > { %2539 = vpow2.f32 %v917_v55  ;;  %v900_v51 = vsub.f32 %v814_v24, %v872_v62  ;;  %v868_v0 = vpop.xlane.xlu0 %867 }
 0x208   : > { %v898_v18 = vsub.f32 %v806_v25, %v868_v0  ;;  %2541 = vpow2.f32 %v913_v60 }
 0x209   : > { %v919_v20 = vmul.f32 1.442695, %v900_v51 }
 0x20a   : > { %v915_v22 = vmul.f32 1.442695, %v898_v18 }
 0x20b   : > { %2543 = vpow2.f32 %v919_v20  ;;  %v878_v24 = vpop.xlane.xlu0 %877 }
 0x20c   : > { %2545 = vpow2.f32 %v915_v22  ;;  %v880_v29 = vpop.xlane.xlu1 %879  ;;  %v903_v36 = vsub.f32 %v3130_v27, %v878_v24 }
 0x20d   : > { %v904_v46 = vsub.f32 %v3133_v30, %v880_v29 }
 0x20e   : > { %v925_v42 = vmul.f32 1.442695, %v903_v36 }
 0x20f   : > { %v874_v25 = vpop.xlane.xlu0 %873  ;;  %v927_v56 = vmul.f32 1.442695, %v904_v46  ;;  %v1219_v46 = vsel %vm719_vm0, %v3113_v16, 0 }
 0x210   : > { %v876_v34 = vpop.xlane.xlu1 %875  ;;  %v901_v37 = vsub.f32 %v3136_v32, %v874_v25  ;;  %2547 = vpow2.f32 %v925_v42 }
 0x211   : > { %v3183_v23 = vpop.eup %2539  ;;  %v902_v44 = vsub.f32 %v3141_v33, %v876_v34 }
 0x212   : > { %949 = vadd.xlane.f32.xlu0 %v3183_v23  ;;  %v3186_v26 = vpop.eup %2541  ;;  %v921_v52 = vmul.f32 1.442695, %v901_v37 }
 0x213   : > { %v886_v28 = vpop.xlane.xlu0 %885 }
 0x214   : > { %v888_v45 = vpop.xlane.xlu1 %887  ;;  %2549 = vpow2.f32 %v921_v52  ;;  %v907_v58 = vsub.f32 %v3145_v35, %v886_v28 }
 0x215   : > { %v3188_v19 = vpop.eup %2543  ;;  %v908_v35 = vsub.f32 %v3149_v38, %v888_v45 }
 0x216   : > { %951 = vadd.xlane.f32.xlu1 %v3188_v19  ;;  %945 = vadd.xlane.f32.xlu0 %v3186_v26  ;;  %v3192_v21 = vpop.eup %2545  ;;  %v933_v33 = vmul.f32 1.442695, %v907_v58 }
 0x217   : > { %v882_v31 = vpop.xlane.xlu0 %881  ;;  %v935_v20 = vmul.f32 1.442695, %v908_v35 }
 0x218   : > { %v884_v27 = vpop.xlane.xlu1 %883  ;;  %v905_v60 = vsub.f32 %v3152_v40, %v882_v31 }
 0x219   : > { %v906_v22 = vsub.f32 %v3157_v41, %v884_v27 }
 0x21a   : > { %947 = vadd.xlane.f32.xlu1 %v3192_v21  ;;  %v3209_v51 = vpop.eup %2547 }
 0x21b   : > { %v894_v39 = vpop.xlane.xlu0 %893 }
 0x21c   : > { %v3207_v62 = vpop.permute.xlu1 %1184 }
 0x21d   : > { %v1228_v16 = vsel %vm719_vm0, %v3207_v62, 0 }
 0x21e   : > { %v3213_v0 = vpop.eup %2549 }
 0x21f   : > { %v890_v54 = vpop.xlane.xlu0 %889 }
 0x220   : > { %v909_v55 = vsub.f32 %v3166_v47, %v890_v54 }
 0x222   : > { %v937_v30 = vmul.f32 1.442695, %v909_v55 }
 0x22b   : > { %1188 = vrot.lane.b32.xlu1 %v3026_v59, %s2755_s6  ;;  %v923_v59 = vmul.f32 1.442695, %v902_v44 }
 0x22c   : > { %1186 = vrot.lane.b32.xlu0 %v3019_v57, %s2755_s6  ;;  %v911_v57 = vsub.f32 %v3161_v43, %v894_v39  ;;  %v929_v43 = vmul.f32 1.442695, %v905_v60 }
 0x22d   : > { %2551 = vpow2.f32 %v923_v59 }
 0x22e   : > { %v941_v32 = vmul.f32 1.442695, %v911_v57  ;;  %2553 = vpow2.f32 %v927_v56 }
 0x230   : > { %2555 = vpow2.f32 %v941_v32 }
 0x231   : > { %2557 = vpow2.f32 %v933_v33 }
 0x232   : > { %2559 = vpow2.f32 %v937_v30 }
 0x233   : > { %2561 = vpow2.f32 %v929_v43 }
 0x237   : > { %v3215_v18 = vpop.eup %2551 }
 0x238   : > { %v3221_v25 = vpop.eup %2553 }
 0x23a   : > { %v3223_v28 = vpop.eup %2555 }
 0x23b   : > { %v3228_v31 = vpop.eup %2557 }
 0x23c   : > { %v3230_v34 = vpop.eup %2559 }
 0x23d   : > { %v3234_v36 = vpop.eup %2561 }
 0x24b   : > { %957 = vadd.xlane.f32.xlu0 %v3209_v51 }
 0x24d   : > { %v896_v47 = vpop.xlane.xlu1 %895 }
 0x24e   : > { %v912_v40 = vsub.f32 %v3174_v48, %v896_v47  ;;  %v931_v48 = vmul.f32 1.442695, %v906_v22 }
 0x24f   : > { %955 = vadd.xlane.f32.xlu0 %v3215_v18  ;;  %953 = vadd.xlane.f32.xlu1 %v3213_v0 }
 0x250   : > { %v943_v24 = vmul.f32 1.442695, %v912_v40 }
 0x251   : > { %v892_v38 = vpop.xlane.xlu1 %891 }
 0x252   : > { %2563 = vpow2.f32 %v943_v24  ;;  %v910_v29 = vsub.f32 %v3178_v49, %v892_v38 }
 0x253   : > { %959 = vadd.xlane.f32.xlu1 %v3221_v25  ;;  %973 = vadd.xlane.f32.xlu0 %v3223_v28  ;;  %2565 = vpow2.f32 %v935_v20 }
 0x254   : > { %2567 = vpow2.f32 %v931_v48  ;;  %v939_v41 = vmul.f32 1.442695, %v910_v29 }
 0x256   : > { %2569 = vpow2.f32 %v939_v41 }
 0x257   : > { %965 = vadd.xlane.f32.xlu1 %v3228_v31  ;;  %969 = vadd.xlane.f32.xlu0 %v3230_v34 }
 0x25b   : > { %961 = vadd.xlane.f32.xlu1 %v3234_v36 }
 0x25c   : > { %v3237_v37 = vpop.eup %2563 }
 0x25d   : > { %975 = vadd.xlane.f32.xlu0 %v3237_v37  ;;  %v3240_v49 = vpop.eup %2565 }
 0x25e   : > { %v3243_v39 = vpop.eup %2567 }
 0x25f   : > { %967 = vadd.xlane.f32.xlu1 %v3240_v49 }
 0x260   : > { %v3246_v42 = vpop.eup %2569 }
 0x263   : > { %963 = vadd.xlane.f32.xlu1 %v3243_v39 }
 0x267   : > { %971 = vadd.xlane.f32.xlu1 %v3246_v42 }
 0x273   : > { %1190 = vrot.lane.b32.xlu0 %v3033_v61, %s2755_s6 }
 0x277   : > { %1162 = vrot.lane.b32.xlu0 %v3003_v53, %s2755_s6  ;;  %v1183_v53 = vpop.permute.xlu0 %1182 }
 0x278   : > { %1192 = vrot.lane.b32.xlu1 %v3040_v63, %s2755_s6 }
 0x27b   : > { %1166 = vrot.lane.b32.xlu0 %v3050_v2, %s2755_s6 }
 0x27c   : > { %1164 = vrot.lane.b32.xlu1 %v3047_v1, %s2755_s6 }
 0x27f   : > { %1170 = vrot.lane.b32.xlu0 %v3060_v4, %s2755_s6 }
 0x280   : > { %1168 = vrot.lane.b32.xlu1 %v3057_v3, %s2755_s6 }
 0x283   : > { %1174 = vrot.lane.b32.xlu0 %v3070_v6, %s2755_s6 }
 0x284   : > { %1172 = vrot.lane.b32.xlu1 %v3067_v5, %s2755_s6 }
 0x287   : > { %1491 = vrot.lane.b32.xlu0 %v3082_v8, %s2755_s6 }
 0x288   : > { %1176 = vrot.lane.b32.xlu1 %v3077_v7, %s2755_s6 }
 0x28b   : > { %1495 = vrot.lane.b32.xlu0 %v3089_v10, %s2755_s6 }
 0x28c   : > { %1493 = vrot.lane.b32.xlu1 %v3084_v9, %s2755_s6 }
 0x29f   : > { %v950_v61 = vpop.xlane.xlu0 %949 }
 0x2a3   : > { %v952_v63 = vpop.xlane.xlu1 %951  ;;  %v946_v1 = vpop.xlane.xlu0 %945 }
 0x2a4   : > { %2571 = vrcp.f32 %v952_v63 }
 0x2a5   : > { %2573 = vrcp.f32 %v946_v1 }
 0x2a6   : > { %2575 = vrcp.f32 %v950_v61 }
 0x2a7   : > { %v948_v2 = vpop.xlane.xlu1 %947 }
 0x2a8   : > { %2577 = vrcp.f32 %v948_v2 }
 0x2ab   : > { %v1189_v52 = vpop.permute.xlu1 %1188 }
 0x2ac   : > { %v1234_v54 = vsel %vm719_vm0, %v1189_v52, 0 }
 0x2ae   : > { %v2572_v3 = vpop.eup %2571 }
 0x2af   : > { %v2574_v4 = vpop.eup %2573  ;;  %v996_v7 = vmul.f32 %v2572_v3, %v3188_v19  ;;  %v1222_v19 = vsel %vm719_vm0, %v3181_v50, 0 }
 0x2b0   : > { %v2576_v5 = vpop.eup %2575  ;;  %v993_v8 = vmul.f32 %v2574_v4, %v3186_v26  ;;  %v1225_v26 = vsel %vm719_vm0, %v1183_v53, 0 }
 0x2b1   : > { %v995_v9 = vmul.f32 %v2576_v5, %v3183_v23  ;;  %v1187_v23 = vpop.permute.xlu0 %1186 }
 0x2b2   : > { %v2578_v6 = vpop.eup %2577 }
 0x2b3   : > { %v994_v10 = vmul.f32 %v2578_v6, %v3192_v21  ;;  %v1010_v45 = vpack.c.bf16 %v996_v7, %v995_v9  ;;  %v1231_v21 = vsel %vm719_vm0, %v1187_v23, 0 }
 0x2b5   : > { %v1009_v44 = vpack.c.bf16 %v994_v10, %v993_v8 }
 0x2b7   : > { %2289 = vmatprep.mubr.bf16.mxu1 %v1009_v44 }
 0x2b8   : > { %2290 = vmatmul.mubr.bf16.vlgmr.msra.gmra.mrb[0].mxu1 %v1010_v45 }
 0x2b9   : > { %2306 = vmatpush3.bf16.xpose.msra.mxu1 %v1219_v46 }
 0x2ba   : > { %2378 = vmatprep.subr.msk.bf16.mxu1 %vm719_vm0, %v3181_v50 }
 0x2c1   : > { %2308 = vmatpush3.bf16.xpose.msra.mxu1 %v1222_v19 }
 0x2c2   : > { %2379 = vmatprep.subr.msk.bf16.mxu1 %vm719_vm0, %v1183_v53 }
 0x2c9   : > { %2310 = vmatpush3.bf16.xpose.msra.mxu1 %v1225_v26 }
 0x2ca   : > { %2380 = vmatprep.subr.msk.bf16.mxu1 %vm719_vm0, %v3207_v62 }
 0x2d1   : > { %2312 = vmatpush3.bf16.xpose.msra.mxu1 %v1228_v16 }
 0x2d2   : > { %2381 = vmatprep.subr.msk.bf16.mxu1 %vm719_vm0, %v1187_v23 }
 0x2d8   : > { %v958_v50 = vpop.xlane.xlu0 %957 }
 0x2d9   : > { %2314 = vmatpush3.bf16.xpose.msra.mxu1 %v1231_v21 }
 0x2da   : > { %2382 = vmatprep.subr.msk.bf16.mxu1 %vm719_vm0, %v1189_v52 }
 0x2dc   : > { %v954_v59 = vpop.xlane.xlu1 %953  ;;  %v956_v57 = vpop.xlane.xlu0 %955 }
 0x2dd   : > { %2579 = vrcp.f32 %v954_v59 }
 0x2de   : > { %2581 = vrcp.f32 %v956_v57 }
 0x2df   : > { %2583 = vrcp.f32 %v958_v50 }
 0x2e0   : > { %v960_v56 = vpop.xlane.xlu1 %959  ;;  %v974_v58 = vpop.xlane.xlu0 %973 }
 0x2e1   : > { %2585 = vrcp.f32 %v960_v56  ;;  %2316 = vmatpush3.bf16.xpose.msra.mxu1 %v1234_v54 }
 0x2e4   : > { %v966_v27 = vpop.xlane.xlu1 %965  ;;  %v970_v32 = vpop.xlane.xlu0 %969 }
 0x2e7   : > { %v2580_v55 = vpop.eup %2579 }
 0x2e8   : > { %v2582_v33 = vpop.eup %2581  ;;  %v962_v60 = vpop.xlane.xlu1 %961  ;;  %v997_v30 = vmul.f32 %v2580_v55, %v3213_v0 }
 0x2e9   : > { %v2584_v62 = vpop.eup %2583  ;;  %v998_v35 = vmul.f32 %v2582_v33, %v3215_v18 }
 0x2ea   : > { %v976_v43 = vpop.xlane.xlu0 %975  ;;  %v999_v22 = vmul.f32 %v2584_v62, %v3209_v51 }
 0x2eb   : > { %v2586_v47 = vpop.eup %2585  ;;  %v1011_v40 = vpack.c.bf16 %v998_v35, %v997_v30 }
 0x2ec   : > { %v968_v20 = vpop.xlane.xlu1 %967  ;;  %v1000_v24 = vmul.f32 %v2586_v47, %v3221_v25 }
 0x2ed   : > { %2293 = vmatprep.mubr.bf16.mxu1 %v1011_v40  ;;  %2587 = vrcp.f32 %v968_v20 }
 0x2ee   : > { %v1012_v38 = vpack.c.bf16 %v1000_v24, %v999_v22  ;;  %v1191_v48 = vpop.permute.xlu0 %1190  ;;  %2589 = vrcp.f32 %v962_v60 }
 0x2ef   : > { %v1237_v29 = vsel %vm719_vm0, %v1191_v48, 0  ;;  %2383 = vmatprep.subr.msk.bf16.mxu1 %vm719_vm0, %v1191_v48  ;;  %2591 = vrcp.f32 %v966_v27 }
 0x2f0   : > { %v964_v0 = vpop.xlane.xlu1 %963  ;;  %2294 = vmatmul.mubr.bf16.gmra.mrb[4].mxu1 %v1012_v38 }
 0x2f1   : > { %2593 = vrcp.f32 %v964_v0  ;;  %2318 = vmatpush3.bf16.xpose.msra.mxu1 %v1237_v29 }
 0x2f2   : > { %2595 = vrcp.f32 %v970_v32  ;;  %v1163_v19 = vpop.permute.xlu0 %1162 }
 0x2f4   : > { %v972_v18 = vpop.xlane.xlu1 %971 }
 0x2f5   : > { %2597 = vrcp.f32 %v972_v18 }
 0x2f6   : > { %2599 = vrcp.f32 %v976_v43  ;;  %v1167_v26 = vpop.permute.xlu0 %1166 }
 0x2f7   : > { %v2588_v51 = vpop.eup %2587  ;;  %2601 = vrcp.f32 %v974_v58 }
 0x2f8   : > { %v1193_v25 = vpop.permute.xlu1 %1192  ;;  %v2590_v41 = vpop.eup %2589  ;;  %v1004_v1 = vmul.f32 %v2588_v51, %v3240_v49 }
 0x2f9   : > { %v1240_v53 = vsel %vm719_vm0, %v1193_v25, 0  ;;  %2384 = vmatprep.subr.msk.bf16.mxu1 %vm719_vm0, %v1193_v25  ;;  %v2592_v61 = vpop.eup %2591  ;;  %v1001_v2 = vmul.f32 %v2590_v41, %v3234_v36 }
 0x2fa   : > { %2320 = vmatpush3.bf16.xpose.msra.mxu1 %v1240_v53  ;;  %v1003_v5 = vmul.f32 %v2592_v61, %v3228_v31 }
 0x2fb   : > { %v2594_v63 = vpop.eup %2593 }
 0x2fc   : > { %v1002_v3 = vmul.f32 %v2594_v63, %v3243_v39  ;;  %v2596_v4 = vpop.eup %2595  ;;  %v1014_v8 = vpack.c.bf16 %v1004_v1, %v1003_v5  ;;  %v1165_v31 = vpop.permute.xlu1 %1164 }
 0x2fd   : > { %v1005_v9 = vmul.f32 %v2596_v4, %v3230_v34 }
 0x2fe   : > { %v1013_v6 = vpack.c.bf16 %v1002_v3, %v1001_v2 }
 0x2ff   : > { %v2598_v7 = vpop.eup %2597 }
 0x300   : > { %v2600_v10 = vpop.eup %2599  ;;  %2297 = vmatprep.mubr.bf16.mxu1 %v1013_v6  ;;  %v1006_v44 = vmul.f32 %v2598_v7, %v3246_v42  ;;  %v1169_v34 = vpop.permute.xlu1 %1168 }
 0x301   : > { %2298 = vmatmul.mubr.bf16.gmra.mrb[8].mxu1 %v1014_v8  ;;  %v2602_v45 = vpop.eup %2601  ;;  %v1008_v49 = vmul.f32 %v2600_v10, %v3237_v37  ;;  %v1171_v42 = vpop.permute.xlu0 %1170 }
 0x302   : > { %v1015_v46 = vpack.c.bf16 %v1006_v44, %v1005_v9  ;;  %v1007_v36 = vmul.f32 %v2602_v45, %v3223_v28 }
 0x304   : > { %2301 = vmatprep.mubr.bf16.mxu1 %v1015_v46  ;;  %v1016_v39 = vpack.c.bf16 %v1008_v49, %v1007_v36  ;;  %v1173_v37 = vpop.permute.xlu1 %1172 }
 0x305   : > { %v1175_v16 = vpop.permute.xlu0 %1174 }
 0x308   : > { %v1177_v28 = vpop.permute.xlu1 %1176 }
 0x309   : > { %2302 = vmatmul.mubr.bf16.gmra.mrb[12].mxu1 %v1016_v39  ;;  %v1492_v59 = vpop.permute.xlu0 %1491 }
 0x30a   : > { %2321 = vmatprep.mubr.msk.bf16.mxu1 %vm719_vm0, %v1163_v19  ;;  %2337 = vmatprep.subr.bf16.mxu0 %v1492_v59 }
 0x30b   : > { %2338 = vmatpush3.bf16.msra.mxu0 %v1492_v59 }
 0x30c   : > { %v1494_v57 = vpop.permute.xlu1 %1493 }
 0x30d   : > { %2339 = vmatprep.subr.bf16.mxu0 %v1494_v57  ;;  %v1496_v54 = vpop.permute.xlu0 %1495 }
 0x30f   : > { %2340 = vmatpush3.bf16.msra.mxu0 %v1494_v57 }
 0x310   : > { %2341 = vmatprep.subr.bf16.mxu0 %v1496_v54 }
 0x311   : > { %2322 = vmatmul.mubr.msk.bf16.vlgmr.msra.gmra.mrb[16].mxu1 %vm719_vm0, %v1165_v31 }
 0x312   : > { %2325 = vmatprep.mubr.msk.bf16.mxu1 %vm719_vm0, %v1167_v26 }
 0x313   : > { %2342 = vmatpush3.bf16.msra.mxu0 %v1496_v54 }
 0x319   : > { %2326 = vmatmul.mubr.msk.bf16.gmra.mrb[20].mxu1 %vm719_vm0, %v1169_v34 }
 0x31a   : > { %2329 = vmatprep.mubr.msk.bf16.mxu1 %vm719_vm0, %v1171_v42 }
 0x321   : > { %2330 = vmatmul.mubr.msk.bf16.gmra.mrb[24].mxu1 %vm719_vm0, %v1173_v37 }
 0x322   : > { %2333 = vmatprep.mubr.msk.bf16.mxu1 %vm719_vm0, %v1175_v16 }
 0x329   : > { %2334 = vmatmul.mubr.msk.bf16.gmra.mrb[28].mxu1 %vm719_vm0, %v1177_v28 }
 0x38b   : > { %v3319_v23 = vpop.f32.mrb[0].mxu1 }
 0x38c   : > { %v3321_v21 = vpop.f32.mrb[1].mxu1 }
 0x38d   : > { %v3323_v52 = vpop.f32.mrb[2].mxu1 }
 0x38e   : > { %v3325_v50 = vpop.f32.mrb[3].mxu1 }
 0x3c3   : > { %v3327_v56 = vpop.f32.mrb[4].mxu1 }
 0x3c4   : > { %v3329_v58 = vpop.f32.mrb[5].mxu1 }
 0x3c5   : > { %v3331_v27 = vpop.f32.mrb[6].mxu1 }
 0x3c6   : > { %v3333_v32 = vpop.f32.mrb[7].mxu1 }
 0x3d4   : > { %v3335_v55 = vpop.f32.mrb[8].mxu1 }
 0x3d5   : > { %v3337_v33 = vpop.f32.mrb[9].mxu1 }
 0x3d6   : > { %v3339_v60 = vpop.f32.mrb[10].mxu1 }
 0x3d7   : > { %v3341_v30 = vpop.f32.mrb[11].mxu1 }
 0x3dc   : > { %v3343_v62 = vpop.f32.mrb[12].mxu1 }
 0x3dd   : > { %v3345_v35 = vpop.f32.mrb[13].mxu1 }
 0x3de   : > { %v3347_v43 = vpop.f32.mrb[14].mxu1 }
 0x3df   : > { %v3349_v47 = vpop.f32.mrb[15].mxu1 }
 0x3e4   : > { %v2323_v40 = vpop.f32.mrb[16].mxu1 }
 0x3e5   : > { %v1285_v20 = vadd.f32 %v2323_v40, %v3123_v17  ;;  %v1276_v22 = vpop.f32.mrb[17].mxu1 }
 0x3e6   : > { %v2324_v24 = vpop.f32.mrb[18].mxu1  ;;  %v1277_v29 = vadd.f32 %v3123_v17, %v1276_v22 }
 0x3e7   : > { %1343 = vmax.xlane.f32.xlu0 %v1285_v20  ;;  %v1279_v38 = vpop.f32.mrb[19].mxu1  ;;  %v1288_v18 = vadd.f32 %v2324_v24, %v3123_v17 }
 0x3e8   : > { %v1280_v48 = vadd.f32 %v3123_v17, %v1279_v38 }
 0x3ea   : > { %1341 = vmax.xlane.f32.xlu1 %v1280_v48 }
 0x3eb   : > { %1339 = vmax.xlane.f32.xlu0 %v1277_v29 }
 0x3ec   : > { %v2327_v0 = vpop.f32.mrb[20].mxu1 }
 0x3ed   : > { %v1292_v51 = vpop.f32.mrb[21].mxu1  ;;  %v1301_v41 = vadd.f32 %v2327_v0, %v3123_v17 }
 0x3ee   : > { %v2328_v25 = vpop.f32.mrb[22].mxu1  ;;  %v1293_v2 = vadd.f32 %v3123_v17, %v1292_v51 }
 0x3ef   : > { %v3357_v53 = vadd.f32 %v2328_v25, %v3123_v17  ;;  %1345 = vmax.xlane.f32.xlu0 %v1288_v18  ;;  %v1295_v61 = vpop.f32.mrb[23].mxu1 }
 0x3f0   : > { %v1296_v63 = vadd.f32 %v3123_v17, %v1295_v61 }
 0x3f1   : > { %1353 = vmax.xlane.f32.xlu1 %v3357_v53 }
 0x3f3   : > { %1351 = vmax.xlane.f32.xlu0 %v1301_v41 }
 0x3f4   : > { %v2331_v1 = vpop.f32.mrb[24].mxu1 }
 0x3f5   : > { %1349 = vmax.xlane.f32.xlu1 %v1296_v63  ;;  %v1308_v3 = vpop.f32.mrb[25].mxu1  ;;  %v3363_v5 = vadd.f32 %v2331_v1, %v3123_v17 }
 0x3f6   : > { %v2332_v4 = vpop.f32.mrb[26].mxu1  ;;  %v3374_v9 = vadd.f32 %v3123_v17, %v1308_v3 }
 0x3f7   : > { %v3366_v6 = vadd.f32 %v2332_v4, %v3123_v17  ;;  %1347 = vmax.xlane.f32.xlu0 %v1293_v2  ;;  %v1311_v7 = vpop.f32.mrb[27].mxu1 }
 0x3f8   : > { %v3370_v8 = vadd.f32 %v3123_v17, %v1311_v7 }
 0x3f9   : > { %1361 = vmax.xlane.f32.xlu1 %v3366_v6 }
 0x3fb   : > { %1359 = vmax.xlane.f32.xlu0 %v3363_v5 }
 0x3fc   : > { %v2335_v10 = vpop.f32.mrb[28].mxu1 }
 0x3fd   : > { %1357 = vmax.xlane.f32.xlu1 %v3370_v8  ;;  %v1324_v44 = vpop.f32.mrb[29].mxu1  ;;  %v3379_v46 = vadd.f32 %v2335_v10, %v3123_v17 }
 0x3fe   : > { %v2336_v45 = vpop.f32.mrb[30].mxu1  ;;  %v3383_v36 = vadd.f32 %v3123_v17, %v1324_v44 }
 0x3ff   : > { %1355 = vmax.xlane.f32.xlu0 %v3374_v9  ;;  %v1327_v49 = vpop.f32.mrb[31].mxu1  ;;  %v3391_v39 = vadd.f32 %v2336_v45, %v3123_v17 }
 0x400   : > { %v3395_v19 = vadd.f32 %v3123_v17, %v1327_v49 }
 0x403   : > { %1367 = vmax.xlane.f32.xlu0 %v3379_v46 }
 0x407   : > { %1363 = vmax.xlane.f32.xlu0 %v3383_v36 }
 0x40e   : > { %1499 = vrot.lane.b32.xlu1 %v3097_v12, %s2755_s6 }
 0x41d   : > { %1497 = vrot.lane.b32.xlu0 %v3093_v11, %s2755_s6 }
 0x432   : > { %1369 = vmax.xlane.f32.xlu1 %v3391_v39 }
 0x436   : > { %1365 = vmax.xlane.f32.xlu1 %v3395_v19 }
 0x447   : > { %1501 = vrot.lane.b32.xlu1 %v3102_v13, %s2755_s6 }
 0x474   : > { %v1344_v31 = vpop.xlane.xlu0 %1343 }
 0x475   : > { %v1373_v26 = vsub.f32 %v1285_v20, %v1344_v31 }
 0x477   : > { %v1391_v34 = vmul.f32 1.442695, %v1373_v26  ;;  %v1342_v42 = vpop.xlane.xlu1 %1341 }
 0x478   : > { %v1340_v12 = vpop.xlane.xlu0 %1339  ;;  %v1372_v16 = vsub.f32 %v1280_v48, %v1342_v42 }
 0x479   : > { %2603 = vpow2.f32 %v1391_v34  ;;  %v1371_v11 = vsub.f32 %v1277_v29, %v1340_v12 }
 0x47a   : > { %v1389_v54 = vmul.f32 1.442695, %v1372_v16 }
 0x47b   : > { %v1387_v37 = vmul.f32 1.442695, %v1371_v11 }
 0x47c   : > { %v1346_v28 = vpop.xlane.xlu0 %1345 }
 0x47d   : > { %2605 = vpow2.f32 %v1387_v37  ;;  %v1374_v59 = vsub.f32 %v1288_v18, %v1346_v28 }
 0x47e   : > { %v1354_v57 = vpop.xlane.xlu1 %1353 }
 0x47f   : > { %v1393_v17 = vmul.f32 1.442695, %v1374_v59  ;;  %v1378_v48 = vsub.f32 %v3357_v53, %v1354_v57 }
 0x480   : > { %v1352_v40 = vpop.xlane.xlu0 %1351 }
 0x481   : > { %2607 = vpow2.f32 %v1393_v17  ;;  %v1377_v22 = vsub.f32 %v1301_v41, %v1352_v40  ;;  %v1401_v1 = vmul.f32 1.442695, %v1378_v48 }
 0x482   : > { %v1350_v24 = vpop.xlane.xlu1 %1349  ;;  %2609 = vpow2.f32 %v1389_v54 }
 0x483   : > { %v3400_v13 = vpop.eup %2603  ;;  %v1399_v20 = vmul.f32 1.442695, %v1377_v22  ;;  %v1376_v38 = vsub.f32 %v1296_v63, %v1350_v24 }
 0x484   : > { %1423 = vadd.xlane.f32.xlu1 %v3400_v13  ;;  %v1348_v29 = vpop.xlane.xlu0 %1347 }
 0x485   : > { %2611 = vpow2.f32 %v1399_v20  ;;  %v1397_v0 = vmul.f32 1.442695, %v1376_v38  ;;  %v1375_v18 = vsub.f32 %v1293_v2, %v1348_v29 }
 0x486   : > { %v1362_v61 = vpop.xlane.xlu1 %1361 }
 0x487   : > { %v3404_v51 = vpop.eup %2605  ;;  %v1395_v25 = vmul.f32 1.442695, %v1375_v18  ;;  %2613 = vpow2.f32 %v1397_v0  ;;  %v1382_v4 = vsub.f32 %v3366_v6, %v1362_v61 }
 0x488   : > { %1419 = vadd.xlane.f32.xlu1 %v3404_v51  ;;  %v1360_v41 = vpop.xlane.xlu0 %1359 }
 0x489   : > { %2615 = vpow2.f32 %v1395_v25  ;;  %v1381_v63 = vsub.f32 %v3363_v5, %v1360_v41  ;;  %v1409_v31 = vmul.f32 1.442695, %v1382_v4 }
 0x48a   : > { %2617 = vpow2.f32 %v1401_v1  ;;  %v1358_v7 = vpop.xlane.xlu1 %1357 }
 0x48b   : > { %v3408_v3 = vpop.eup %2607  ;;  %v1407_v53 = vmul.f32 1.442695, %v1381_v63  ;;  %v1380_v5 = vsub.f32 %v3370_v8, %v1358_v7 }
 0x48c   : > { %1425 = vadd.xlane.f32.xlu1 %v3408_v3  ;;  %v1356_v2 = vpop.xlane.xlu0 %1355  ;;  %v3413_v44 = vpop.eup %2609 }
 0x48d   : > { %v1379_v10 = vsub.f32 %v3374_v9, %v1356_v2  ;;  %2619 = vpow2.f32 %v1407_v53  ;;  %v1405_v42 = vmul.f32 1.442695, %v1380_v5 }
 0x48e   : > { %v1500_v59 = vpop.permute.xlu1 %1499 }
 0x48f   : > { %v3415_v45 = vpop.eup %2611  ;;  %v1403_v49 = vmul.f32 1.442695, %v1379_v10 }
 0x490   : > { %1421 = vadd.xlane.f32.xlu1 %v3413_v44  ;;  %1431 = vadd.xlane.f32.xlu0 %v3415_v45  ;;  %v1368_v6 = vpop.xlane.xlu0 %1367 }
 0x491   : > { %2621 = vpow2.f32 %v1403_v49  ;;  %v1385_v26 = vsub.f32 %v3379_v46, %v1368_v6  ;;  %v3421_v34 = vpop.eup %2613 }
 0x492   : > { %2623 = vpow2.f32 %v1409_v31 }
 0x493   : > { %v3423_v9 = vpop.eup %2615  ;;  %v1415_v12 = vmul.f32 1.442695, %v1385_v26 }
 0x494   : > { %1429 = vadd.xlane.f32.xlu1 %v3421_v34  ;;  %1427 = vadd.xlane.f32.xlu0 %v3423_v9  ;;  %v1364_v8 = vpop.xlane.xlu0 %1363  ;;  %v3428_v37 = vpop.eup %2617 }
 0x495   : > { %2625 = vpow2.f32 %v1415_v12  ;;  %v1383_v11 = vsub.f32 %v3383_v36, %v1364_v8 }
 0x496   : > { %2627 = vpow2.f32 %v1405_v42 }
 0x497   : > { %v1411_v16 = vmul.f32 1.442695, %v1383_v11  ;;  %v3431_v28 = vpop.eup %2619 }
 0x498   : > { %1433 = vadd.xlane.f32.xlu0 %v3428_v37  ;;  %v1498_v46 = vpop.permute.xlu0 %1497 }
 0x499   : > { %2629 = vpow2.f32 %v1411_v16  ;;  %2343 = vmatprep.subr.bf16.mxu0 %v1498_v46 }
 0x49a   : > { %2344 = vmatpush3.bf16.msra.mxu0 %v1498_v46 }
 0x49b   : > { %v3433_v57 = vpop.eup %2621  ;;  %2345 = vmatprep.subr.bf16.mxu0 %v1500_v59 }
 0x49c   : > { %1439 = vadd.xlane.f32.xlu0 %v3431_v28  ;;  %1435 = vadd.xlane.f32.xlu1 %v3433_v57  ;;  %v3437_v36 = vpop.eup %2623 }
 0x49e   : > { %2346 = vmatpush3.bf16.msra.mxu0 %v1500_v59 }
 0x49f   : > { %v3439_v17 = vpop.eup %2625 }
 0x4a0   : > { %1441 = vadd.xlane.f32.xlu0 %v3437_v36  ;;  %1447 = vadd.xlane.f32.xlu1 %v3439_v17  ;;  %v3443_v54 = vpop.eup %2627 }
 0x4a3   : > { %v3445_v40 = vpop.eup %2629 }
 0x4a4   : > { %1437 = vadd.xlane.f32.xlu0 %v3443_v54  ;;  %1443 = vadd.xlane.f32.xlu1 %v3445_v40 }
 0x4b5   : > { %1505 = vrot.lane.b32.xlu1 %v3108_v15, %s2755_s6 }
 0x4ba   : > { %1503 = vrot.lane.b32.xlu0 %v3106_v14, %s2755_s6 }
 0x4bf   : > { %v1370_v22 = vpop.xlane.xlu1 %1369 }
 0x4c0   : > { %v1386_v29 = vsub.f32 %v3391_v39, %v1370_v22 }
 0x4c2   : > { %v1417_v0 = vmul.f32 1.442695, %v1386_v29 }
 0x4c3   : > { %v1366_v24 = vpop.xlane.xlu1 %1365 }
 0x4c4   : > { %v1384_v20 = vsub.f32 %v3395_v19, %v1366_v24 }
 0x4c6   : > { %v1413_v48 = vmul.f32 1.442695, %v1384_v20 }
 0x4c7   : > { %v1502_v38 = vpop.permute.xlu1 %1501 }
 0x4c8   : > { %2347 = vmatprep.subr.bf16.mxu0 %v1502_v38  ;;  %2631 = vpow2.f32 %v1413_v48 }
 0x4c9   : > { %2348 = vmatpush3.bf16.msra.mxu0 %v1502_v38  ;;  %2633 = vpow2.f32 %v1417_v0 }
 0x4d2   : > { %v3455_v18 = vpop.eup %2631 }
 0x4d3   : > { %v3458_v15 = vpop.eup %2633 }
 0x4d9   : > { %1445 = vadd.xlane.f32.xlu0 %v3455_v18 }
 0x4dd   : > { %1449 = vadd.xlane.f32.xlu0 %v3458_v15 }
 0x511   : > { %v1424_v14 = vpop.xlane.xlu1 %1423 }
 0x515   : > { %v1420_v25 = vpop.xlane.xlu1 %1419 }
 0x516   : > { %2635 = vrcp.f32 %v1420_v25 }
 0x519   : > { %v1426_v19 = vpop.xlane.xlu1 %1425 }
 0x51d   : > { %v1422_v61 = vpop.xlane.xlu1 %1421  ;;  %v1432_v41 = vpop.xlane.xlu0 %1431 }
 0x51e   : > { %2637 = vrcp.f32 %v1422_v61 }
 0x51f   : > { %2639 = vrcp.f32 %v1426_v19 }
 0x520   : > { %v2636_v4 = vpop.eup %2635 }
 0x521   : > { %v1428_v39 = vpop.xlane.xlu0 %1427  ;;  %v1430_v1 = vpop.xlane.xlu1 %1429  ;;  %v1467_v10 = vmul.f32 %v2636_v4, %v3404_v51 }
 0x522   : > { %2641 = vrcp.f32 %v1430_v1 }
 0x523   : > { %2643 = vrcp.f32 %v1428_v39 }
 0x524   : > { %2645 = vrcp.f32 %v1424_v14 }
 0x525   : > { %v1434_v63 = vpop.xlane.xlu0 %1433 }
 0x526   : > { %2647 = vrcp.f32 %v1434_v63 }
 0x528   : > { %v2638_v53 = vpop.eup %2637 }
 0x529   : > { %v1436_v2 = vpop.xlane.xlu1 %1435  ;;  %v1440_v7 = vpop.xlane.xlu0 %1439  ;;  %v1468_v49 = vmul.f32 %v2638_v53, %v3413_v44 }
 0x52a   : > { %v2640_v42 = vpop.eup %2639 }
 0x52b   : > { %v1483_v31 = vpack.c.bf16 %v1468_v49, %v1467_v10  ;;  %v1470_v46 = vmul.f32 %v2640_v42, %v3408_v3 }
 0x52c   : > { %v2642_v8 = vpop.eup %2641 }
 0x52d   : > { %2353 = vmatprep.mubr.bf16.mxu0 %v1483_v31  ;;  %v1448_v5 = vpop.xlane.xlu1 %1447  ;;  %v1442_v6 = vpop.xlane.xlu0 %1441  ;;  %v1472_v22 = vmul.f32 %v2642_v8, %v3421_v34 }
 0x52e   : > { %v2644_v51 = vpop.eup %2643 }
 0x52f   : > { %v2646_v44 = vpop.eup %2645  ;;  %v1471_v59 = vmul.f32 %v2644_v51, %v3423_v9 }
 0x530   : > { %v1469_v24 = vmul.f32 %v2646_v44, %v3400_v13  ;;  %v2648_v38 = vpop.eup %2647 }
 0x531   : > { %v1444_v26 = vpop.xlane.xlu1 %1443  ;;  %v1438_v12 = vpop.xlane.xlu0 %1437  ;;  %v1485_v29 = vpack.c.bf16 %v1472_v22, %v1471_v59  ;;  %v1474_v3 = vmul.f32 %v2648_v38, %v3428_v37 }
 0x532   : > { %2649 = vrcp.f32 %v1438_v12  ;;  %v1484_v20 = vpack.c.bf16 %v1470_v46, %v1469_v24 }
 0x533   : > { %2651 = vrcp.f32 %v1432_v41 }
 0x534   : > { %2653 = vrcp.f32 %v1436_v2 }
 0x535   : > { %v1504_v11 = vpop.permute.xlu0 %1503  ;;  %v1506_v16 = vpop.permute.xlu1 %1505  ;;  %2655 = vrcp.f32 %v1442_v6 }
 0x536   : > { %2349 = vmatprep.subr.bf16.mxu0 %v1504_v11  ;;  %2657 = vrcp.f32 %v1440_v7 }
 0x537   : > { %2350 = vmatpush3.bf16.msra.mxu0 %v1504_v11  ;;  %2659 = vrcp.f32 %v1444_v26 }
 0x538   : > { %2351 = vmatprep.subr.bf16.mxu0 %v1506_v16 }
 0x53b   : > { %2352 = vmatpush3.bf16.msra.mxu0 %v1506_v16 }
 0x53c   : > { %v2650_v48 = vpop.eup %2649 }
 0x53d   : > { %v2652_v0 = vpop.eup %2651  ;;  %v1476_v25 = vmul.f32 %v2650_v48, %v3443_v54 }
 0x53e   : > { %2354 = vmatmul.mubr.bf16.vlgmr.msra.gmra.mrb[16].mxu0 %v1484_v20  ;;  %v2654_v14 = vpop.eup %2653  ;;  %v1473_v9 = vmul.f32 %v2652_v0, %v3415_v45 }
 0x53f   : > { %2357 = vmatprep.mubr.bf16.mxu0 %v1485_v29  ;;  %v1475_v34 = vmul.f32 %v2654_v14, %v3433_v57  ;;  %v2656_v19 = vpop.eup %2655 }
 0x540   : > { %v1486_v13 = vpack.c.bf16 %v1474_v3, %v1473_v9  ;;  %v2658_v41 = vpop.eup %2657  ;;  %v1478_v39 = vmul.f32 %v2656_v19, %v3437_v36 }
 0x541   : > { %v1487_v61 = vpack.c.bf16 %v1476_v25, %v1475_v34  ;;  %v1477_v1 = vmul.f32 %v2658_v41, %v3431_v28  ;;  %v2660_v45 = vpop.eup %2659 }
 0x542   : > { %v1479_v4 = vmul.f32 %v2660_v45, %v3445_v40 }
 0x543   : > { %v1488_v63 = vpack.c.bf16 %v1478_v39, %v1477_v1 }
 0x546   : > { %2358 = vmatmul.mubr.bf16.gmra.mrb[20].mxu0 %v1486_v13 }
 0x547   : > { %2361 = vmatprep.mubr.bf16.mxu0 %v1487_v61 }
 0x54e   : > { %2362 = vmatmul.mubr.bf16.gmra.mrb[24].mxu0 %v1488_v63 }
 0x566   : > { %v1446_v37 = vpop.xlane.xlu0 %1445 }
 0x567   : > { %2661 = vrcp.f32 %v1446_v37 }
 0x568   : > { %2663 = vrcp.f32 %v1448_v5 }
 0x56a   : > { %v1450_v54 = vpop.xlane.xlu0 %1449 }
 0x56b   : > { %2665 = vrcp.f32 %v1450_v54 }
 0x571   : > { %v2662_v57 = vpop.eup %2661 }
 0x572   : > { %v1480_v53 = vmul.f32 %v2662_v57, %v3455_v18  ;;  %v2664_v2 = vpop.eup %2663 }
 0x573   : > { %v1481_v28 = vmul.f32 %v2664_v2, %v3439_v17 }
 0x574   : > { %v1489_v7 = vpack.c.bf16 %v1480_v53, %v1479_v4 }
 0x575   : > { %v2666_v10 = vpop.eup %2665 }
 0x576   : > { %2365 = vmatprep.mubr.bf16.mxu0 %v1489_v7  ;;  %v1482_v36 = vmul.f32 %v2666_v10, %v3458_v15 }
 0x578   : > { %v1490_v49 = vpack.c.bf16 %v1482_v36, %v1481_v28 }
 0x57a   : > { %2366 = vmatmul.mubr.bf16.gmra.mrb[28].mxu0 %v1490_v49 }
 0x611   : > { %v2355_v31 = vpop.f32.mrb[16].mxu0 }
 0x612   : > { %v1549_v5 = vpop.f32.mrb[17].mxu0 }
 0x613   : > { %v2356_v6 = vpop.f32.mrb[18].mxu0 }
 0x614   : > { %v2475_v26 = vpack.i.bf16 %v2356_v6, %v2355_v31  ;;  %v1552_v12 = vpop.f32.mrb[19].mxu0 }
 0x615   : > { %v2480_v42 = vpack.i.bf16 %v1552_v12, %v1549_v5 }
 0x616   : > { %2476 = vrot.lane.b32.xlu1 %v2475_v26, %s2755_s6 }
 0x617   : > { %2481 = vrot.lane.b32.xlu0 %v2480_v42, %s2755_s6 }
 0x619   : > { %v2359_v40 = vpop.f32.mrb[20].mxu0 }
 0x61a   : > { %v1565_v18 = vpop.f32.mrb[21].mxu0 }
 0x61b   : > { %v2360_v8 = vpop.f32.mrb[22].mxu0 }
 0x61c   : > { %v2485_v11 = vpack.i.bf16 %v2360_v8, %v2359_v40  ;;  %v1568_v16 = vpop.f32.mrb[23].mxu0 }
 0x61d   : > { %v2490_v17 = vpack.i.bf16 %v1568_v16, %v1565_v18 }
 0x61e   : > { %2486 = vrot.lane.b32.xlu1 %v2485_v11, %s2755_s6 }
 0x621   : > { %v2363_v15 = vpop.f32.mrb[24].mxu0 }
 0x622   : > { %2491 = vrot.lane.b32.xlu1 %v2490_v17, %s2755_s6  ;;  %v1581_v51 = vpop.f32.mrb[25].mxu0 }
 0x623   : > { %v2364_v44 = vpop.f32.mrb[26].mxu0 }
 0x624   : > { %v2495_v46 = vpack.i.bf16 %v2364_v44, %v2363_v15  ;;  %v1584_v59 = vpop.f32.mrb[27].mxu0 }
 0x625   : > { %v2500_v22 = vpack.i.bf16 %v1584_v59, %v1581_v51 }
 0x626   : > { %2496 = vrot.lane.b32.xlu1 %v2495_v46, %s2755_s6 }
 0x627   : > { %2501 = vrot.lane.b32.xlu0 %v2500_v22, %s2755_s6 }
 0x64d   : > { %v2367_v24 = vpop.f32.mrb[28].mxu0 }
 0x64e   : > { %v1597_v20 = vpop.f32.mrb[29].mxu0 }
 0x64f   : > { %v2368_v38 = vpop.f32.mrb[30].mxu0 }
 0x650   : > { %v2510_v29 = vpack.i.bf16 %v2368_v38, %v2367_v24  ;;  %v1600_v48 = vpop.f32.mrb[31].mxu0 }
 0x651   : > { %v2505_v0 = vpack.i.bf16 %v1600_v48, %v1597_v20 }
 0x652   : > { %2511 = vrot.lane.b32.xlu1 %v2510_v29, %s2755_s6 }
 0x653   : > { %2506 = vrot.lane.b32.xlu0 %v2505_v0, %s2755_s6  ;;  %s3599_s6 = sld [smem:[#allocation8_spill]] (%p2894_p13) }
 0x659   : > { %s1782_s17 = scalar_lea.vmem (%p2894_p13), %s3599_s6, %s2111_s11 }
 0x688   : > { %v2477_v14 = vpop.permute.xlu1 %2476 }
 0x689   : > { %v2479_v3 = vunpack.i.h.bf16 %v2477_v14  ;;  %v2478_v25 = vunpack.i.l.bf16 %v2477_v14  ;;  %v2482_v9 = vpop.permute.xlu0 %2481 }
 0x68a   : > { %v2484_v34 = vunpack.i.h.bf16 %v2482_v9  ;;  %v2483_v13 = vunpack.i.l.bf16 %v2482_v9 }
 0x68b   : > { %v1679_v19 = vsel %vm719_vm0, %v3323_v52, %v2479_v3  ;;  %v1678_v61 = vsel %vm719_vm0, %v3319_v23, %v2478_v25 }
 0x68c   : > { %v2138_v41 = vpack.c.bf16 %v1679_v19, %v1678_v61  ;;  %v1677_v39 = vsel %vm719_vm0, %v3325_v50, %v2484_v34  ;;  %v1676_v1 = vsel %vm719_vm0, %v3321_v21, %v2483_v13 }
 0x68d   : > { %v2133_v63 = vpack.c.bf16 %v1677_v39, %v1676_v1 }
 0x68e   : > { %2170 = vst [vmem:[%s3494_s8 + $0x8] sm:$0xff] %v2138_v41  }
 0x68f   : > { %2134 = vst [vmem:[%s3494_s8] sm:$0xff] %v2133_v63  }
 0x690   : > { %v2487_v37 = vpop.permute.xlu1 %2486 }
 0x691   : > { %v2489_v52 = vunpack.i.h.bf16 %v2487_v37  ;;  %v2488_v54 = vunpack.i.l.bf16 %v2487_v37 }
 0x693   : > { %v1683_v23 = vsel %vm719_vm0, %v3331_v27, %v2489_v52  ;;  %v1682_v50 = vsel %vm719_vm0, %v3327_v56, %v2488_v54 }
 0x694   : > { %v2148_v45 = vpack.c.bf16 %v1683_v23, %v1682_v50  ;;  %v2492_v21 = vpop.permute.xlu1 %2491 }
 0x695   : > { %v2494_v57 = vunpack.i.h.bf16 %v2492_v21  ;;  %v2493_v4 = vunpack.i.l.bf16 %v2492_v21 }
 0x696   : > { %2172 = vst [vmem:[%s3494_s8 + $0x18] sm:$0xff] %v2148_v45  }
 0x697   : > { %v1681_v53 = vsel %vm719_vm0, %v3333_v32, %v2494_v57  ;;  %v1680_v2 = vsel %vm719_vm0, %v3329_v58, %v2493_v4 }
 0x698   : > { %v2143_v7 = vpack.c.bf16 %v1681_v53, %v1680_v2  ;;  %v2497_v10 = vpop.permute.xlu1 %2496 }
 0x699   : > { %v2499_v28 = vunpack.i.h.bf16 %v2497_v10  ;;  %v2498_v27 = vunpack.i.l.bf16 %v2497_v10  ;;  %v2502_v36 = vpop.permute.xlu0 %2501 }
 0x69a   : > { %2171 = vst [vmem:[%s3494_s8 + $0x10] sm:$0xff] %v2143_v7   ;;  %v2504_v56 = vunpack.i.h.bf16 %v2502_v36  ;;  %v2503_v49 = vunpack.i.l.bf16 %v2502_v36 }
 0x69b   : > { %v1687_v31 = vsel %vm719_vm0, %v3339_v60, %v2499_v28  ;;  %v1686_v5 = vsel %vm719_vm0, %v3335_v55, %v2498_v27 }
 0x69c   : > { %v2158_v32 = vpack.c.bf16 %v1687_v31, %v1686_v5  ;;  %v1685_v6 = vsel %vm719_vm0, %v3341_v30, %v2504_v56  ;;  %v1684_v58 = vsel %vm719_vm0, %v3337_v33, %v2503_v49 }
 0x69d   : > { %v2153_v26 = vpack.c.bf16 %v1685_v6, %v1684_v58  ;;  %v1810_v44 = vld [vmem:[%s3494_s8 + $0x18] sm:$0xf] (%p2894_p13)  ;;  %v1812_v46 = vld [vmem:[%s3494_s8 + $0x1c] sm:$0xf] (%p2894_p13) }
 0x69e   : > { %2174 = vst [vmem:[%s3494_s8 + $0x28] sm:$0xff] %v2158_v32   ;;  %1811 = vst [vmem:[%s1782_s17 + $0x30] sm:$0xf] (%p2894_p13), %v1810_v44 }
 0x69f   : > { %2173 = vst [vmem:[%s3494_s8 + $0x20] sm:$0xff] %v2153_v26   ;;  %1813 = vst [vmem:[%s1782_s17 + $0x38] sm:$0xf] (%p2894_p13), %v1812_v46 }
 0x6a1   : > { %v1806_v15 = vld [vmem:[%s3494_s8 + $0x10] sm:$0xf] (%p2894_p13)  ;;  %v1808_v51 = vld [vmem:[%s3494_s8 + $0x14] sm:$0xf] (%p2894_p13) }
 0x6a2   : > { %1807 = vst [vmem:[%s1782_s17 + $0x20] sm:$0xf] (%p2894_p13), %v1806_v15  ;;  %1809 = vst [vmem:[%s1782_s17 + $0x28] sm:$0xf] (%p2894_p13), %v1808_v51 }
 0x6a5   : > { %v1818_v24 = vld [vmem:[%s3494_s8 + $0x28] sm:$0xf] (%p2894_p13)  ;;  %v1820_v20 = vld [vmem:[%s3494_s8 + $0x2c] sm:$0xf] (%p2894_p13) }
 0x6a6   : > { %v1814_v59 = vld [vmem:[%s3494_s8 + $0x20] sm:$0xf] (%p2894_p13)  ;;  %v1816_v22 = vld [vmem:[%s3494_s8 + $0x24] sm:$0xf] (%p2894_p13)  ;;  %1819 = vst [vmem:[%s1782_s17 + $0x50] sm:$0xf] (%p2894_p13), %v1818_v24 }
 0x6a7   : > { %1815 = vst [vmem:[%s1782_s17 + $0x40] sm:$0xf] (%p2894_p13), %v1814_v59  ;;  %1817 = vst [vmem:[%s1782_s17 + $0x48] sm:$0xf] (%p2894_p13), %v1816_v22 }
 0x6a8   : > { %1821 = vst [vmem:[%s1782_s17 + $0x58] sm:$0xf] (%p2894_p13), %v1820_v20 }
 0x6c4   : > { %v2512_v12 = vpop.permute.xlu1 %2511 }
 0x6c5   : > { %v2514_v42 = vunpack.i.h.bf16 %v2512_v12  ;;  %v2513_v40 = vunpack.i.l.bf16 %v2512_v12  ;;  %v2507_v18 = vpop.permute.xlu0 %2506  ;;  %1778 = sbr.rel (!%p2894_p13) target bundleno = 1749 (0x6d5), region = 163 }
 0x6c6   : > { %v2509_v60 = vunpack.i.h.bf16 %v2507_v18  ;;  %v2508_v8 = vunpack.i.l.bf16 %v2507_v18 }
 0x6c7   : > { %v1691_v55 = vsel %vm719_vm0, %v3347_v43, %v2514_v42  ;;  %v1690_v30 = vsel %vm719_vm0, %v3343_v62, %v2513_v40  ;;  %v1798_v62 = vld [vmem:[%s3494_s8] sm:$0xf] (%p2894_p13)  ;;  %v1802_v43 = vld [vmem:[%s3494_s8 + $0x8] sm:$0xf] (%p2894_p13) }
 0x6c8   : > { %v2168_v11 = vpack.c.bf16 %v1691_v55, %v1690_v30  ;;  %v1689_v33 = vsel %vm719_vm0, %v3349_v47, %v2509_v60  ;;  %v1688_v16 = vsel %vm719_vm0, %v3345_v35, %v2508_v8  ;;  %v1800_v35 = vld [vmem:[%s3494_s8 + $0x4] sm:$0xf] (%p2894_p13)  ;;  %v1804_v47 = vld [vmem:[%s3494_s8 + $0xc] sm:$0xf] (%p2894_p13)  ;;  %1799 = vst [vmem:[%s1782_s17] sm:$0xf] (%p2894_p13), %v1798_v62 }
 0x6c9   : > { %v2163_v17 = vpack.c.bf16 %v1689_v33, %v1688_v16  ;;  %1801 = vst [vmem:[%s1782_s17 + $0x8] sm:$0xf] (%p2894_p13), %v1800_v35  ;;  %1803 = vst [vmem:[%s1782_s17 + $0x10] sm:$0xf] (%p2894_p13), %v1802_v43 }
 0x6ca   : > { %2176 = vst [vmem:[%s3494_s8 + $0x38] sm:$0xff] %v2168_v11   ;;  %1805 = vst [vmem:[%s1782_s17 + $0x18] sm:$0xf] (%p2894_p13), %v1804_v47 }
 0x6cb   : > { %2175 = vst [vmem:[%s3494_s8 + $0x30] sm:$0xff] %v2163_v17  }
 0x6d1   : > { %v1826_v48 = vld [vmem:[%s3494_s8 + $0x38] sm:$0xf]  ;;  %v1828_v0 = vld [vmem:[%s3494_s8 + $0x3c] sm:$0xf] }
 0x6d2   : > { %v1822_v38 = vld [vmem:[%s3494_s8 + $0x30] sm:$0xf]  ;;  %v1824_v29 = vld [vmem:[%s3494_s8 + $0x34] sm:$0xf]  ;;  %1827 = vst [vmem:[%s1782_s17 + $0x70] sm:$0xf] %v1826_v48 }
 0x6d3   : > { %1823 = vst [vmem:[%s1782_s17 + $0x60] sm:$0xf] %v1822_v38  ;;  %1825 = vst [vmem:[%s1782_s17 + $0x68] sm:$0xf] %v1824_v29 }
 0x6d4   : > { %1829 = vst [vmem:[%s1782_s17 + $0x78] sm:$0xf] %v1828_v0 }
 0x6d5 PF: > { %s14_s25 = sadd.s32 1, %s2753_s25   ;;  %s3600_s4 = sld [smem:[#allocation7_spill]] }
 0x6d6   : > { %p11_p5 = scmp.ge.s32.totalorder %s14_s25, 6   ;;  %s3601_s15 = smov %s2717_s16 }
 0x6d7   : > { %s3602_s16 = smov %s2899_s29  ;;  %s3603_s17 = smov %s2725_s18 }
 0x6d8   : > { %s3604_s18 = smov %s2877_s5  ;;  %s3605_s19 = smov %s2733_s20 }
 0x6d9   : > { %s3606_s20 = smov %s2874_s26  ;;  %s3607_s21 = smov %s2745_s23 }
 0x6da   : > { %s3608_s22 = smov %s2749_s24  ;;  %s3609_s23 = smov %s3612_s27 }
 0x6db   : > { %s3610_s24 = smov %s3600_s4  ;;  %13 = sbr.rel (!%p11_p5) target bundleno = 8 (0x8), region = 254 }

// kernel: xlm_r_forward.12
= control target key start
LH: loop header
LB: loop body
LE: loop exit
PB: predicated region body
PF: predicated region fallthrough
CT: control target
= control target key end

     0   :  { %s3606_s1 = inlined_call_operand.vmem [shape: bf16[256,256], index: 1, kind: input, shape index: {}]   ;;  %s3607_s0 = inlined_call_operand.vmem [shape: bf16[256,256], index: 0, kind: input, shape index: {}]   ;;  %s3608_s2 = inlined_call_operand.vmem [shape: f32[1,256], index: 2, kind: input, shape index: {}]   ;;  %s3609_s3 = inlined_call_operand.vmem [shape: bf16[256,256], index: 3, kind: input, shape index: {}]   ;;  %s3610_s4 = inlined_call_operand.vmem [shape: f32[1,256], index: 4, kind: input, shape index: {}]   ;;  %s3611_s5 = inlined_call_operand.vmem [shape: f32[1,256], index: 5, kind: input, shape index: {}]   ;;  %s3612_s6 = inlined_call_operand.vmem [shape: bf16[256,256], index: 6, kind: output, shape index: {}]  }
   0x1   :  { %v2216_v0 = vld [vmem:[%s3606_s1 + $0x4] ss:$8 sps:$4 sm:$0xff]   ;;  %v2218_v1 = vld [vmem:[%s3606_s1] ss:$8 sps:$4 sm:$0xff]   ;;  %v2219_v2 = vld [vmem:[%s3606_s1 + $0x14] ss:$8 sps:$4 sm:$0xff]  }
   0x2   :  { %539 = vmatprep.subr.bf16.mxu0 %v2216_v0  ;;  %2184 = vmatprep.subr.bf16.mxu1 %v2216_v0  ;;  %v2221_v3 = vld [vmem:[%s3606_s1 + $0x10] ss:$8 sps:$4 sm:$0xff]   ;;  %v2222_v4 = vld [vmem:[%s3606_s1 + $0x24] ss:$8 sps:$4 sm:$0xff]   ;;  %v2224_v5 = vld [vmem:[%s3606_s1 + $0x20] ss:$8 sps:$4 sm:$0xff]   ;;  %v929_v0 = vlaneseq }
   0x3   :  { %540 = vmatpush1.bf16.msra.mxu0 %v2218_v1  ;;  %2200 = vmatpush1.bf16.msra.mxu1 %v2218_v1  ;;  %v2225_v6 = vld [vmem:[%s3606_s1 + $0x34] ss:$8 sps:$4 sm:$0xff]   ;;  %v2227_v7 = vld [vmem:[%s3606_s1 + $0x30] ss:$8 sps:$4 sm:$0xff]   ;;  %v2228_v8 = vld [vmem:[%s3606_s1 + $0x44] ss:$8 sps:$4 sm:$0xff]  }
   0x4   :  { %541 = vmatprep.subr.bf16.mxu0 %v2219_v2  ;;  %2185 = vmatprep.subr.bf16.mxu1 %v2219_v2  ;;  %v2230_v9 = vld [vmem:[%s3606_s1 + $0x40] ss:$8 sps:$4 sm:$0xff]   ;;  %v2231_v10 = vld [vmem:[%s3606_s1 + $0x54] ss:$8 sps:$4 sm:$0xff]   ;;  %v2233_v11 = vld [vmem:[%s3606_s1 + $0x50] ss:$8 sps:$4 sm:$0xff]  }
   0x5   :  { %v2234_v12 = vld [vmem:[%s3606_s1 + $0x64] ss:$8 sps:$4 sm:$0xff]   ;;  %v2236_v14 = vld [vmem:[%s3606_s1 + $0x60] ss:$8 sps:$4 sm:$0xff]   ;;  %v2237_v16 = vld [vmem:[%s3606_s1 + $0x74] ss:$8 sps:$4 sm:$0xff]  }
   0x6   :  { %v2266_v13 = vld [vmem:[%s3607_s0 + $0x4] ss:$8 sps:$4 sm:$0xff]   ;;  %v2239_v17 = vld [vmem:[%s3606_s1 + $0x70] ss:$8 sps:$4 sm:$0xff]   ;;  %v2242_v19 = vld [vmem:[%s3606_s1 + $0x80] ss:$8 sps:$4 sm:$0xff]  }
   0x7   :  { %542 = vmatpush1.bf16.msra.mxu0 %v2221_v3  ;;  %2201 = vmatpush1.bf16.msra.mxu1 %v2221_v3  ;;  %v2269_v15 = vld [vmem:[%s3607_s0 + $0x84] ss:$8 sps:$4 sm:$0xff]   ;;  %v2243_v20 = vld [vmem:[%s3606_s1 + $0x94] ss:$8 sps:$4 sm:$0xff]   ;;  %v2245_v21 = vld [vmem:[%s3606_s1 + $0x90] ss:$8 sps:$4 sm:$0xff]  }
   0x8   :  { %543 = vmatprep.subr.bf16.mxu0 %v2222_v4  ;;  %2186 = vmatprep.subr.bf16.mxu1 %v2222_v4  ;;  %v2240_v18 = vld [vmem:[%s3606_s1 + $0x84] ss:$8 sps:$4 sm:$0xff]   ;;  %v2248_v23 = vld [vmem:[%s3606_s1 + $0xa0] ss:$8 sps:$4 sm:$0xff]   ;;  %v2249_v24 = vld [vmem:[%s3606_s1 + $0xb4] ss:$8 sps:$4 sm:$0xff]  }
   0x9   :  { %571 = vmatprep.mubr.bf16.mxu0 %v2266_v13  ;;  %651 = vmatprep.mubr.bf16.mxu1 %v2269_v15  ;;  %v2246_v22 = vld [vmem:[%s3606_s1 + $0xa4] ss:$8 sps:$4 sm:$0xff]   ;;  %v2251_v25 = vld [vmem:[%s3606_s1 + $0xb0] ss:$8 sps:$4 sm:$0xff]   ;;  %v2254_v27 = vld [vmem:[%s3606_s1 + $0xc0] ss:$8 sps:$4 sm:$0xff]  }
   0xa   :  { %v2252_v26 = vld [vmem:[%s3606_s1 + $0xc4] ss:$8 sps:$4 sm:$0xff]   ;;  %v2255_v28 = vld [vmem:[%s3606_s1 + $0xd4] ss:$8 sps:$4 sm:$0xff]   ;;  %v2257_v29 = vld [vmem:[%s3606_s1 + $0xd0] ss:$8 sps:$4 sm:$0xff]  }
   0xb   :  { %544 = vmatpush1.bf16.msra.mxu0 %v2224_v5  ;;  %2202 = vmatpush1.bf16.msra.mxu1 %v2224_v5  ;;  %v2258_v30 = vld [vmem:[%s3606_s1 + $0xe4] ss:$8 sps:$4 sm:$0xff]   ;;  %v2260_v31 = vld [vmem:[%s3606_s1 + $0xe0] ss:$8 sps:$4 sm:$0xff]   ;;  %v2261_v32 = vld [vmem:[%s3606_s1 + $0xf4] ss:$8 sps:$4 sm:$0xff]  }
   0xc   :  { %545 = vmatprep.subr.bf16.mxu0 %v2225_v6  ;;  %2187 = vmatprep.subr.bf16.mxu1 %v2225_v6  ;;  %v2263_v33 = vld [vmem:[%s3606_s1 + $0xf0] ss:$8 sps:$4 sm:$0xff]   ;;  %v2264_v34 = vld [vmem:[%s3607_s0] ss:$8 sps:$4 sm:$0xff]   ;;  %v2270_v36 = vld [vmem:[%s3607_s0 + $0x14] ss:$8 sps:$4 sm:$0xff]  }
   0xd   :  { %v2267_v35 = vld [vmem:[%s3607_s0 + $0x80] ss:$8 sps:$4 sm:$0xff]   ;;  %v2273_v37 = vld [vmem:[%s3607_s0 + $0x94] ss:$8 sps:$4 sm:$0xff]   ;;  %v2272_v38 = vld [vmem:[%s3607_s0 + $0x10] ss:$8 sps:$4 sm:$0xff]  }
   0xe   :  { %v2275_v39 = vld [vmem:[%s3607_s0 + $0x90] ss:$8 sps:$4 sm:$0xff]   ;;  %v2276_v40 = vld [vmem:[%s3607_s0 + $0x24] ss:$8 sps:$4 sm:$0xff]   ;;  %v2278_v42 = vld [vmem:[%s3607_s0 + $0x20] ss:$8 sps:$4 sm:$0xff]  }
   0xf   :  { %546 = vmatpush1.bf16.msra.mxu0 %v2227_v7  ;;  %2203 = vmatpush1.bf16.msra.mxu1 %v2227_v7  ;;  %v2279_v41 = vld [vmem:[%s3607_s0 + $0xa4] ss:$8 sps:$4 sm:$0xff]   ;;  %v2281_v43 = vld [vmem:[%s3607_s0 + $0xa0] ss:$8 sps:$4 sm:$0xff]   ;;  %v2282_v44 = vld [vmem:[%s3607_s0 + $0x34] ss:$8 sps:$4 sm:$0xff]  }
  0x10   :  { %547 = vmatprep.subr.bf16.mxu0 %v2228_v8  ;;  %2188 = vmatprep.subr.bf16.mxu1 %v2228_v8  ;;  %v2285_v45 = vld [vmem:[%s3607_s0 + $0xb4] ss:$8 sps:$4 sm:$0xff]   ;;  %v2284_v46 = vld [vmem:[%s3607_s0 + $0x30] ss:$8 sps:$4 sm:$0xff]   ;;  %v2288_v48 = vld [vmem:[%s3607_s0 + $0x44] ss:$8 sps:$4 sm:$0xff]  }
  0x11   :  { %v2287_v47 = vld [vmem:[%s3607_s0 + $0xb0] ss:$8 sps:$4 sm:$0xff]   ;;  %v2291_v49 = vld [vmem:[%s3607_s0 + $0xc4] ss:$8 sps:$4 sm:$0xff]   ;;  %v2290_v50 = vld [vmem:[%s3607_s0 + $0x40] ss:$8 sps:$4 sm:$0xff]  }
  0x12   :  { %v2293_v51 = vld [vmem:[%s3607_s0 + $0xc0] ss:$8 sps:$4 sm:$0xff]   ;;  %v2294_v52 = vld [vmem:[%s3607_s0 + $0x54] ss:$8 sps:$4 sm:$0xff]   ;;  %v2296_v54 = vld [vmem:[%s3607_s0 + $0x50] ss:$8 sps:$4 sm:$0xff]  }
  0x13   :  { %548 = vmatpush1.bf16.msra.mxu0 %v2230_v9  ;;  %2204 = vmatpush1.bf16.msra.mxu1 %v2230_v9  ;;  %v2297_v53 = vld [vmem:[%s3607_s0 + $0xd4] ss:$8 sps:$4 sm:$0xff]   ;;  %v2299_v55 = vld [vmem:[%s3607_s0 + $0xd0] ss:$8 sps:$4 sm:$0xff]   ;;  %v2300_v56 = vld [vmem:[%s3607_s0 + $0x64] ss:$8 sps:$4 sm:$0xff]  }
  0x14   :  { %549 = vmatprep.subr.bf16.mxu0 %v2231_v10  ;;  %2189 = vmatprep.subr.bf16.mxu1 %v2231_v10  ;;  %v2303_v57 = vld [vmem:[%s3607_s0 + $0xe4] ss:$8 sps:$4 sm:$0xff]   ;;  %v2302_v58 = vld [vmem:[%s3607_s0 + $0x60] ss:$8 sps:$4 sm:$0xff]   ;;  %v2306_v60 = vld [vmem:[%s3607_s0 + $0x74] ss:$8 sps:$4 sm:$0xff]  }
  0x15   :  { %v2305_v59 = vld [vmem:[%s3607_s0 + $0xe0] ss:$8 sps:$4 sm:$0xff]   ;;  %v2309_v61 = vld [vmem:[%s3607_s0 + $0xf4] ss:$8 sps:$4 sm:$0xff]   ;;  %v2308_v62 = vld [vmem:[%s3607_s0 + $0x70] ss:$8 sps:$4 sm:$0xff]  }
  0x16   :  { %v2311_v63 = vld [vmem:[%s3607_s0 + $0xf0] ss:$8 sps:$4 sm:$0xff]   ;;  %v930_v1 = vshrl.u32 %v929_v0, 7  ;;  %v927_v3 = vld [vmem:[%s3608_s2] sm:$0x3]  ;;  %v1020_v9 = vld [vmem:[%s3609_s3 + $0x88] sm:$0xff] }
  0x17   :  { %550 = vmatpush1.bf16.msra.mxu0 %v2233_v11  ;;  %2205 = vmatpush1.bf16.msra.mxu1 %v2233_v11  ;;  %v1003_v5 = vld [vmem:[%s3609_s3] sm:$0xff]  ;;  %v1004_v15 = vld [vmem:[%s3609_s3 + $0x8] sm:$0xff] }
  0x18   :  { %551 = vmatprep.subr.bf16.mxu0 %v2234_v12  ;;  %2190 = vmatprep.subr.bf16.mxu1 %v2234_v12  ;;  %v2603_v2 = vsub.s32 0, %v930_v1  ;;  %v2608_v4 = vsub.s32 1, %v930_v1  ;;  %v1019_v7 = vld [vmem:[%s3609_s3 + $0x80] sm:$0xff]  ;;  %v1035_v10 = vunpack.c.l.bf16 %v1003_v5 }
  0x19   :  { %v1067_v13 = vunpack.c.l.bf16 %v1019_v7 }
  0x1a   :  { %3660 = vst [vmem:[#allocation3_spill] sm:$0xff] %v2603_v2  ;;  %3661 = vst [vmem:[#allocation4_spill] sm:$0xff] %v2608_v4  ;;  %v2614_v6 = vrot.slane %v927_v3, %v2603_v2  ;;  %v2620_v8 = vrot.slane %v927_v3, %v2608_v4 }
  0x1b   :  { %552 = vmatpush1.bf16.msra.mxu0 %v2236_v14  ;;  %2206 = vmatpush1.bf16.msra.mxu1 %v2236_v14  ;;  %v1068_v14 = vunpack.c.h.bf16 %v1019_v7 }
  0x1c   :  { %553 = vmatprep.subr.bf16.mxu0 %v2237_v16  ;;  %2191 = vmatprep.subr.bf16.mxu1 %v2237_v16  ;;  %v1036_v16 = vunpack.c.h.bf16 %v1003_v5 }
  0x1f   :  { %554 = vmatpush1.bf16.msra.mxu0 %v2239_v17  ;;  %2207 = vmatpush1.bf16.msra.mxu1 %v2239_v17 }
  0x20   :  { %555 = vmatprep.subr.bf16.mxu0 %v2240_v18  ;;  %2192 = vmatprep.subr.bf16.mxu1 %v2240_v18 }
  0x23   :  { %556 = vmatpush1.bf16.msra.mxu0 %v2242_v19  ;;  %2208 = vmatpush1.bf16.msra.mxu1 %v2242_v19 }
  0x24   :  { %557 = vmatprep.subr.bf16.mxu0 %v2243_v20  ;;  %2193 = vmatprep.subr.bf16.mxu1 %v2243_v20 }
  0x27   :  { %558 = vmatpush1.bf16.msra.mxu0 %v2245_v21  ;;  %2209 = vmatpush1.bf16.msra.mxu1 %v2245_v21  ;;  %v1069_v21 = vunpack.c.l.bf16 %v1020_v9 }
  0x28   :  { %559 = vmatprep.subr.bf16.mxu0 %v2246_v22  ;;  %2194 = vmatprep.subr.bf16.mxu1 %v2246_v22 }
  0x2b   :  { %560 = vmatpush1.bf16.msra.mxu0 %v2248_v23  ;;  %2210 = vmatpush1.bf16.msra.mxu1 %v2248_v23 }
  0x2c   :  { %561 = vmatprep.subr.bf16.mxu0 %v2249_v24  ;;  %2195 = vmatprep.subr.bf16.mxu1 %v2249_v24 }
  0x2f   :  { %562 = vmatpush1.bf16.msra.mxu0 %v2251_v25  ;;  %2211 = vmatpush1.bf16.msra.mxu1 %v2251_v25 }
  0x30   :  { %563 = vmatprep.subr.bf16.mxu0 %v2252_v26  ;;  %2196 = vmatprep.subr.bf16.mxu1 %v2252_v26  ;;  %v1070_v26 = vunpack.c.h.bf16 %v1020_v9 }
  0x33   :  { %564 = vmatpush1.bf16.msra.mxu0 %v2254_v27  ;;  %2212 = vmatpush1.bf16.msra.mxu1 %v2254_v27  ;;  %v1037_v27 = vunpack.c.l.bf16 %v1004_v15 }
  0x34   :  { %565 = vmatprep.subr.bf16.mxu0 %v2255_v28  ;;  %2197 = vmatprep.subr.bf16.mxu1 %v2255_v28 }
  0x37   :  { %566 = vmatpush1.bf16.msra.mxu0 %v2257_v29  ;;  %2213 = vmatpush1.bf16.msra.mxu1 %v2257_v29 }
  0x38   :  { %567 = vmatprep.subr.bf16.mxu0 %v2258_v30  ;;  %2198 = vmatprep.subr.bf16.mxu1 %v2258_v30 }
  0x3b   :  { %568 = vmatpush1.bf16.msra.mxu0 %v2260_v31  ;;  %2214 = vmatpush1.bf16.msra.mxu1 %v2260_v31 }
  0x3c   :  { %569 = vmatprep.subr.bf16.mxu0 %v2261_v32  ;;  %2199 = vmatprep.subr.bf16.mxu1 %v2261_v32 }
  0x3f   :  { %570 = vmatpush1.bf16.msra.mxu0 %v2263_v33  ;;  %2215 = vmatpush1.bf16.msra.mxu1 %v2263_v33 }
  0x42   :  { %572 = vmatmul.mubr.bf16.vlgmr.msra.gmra.mrb[0].mxu0 %v2264_v34  ;;  %652 = vmatmul.mubr.bf16.vlgmr.msra.gmra.mrb[0].mxu1 %v2267_v35 }
  0x43   :  { %581 = vmatprep.mubr.bf16.mxu0 %v2270_v36  ;;  %661 = vmatprep.mubr.bf16.mxu1 %v2273_v37  ;;  %v1005_v36 = vld [vmem:[%s3609_s3 + $0x10] sm:$0xff]  ;;  %v1006_v37 = vld [vmem:[%s3609_s3 + $0x18] sm:$0xff] }
  0x4a   :  { %582 = vmatmul.mubr.bf16.gmra.mrb[4].mxu0 %v2272_v38  ;;  %662 = vmatmul.mubr.bf16.gmra.mrb[4].mxu1 %v2275_v39  ;;  %v1021_v38 = vld [vmem:[%s3609_s3 + $0x90] sm:$0xff] }
  0x4b   :  { %591 = vmatprep.mubr.bf16.mxu0 %v2276_v40  ;;  %671 = vmatprep.mubr.bf16.mxu1 %v2279_v41  ;;  %v1038_v41 = vunpack.c.h.bf16 %v1004_v15 }
  0x52   :  { %592 = vmatmul.mubr.bf16.gmra.mrb[8].mxu0 %v2278_v42  ;;  %672 = vmatmul.mubr.bf16.gmra.mrb[8].mxu1 %v2281_v43 }
  0x53   :  { %601 = vmatprep.mubr.bf16.mxu0 %v2282_v44  ;;  %681 = vmatprep.mubr.bf16.mxu1 %v2285_v45  ;;  %v1039_v45 = vunpack.c.l.bf16 %v1005_v36 }
  0x5a   :  { %602 = vmatmul.mubr.bf16.gmra.mrb[12].mxu0 %v2284_v46  ;;  %682 = vmatmul.mubr.bf16.gmra.mrb[12].mxu1 %v2287_v47  ;;  %v1040_v46 = vunpack.c.h.bf16 %v1005_v36  ;;  %v1041_v47 = vunpack.c.l.bf16 %v1006_v37 }
  0x5b   :  { %611 = vmatprep.mubr.bf16.mxu0 %v2288_v48  ;;  %691 = vmatprep.mubr.bf16.mxu1 %v2291_v49  ;;  %v1071_v48 = vunpack.c.l.bf16 %v1021_v38  ;;  %v1022_v49 = vld [vmem:[%s3609_s3 + $0x98] sm:$0xff] }
  0x5c   :  { %v1073_v3 = vunpack.c.l.bf16 %v1022_v49  ;;  %v1074_v5 = vunpack.c.h.bf16 %v1022_v49 }
  0x62   :  { %612 = vmatmul.mubr.bf16.gmra.mrb[16].mxu0 %v2290_v50  ;;  %692 = vmatmul.mubr.bf16.gmra.mrb[16].mxu1 %v2293_v51 }
  0x63   :  { %621 = vmatprep.mubr.bf16.mxu0 %v2294_v52  ;;  %701 = vmatprep.mubr.bf16.mxu1 %v2297_v53 }
  0x6a   :  { %622 = vmatmul.mubr.bf16.gmra.mrb[20].mxu0 %v2296_v54  ;;  %702 = vmatmul.mubr.bf16.gmra.mrb[20].mxu1 %v2299_v55  ;;  %v1042_v54 = vunpack.c.h.bf16 %v1006_v37  ;;  %v1072_v55 = vunpack.c.h.bf16 %v1021_v38 }
  0x6b   :  { %631 = vmatprep.mubr.bf16.mxu0 %v2300_v56  ;;  %711 = vmatprep.mubr.bf16.mxu1 %v2303_v57 }
  0x72   :  { %632 = vmatmul.mubr.bf16.gmra.mrb[24].mxu0 %v2302_v58  ;;  %712 = vmatmul.mubr.bf16.gmra.mrb[24].mxu1 %v2305_v59 }
  0x73   :  { %641 = vmatprep.mubr.bf16.mxu0 %v2306_v60  ;;  %721 = vmatprep.mubr.bf16.mxu1 %v2309_v61 }
  0x7a   :  { %642 = vmatmul.mubr.bf16.gmra.mrb[28].mxu0 %v2308_v62  ;;  %722 = vmatmul.mubr.bf16.gmra.mrb[28].mxu1 %v2311_v63 }
 0x115   :  { %v573_v11 = vpop.f32.mrb[0].mxu0  ;;  %v653_v12 = vpop.f32.mrb[0].mxu1 }
 0x116   :  { %v939_v17 = vadd.f32 %v2614_v6, %v573_v11  ;;  %v971_v18 = vadd.f32 %v2614_v6, %v653_v12  ;;  %v575_v19 = vpop.f32.mrb[1].mxu0  ;;  %v655_v20 = vpop.f32.mrb[1].mxu1 }
 0x117   :  { %v940_v22 = vadd.f32 %v2620_v8, %v575_v19  ;;  %v972_v23 = vadd.f32 %v2620_v8, %v655_v20  ;;  %v577_v24 = vpop.f32.mrb[2].mxu0  ;;  %v657_v25 = vpop.f32.mrb[2].mxu1  ;;  %v1023_v19 = vld [vmem:[%s3609_s3 + $0xa0] sm:$0xff] }
 0x118   :  { %v973_v28 = vadd.f32 %v2614_v6, %v657_v25  ;;  %v579_v29 = vpop.f32.mrb[3].mxu0  ;;  %v659_v30 = vpop.f32.mrb[3].mxu1  ;;  %v2633_v31 = vadd.f32 %v1035_v10, %v939_v17  ;;  %v2635_v32 = vadd.f32 %v1067_v13, %v971_v18  ;;  %v941_v39 = vadd.f32 %v2614_v6, %v577_v24  ;;  %v1007_v17 = vld [vmem:[%s3609_s3 + $0x20] sm:$0xff] }
 0x119   :  { %v2637_v33 = vadd.f32 %v1068_v14, %v972_v23  ;;  %v974_v34 = vadd.f32 %v2620_v8, %v659_v30  ;;  %v2640_v35 = vadd.f32 %v1036_v16, %v940_v22  ;;  %v942_v40 = vadd.f32 %v2620_v8, %v579_v29  ;;  %v1008_v22 = vld [vmem:[%s3609_s3 + $0x28] sm:$0xff] }
 0x11a   :  { %v2653_v42 = vadd.f32 %v1069_v21, %v973_v28  ;;  %v2666_v56 = vadd.f32 %v1037_v27, %v941_v39  ;;  %v1024_v27 = vld [vmem:[%s3609_s3 + $0xa8] sm:$0xff]  ;;  %v1043_v28 = vunpack.c.l.bf16 %v1007_v17  ;;  %v1044_v29 = vunpack.c.h.bf16 %v1007_v17 }
 0x11b   :  { %v1163_v43 = vadd.f32 %v2640_v35, %v2633_v31  ;;  %v2657_v44 = vadd.f32 %v1070_v26, %v974_v34  ;;  %v1211_v53 = vadd.f32 %v2637_v33, %v2635_v32  ;;  %v2668_v57 = vadd.f32 %v1038_v41, %v942_v40 }
 0x11c   :  { %v1075_v30 = vunpack.c.l.bf16 %v1023_v19  ;;  %v1045_v39 = vunpack.c.l.bf16 %v1008_v22  ;;  %v1076_v40 = vunpack.c.h.bf16 %v1023_v19 }
 0x11d   :  { %1164 = vadd.xlane.f32.xlu0 %v1163_v43  ;;  %v583_v50 = vpop.f32.mrb[4].mxu0  ;;  %v1214_v51 = vadd.f32 %v2657_v44, %v2653_v42  ;;  %v663_v52 = vpop.f32.mrb[4].mxu1  ;;  %v1166_v21 = vadd.f32 %v2668_v57, %v2666_v56 }
 0x11e   :  { %v943_v58 = vadd.f32 %v2614_v6, %v583_v50  ;;  %v585_v59 = vpop.f32.mrb[5].mxu0  ;;  %v975_v60 = vadd.f32 %v2614_v6, %v663_v52  ;;  %v665_v61 = vpop.f32.mrb[5].mxu1 }
 0x11f   :  { %v944_v62 = vadd.f32 %v2620_v8, %v585_v59  ;;  %1215 = vadd.xlane.f32.xlu1 %v1214_v51  ;;  %v587_v63 = vpop.f32.mrb[6].mxu0  ;;  %v976_v0 = vadd.f32 %v2620_v8, %v665_v61  ;;  %v667_v1 = vpop.f32.mrb[6].mxu1 }
 0x120   :  { %v2674_v7 = vadd.f32 %v1039_v45, %v943_v58  ;;  %v945_v9 = vadd.f32 %v2614_v6, %v587_v63  ;;  %v2677_v10 = vadd.f32 %v1071_v48, %v975_v60  ;;  %v589_v11 = vpop.f32.mrb[7].mxu0  ;;  %v977_v12 = vadd.f32 %v2614_v6, %v667_v1  ;;  %v669_v13 = vpop.f32.mrb[7].mxu1 }
 0x121   :  { %v2680_v14 = vadd.f32 %v1040_v46, %v944_v62  ;;  %1212 = vadd.xlane.f32.xlu0 %v1211_v53  ;;  %v946_v15 = vadd.f32 %v2620_v8, %v589_v11  ;;  %v2683_v16 = vadd.f32 %v1072_v55, %v976_v0  ;;  %v978_v18 = vadd.f32 %v2620_v8, %v669_v13 }
 0x122   :  { %v2692_v20 = vadd.f32 %v1041_v47, %v945_v9  ;;  %v2701_v24 = vadd.f32 %v1073_v3, %v977_v12  ;;  %v1046_v46 = vunpack.c.h.bf16 %v1008_v22  ;;  %v1077_v48 = vunpack.c.l.bf16 %v1024_v27  ;;  %v1009_v3 = vld [vmem:[%s3609_s3 + $0x30] sm:$0xff]  ;;  %v1010_v12 = vld [vmem:[%s3609_s3 + $0x38] sm:$0xff] }
 0x123   :  { %v2699_v23 = vadd.f32 %v1042_v54, %v946_v15  ;;  %v1169_v25 = vadd.f32 %v2680_v14, %v2674_v7  ;;  %v2705_v26 = vadd.f32 %v1074_v5, %v978_v18  ;;  %v1217_v37 = vadd.f32 %v2683_v16, %v2677_v10  ;;  %v1025_v5 = vld [vmem:[%s3609_s3 + $0xb0] sm:$0xff]  ;;  %v1026_v18 = vld [vmem:[%s3609_s3 + $0xb8] sm:$0xff] }
 0x124   :  { %v1078_v54 = vunpack.c.h.bf16 %v1024_v27  ;;  %v1047_v19 = vunpack.c.l.bf16 %v1009_v3 }
 0x125   :  { %1167 = vadd.xlane.f32.xlu0 %v1166_v21  ;;  %1170 = vadd.xlane.f32.xlu1 %v1169_v25  ;;  %v593_v34 = vpop.f32.mrb[8].mxu0  ;;  %v673_v36 = vpop.f32.mrb[8].mxu1  ;;  %v1172_v38 = vadd.f32 %v2699_v23, %v2692_v20  ;;  %v1220_v53 = vadd.f32 %v2705_v26, %v2701_v24  ;;  %v1048_v21 = vunpack.c.h.bf16 %v1009_v3  ;;  %v1079_v25 = vunpack.c.l.bf16 %v1025_v5  ;;  %v1011_v3 = vld [vmem:[%s3609_s3 + $0x40] sm:$0xff] }
 0x126   :  { %v947_v41 = vadd.f32 %v2614_v6, %v593_v34  ;;  %v595_v43 = vpop.f32.mrb[9].mxu0  ;;  %v979_v45 = vadd.f32 %v2614_v6, %v673_v36  ;;  %v675_v47 = vpop.f32.mrb[9].mxu1  ;;  %v1049_v34 = vunpack.c.l.bf16 %v1010_v12  ;;  %v1080_v36 = vunpack.c.h.bf16 %v1025_v5  ;;  %v1027_v5 = vld [vmem:[%s3609_s3 + $0xc0] sm:$0xff] }
 0x127   :  { %v948_v49 = vadd.f32 %v2620_v8, %v595_v43  ;;  %v597_v50 = vpop.f32.mrb[10].mxu0  ;;  %v980_v51 = vadd.f32 %v2620_v8, %v675_v47  ;;  %v677_v52 = vpop.f32.mrb[10].mxu1  ;;  %v1081_v43 = vunpack.c.l.bf16 %v1026_v18 }
 0x128   :  { %v2720_v55 = vadd.f32 %v1043_v28, %v947_v41  ;;  %v2722_v58 = vadd.f32 %v1075_v30, %v979_v45  ;;  %v949_v59 = vadd.f32 %v2614_v6, %v597_v50  ;;  %v599_v60 = vpop.f32.mrb[11].mxu0  ;;  %v981_v61 = vadd.f32 %v2614_v6, %v677_v52  ;;  %v679_v62 = vpop.f32.mrb[11].mxu1 }
 0x129   :  { %v2726_v63 = vadd.f32 %v1044_v29, %v948_v49  ;;  %1218 = vadd.xlane.f32.xlu0 %v1217_v37  ;;  %1173 = vadd.xlane.f32.xlu1 %v1172_v38  ;;  %v950_v0 = vadd.f32 %v2620_v8, %v599_v60  ;;  %v2729_v1 = vadd.f32 %v1076_v40, %v980_v51  ;;  %v1050_v40 = vunpack.c.h.bf16 %v1010_v12 }
 0x12a   :  { %v2737_v9 = vadd.f32 %v1045_v39, %v949_v59  ;;  %v982_v11 = vadd.f32 %v2620_v8, %v679_v62  ;;  %v2745_v15 = vadd.f32 %v1077_v48, %v981_v61  ;;  %v1082_v50 = vunpack.c.h.bf16 %v1026_v18 }
 0x12b   :  { %v2743_v13 = vadd.f32 %v1046_v46, %v950_v0  ;;  %v1175_v17 = vadd.f32 %v2726_v63, %v2720_v55  ;;  %v1223_v29 = vadd.f32 %v2729_v1, %v2722_v58 }
 0x12c   :  { %v2752_v22 = vadd.f32 %v1078_v54, %v982_v11 }
 0x12d   :  { %1221 = vadd.xlane.f32.xlu1 %v1220_v53  ;;  %1176 = vadd.xlane.f32.xlu0 %v1175_v17  ;;  %v603_v27 = vpop.f32.mrb[12].mxu0  ;;  %v683_v28 = vpop.f32.mrb[12].mxu1  ;;  %v1178_v30 = vadd.f32 %v2743_v13, %v2737_v9  ;;  %v1012_v17 = vld [vmem:[%s3609_s3 + $0x48] sm:$0xff] }
 0x12e   :  { %v951_v37 = vadd.f32 %v2614_v6, %v603_v27  ;;  %v605_v38 = vpop.f32.mrb[13].mxu0  ;;  %v983_v39 = vadd.f32 %v2614_v6, %v683_v28  ;;  %v685_v41 = vpop.f32.mrb[13].mxu1  ;;  %v1226_v49 = vadd.f32 %v2752_v22, %v2745_v15  ;;  %v1051_v27 = vunpack.c.l.bf16 %v1011_v3 }
 0x12f   :  { %v952_v45 = vadd.f32 %v2620_v8, %v605_v38  ;;  %v607_v46 = vpop.f32.mrb[14].mxu0  ;;  %v984_v47 = vadd.f32 %v2620_v8, %v685_v41  ;;  %v687_v48 = vpop.f32.mrb[14].mxu1  ;;  %v1052_v28 = vunpack.c.h.bf16 %v1011_v3 }
 0x130   :  { %v2764_v51 = vadd.f32 %v1047_v19, %v951_v37  ;;  %v2766_v52 = vadd.f32 %v1079_v25, %v983_v39  ;;  %v953_v53 = vadd.f32 %v2614_v6, %v607_v46  ;;  %v609_v54 = vpop.f32.mrb[15].mxu0  ;;  %v985_v59 = vadd.f32 %v2614_v6, %v687_v48  ;;  %v689_v60 = vpop.f32.mrb[15].mxu1  ;;  %v1028_v25 = vld [vmem:[%s3609_s3 + $0xc8] sm:$0xff] }
 0x131   :  { %v2770_v61 = vadd.f32 %v1048_v21, %v952_v45  ;;  %1224 = vadd.xlane.f32.xlu0 %v1223_v29  ;;  %1179 = vadd.xlane.f32.xlu1 %v1178_v30  ;;  %v954_v62 = vadd.f32 %v2620_v8, %v609_v54  ;;  %v2773_v0 = vadd.f32 %v1080_v36, %v984_v47  ;;  %v1083_v30 = vunpack.c.l.bf16 %v1027_v5 }
 0x132   :  { %v2781_v11 = vadd.f32 %v1049_v34, %v953_v53  ;;  %v986_v12 = vadd.f32 %v2620_v8, %v689_v60  ;;  %v2789_v19 = vadd.f32 %v1081_v43, %v985_v59  ;;  %v1053_v39 = vunpack.c.l.bf16 %v1012_v17 }
 0x133   :  { %v2787_v18 = vadd.f32 %v1050_v40, %v954_v62  ;;  %v1181_v21 = vadd.f32 %v2770_v61, %v2764_v51  ;;  %v1229_v37 = vadd.f32 %v2773_v0, %v2766_v52  ;;  %v1084_v40 = vunpack.c.h.bf16 %v1027_v5 }
 0x134   :  { %v2796_v29 = vadd.f32 %v1082_v50, %v986_v12  ;;  %v1054_v46 = vunpack.c.h.bf16 %v1012_v17  ;;  %v1085_v48 = vunpack.c.l.bf16 %v1028_v25  ;;  %v1086_v60 = vunpack.c.h.bf16 %v1028_v25  ;;  %v1013_v25 = vld [vmem:[%s3609_s3 + $0x50] sm:$0xff] }
 0x135   :  { %1227 = vadd.xlane.f32.xlu1 %v1226_v49  ;;  %1182 = vadd.xlane.f32.xlu0 %v1181_v21  ;;  %v613_v34 = vpop.f32.mrb[16].mxu0  ;;  %v693_v36 = vpop.f32.mrb[16].mxu1  ;;  %v1184_v38 = vadd.f32 %v2787_v18, %v2781_v11 }
 0x136   :  { %v955_v41 = vadd.f32 %v2614_v6, %v613_v34  ;;  %v615_v43 = vpop.f32.mrb[17].mxu0  ;;  %v987_v45 = vadd.f32 %v2614_v6, %v693_v36  ;;  %v695_v47 = vpop.f32.mrb[17].mxu1  ;;  %v1232_v59 = vadd.f32 %v2796_v29, %v2789_v19 }
 0x137   :  { %v956_v49 = vadd.f32 %v2620_v8, %v615_v43  ;;  %v617_v50 = vpop.f32.mrb[18].mxu0  ;;  %v988_v53 = vadd.f32 %v2620_v8, %v695_v47  ;;  %v697_v54 = vpop.f32.mrb[18].mxu1  ;;  %v1055_v47 = vunpack.c.l.bf16 %v1013_v25 }
 0x138   :  { %v2808_v62 = vadd.f32 %v1051_v27, %v955_v41  ;;  %v2810_v3 = vadd.f32 %v1083_v30, %v987_v45  ;;  %v957_v5 = vadd.f32 %v2614_v6, %v617_v50  ;;  %v619_v12 = vpop.f32.mrb[19].mxu0  ;;  %v989_v17 = vadd.f32 %v2614_v6, %v697_v54  ;;  %v699_v21 = vpop.f32.mrb[19].mxu1  ;;  %v1029_v27 = vld [vmem:[%s3609_s3 + $0xd0] sm:$0xff]  ;;  %v1030_v45 = vld [vmem:[%s3609_s3 + $0xd8] sm:$0xff] }
 0x139   :  { %v2814_v34 = vadd.f32 %v1052_v28, %v956_v49  ;;  %1230 = vadd.xlane.f32.xlu0 %v1229_v37  ;;  %1185 = vadd.xlane.f32.xlu1 %v1184_v38  ;;  %v958_v36 = vadd.f32 %v2620_v8, %v619_v12  ;;  %v2817_v43 = vadd.f32 %v1084_v40, %v988_v53  ;;  %v1014_v28 = vld [vmem:[%s3609_s3 + $0x58] sm:$0xff]  ;;  %v1087_v50 = vunpack.c.l.bf16 %v1029_v27 }
 0x13a   :  { %3662 = vst [vmem:[#allocation5_spill] sm:$0xff] %v2810_v3  ;;  %v2825_v30 = vadd.f32 %v1053_v39, %v957_v5  ;;  %v990_v41 = vadd.f32 %v2620_v8, %v699_v21  ;;  %v2833_v38 = vadd.f32 %v1085_v48, %v989_v17  ;;  %v1056_v39 = vunpack.c.h.bf16 %v1013_v25 }
 0x13b   :  { %3663 = vst [vmem:[#allocation6_spill] sm:$0xff] %v2814_v34  ;;  %3664 = vst [vmem:[#allocation7_spill] sm:$0xff] %v2817_v43  ;;  %v2831_v37 = vadd.f32 %v1054_v46, %v958_v36  ;;  %v1187_v40 = vadd.f32 %v2814_v34, %v2808_v62  ;;  %v1235_v46 = vadd.f32 %v2817_v43, %v2810_v3  ;;  %v1057_v5 = vunpack.c.l.bf16 %v1014_v28 }
 0x13c   :  { %3665 = vst [vmem:[#allocation8_spill] sm:$0xff] %v2825_v30  ;;  %3667 = vst [vmem:[#allocation10_spill] sm:$0xff] %v2833_v38  ;;  %v2840_v49 = vadd.f32 %v1086_v60, %v990_v41  ;;  %v1088_v12 = vunpack.c.h.bf16 %v1029_v27  ;;  %v1058_v60 = vunpack.c.h.bf16 %v1014_v28  ;;  %v1089_v41 = vunpack.c.l.bf16 %v1030_v45 }
 0x13d   :  { %3666 = vst [vmem:[#allocation9_spill] sm:$0xff] %v2831_v37  ;;  %1233 = vadd.xlane.f32.xlu1 %v1232_v59  ;;  %1188 = vadd.xlane.f32.xlu0 %v1187_v40  ;;  %v623_v53 = vpop.f32.mrb[20].mxu0  ;;  %v703_v54 = vpop.f32.mrb[20].mxu1  ;;  %v1190_v48 = vadd.f32 %v2831_v37, %v2825_v30  ;;  %v1090_v37 = vunpack.c.h.bf16 %v1030_v45  ;;  %v1015_v45 = vld [vmem:[%s3609_s3 + $0x60] sm:$0xff] }
 0x13e   :  { %3668 = vst [vmem:[#allocation11_spill] sm:$0xff] %v2840_v49  ;;  %v959_v17 = vadd.f32 %v2614_v6, %v623_v53  ;;  %v625_v21 = vpop.f32.mrb[21].mxu0  ;;  %v991_v36 = vadd.f32 %v2614_v6, %v703_v54  ;;  %v705_v25 = vpop.f32.mrb[21].mxu1  ;;  %v1238_v43 = vadd.f32 %v2840_v49, %v2833_v38 }
 0x13f   :  { %v960_v59 = vadd.f32 %v2620_v8, %v625_v21  ;;  %v627_v40 = vpop.f32.mrb[22].mxu0  ;;  %v992_v4 = vadd.f32 %v2620_v8, %v705_v25  ;;  %v707_v2 = vpop.f32.mrb[22].mxu1 }
 0x140   :  { %v2852_v30 = vadd.f32 %v1055_v47, %v959_v17  ;;  %v2854_v27 = vadd.f32 %v1087_v50, %v991_v36  ;;  %v961_v53 = vadd.f32 %v2614_v6, %v627_v40  ;;  %v629_v54 = vpop.f32.mrb[23].mxu0  ;;  %v993_v28 = vadd.f32 %v2614_v6, %v707_v2  ;;  %v709_v3 = vpop.f32.mrb[23].mxu1  ;;  %v1031_v47 = vld [vmem:[%s3609_s3 + $0xe0] sm:$0xff] }
 0x141   :  { %v2858_v34 = vadd.f32 %v1056_v39, %v960_v59  ;;  %1236 = vadd.xlane.f32.xlu0 %v1235_v46  ;;  %1191 = vadd.xlane.f32.xlu1 %v1190_v48  ;;  %v962_v21 = vadd.f32 %v2620_v8, %v629_v54  ;;  %v2861_v25 = vadd.f32 %v1088_v12, %v992_v4  ;;  %v1016_v39 = vld [vmem:[%s3609_s3 + $0x68] sm:$0xff]  ;;  %v1059_v17 = vunpack.c.l.bf16 %v1015_v45 }
 0x142   :  { %3669 = vst [vmem:[#allocation12_spill] sm:$0xff] %v2852_v30  ;;  %3670 = vst [vmem:[#allocation13_spill] sm:$0xff] %v2854_v27  ;;  %v2869_v50 = vadd.f32 %v1057_v5, %v961_v53  ;;  %v994_v2 = vadd.f32 %v2620_v8, %v709_v3  ;;  %v2877_v4 = vadd.f32 %v1089_v41, %v993_v28  ;;  %v1032_v12 = vld [vmem:[%s3609_s3 + $0xe8] sm:$0xff]  ;;  %v1060_v5 = vunpack.c.h.bf16 %v1015_v45 }
 0x143   :  { %3671 = vst [vmem:[#allocation14_spill] sm:$0xff] %v2858_v34  ;;  %3672 = vst [vmem:[#allocation15_spill] sm:$0xff] %v2861_v25  ;;  %v2875_v46 = vadd.f32 %v1058_v60, %v962_v21  ;;  %v1193_v48 = vadd.f32 %v2858_v34, %v2852_v30  ;;  %v1091_v3 = vunpack.c.l.bf16 %v1031_v47  ;;  %v1241_v60 = vadd.f32 %v2861_v25, %v2854_v27 }
 0x144   :  { %3673 = vst [vmem:[#allocation16_spill] sm:$0xff] %v2869_v50  ;;  %3675 = vst [vmem:[#allocation18_spill] sm:$0xff] %v2877_v4  ;;  %v2884_v36 = vadd.f32 %v1090_v37, %v994_v2  ;;  %v1061_v53 = vunpack.c.l.bf16 %v1016_v39  ;;  %v1092_v54 = vunpack.c.h.bf16 %v1031_v47  ;;  %v1062_v37 = vunpack.c.h.bf16 %v1016_v39 }
 0x145   :  { %3674 = vst [vmem:[#allocation17_spill] sm:$0xff] %v2875_v46  ;;  %1239 = vadd.xlane.f32.xlu1 %v1238_v43  ;;  %1194 = vadd.xlane.f32.xlu0 %v1193_v48  ;;  %v633_v59 = vpop.f32.mrb[24].mxu0  ;;  %v713_v40 = vpop.f32.mrb[24].mxu1  ;;  %v1196_v41 = vadd.f32 %v2875_v46, %v2869_v50  ;;  %v1093_v49 = vunpack.c.l.bf16 %v1032_v12  ;;  %v1094_v46 = vunpack.c.h.bf16 %v1032_v12  ;;  %v1017_v12 = vld [vmem:[%s3609_s3 + $0x70] sm:$0xff] }
 0x146   :  { %3676 = vst [vmem:[#allocation19_spill] sm:$0xff] %v2884_v36  ;;  %v963_v28 = vadd.f32 %v2614_v6, %v633_v59  ;;  %v635_v21 = vpop.f32.mrb[25].mxu0  ;;  %v995_v45 = vadd.f32 %v2614_v6, %v713_v40  ;;  %v715_v2 = vpop.f32.mrb[25].mxu1  ;;  %v1244_v25 = vadd.f32 %v2884_v36, %v2877_v4 }
 0x147   :  { %v964_v43 = vadd.f32 %v2620_v8, %v635_v21  ;;  %v637_v48 = vpop.f32.mrb[26].mxu0  ;;  %v996_v38 = vadd.f32 %v2620_v8, %v715_v2  ;;  %v717_v34 = vpop.f32.mrb[26].mxu1 }
 0x148   :  { %v2896_v50 = vadd.f32 %v1059_v17, %v963_v28  ;;  %v2898_v47 = vadd.f32 %v1091_v3, %v995_v45  ;;  %v965_v59 = vadd.f32 %v2614_v6, %v637_v48  ;;  %v639_v40 = vpop.f32.mrb[27].mxu0  ;;  %v997_v39 = vadd.f32 %v2614_v6, %v717_v34  ;;  %v719_v27 = vpop.f32.mrb[27].mxu1  ;;  %v1033_v17 = vld [vmem:[%s3609_s3 + $0xf0] sm:$0xff] }
 0x149   :  { %v2902_v30 = vadd.f32 %v1060_v5, %v964_v43  ;;  %1242 = vadd.xlane.f32.xlu0 %v1241_v60  ;;  %1197 = vadd.xlane.f32.xlu1 %v1196_v41  ;;  %v966_v21 = vadd.f32 %v2620_v8, %v639_v40  ;;  %v2905_v2 = vadd.f32 %v1092_v54, %v996_v38  ;;  %v1018_v5 = vld [vmem:[%s3609_s3 + $0x78] sm:$0xff]  ;;  %v1063_v28 = vunpack.c.l.bf16 %v1017_v12 }
 0x14a   :  { %3677 = vst [vmem:[#allocation20_spill] sm:$0xff] %v2896_v50  ;;  %3678 = vst [vmem:[#allocation21_spill] sm:$0xff] %v2898_v47  ;;  %v2913_v3 = vadd.f32 %v1061_v53, %v965_v59  ;;  %v998_v34 = vadd.f32 %v2620_v8, %v719_v27  ;;  %v2921_v38 = vadd.f32 %v1093_v49, %v997_v39  ;;  %v1034_v54 = vld [vmem:[%s3609_s3 + $0xf8] sm:$0xff]  ;;  %v1064_v53 = vunpack.c.h.bf16 %v1017_v12 }
 0x14b   :  { %3679 = vst [vmem:[#allocation22_spill] sm:$0xff] %v2902_v30  ;;  %3680 = vst [vmem:[#allocation23_spill] sm:$0xff] %v2905_v2  ;;  %v2919_v60 = vadd.f32 %v1062_v37, %v966_v21  ;;  %v1199_v41 = vadd.f32 %v2902_v30, %v2896_v50  ;;  %v1095_v27 = vunpack.c.l.bf16 %v1033_v17  ;;  %v1247_v49 = vadd.f32 %v2905_v2, %v2898_v47 }
 0x14c   :  { %3681 = vst [vmem:[#allocation24_spill] sm:$0xff] %v2913_v3  ;;  %v2928_v45 = vadd.f32 %v1094_v46, %v998_v34  ;;  %v1065_v59 = vunpack.c.l.bf16 %v1018_v5  ;;  %v1096_v40 = vunpack.c.h.bf16 %v1033_v17  ;;  %v1066_v46 = vunpack.c.h.bf16 %v1018_v5 }
 0x14d   :  { %3682 = vst [vmem:[#allocation25_spill] sm:$0xff] %v2919_v60  ;;  %1245 = vadd.xlane.f32.xlu1 %v1244_v25  ;;  %1200 = vadd.xlane.f32.xlu0 %v1199_v41  ;;  %v643_v43 = vpop.f32.mrb[28].mxu0  ;;  %v723_v48 = vpop.f32.mrb[28].mxu1  ;;  %v1202_v37 = vadd.f32 %v2919_v60, %v2913_v3  ;;  %v1097_v36 = vunpack.c.l.bf16 %v1034_v54  ;;  %v1098_v60 = vunpack.c.h.bf16 %v1034_v54 }
 0x14e   :  { %3683 = vst [vmem:[#allocation26_spill] sm:$0xff] %v2928_v45  ;;  %v967_v39 = vadd.f32 %v2614_v6, %v643_v43  ;;  %v645_v21 = vpop.f32.mrb[29].mxu0  ;;  %v999_v12 = vadd.f32 %v2614_v6, %v723_v48  ;;  %v725_v34 = vpop.f32.mrb[29].mxu1  ;;  %v1250_v2 = vadd.f32 %v2928_v45, %v2921_v38 }
 0x14f   :  { %v968_v25 = vadd.f32 %v2620_v8, %v645_v21  ;;  %v647_v41 = vpop.f32.mrb[30].mxu0  ;;  %v1000_v30 = vadd.f32 %v2620_v8, %v725_v34  ;;  %v727_v50 = vpop.f32.mrb[30].mxu1 }
 0x150   :  { %v2940_v3 = vadd.f32 %v1063_v28, %v967_v39  ;;  %v2942_v17 = vadd.f32 %v1095_v27, %v999_v12  ;;  %v969_v43 = vadd.f32 %v2614_v6, %v647_v41  ;;  %v649_v48 = vpop.f32.mrb[31].mxu0  ;;  %v1001_v5 = vadd.f32 %v2614_v6, %v727_v50  ;;  %v729_v47 = vpop.f32.mrb[31].mxu1 }
 0x151   :  { %v2946_v4 = vadd.f32 %v1064_v53, %v968_v25  ;;  %1248 = vadd.xlane.f32.xlu0 %v1247_v49  ;;  %1203 = vadd.xlane.f32.xlu1 %v1202_v37  ;;  %v970_v21 = vadd.f32 %v2620_v8, %v649_v48  ;;  %v2949_v34 = vadd.f32 %v1096_v40, %v1000_v30 }
 0x152   :  { %v2951_v45 = vadd.f32 %v1065_v59, %v969_v43  ;;  %v2953_v54 = vadd.f32 %v1097_v36, %v1001_v5  ;;  %v1002_v28 = vadd.f32 %v2620_v8, %v729_v47 }
 0x153   :  { %v2956_v27 = vadd.f32 %v1066_v46, %v970_v21  ;;  %v1205_v6 = vadd.f32 %v2946_v4, %v2940_v3  ;;  %v1253_v53 = vadd.f32 %v2949_v34, %v2942_v17 }
 0x154   :  { %v2960_v50 = vadd.f32 %v1098_v60, %v1002_v28 }
 0x155   :  { %1251 = vadd.xlane.f32.xlu1 %v1250_v2  ;;  %1206 = vadd.xlane.f32.xlu0 %v1205_v6  ;;  %v1208_v30 = vadd.f32 %v2956_v27, %v2951_v45 }
 0x156   :  { %v1256_v8 = vadd.f32 %v2960_v50, %v2953_v54 }
 0x159   :  { %1254 = vadd.xlane.f32.xlu0 %v1253_v53  ;;  %1209 = vadd.xlane.f32.xlu1 %v1208_v30 }
 0x15d   :  { %1257 = vadd.xlane.f32.xlu1 %v1256_v8 }
 0x1aa   :  { %v1165_v36 = vpop.xlane.xlu0 %1164 }
 0x1ab   :  { %v1260_v47 = vmul.f32 0.00390625, %v1165_v36 }
 0x1ac   :  { %v1216_v60 = vpop.xlane.xlu1 %1215 }
 0x1ad   :  { %v2969_v49 = vsub.f32 %v2633_v31, %v1260_v47  ;;  %v2972_v2 = vsub.f32 %v2640_v35, %v1260_v47  ;;  %v1277_v39 = vmul.f32 0.00390625, %v1216_v60 }
 0x1ae   :  { %v1213_v37 = vpop.xlane.xlu0 %1212 }
 0x1af   :  { %v1276_v59 = vmul.f32 0.00390625, %v1213_v37  ;;  %v1356_v40 = vmul.f32 %v2969_v49, %v2969_v49  ;;  %v1357_v12 = vmul.f32 %v2972_v2, %v2972_v2  ;;  %v2989_v28 = vsub.f32 %v2653_v42, %v1277_v39 }
 0x1b1   :  { %v2979_v46 = vsub.f32 %v2635_v32, %v1276_v59  ;;  %v2982_v25 = vsub.f32 %v2637_v33, %v1276_v59  ;;  %v1420_v35 = vadd.f32 %v1357_v12, %v1356_v40  ;;  %v2992_v32 = vsub.f32 %v2657_v44, %v1277_v39 }
 0x1b2   :  { %v1168_v31 = vpop.xlane.xlu0 %1167  ;;  %v1171_v41 = vpop.xlane.xlu1 %1170 }
 0x1b3   :  { %v1261_v43 = vmul.f32 0.00390625, %v1168_v31  ;;  %v1262_v48 = vmul.f32 0.00390625, %v1171_v41  ;;  %v1388_v5 = vmul.f32 %v2979_v46, %v2979_v46  ;;  %v1389_v21 = vmul.f32 %v2982_v25, %v2982_v25  ;;  %1421 = vadd.xlane.f32.xlu0 %v1420_v35 }
 0x1b4   :  { %v1391_v39 = vmul.f32 %v2992_v32, %v2992_v32 }
 0x1b5   :  { %v2995_v33 = vsub.f32 %v2666_v56, %v1261_v43  ;;  %v2998_v6 = vsub.f32 %v2668_v57, %v1261_v43  ;;  %v3001_v53 = vsub.f32 %v2674_v7, %v1262_v48  ;;  %v3004_v30 = vsub.f32 %v2680_v14, %v1262_v48 }
 0x1b6   :  { %v1219_v8 = vpop.xlane.xlu0 %1218  ;;  %v1174_v36 = vpop.xlane.xlu1 %1173  ;;  %v1468_v42 = vadd.f32 %v1389_v21, %v1388_v5  ;;  %v1390_v14 = vmul.f32 %v2989_v28, %v2989_v28 }
 0x1b7   :  { %v1278_v47 = vmul.f32 0.00390625, %v1219_v8  ;;  %v1263_v60 = vmul.f32 0.00390625, %v1174_v36  ;;  %v1360_v44 = vmul.f32 %v3001_v53, %v3001_v53  ;;  %v1361_v56 = vmul.f32 %v3004_v30, %v3004_v30 }
 0x1b8   :  { %1469 = vadd.xlane.f32.xlu0 %v1468_v42  ;;  %v1358_v57 = vmul.f32 %v2995_v33, %v2995_v33  ;;  %v1359_v7 = vmul.f32 %v2998_v6, %v2998_v6  ;;  %v1471_v21 = vadd.f32 %v1391_v39, %v1390_v14 }
 0x1b9   :  { %v3017_v37 = vsub.f32 %v2677_v10, %v1278_v47  ;;  %v3020_v59 = vsub.f32 %v2683_v16, %v1278_v47  ;;  %v3023_v40 = vsub.f32 %v2692_v20, %v1263_v60  ;;  %v3028_v12 = vsub.f32 %v2699_v23, %v1263_v60 }
 0x1ba   :  { %v1222_v31 = vpop.xlane.xlu1 %1221  ;;  %v1177_v41 = vpop.xlane.xlu0 %1176  ;;  %v1426_v35 = vadd.f32 %v1361_v56, %v1360_v44  ;;  %v1423_v43 = vadd.f32 %v1359_v7, %v1358_v57 }
 0x1bb   :  { %v1279_v48 = vmul.f32 0.00390625, %v1222_v31  ;;  %v1264_v5 = vmul.f32 0.00390625, %v1177_v41  ;;  %v1392_v10 = vmul.f32 %v3017_v37, %v3017_v37  ;;  %v1393_v16 = vmul.f32 %v3020_v59, %v3020_v59 }
 0x1bc   :  { %1427 = vadd.xlane.f32.xlu0 %v1426_v35  ;;  %1424 = vadd.xlane.f32.xlu1 %v1423_v43  ;;  %v1362_v8 = vmul.f32 %v3023_v40, %v3023_v40 }
 0x1bd   :  { %v3035_v20 = vsub.f32 %v2720_v55, %v1264_v5  ;;  %v3038_v23 = vsub.f32 %v2726_v63, %v1264_v5  ;;  %v3043_v36 = vsub.f32 %v2701_v24, %v1279_v48  ;;  %v3046_v42 = vsub.f32 %v2705_v26, %v1279_v48 }
 0x1be   :  { %v1225_v47 = vpop.xlane.xlu0 %1224  ;;  %v1180_v60 = vpop.xlane.xlu1 %1179  ;;  %v1474_v44 = vadd.f32 %v1393_v16, %v1392_v10  ;;  %v1363_v55 = vmul.f32 %v3028_v12, %v3028_v12 }
 0x1bf   :  { %v1280_v56 = vmul.f32 0.00390625, %v1225_v47  ;;  %v1265_v57 = vmul.f32 0.00390625, %v1180_v60  ;;  %v1364_v63 = vmul.f32 %v3035_v20, %v3035_v20  ;;  %v1365_v7 = vmul.f32 %v3038_v23, %v3038_v23 }
 0x1c0   :  { %1475 = vadd.xlane.f32.xlu0 %v1474_v44  ;;  %1472 = vadd.xlane.f32.xlu1 %v1471_v21  ;;  %v1429_v43 = vadd.f32 %v1363_v55, %v1362_v8  ;;  %v1394_v48 = vmul.f32 %v3043_v36, %v3043_v36 }
 0x1c1   :  { %v3055_v24 = vsub.f32 %v2722_v58, %v1280_v56  ;;  %v3058_v26 = vsub.f32 %v2729_v1, %v1280_v56  ;;  %v3061_v14 = vsub.f32 %v2737_v9, %v1265_v57  ;;  %v3064_v39 = vsub.f32 %v2743_v13, %v1265_v57 }
 0x1c2   :  { %v1228_v31 = vpop.xlane.xlu1 %1227  ;;  %v1183_v41 = vpop.xlane.xlu0 %1182  ;;  %v1432_v35 = vadd.f32 %v1365_v7, %v1364_v63  ;;  %v1395_v58 = vmul.f32 %v3046_v42, %v3046_v42 }
 0x1c3   :  { %v1281_v5 = vmul.f32 0.00390625, %v1228_v31  ;;  %v1266_v10 = vmul.f32 0.00390625, %v1183_v41  ;;  %v1396_v1 = vmul.f32 %v3055_v24, %v3055_v24  ;;  %v1397_v9 = vmul.f32 %v3058_v26, %v3058_v26 }
 0x1c4   :  { %1433 = vadd.xlane.f32.xlu0 %v1432_v35  ;;  %1430 = vadd.xlane.f32.xlu1 %v1429_v43  ;;  %v1366_v13 = vmul.f32 %v3061_v14, %v3061_v14  ;;  %v1367_v47 = vmul.f32 %v3064_v39, %v3064_v39  ;;  %v1477_v57 = vadd.f32 %v1395_v58, %v1394_v48 }
 0x1c5   :  { %v3077_v16 = vsub.f32 %v2745_v15, %v1281_v5  ;;  %v3080_v21 = vsub.f32 %v2764_v51, %v1266_v10  ;;  %v3083_v8 = vsub.f32 %v2770_v61, %v1266_v10  ;;  %v3088_v60 = vsub.f32 %v2752_v22, %v1281_v5 }
 0x1c6   :  { %v1231_v44 = vpop.xlane.xlu0 %1230  ;;  %v1186_v55 = vpop.xlane.xlu1 %1185  ;;  %v1480_v56 = vadd.f32 %v1397_v9, %v1396_v1  ;;  %v1435_v31 = vadd.f32 %v1367_v47, %v1366_v13  ;;  %v3686_v47 = vld [vmem:[#allocation6_spill] sm:$0xff] }
 0x1c7   :  { %v1282_v63 = vmul.f32 0.00390625, %v1231_v44  ;;  %v1267_v7 = vmul.f32 0.00390625, %v1186_v55  ;;  %v1368_v15 = vmul.f32 %v3080_v21, %v3080_v21  ;;  %v1369_v51 = vmul.f32 %v3083_v8, %v3083_v8 }
 0x1c8   :  { %1481 = vadd.xlane.f32.xlu0 %v1480_v56  ;;  %1478 = vadd.xlane.f32.xlu1 %v1477_v57  ;;  %v1398_v41 = vmul.f32 %v3077_v16, %v3077_v16 }
 0x1c9   :  { %v3095_v61 = vsub.f32 %v2766_v52, %v1282_v63  ;;  %v3098_v22 = vsub.f32 %v2773_v0, %v1282_v63  ;;  %v3103_v35 = vsub.f32 %v2781_v11, %v1267_v7  ;;  %v3106_v43 = vsub.f32 %v2787_v18, %v1267_v7 }
 0x1ca   :  { %v1234_v48 = vpop.xlane.xlu1 %1233  ;;  %v1189_v58 = vpop.xlane.xlu0 %1188  ;;  %v1438_v5 = vadd.f32 %v1369_v51, %v1368_v15  ;;  %v1399_v52 = vmul.f32 %v3088_v60, %v3088_v60 }
 0x1cb   :  { %v1283_v10 = vmul.f32 0.00390625, %v1234_v48  ;;  %v1268_v1 = vmul.f32 0.00390625, %v1189_v58  ;;  %v1400_v0 = vmul.f32 %v3095_v61, %v3095_v61  ;;  %v1401_v9 = vmul.f32 %v3098_v22, %v3098_v22  ;;  %v3689_v58 = vld [vmem:[#allocation7_spill] sm:$0xff] }
 0x1cc   :  { %1439 = vadd.xlane.f32.xlu0 %v1438_v5  ;;  %1436 = vadd.xlane.f32.xlu1 %v1435_v31  ;;  %v1483_v63 = vadd.f32 %v1399_v52, %v1398_v41  ;;  %v1370_v7 = vmul.f32 %v3103_v35, %v3103_v35  ;;  %v3687_v41 = vld [vmem:[#allocation5_spill] sm:$0xff]  ;;  %v3691_v52 = vld [vmem:[#allocation8_spill] sm:$0xff] }
 0x1cd   :  { %v3115_v11 = vsub.f32 %v2789_v19, %v1283_v10  ;;  %v3118_v18 = vsub.f32 %v2796_v29, %v1283_v10  ;;  %v3121_v13 = vsub.f32 %v2808_v62, %v1268_v1  ;;  %v3124_v44 = vsub.f32 %v3686_v47, %v1268_v1 }
 0x1ce   :  { %v1237_v55 = vpop.xlane.xlu0 %1236  ;;  %v1192_v56 = vpop.xlane.xlu1 %1191  ;;  %v1486_v57 = vadd.f32 %v1401_v9, %v1400_v0  ;;  %v1371_v19 = vmul.f32 %v3106_v43, %v3106_v43  ;;  %v3693_v0 = vld [vmem:[#allocation9_spill] sm:$0xff] }
 0x1cf   :  { %3684 = vst [vmem:[#allocation27_spill] sm:$0xff] %v3115_v11  ;;  %3685 = vst [vmem:[#allocation28_spill] sm:$0xff] %v3118_v18  ;;  %v1284_v15 = vmul.f32 0.00390625, %v1237_v55  ;;  %v1269_v51 = vmul.f32 0.00390625, %v1192_v56  ;;  %v1372_v29 = vmul.f32 %v3121_v13, %v3121_v13  ;;  %v1373_v62 = vmul.f32 %v3124_v44, %v3124_v44 }
 0x1d0   :  { %1487 = vadd.xlane.f32.xlu0 %v1486_v57  ;;  %1484 = vadd.xlane.f32.xlu1 %v1483_v63  ;;  %v1402_v31 = vmul.f32 %v3115_v11, %v3115_v11  ;;  %v1403_v1 = vmul.f32 %v3118_v18, %v3118_v18  ;;  %v1441_v57 = vadd.f32 %v1371_v19, %v1370_v7  ;;  %v3697_v18 = vld [vmem:[#allocation14_spill] sm:$0xff] }
 0x1d1   :  { %v3137_v48 = vsub.f32 %v3687_v41, %v1284_v15  ;;  %v3140_v5 = vsub.f32 %v3689_v58, %v1284_v15  ;;  %v3143_v10 = vsub.f32 %v3691_v52, %v1269_v51  ;;  %v3148_v9 = vsub.f32 %v3693_v0, %v1269_v51  ;;  %v3695_v58 = vld [vmem:[#allocation12_spill] sm:$0xff]  ;;  %v3699_v19 = vld [vmem:[#allocation10_spill] sm:$0xff] }
 0x1d2   :  { %v1240_v47 = vpop.xlane.xlu1 %1239  ;;  %v1195_v55 = vpop.xlane.xlu0 %1194  ;;  %v1444_v56 = vadd.f32 %v1373_v62, %v1372_v29  ;;  %v1489_v0 = vadd.f32 %v1403_v1, %v1402_v31  ;;  %v3701_v62 = vld [vmem:[#allocation11_spill] sm:$0xff]  ;;  %v3703_v31 = vld [vmem:[#allocation13_spill] sm:$0xff] }
 0x1d3   :  { %3688 = vst [vmem:[#allocation6_spill] sm:$0xff] %v3137_v48  ;;  %3690 = vst [vmem:[#allocation5_spill] sm:$0xff] %v3140_v5  ;;  %v1285_v63 = vmul.f32 0.00390625, %v1240_v47  ;;  %v1270_v11 = vmul.f32 0.00390625, %v1195_v55  ;;  %v1404_v41 = vmul.f32 %v3137_v48, %v3137_v48  ;;  %v1405_v15 = vmul.f32 %v3140_v5, %v3140_v5 }
 0x1d4   :  { %3692 = vst [vmem:[#allocation7_spill] sm:$0xff] %v3143_v10  ;;  %3694 = vst [vmem:[#allocation8_spill] sm:$0xff] %v3148_v9  ;;  %1445 = vadd.xlane.f32.xlu0 %v1444_v56  ;;  %1442 = vadd.xlane.f32.xlu1 %v1441_v57  ;;  %v1374_v7 = vmul.f32 %v3143_v10, %v3143_v10  ;;  %v1375_v57 = vmul.f32 %v3148_v9, %v3148_v9 }
 0x1d5   :  { %v3155_v52 = vsub.f32 %v3695_v58, %v1270_v11  ;;  %v3158_v51 = vsub.f32 %v3697_v18, %v1270_v11  ;;  %v3163_v29 = vsub.f32 %v3699_v19, %v1285_v63  ;;  %v3166_v47 = vsub.f32 %v3701_v62, %v1285_v63  ;;  %v3705_v63 = vld [vmem:[#allocation15_spill] sm:$0xff]  ;;  %v3709_v62 = vld [vmem:[#allocation17_spill] sm:$0xff] }
 0x1d6   :  { %v1243_v55 = vpop.xlane.xlu0 %1242  ;;  %v1198_v5 = vpop.xlane.xlu1 %1197  ;;  %v1492_v56 = vadd.f32 %v1405_v15, %v1404_v41  ;;  %v3707_v41 = vld [vmem:[#allocation16_spill] sm:$0xff] }
 0x1d7   :  { %3696 = vst [vmem:[#allocation9_spill] sm:$0xff] %v3155_v52  ;;  %3698 = vst [vmem:[#allocation12_spill] sm:$0xff] %v3158_v51  ;;  %v1286_v58 = vmul.f32 0.00390625, %v1243_v55  ;;  %v1271_v48 = vmul.f32 0.00390625, %v1198_v5  ;;  %v1376_v11 = vmul.f32 %v3155_v52, %v3155_v52  ;;  %v1377_v18 = vmul.f32 %v3158_v51, %v3158_v51 }
 0x1d8   :  { %3700 = vst [vmem:[#allocation14_spill] sm:$0xff] %v3163_v29  ;;  %3702 = vst [vmem:[#allocation10_spill] sm:$0xff] %v3166_v47  ;;  %1493 = vadd.xlane.f32.xlu0 %v1492_v56  ;;  %1490 = vadd.xlane.f32.xlu1 %v1489_v0  ;;  %v1447_v52 = vadd.f32 %v1375_v57, %v1374_v7  ;;  %v1406_v56 = vmul.f32 %v3163_v29, %v3163_v29  ;;  %v3711_v7 = vld [vmem:[#allocation18_spill] sm:$0xff] }
 0x1d9   :  { %v3175_v1 = vsub.f32 %v3703_v31, %v1286_v58  ;;  %v3178_v19 = vsub.f32 %v3705_v63, %v1286_v58  ;;  %v3181_v15 = vsub.f32 %v3707_v41, %v1271_v48  ;;  %v3184_v55 = vsub.f32 %v3709_v62, %v1271_v48  ;;  %v3714_v41 = vld [vmem:[#allocation22_spill] sm:$0xff] }
 0x1da   :  { %v1246_v5 = vpop.xlane.xlu1 %1245  ;;  %v1201_v9 = vpop.xlane.xlu0 %1200  ;;  %v1450_v10 = vadd.f32 %v1377_v18, %v1376_v11  ;;  %v1407_v0 = vmul.f32 %v3166_v47, %v3166_v47  ;;  %v3712_v11 = vld [vmem:[#allocation20_spill] sm:$0xff] }
 0x1db   :  { %3704 = vst [vmem:[#allocation11_spill] sm:$0xff] %v3175_v1  ;;  %3706 = vst [vmem:[#allocation13_spill] sm:$0xff] %v3178_v19  ;;  %v1287_v31 = vmul.f32 0.00390625, %v1246_v5  ;;  %v1272_v51 = vmul.f32 0.00390625, %v1201_v9  ;;  %v1408_v58 = vmul.f32 %v3175_v1, %v3175_v1  ;;  %v1409_v63 = vmul.f32 %v3178_v19, %v3178_v19  ;;  %v3716_v5 = vld [vmem:[#allocation19_spill] sm:$0xff] }
 0x1dc   :  { %3708 = vst [vmem:[#allocation15_spill] sm:$0xff] %v3181_v15  ;;  %3710 = vst [vmem:[#allocation16_spill] sm:$0xff] %v3184_v55  ;;  %1451 = vadd.xlane.f32.xlu0 %v1450_v10  ;;  %1448 = vadd.xlane.f32.xlu1 %v1447_v52  ;;  %v1378_v48 = vmul.f32 %v3181_v15, %v3181_v15  ;;  %v1379_v9 = vmul.f32 %v3184_v55, %v3184_v55  ;;  %v3719_v55 = vld [vmem:[#allocation23_spill] sm:$0xff] }
 0x1dd   :  { %v3197_v57 = vsub.f32 %v3711_v7, %v1287_v31  ;;  %v3200_v18 = vsub.f32 %v3712_v11, %v1272_v51  ;;  %v3203_v62 = vsub.f32 %v3714_v41, %v1272_v51  ;;  %v3208_v47 = vsub.f32 %v3716_v5, %v1287_v31  ;;  %v3718_v51 = vld [vmem:[#allocation21_spill] sm:$0xff] }
 0x1de   :  { %v1249_v10 = vpop.xlane.xlu0 %1248  ;;  %v1204_v52 = vpop.xlane.xlu1 %1203  ;;  %v1498_v29 = vadd.f32 %v1409_v63, %v1408_v58  ;;  %v1495_v19 = vadd.f32 %v1407_v0, %v1406_v56  ;;  %v1453_v5 = vadd.f32 %v1379_v9, %v1378_v48  ;;  %v3720_v0 = vld [vmem:[#allocation24_spill] sm:$0xff]  ;;  %v3721_v63 = vld [vmem:[#allocation25_spill] sm:$0xff] }
 0x1df   :  { %3713 = vst [vmem:[#allocation17_spill] sm:$0xff] %v3200_v18  ;;  %3715 = vst [vmem:[#allocation18_spill] sm:$0xff] %v3203_v62  ;;  %v1288_v15 = vmul.f32 0.00390625, %v1249_v10  ;;  %v1273_v1 = vmul.f32 0.00390625, %v1204_v52  ;;  %v1380_v7 = vmul.f32 %v3200_v18, %v3200_v18  ;;  %v1381_v11 = vmul.f32 %v3203_v62, %v3203_v62 }
 0x1e0   :  { %3717 = vst [vmem:[#allocation20_spill] sm:$0xff] %v3208_v47  ;;  %1499 = vadd.xlane.f32.xlu0 %v1498_v29  ;;  %1496 = vadd.xlane.f32.xlu1 %v1495_v19  ;;  %v1410_v56 = vmul.f32 %v3197_v57, %v3197_v57  ;;  %v1411_v19 = vmul.f32 %v3208_v47, %v3208_v47 }
 0x1e1   :  { %v3215_v41 = vsub.f32 %v3718_v51, %v1288_v15  ;;  %v3218_v31 = vsub.f32 %v3719_v55, %v1288_v15  ;;  %v3223_v58 = vsub.f32 %v3720_v0, %v1273_v1  ;;  %v3226_v10 = vsub.f32 %v3721_v63, %v1273_v1  ;;  %v3722_v1 = vld [vmem:[#allocation26_spill] sm:$0xff] }
 0x1e2   :  { %v1252_v52 = vpop.xlane.xlu1 %1251  ;;  %v1207_v62 = vpop.xlane.xlu0 %1206  ;;  %v1456_v29 = vadd.f32 %v1381_v11, %v1380_v7 }
 0x1e3   :  { %v1289_v51 = vmul.f32 0.00390625, %v1252_v52  ;;  %v1274_v18 = vmul.f32 0.00390625, %v1207_v62  ;;  %v1412_v15 = vmul.f32 %v3215_v41, %v3215_v41  ;;  %v1413_v55 = vmul.f32 %v3218_v31, %v3218_v31 }
 0x1e4   :  { %1457 = vadd.xlane.f32.xlu0 %v1456_v29  ;;  %1454 = vadd.xlane.f32.xlu1 %v1453_v5  ;;  %v1501_v52 = vadd.f32 %v1411_v19, %v1410_v56  ;;  %v1382_v29 = vmul.f32 %v3223_v58, %v3223_v58 }
 0x1e5   :  { %v3235_v48 = vsub.f32 %v2921_v38, %v1289_v51  ;;  %v3238_v9 = vsub.f32 %v3722_v1, %v1289_v51  ;;  %v3241_v7 = vsub.f32 %v2940_v3, %v1274_v18  ;;  %v3244_v11 = vsub.f32 %v2946_v4, %v1274_v18 }
 0x1e6   :  { %v1255_v62 = vpop.xlane.xlu0 %1254  ;;  %v1210_v0 = vpop.xlane.xlu1 %1209  ;;  %v1504_v63 = vadd.f32 %v1413_v55, %v1412_v15  ;;  %v1383_v38 = vmul.f32 %v3226_v10, %v3226_v10 }
 0x1e7   :  { %v1290_v5 = vmul.f32 0.00390625, %v1255_v62  ;;  %v1275_v47 = vmul.f32 0.00390625, %v1210_v0  ;;  %v1384_v51 = vmul.f32 %v3241_v7, %v3241_v7  ;;  %v1385_v3 = vmul.f32 %v3244_v11, %v3244_v11 }
 0x1e8   :  { %1505 = vadd.xlane.f32.xlu0 %v1504_v63  ;;  %1502 = vadd.xlane.f32.xlu1 %v1501_v52  ;;  %v1414_v56 = vmul.f32 %v3235_v48, %v3235_v48  ;;  %v1415_v19 = vmul.f32 %v3238_v9, %v3238_v9  ;;  %v1459_v0 = vadd.f32 %v1383_v38, %v1382_v29 }
 0x1e9   :  { %v3255_v4 = vsub.f32 %v2942_v17, %v1290_v5  ;;  %v3258_v18 = vsub.f32 %v2949_v34, %v1290_v5  ;;  %v3265_v15 = vsub.f32 %v2951_v45, %v1275_v47  ;;  %v3268_v55 = vsub.f32 %v2956_v27, %v1275_v47 }
 0x1ea   :  { %v1258_v1 = vpop.xlane.xlu1 %1257  ;;  %v1462_v62 = vadd.f32 %v1385_v3, %v1384_v51  ;;  %v1507_v5 = vadd.f32 %v1415_v19, %v1414_v56 }
 0x1eb   :  { %3723 = vst [vmem:[#allocation22_spill] sm:$0xff] %v3265_v15  ;;  %3724 = vst [vmem:[#allocation19_spill] sm:$0xff] %v3268_v55  ;;  %v1291_v17 = vmul.f32 0.00390625, %v1258_v1  ;;  %v1416_v34 = vmul.f32 %v3255_v4, %v3255_v4  ;;  %v1417_v63 = vmul.f32 %v3258_v18, %v3258_v18  ;;  %v1386_v47 = vmul.f32 %v3265_v15, %v3265_v15 }
 0x1ec   :  { %1463 = vadd.xlane.f32.xlu0 %v1462_v62  ;;  %1460 = vadd.xlane.f32.xlu1 %v1459_v0  ;;  %v1387_v29 = vmul.f32 %v3268_v55, %v3268_v55 }
 0x1ed   :  { %v1510_v52 = vadd.f32 %v1417_v63, %v1416_v34  ;;  %v3275_v45 = vsub.f32 %v2953_v54, %v1291_v17  ;;  %v3278_v27 = vsub.f32 %v2960_v50, %v1291_v17 }
 0x1ee   :  { %v1465_v38 = vadd.f32 %v1387_v29, %v1386_v47 }
 0x1ef   :  { %3725 = vst [vmem:[#allocation21_spill] sm:$0xff] %v3275_v45  ;;  %3726 = vst [vmem:[#allocation23_spill] sm:$0xff] %v3278_v27  ;;  %v1418_v51 = vmul.f32 %v3275_v45, %v3275_v45  ;;  %v1419_v3 = vmul.f32 %v3278_v27, %v3278_v27 }
 0x1f0   :  { %1511 = vadd.xlane.f32.xlu0 %v1510_v52  ;;  %1508 = vadd.xlane.f32.xlu1 %v1507_v5  ;;  %v1676_v5 = vld [vmem:[%s3610_s4] sm:$0x3] }
 0x1f1   :  { %v1513_v54 = vadd.f32 %v1419_v3, %v1418_v51  ;;  %v1752_v3 = vld [vmem:[%s3611_s5] sm:$0x3] }
 0x1f4   :  { %1466 = vadd.xlane.f32.xlu1 %v1465_v38 }
 0x1f8   :  { %1514 = vadd.xlane.f32.xlu1 %v1513_v54 }
 0x240   :  { %v1422_v50 = vpop.xlane.xlu0 %1421 }
 0x241   :  { %v1516_v56 = vmul.f32 0.00390625, %v1422_v50 }
 0x243   :  { %v1548_v19 = vadd.f32 1e-05, %v1516_v56  ;;  %v3727_v56 = vld [vmem:[#allocation3_spill] sm:$0xff] }
 0x245   :  { %v1470_v1 = vpop.xlane.xlu0 %1469  ;;  %2312 = vrsqrt.f32 %v1548_v19  ;;  %v3295_v19 = vrot.slane %v1676_v5, %v3727_v56 }
 0x246   :  { %v1532_v62 = vmul.f32 0.00390625, %v1470_v1  ;;  %v3728_v1 = vld [vmem:[#allocation4_spill] sm:$0xff] }
 0x248   :  { %v1564_v0 = vadd.f32 1e-05, %v1532_v62  ;;  %v3298_v62 = vrot.slane %v1676_v5, %v3728_v1 }
 0x249   :  { %v1428_v17 = vpop.xlane.xlu0 %1427  ;;  %v1425_v34 = vpop.xlane.xlu1 %1424 }
 0x24a   :  { %2314 = vrsqrt.f32 %v1564_v0  ;;  %v1518_v63 = vmul.f32 0.00390625, %v1428_v17  ;;  %v1517_v52 = vmul.f32 0.00390625, %v1425_v34 }
 0x24c   :  { %v1550_v47 = vadd.f32 1e-05, %v1518_v63  ;;  %v1549_v29 = vadd.f32 1e-05, %v1517_v52  ;;  %v3301_v63 = vrot.slane %v1752_v3, %v3727_v56  ;;  %v3304_v52 = vrot.slane %v1752_v3, %v3728_v1 }
 0x24d   :  { %v1476_v38 = vpop.xlane.xlu0 %1475  ;;  %v1473_v51 = vpop.xlane.xlu1 %1472 }
 0x24e   :  { %2316 = vrsqrt.f32 %v1550_v47  ;;  %v1534_v54 = vmul.f32 0.00390625, %v1476_v38  ;;  %v1533_v50 = vmul.f32 0.00390625, %v1473_v51 }
 0x24f   :  { %2318 = vrsqrt.f32 %v1549_v29  ;;  %v2313_v0 = vpop.eup %2312 }
 0x250   :  { %v1566_v17 = vadd.f32 1e-05, %v1534_v54  ;;  %v1565_v34 = vadd.f32 1e-05, %v1533_v50  ;;  %v1612_v47 = vmul.f32 %v2313_v0, %v2969_v49  ;;  %v1613_v38 = vmul.f32 %v2313_v0, %v2972_v2 }
 0x251   :  { %v1434_v51 = vpop.xlane.xlu0 %1433  ;;  %v1431_v27 = vpop.xlane.xlu1 %1430 }
 0x252   :  { %2320 = vrsqrt.f32 %v1566_v17  ;;  %v1520_v45 = vmul.f32 0.00390625, %v1434_v51  ;;  %v1519_v5 = vmul.f32 0.00390625, %v1431_v27  ;;  %v1688_v29 = vmul.f32 %v3295_v19, %v1612_v47 }
 0x253   :  { %v1689_v54 = vmul.f32 %v3298_v62, %v1613_v38  ;;  %2322 = vrsqrt.f32 %v1565_v34 }
 0x254   :  { %v2315_v50 = vpop.eup %2314  ;;  %v1552_v56 = vadd.f32 1e-05, %v1520_v45  ;;  %v1551_v55 = vadd.f32 1e-05, %v1519_v5  ;;  %v1764_v3 = vadd.f32 %v3301_v63, %v1688_v29 }
 0x255   :  { %v1765_v1 = vadd.f32 %v3304_v52, %v1689_v54  ;;  %v1644_v49 = vmul.f32 %v2315_v50, %v2979_v46  ;;  %v1645_v2 = vmul.f32 %v2315_v50, %v2982_v25  ;;  %v1482_v0 = vpop.xlane.xlu0 %1481  ;;  %v1479_v17 = vpop.xlane.xlu1 %1478 }
 0x256   :  { %2324 = vrsqrt.f32 %v1552_v56  ;;  %v1536_v27 = vmul.f32 0.00390625, %v1482_v0  ;;  %v1535_v51 = vmul.f32 0.00390625, %v1479_v17 }
 0x257   :  { %v2152_v47 = vpack.c.bf16 %v1765_v1, %v1764_v3  ;;  %v1720_v38 = vmul.f32 %v3295_v19, %v1644_v49  ;;  %v1721_v34 = vmul.f32 %v3298_v62, %v1645_v2  ;;  %2326 = vrsqrt.f32 %v1551_v55 }
 0x258   :  { %v2317_v45 = vpop.eup %2316  ;;  %v1568_v5 = vadd.f32 1e-05, %v1536_v27  ;;  %v1567_v29 = vadd.f32 1e-05, %v1535_v51 }
 0x259   :  { %v2319_v15 = vpop.eup %2318  ;;  %2020 = vst [vmem:[%s3612_s6] sm:$0xff] %v2152_v47  ;;  %v1796_v46 = vadd.f32 %v3301_v63, %v1720_v38  ;;  %v1797_v25 = vadd.f32 %v3304_v52, %v1721_v34  ;;  %v1616_v54 = vmul.f32 %v2317_v45, %v3001_v53  ;;  %v1617_v50 = vmul.f32 %v2317_v45, %v3004_v30  ;;  %v1440_v56 = vpop.xlane.xlu0 %1439 }
 0x25a   :  { %v1437_v3 = vpop.xlane.xlu1 %1436  ;;  %v1614_v55 = vmul.f32 %v2319_v15, %v2995_v33  ;;  %v1615_v1 = vmul.f32 %v2319_v15, %v2998_v6  ;;  %2328 = vrsqrt.f32 %v1568_v5  ;;  %v1522_v49 = vmul.f32 0.00390625, %v1440_v56 }
 0x25b   :  { %v2168_v2 = vpack.c.bf16 %v1797_v25, %v1796_v46  ;;  %v1692_v0 = vmul.f32 %v3295_v19, %v1616_v54  ;;  %v1693_v17 = vmul.f32 %v3298_v62, %v1617_v50  ;;  %2330 = vrsqrt.f32 %v1567_v29 }
 0x25c   :  { %v2321_v27 = vpop.eup %2320  ;;  %v1690_v51 = vmul.f32 %v3295_v19, %v1614_v55  ;;  %v1691_v53 = vmul.f32 %v3298_v62, %v1615_v1  ;;  %v1554_v30 = vadd.f32 1e-05, %v1522_v49  ;;  %v1521_v47 = vmul.f32 0.00390625, %v1437_v3 }
 0x25d   :  { %v2323_v38 = vpop.eup %2322  ;;  %2036 = vst [vmem:[%s3612_s6 + $0x80] sm:$0xff] %v2168_v2  ;;  %v1768_v33 = vadd.f32 %v3301_v63, %v1692_v0  ;;  %v1769_v6 = vadd.f32 %v3304_v52, %v1693_v17  ;;  %v1648_v15 = vmul.f32 %v2321_v27, %v3017_v37  ;;  %v1649_v34 = vmul.f32 %v2321_v27, %v3020_v59  ;;  %v1488_v45 = vpop.xlane.xlu0 %1487 }
 0x25e   :  { %v1485_v5 = vpop.xlane.xlu1 %1484  ;;  %v1766_v29 = vadd.f32 %v3301_v63, %v1690_v51  ;;  %v1767_v46 = vadd.f32 %v3304_v52, %v1691_v53  ;;  %v1646_v25 = vmul.f32 %v2323_v38, %v2989_v28  ;;  %v1647_v54 = vmul.f32 %v2323_v38, %v2992_v32 }
 0x25f   :  { %v2154_v50 = vpack.c.bf16 %v1769_v6, %v1768_v33  ;;  %v1724_v56 = vmul.f32 %v3295_v19, %v1648_v15  ;;  %v1725_v3 = vmul.f32 %v3298_v62, %v1649_v34  ;;  %2332 = vrsqrt.f32 %v1554_v30 }
 0x260   :  { %v2325_v55 = vpop.eup %2324  ;;  %v2153_v37 = vpack.c.bf16 %v1767_v46, %v1766_v29  ;;  %v1722_v59 = vmul.f32 %v3295_v19, %v1646_v25  ;;  %v1723_v1 = vmul.f32 %v3298_v62, %v1647_v54  ;;  %v1553_v49 = vadd.f32 1e-05, %v1521_v47 }
 0x261   :  { %v2327_v2 = vpop.eup %2326  ;;  %2022 = vst [vmem:[%s3612_s6 + $0x10] sm:$0xff] %v2154_v50  ;;  %v1800_v28 = vadd.f32 %v3301_v63, %v1724_v56  ;;  %v1801_v32 = vadd.f32 %v3304_v52, %v1725_v3  ;;  %v1620_v0 = vmul.f32 %v2325_v55, %v3035_v20  ;;  %v1621_v17 = vmul.f32 %v2325_v55, %v3038_v23  ;;  %v1446_v27 = vpop.xlane.xlu0 %1445 }
 0x262   :  { %v1443_v51 = vpop.xlane.xlu1 %1442  ;;  %2021 = vst [vmem:[%s3612_s6 + $0x8] sm:$0xff] %v2153_v37  ;;  %v1798_v53 = vadd.f32 %v3301_v63, %v1722_v59  ;;  %v1799_v30 = vadd.f32 %v3304_v52, %v1723_v1  ;;  %v1618_v47 = vmul.f32 %v2327_v2, %v3023_v40  ;;  %v1619_v38 = vmul.f32 %v2327_v2, %v3028_v12 }
 0x263   :  { %v2170_v33 = vpack.c.bf16 %v1801_v32, %v1800_v28  ;;  %v1696_v6 = vmul.f32 %v3295_v19, %v1620_v0  ;;  %v1697_v20 = vmul.f32 %v3298_v62, %v1621_v17  ;;  %2334 = vrsqrt.f32 %v1553_v49 }
 0x264   :  { %v2329_v23 = vpop.eup %2328  ;;  %v2169_v15 = vpack.c.bf16 %v1799_v30, %v1798_v53  ;;  %v1694_v34 = vmul.f32 %v3295_v19, %v1618_v47  ;;  %v1695_v29 = vmul.f32 %v3298_v62, %v1619_v38  ;;  %v1538_v46 = vmul.f32 0.00390625, %v1488_v45 }
 0x265   :  { %v2331_v25 = vpop.eup %2330  ;;  %2038 = vst [vmem:[%s3612_s6 + $0x90] sm:$0xff] %v2170_v33  ;;  %v1772_v40 = vadd.f32 %v3301_v63, %v1696_v6  ;;  %v1773_v12 = vadd.f32 %v3304_v52, %v1697_v20  ;;  %v1652_v54 = vmul.f32 %v2329_v23, %v3055_v24  ;;  %v1653_v50 = vmul.f32 %v2329_v23, %v3058_v26  ;;  %v1494_v56 = vpop.xlane.xlu0 %1493 }
 0x266   :  { %v1491_v3 = vpop.xlane.xlu1 %1490  ;;  %2037 = vst [vmem:[%s3612_s6 + $0x88] sm:$0xff] %v2169_v15  ;;  %v1770_v45 = vadd.f32 %v3301_v63, %v1694_v34  ;;  %v1771_v55 = vadd.f32 %v3304_v52, %v1695_v29  ;;  %v1650_v37 = vmul.f32 %v2331_v25, %v3043_v36  ;;  %v1651_v59 = vmul.f32 %v2331_v25, %v3046_v42 }
 0x267   :  { %v2156_v1 = vpack.c.bf16 %v1773_v12, %v1772_v40  ;;  %v1728_v49 = vmul.f32 %v3295_v19, %v1652_v54  ;;  %v1729_v24 = vmul.f32 %v3298_v62, %v1653_v50  ;;  %v1570_v26 = vadd.f32 1e-05, %v1538_v46 }
 0x268   :  { %v2155_v2 = vpack.c.bf16 %v1771_v55, %v1770_v45  ;;  %v1726_v28 = vmul.f32 %v3295_v19, %v1650_v37  ;;  %v1727_v32 = vmul.f32 %v3298_v62, %v1651_v59  ;;  %v1537_v0 = vmul.f32 0.00390625, %v1485_v5 }
 0x269   :  { %v2333_v17 = vpop.eup %2332  ;;  %2024 = vst [vmem:[%s3612_s6 + $0x20] sm:$0xff] %v2156_v1  ;;  %v1804_v36 = vadd.f32 %v3301_v63, %v1728_v49  ;;  %v1805_v42 = vadd.f32 %v3304_v52, %v1729_v24  ;;  %2336 = vrsqrt.f32 %v1570_v26  ;;  %v1524_v53 = vmul.f32 0.00390625, %v1446_v27  ;;  %v1452_v30 = vpop.xlane.xlu0 %1451 }
 0x26a   :  { %v1449_v47 = vpop.xlane.xlu1 %1448  ;;  %2023 = vst [vmem:[%s3612_s6 + $0x18] sm:$0xff] %v2155_v2  ;;  %v1802_v38 = vadd.f32 %v3301_v63, %v1726_v28  ;;  %v1803_v5 = vadd.f32 %v3304_v52, %v1727_v32  ;;  %v1624_v33 = vmul.f32 %v2333_v17, %v3080_v21  ;;  %v1625_v6 = vmul.f32 %v2333_v17, %v3083_v8 }
 0x26b   :  { %v2172_v20 = vpack.c.bf16 %v1805_v42, %v1804_v36  ;;  %v1569_v23 = vadd.f32 1e-05, %v1537_v0  ;;  %v1556_v15 = vadd.f32 1e-05, %v1524_v53  ;;  %v1523_v34 = vmul.f32 0.00390625, %v1443_v51 }
 0x26c   :  { %v2171_v29 = vpack.c.bf16 %v1803_v5, %v1802_v38  ;;  %v1700_v27 = vmul.f32 %v3295_v19, %v1624_v33  ;;  %v1701_v46 = vmul.f32 %v3298_v62, %v1625_v6  ;;  %v1540_v25 = vmul.f32 0.00390625, %v1494_v56 }
 0x26d   :  { %v2335_v40 = vpop.eup %2334  ;;  %2040 = vst [vmem:[%s3612_s6 + $0xa0] sm:$0xff] %v2172_v20  ;;  %2338 = vrsqrt.f32 %v1569_v23  ;;  %v1555_v12 = vadd.f32 1e-05, %v1523_v34  ;;  %v1539_v21 = vmul.f32 0.00390625, %v1491_v3  ;;  %v1526_v54 = vmul.f32 0.00390625, %v1452_v30  ;;  %v1500_v8 = vpop.xlane.xlu0 %1499 }
 0x26e   :  { %v1497_v50 = vpop.xlane.xlu1 %1496  ;;  %2039 = vst [vmem:[%s3612_s6 + $0x98] sm:$0xff] %v2171_v29  ;;  %v1776_v51 = vadd.f32 %v3301_v63, %v1700_v27  ;;  %v1777_v45 = vadd.f32 %v3304_v52, %v1701_v46  ;;  %v1622_v56 = vmul.f32 %v2335_v40, %v3061_v14  ;;  %v1623_v55 = vmul.f32 %v2335_v40, %v3064_v39 }
 0x26f   :  { %2340 = vrsqrt.f32 %v1556_v15  ;;  %v1572_v37 = vadd.f32 1e-05, %v1540_v25  ;;  %v1571_v59 = vadd.f32 1e-05, %v1539_v21  ;;  %v1558_v1 = vadd.f32 1e-05, %v1526_v54 }
 0x270   :  { %v2158_v3 = vpack.c.bf16 %v1777_v45, %v1776_v51  ;;  %v1698_v49 = vmul.f32 %v3295_v19, %v1622_v56  ;;  %v1699_v24 = vmul.f32 %v3298_v62, %v1623_v55  ;;  %2342 = vrsqrt.f32 %v1555_v12 }
 0x271   :  { %2344 = vrsqrt.f32 %v1572_v37  ;;  %v1525_v26 = vmul.f32 0.00390625, %v1449_v47  ;;  %v1542_v2 = vmul.f32 0.00390625, %v1500_v8  ;;  %v1541_v28 = vmul.f32 0.00390625, %v1497_v50  ;;  %v1458_v32 = vpop.xlane.xlu0 %1457 }
 0x272   :  { %v1455_v0 = vpop.xlane.xlu1 %1454  ;;  %2026 = vst [vmem:[%s3612_s6 + $0x30] sm:$0xff] %v2158_v3  ;;  %v1774_v14 = vadd.f32 %v3301_v63, %v1698_v49  ;;  %v1775_v39 = vadd.f32 %v3304_v52, %v1699_v24  ;;  %2346 = vrsqrt.f32 %v1571_v59  ;;  %v1528_v17 = vmul.f32 0.00390625, %v1458_v32  ;;  %v3730_v32 = vld [vmem:[#allocation5_spill] sm:$0xff] }
 0x273   :  { %v2337_v36 = vpop.eup %2336  ;;  %2348 = vrsqrt.f32 %v1558_v1  ;;  %v1557_v42 = vadd.f32 1e-05, %v1525_v26  ;;  %v1574_v53 = vadd.f32 1e-05, %v1542_v2  ;;  %v1573_v30 = vadd.f32 1e-05, %v1541_v28 }
 0x274   :  { %v2157_v47 = vpack.c.bf16 %v1775_v39, %v1774_v14  ;;  %v1656_v38 = vmul.f32 %v2337_v36, %v3095_v61  ;;  %v1657_v5 = vmul.f32 %v2337_v36, %v3098_v22  ;;  %v1560_v33 = vadd.f32 1e-05, %v1528_v17  ;;  %v3729_v26 = vld [vmem:[#allocation6_spill] sm:$0xff]  ;;  %v3731_v36 = vld [vmem:[#allocation27_spill] sm:$0xff] }
 0x275   :  { %2350 = vrsqrt.f32 %v1557_v42  ;;  %v1527_v6 = vmul.f32 0.00390625, %v1455_v0  ;;  %v1506_v20 = vpop.xlane.xlu0 %1505 }
 0x276   :  { %v1503_v23 = vpop.xlane.xlu1 %1502  ;;  %2025 = vst [vmem:[%s3612_s6 + $0x28] sm:$0xff] %v2157_v47  ;;  %v1732_v15 = vmul.f32 %v3295_v19, %v1656_v38  ;;  %v1733_v34 = vmul.f32 %v3298_v62, %v1657_v5  ;;  %2352 = vrsqrt.f32 %v1574_v53  ;;  %v1544_v29 = vmul.f32 0.00390625, %v1506_v20  ;;  %v3732_v20 = vld [vmem:[#allocation28_spill] sm:$0xff] }
 0x277   :  { %v2339_v27 = vpop.eup %2338  ;;  %2354 = vrsqrt.f32 %v1573_v30  ;;  %v1559_v61 = vadd.f32 1e-05, %v1527_v6  ;;  %v1543_v46 = vmul.f32 0.00390625, %v1503_v23 }
 0x278   :  { %v1808_v22 = vadd.f32 %v3301_v63, %v1732_v15  ;;  %v1809_v25 = vadd.f32 %v3304_v52, %v1733_v34  ;;  %v1654_v40 = vmul.f32 %v2339_v27, %v3077_v16  ;;  %v1655_v12 = vmul.f32 %v2339_v27, %v3088_v60  ;;  %v3733_v34 = vld [vmem:[#allocation9_spill] sm:$0xff] }
 0x279   :  { %v2341_v21 = vpop.eup %2340  ;;  %2356 = vrsqrt.f32 %v1560_v33  ;;  %v3422_v54 = vadd.f32 1e-05, %v1544_v29  ;;  %v3424_v8 = vadd.f32 1e-05, %v1543_v46 }
 0x27a   :  { %v2343_v50 = vpop.eup %2342  ;;  %v2174_v51 = vpack.c.bf16 %v1809_v25, %v1808_v22  ;;  %v1730_v45 = vmul.f32 %v3295_v19, %v1654_v40  ;;  %v1731_v56 = vmul.f32 %v3298_v62, %v1655_v12  ;;  %v1628_v55 = vmul.f32 %v2341_v21, %v3121_v13  ;;  %v3429_v37 = vpop.xlane.xlu1 %1460  ;;  %v3734_v40 = vld [vmem:[#allocation12_spill] sm:$0xff] }
 0x27b   :  { %v2345_v59 = vpop.eup %2344  ;;  %v1629_v16 = vmul.f32 %v2341_v21, %v3124_v44  ;;  %v1626_v60 = vmul.f32 %v2343_v50, %v3103_v35  ;;  %v1627_v1 = vmul.f32 %v2343_v50, %v3106_v43  ;;  %2358 = vrsqrt.f32 %v1559_v61 }
 0x27c   :  { %v2347_v3 = vpop.eup %2346  ;;  %2042 = vst [vmem:[%s3612_s6 + $0xb0] sm:$0xff] %v2174_v51  ;;  %v1806_v49 = vadd.f32 %v3301_v63, %v1730_v45  ;;  %v1807_v24 = vadd.f32 %v3304_v52, %v1731_v56  ;;  %v1704_v13 = vmul.f32 %v3295_v19, %v1628_v55  ;;  %v1660_v2 = vmul.f32 %v2345_v59, %v3729_v26  ;;  %v3735_v45 = vld [vmem:[#allocation7_spill] sm:$0xff] }
 0x27d   :  { %v2349_v28 = vpop.eup %2348  ;;  %v1705_v44 = vmul.f32 %v3298_v62, %v1629_v16  ;;  %v1702_v35 = vmul.f32 %v3295_v19, %v1626_v60  ;;  %v1703_v43 = vmul.f32 %v3298_v62, %v1627_v1  ;;  %v1661_v0 = vmul.f32 %v2345_v59, %v3730_v32  ;;  %v3736_v60 = vld [vmem:[#allocation8_spill] sm:$0xff] }
 0x27e   :  { %v2173_v14 = vpack.c.bf16 %v1807_v24, %v1806_v49  ;;  %v1780_v39 = vadd.f32 %v3301_v63, %v1704_v13  ;;  %v1736_v17 = vmul.f32 %v3295_v19, %v1660_v2  ;;  %v1658_v42 = vmul.f32 %v2347_v3, %v3731_v36  ;;  %v3459_v27 = vpop.xlane.xlu1 %1508  ;;  %v3738_v2 = vld [vmem:[#allocation13_spill] sm:$0xff] }
 0x27f   :  { %v2351_v53 = vpop.eup %2350  ;;  %v1781_v30 = vadd.f32 %v3304_v52, %v1705_v44  ;;  %v1778_v47 = vadd.f32 %v3301_v63, %v1702_v35  ;;  %v1779_v38 = vadd.f32 %v3304_v52, %v1703_v43  ;;  %v1737_v5 = vmul.f32 %v3298_v62, %v1661_v0  ;;  %v3739_v0 = vld [vmem:[#allocation14_spill] sm:$0xff] }
 0x280   :  { %v2353_v33 = vpop.eup %2352  ;;  %2041 = vst [vmem:[%s3612_s6 + $0xa8] sm:$0xff] %v2173_v14  ;;  %v1812_v6 = vadd.f32 %v3301_v63, %v1736_v17  ;;  %v1659_v23 = vmul.f32 %v2347_v3, %v3732_v20  ;;  %v1734_v15 = vmul.f32 %v3295_v19, %v1658_v42  ;;  %v1632_v29 = vmul.f32 %v2349_v28, %v3733_v34  ;;  %v3737_v3 = vld [vmem:[#allocation11_spill] sm:$0xff] }
 0x281   :  { %v2355_v61 = vpop.eup %2354  ;;  %v2160_v46 = vpack.c.bf16 %v1781_v30, %v1780_v39  ;;  %v2159_v22 = vpack.c.bf16 %v1779_v38, %v1778_v47  ;;  %v1813_v25 = vadd.f32 %v3304_v52, %v1737_v5  ;;  %v1633_v12 = vmul.f32 %v2349_v28, %v3734_v40  ;;  %v1464_v39 = vpop.xlane.xlu0 %1463 }
 0x282   :  { %v1735_v21 = vmul.f32 %v3298_v62, %v1659_v23  ;;  %v1810_v50 = vadd.f32 %v3301_v63, %v1734_v15  ;;  %v1708_v51 = vmul.f32 %v3295_v19, %v1632_v29  ;;  %v1630_v56 = vmul.f32 %v2351_v53, %v3735_v45  ;;  %v1467_v47 = vpop.xlane.xlu1 %1466  ;;  %v3741_v15 = vld [vmem:[#allocation17_spill] sm:$0xff]  ;;  %v3742_v29 = vld [vmem:[#allocation18_spill] sm:$0xff] }
 0x283   :  { %v2357_v55 = vpop.eup %2356  ;;  %2028 = vst [vmem:[%s3612_s6 + $0x40] sm:$0xff] %v2160_v46  ;;  %2027 = vst [vmem:[%s3612_s6 + $0x38] sm:$0xff] %v2159_v22  ;;  %v2176_v59 = vpack.c.bf16 %v1813_v25, %v1812_v6  ;;  %v1709_v16 = vmul.f32 %v3298_v62, %v1633_v12  ;;  %v1631_v1 = vmul.f32 %v2351_v53, %v3736_v60  ;;  %v3740_v53 = vld [vmem:[#allocation10_spill] sm:$0xff]  ;;  %v3743_v25 = vld [vmem:[#allocation15_spill] sm:$0xff]  ;;  %2360 = vrsqrt.f32 %v3422_v54 }
 0x284   :  { %v1664_v49 = vmul.f32 %v2353_v33, %v3737_v3  ;;  %v1811_v24 = vadd.f32 %v3304_v52, %v1735_v21  ;;  %v1784_v13 = vadd.f32 %v3301_v63, %v1708_v51  ;;  %v1706_v26 = vmul.f32 %v3295_v19, %v1630_v56  ;;  %v3744_v12 = vld [vmem:[#allocation16_spill] sm:$0xff] }
 0x285   :  { %v1665_v28 = vmul.f32 %v2353_v33, %v3738_v2  ;;  %v2359_v44 = vpop.eup %2358  ;;  %2044 = vst [vmem:[%s3612_s6 + $0xc0] sm:$0xff] %v2176_v59  ;;  %v1785_v35 = vadd.f32 %v3304_v52, %v1709_v16  ;;  %v1707_v43 = vmul.f32 %v3298_v62, %v1631_v1  ;;  %v1662_v14 = vmul.f32 %v2355_v61, %v3739_v0  ;;  %v1512_v60 = vpop.xlane.xlu0 %1511 }
 0x286   :  { %v1740_v32 = vmul.f32 %v3295_v19, %v1664_v49  ;;  %v2175_v17 = vpack.c.bf16 %v1811_v24, %v1810_v50  ;;  %v1782_v36 = vadd.f32 %v3301_v63, %v1706_v26  ;;  %v1663_v30 = vmul.f32 %v2355_v61, %v3740_v53  ;;  %v1515_v24 = vpop.xlane.xlu1 %1514 }
 0x287   :  { %v1741_v42 = vmul.f32 %v3298_v62, %v1665_v28  ;;  %v2162_v38 = vpack.c.bf16 %v1785_v35, %v1784_v13  ;;  %v1783_v5 = vadd.f32 %v3304_v52, %v1707_v43  ;;  %v1738_v6 = vmul.f32 %v3295_v19, %v1662_v14 }
 0x288   :  { %v1816_v33 = vadd.f32 %v3301_v63, %v1740_v32  ;;  %2043 = vst [vmem:[%s3612_s6 + $0xb8] sm:$0xff] %v2175_v17  ;;  %v1739_v23 = vmul.f32 %v3298_v62, %v1663_v30  ;;  %v1636_v34 = vmul.f32 %v2357_v55, %v3741_v15  ;;  %v1637_v61 = vmul.f32 %v2357_v55, %v3742_v29 }
 0x289   :  { %v1817_v20 = vadd.f32 %v3304_v52, %v1741_v42  ;;  %2030 = vst [vmem:[%s3612_s6 + $0x50] sm:$0xff] %v2162_v38  ;;  %v2161_v46 = vpack.c.bf16 %v1783_v5, %v1782_v36  ;;  %v1814_v22 = vadd.f32 %v3301_v63, %v1738_v6  ;;  %v1634_v40 = vmul.f32 %v2359_v44, %v3743_v25 }
 0x28a   :  { %v1635_v21 = vmul.f32 %v2359_v44, %v3744_v12  ;;  %v1815_v51 = vadd.f32 %v3304_v52, %v1739_v23  ;;  %v1712_v45 = vmul.f32 %v3295_v19, %v1636_v34  ;;  %v1713_v56 = vmul.f32 %v3298_v62, %v1637_v61 }
 0x28b   :  { %v2178_v50 = vpack.c.bf16 %v1817_v20, %v1816_v33  ;;  %2029 = vst [vmem:[%s3612_s6 + $0x48] sm:$0xff] %v2161_v46  ;;  %v1710_v55 = vmul.f32 %v3295_v19, %v1634_v40  ;;  %v1530_v16 = vmul.f32 0.00390625, %v1464_v39  ;;  %2362 = vrsqrt.f32 %v3424_v8 }
 0x28c   :  { %v1711_v59 = vmul.f32 %v3298_v62, %v1635_v21  ;;  %v2177_v1 = vpack.c.bf16 %v1815_v51, %v1814_v22  ;;  %v1788_v3 = vadd.f32 %v3301_v63, %v1712_v45  ;;  %v1789_v49 = vadd.f32 %v3304_v52, %v1713_v56 }
 0x28d   :  { %2046 = vst [vmem:[%s3612_s6 + $0xd0] sm:$0xff] %v2178_v50  ;;  %v1786_v13 = vadd.f32 %v3301_v63, %v1710_v55  ;;  %v1562_v2 = vadd.f32 1e-05, %v1530_v16  ;;  %v1529_v54 = vmul.f32 0.00390625, %v3429_v37  ;;  %v1546_v44 = vmul.f32 0.00390625, %v1512_v60 }
 0x28e   :  { %v1787_v26 = vadd.f32 %v3304_v52, %v1711_v59  ;;  %2045 = vst [vmem:[%s3612_s6 + $0xc8] sm:$0xff] %v2177_v1  ;;  %v2164_v28 = vpack.c.bf16 %v1789_v49, %v1788_v3  ;;  %v1545_v35 = vmul.f32 0.00390625, %v3459_v27  ;;  %v1531_v43 = vmul.f32 0.00390625, %v1467_v47  ;;  %v2361_v27 = vpop.eup %2360  ;;  %v3745_v47 = vld [vmem:[#allocation20_spill] sm:$0xff] }
 0x28f   :  { %2364 = vrsqrt.f32 %v1562_v2  ;;  %v1561_v8 = vadd.f32 1e-05, %v1529_v54  ;;  %v1547_v0 = vmul.f32 0.00390625, %v1515_v24  ;;  %v1578_v14 = vadd.f32 1e-05, %v1546_v44  ;;  %v3746_v24 = vld [vmem:[#allocation22_spill] sm:$0xff] }
 0x290   :  { %v2163_v32 = vpack.c.bf16 %v1787_v26, %v1786_v13  ;;  %2032 = vst [vmem:[%s3612_s6 + $0x60] sm:$0xff] %v2164_v28  ;;  %v1577_v39 = vadd.f32 1e-05, %v1545_v35  ;;  %v1563_v37 = vadd.f32 1e-05, %v1531_v43  ;;  %v1668_v42 = vmul.f32 %v2361_v27, %v3215_v41  ;;  %v3747_v28 = vld [vmem:[#allocation19_spill] sm:$0xff] }
 0x291   :  { %2366 = vrsqrt.f32 %v1561_v8  ;;  %v1579_v17 = vadd.f32 1e-05, %v1547_v0  ;;  %v1669_v53 = vmul.f32 %v2361_v27, %v3218_v31  ;;  %v3748_v43 = vld [vmem:[#allocation21_spill] sm:$0xff] }
 0x292   :  { %2031 = vst [vmem:[%s3612_s6 + $0x58] sm:$0xff] %v2163_v32  ;;  %2368 = vrsqrt.f32 %v1578_v14  ;;  %v1744_v5 = vmul.f32 %v3295_v19, %v1668_v42 }
 0x293   :  { %2370 = vrsqrt.f32 %v1577_v39  ;;  %v1745_v33 = vmul.f32 %v3298_v62, %v1669_v53  ;;  %v3749_v39 = vld [vmem:[#allocation23_spill] sm:$0xff] }
 0x294   :  { %2372 = vrsqrt.f32 %v1563_v37  ;;  %v1820_v15 = vadd.f32 %v3301_v63, %v1744_v5 }
 0x295   :  { %2374 = vrsqrt.f32 %v1579_v17  ;;  %v2363_v36 = vpop.eup %2362  ;;  %v1821_v34 = vadd.f32 %v3304_v52, %v1745_v33 }
 0x296   :  { %v1666_v30 = vmul.f32 %v2363_v36, %v3197_v57  ;;  %v1667_v38 = vmul.f32 %v2363_v36, %v3745_v47 }
 0x297   :  { %v2180_v22 = vpack.c.bf16 %v1821_v34, %v1820_v15 }
 0x298   :  { %v1742_v20 = vmul.f32 %v3295_v19, %v1666_v30  ;;  %v1743_v23 = vmul.f32 %v3298_v62, %v1667_v38 }
 0x299   :  { %v2365_v6 = vpop.eup %2364  ;;  %2048 = vst [vmem:[%s3612_s6 + $0xe0] sm:$0xff] %v2180_v22 }
 0x29a   :  { %v1640_v41 = vmul.f32 %v2365_v6, %v3241_v7  ;;  %v1641_v31 = vmul.f32 %v2365_v6, %v3244_v11  ;;  %v1818_v29 = vadd.f32 %v3301_v63, %v1742_v20  ;;  %v1819_v61 = vadd.f32 %v3304_v52, %v1743_v23 }
 0x29b   :  { %v2367_v57 = vpop.eup %2366 }
 0x29c   :  { %v2369_v46 = vpop.eup %2368  ;;  %v1716_v25 = vmul.f32 %v3295_v19, %v1640_v41  ;;  %v1717_v40 = vmul.f32 %v3298_v62, %v1641_v31  ;;  %v1638_v12 = vmul.f32 %v2367_v57, %v3223_v58  ;;  %v2179_v50 = vpack.c.bf16 %v1819_v61, %v1818_v29 }
 0x29d   :  { %v2371_v21 = vpop.eup %2370  ;;  %v1639_v51 = vmul.f32 %v2367_v57, %v3226_v10  ;;  %v1672_v7 = vmul.f32 %v2369_v46, %v3255_v4  ;;  %v1673_v11 = vmul.f32 %v2369_v46, %v3258_v18 }
 0x29e   :  { %v2373_v45 = vpop.eup %2372  ;;  %v1792_v56 = vadd.f32 %v3301_v63, %v1716_v25  ;;  %v1793_v55 = vadd.f32 %v3304_v52, %v1717_v40  ;;  %v1714_v59 = vmul.f32 %v3295_v19, %v1638_v12  ;;  %v1670_v58 = vmul.f32 %v2371_v21, %v3235_v48  ;;  %2047 = vst [vmem:[%s3612_s6 + $0xd8] sm:$0xff] %v2179_v50 }
 0x29f   :  { %v2375_v16 = vpop.eup %2374  ;;  %v1715_v10 = vmul.f32 %v3298_v62, %v1639_v51  ;;  %v1748_v4 = vmul.f32 %v3295_v19, %v1672_v7  ;;  %v1749_v18 = vmul.f32 %v3298_v62, %v1673_v11  ;;  %v1671_v60 = vmul.f32 %v2371_v21, %v3238_v9 }
 0x2a0   :  { %v2166_v1 = vpack.c.bf16 %v1793_v55, %v1792_v56  ;;  %v1790_v3 = vadd.f32 %v3301_v63, %v1714_v59  ;;  %v1746_v49 = vmul.f32 %v3295_v19, %v1670_v58  ;;  %v1642_v48 = vmul.f32 %v2373_v45, %v3746_v24 }
 0x2a1   :  { %v1791_v13 = vadd.f32 %v3304_v52, %v1715_v10  ;;  %v1824_v26 = vadd.f32 %v3301_v63, %v1748_v4  ;;  %v1825_v2 = vadd.f32 %v3304_v52, %v1749_v18  ;;  %v1747_v54 = vmul.f32 %v3298_v62, %v1671_v60 }
 0x2a2   :  { %2034 = vst [vmem:[%s3612_s6 + $0x70] sm:$0xff] %v2166_v1  ;;  %v1822_v9 = vadd.f32 %v3301_v63, %v1746_v49  ;;  %v1643_v44 = vmul.f32 %v2373_v45, %v3747_v28  ;;  %v1718_v35 = vmul.f32 %v3295_v19, %v1642_v48  ;;  %v1674_v32 = vmul.f32 %v2375_v16, %v3748_v43 }
 0x2a3   :  { %v2165_v8 = vpack.c.bf16 %v1791_v13, %v1790_v3  ;;  %v2182_v0 = vpack.c.bf16 %v1825_v2, %v1824_v26  ;;  %v1823_v14 = vadd.f32 %v3304_v52, %v1747_v54  ;;  %v1675_v37 = vmul.f32 %v2375_v16, %v3749_v39 }
 0x2a4   :  { %v1719_v17 = vmul.f32 %v3298_v62, %v1643_v44  ;;  %v1794_v27 = vadd.f32 %v3301_v63, %v1718_v35  ;;  %v1750_v36 = vmul.f32 %v3295_v19, %v1674_v32 }
 0x2a5   :  { %2033 = vst [vmem:[%s3612_s6 + $0x68] sm:$0xff] %v2165_v8  ;;  %2050 = vst [vmem:[%s3612_s6 + $0xf0] sm:$0xff] %v2182_v0  ;;  %v2181_v42 = vpack.c.bf16 %v1823_v14, %v1822_v9  ;;  %v1751_v53 = vmul.f32 %v3298_v62, %v1675_v37 }
 0x2a6   :  { %v1795_v30 = vadd.f32 %v3304_v52, %v1719_v17  ;;  %v1826_v47 = vadd.f32 %v3301_v63, %v1750_v36 }
 0x2a7   :  { %2049 = vst [vmem:[%s3612_s6 + $0xe8] sm:$0xff] %v2181_v42  ;;  %v1827_v19 = vadd.f32 %v3304_v52, %v1751_v53 }
 0x2a8   :  { %v2167_v38 = vpack.c.bf16 %v1795_v30, %v1794_v27 }
 0x2a9   :  { %v2183_v5 = vpack.c.bf16 %v1827_v19, %v1826_v47 }
 0x2aa   :  { %2035 = vst [vmem:[%s3612_s6 + $0x78] sm:$0xff] %v2167_v38 }
 0x2ab   :  { %2051 = vst [vmem:[%s3612_s6 + $0xf8] sm:$0xff] %v2183_v5 }

// kernel: xlm_r_forward.13
= control target key start
LH: loop header
LB: loop body
LE: loop exit
PB: predicated region body
PF: predicated region fallthrough
CT: control target
= control target key end

     0   :  { %s8624_s1 = inlined_call_operand.vmem [shape: bf16[256,512], index: 1, kind: input, shape index: {}]   ;;  %s8625_s0 = inlined_call_operand.vmem [shape: bf16[256,256], index: 0, kind: input, shape index: {}, may-alias: {0,5}]   ;;  %s8626_s3 = inlined_call_operand.vmem [shape: bf16[512,256], index: 3, kind: input, shape index: {}]   ;;  %s8627_s2 = inlined_call_operand.vmem [shape: f32[1,512], index: 2, kind: input, shape index: {}]   ;;  %s8628_s4 = inlined_call_operand.vmem [shape: f32[1,256], index: 4, kind: input, shape index: {}]   ;;  %s8629_s5 = inlined_call_operand.vmem [shape: bf16[256,256], index: 5, kind: input, shape index: {}, may-alias: {0,5}]   ;;  %s8630_s6 = inlined_call_operand.vmem [shape: f32[1,256], index: 6, kind: input, shape index: {}]   ;;  %s8631_s7 = inlined_call_operand.vmem [shape: f32[1,256], index: 7, kind: input, shape index: {}]   ;;  %s8632_s8 = inlined_call_operand.vmem [shape: bf16[256,256], index: 8, kind: output, shape index: {}]  }
   0x1   :  { %v4743_v0 = vld [vmem:[%s8624_s1 + $0x4] ss:$16 sps:$4 sm:$0xff]   ;;  %v4745_v1 = vld [vmem:[%s8624_s1] ss:$16 sps:$4 sm:$0xff]   ;;  %v4796_v33 = vld [vmem:[%s8624_s1 + $0xc] ss:$16 sps:$4 sm:$0xff]  }
   0x2   :  { %695 = vmatprep.subr.bf16.mxu1 %v4743_v0  ;;  %v4746_v2 = vld [vmem:[%s8624_s1 + $0x24] ss:$16 sps:$4 sm:$0xff]   ;;  %v4748_v3 = vld [vmem:[%s8624_s1 + $0x20] ss:$16 sps:$4 sm:$0xff]   ;;  %v4794_v35 = vld [vmem:[%s8624_s1 + $0x8] ss:$16 sps:$4 sm:$0xff]  }
   0x3   :  { %696 = vmatpush1.bf16.msra.mxu1 %v4745_v1  ;;  %v4749_v4 = vld [vmem:[%s8624_s1 + $0x44] ss:$16 sps:$4 sm:$0xff]   ;;  %v4751_v5 = vld [vmem:[%s8624_s1 + $0x40] ss:$16 sps:$4 sm:$0xff]   ;;  %v4802_v37 = vld [vmem:[%s8624_s1 + $0x2c] ss:$16 sps:$4 sm:$0xff]  }
   0x4   :  { %697 = vmatprep.subr.bf16.mxu1 %v4746_v2  ;;  %v4752_v6 = vld [vmem:[%s8624_s1 + $0x64] ss:$16 sps:$4 sm:$0xff]   ;;  %v4754_v7 = vld [vmem:[%s8624_s1 + $0x60] ss:$16 sps:$4 sm:$0xff]   ;;  %v4800_v38 = vld [vmem:[%s8624_s1 + $0x28] ss:$16 sps:$4 sm:$0xff]  }
   0x5   :  { %v4755_v8 = vld [vmem:[%s8624_s1 + $0x84] ss:$16 sps:$4 sm:$0xff]   ;;  %v4757_v9 = vld [vmem:[%s8624_s1 + $0x80] ss:$16 sps:$4 sm:$0xff]   ;;  %v4808_v39 = vld [vmem:[%s8624_s1 + $0x4c] ss:$16 sps:$4 sm:$0xff]  }
   0x6   :  { %v4758_v10 = vld [vmem:[%s8624_s1 + $0xa4] ss:$16 sps:$4 sm:$0xff]   ;;  %v4760_v11 = vld [vmem:[%s8624_s1 + $0xa0] ss:$16 sps:$4 sm:$0xff]   ;;  %v4806_v42 = vld [vmem:[%s8624_s1 + $0x48] ss:$16 sps:$4 sm:$0xff]  }
   0x7   :  { %698 = vmatpush1.bf16.msra.mxu1 %v4748_v3  ;;  %v4761_v12 = vld [vmem:[%s8624_s1 + $0xc4] ss:$16 sps:$4 sm:$0xff]   ;;  %v4763_v14 = vld [vmem:[%s8624_s1 + $0xc0] ss:$16 sps:$4 sm:$0xff]   ;;  %v4814_v43 = vld [vmem:[%s8624_s1 + $0x6c] ss:$16 sps:$4 sm:$0xff]  }
   0x8   :  { %699 = vmatprep.subr.bf16.mxu1 %v4749_v4  ;;  %v5391_v13 = vld [vmem:[%s8625_s0 + $0x4] ss:$8 sps:$4 sm:$0xff]   ;;  %v4766_v16 = vld [vmem:[%s8624_s1 + $0xe0] ss:$16 sps:$4 sm:$0xff]   ;;  %v5465_v36 = vld [vmem:[%s8625_s0 + $0x14] ss:$8 sps:$4 sm:$0xff]  }
   0x9   :  { %v4764_v15 = vld [vmem:[%s8624_s1 + $0xe4] ss:$16 sps:$4 sm:$0xff]   ;;  %727 = vmatprep.mubr.bf16.mxu1 %v5391_v13  ;;  %v4769_v18 = vld [vmem:[%s8624_s1 + $0x100] ss:$16 sps:$4 sm:$0xff]   ;;  %v4812_v44 = vld [vmem:[%s8624_s1 + $0x68] ss:$16 sps:$4 sm:$0xff]  }
   0xa   :  { %v4767_v17 = vld [vmem:[%s8624_s1 + $0x104] ss:$16 sps:$4 sm:$0xff]   ;;  %v4772_v20 = vld [vmem:[%s8624_s1 + $0x120] ss:$16 sps:$4 sm:$0xff]   ;;  %v4820_v45 = vld [vmem:[%s8624_s1 + $0x8c] ss:$16 sps:$4 sm:$0xff]  }
   0xb   :  { %700 = vmatpush1.bf16.msra.mxu1 %v4751_v5  ;;  %v4770_v19 = vld [vmem:[%s8624_s1 + $0x124] ss:$16 sps:$4 sm:$0xff]   ;;  %v4775_v22 = vld [vmem:[%s8624_s1 + $0x140] ss:$16 sps:$4 sm:$0xff]   ;;  %v4818_v48 = vld [vmem:[%s8624_s1 + $0x88] ss:$16 sps:$4 sm:$0xff]  }
   0xc   :  { %701 = vmatprep.subr.bf16.mxu1 %v4752_v6  ;;  %v4773_v21 = vld [vmem:[%s8624_s1 + $0x144] ss:$16 sps:$4 sm:$0xff]   ;;  %v4778_v24 = vld [vmem:[%s8624_s1 + $0x160] ss:$16 sps:$4 sm:$0xff]   ;;  %v4826_v49 = vld [vmem:[%s8624_s1 + $0xac] ss:$16 sps:$4 sm:$0xff]  }
   0xd   :  { %v4776_v23 = vld [vmem:[%s8624_s1 + $0x164] ss:$16 sps:$4 sm:$0xff]   ;;  %v4781_v26 = vld [vmem:[%s8624_s1 + $0x180] ss:$16 sps:$4 sm:$0xff]   ;;  %v4824_v50 = vld [vmem:[%s8624_s1 + $0xa8] ss:$16 sps:$4 sm:$0xff]  }
   0xe   :  { %v4779_v25 = vld [vmem:[%s8624_s1 + $0x184] ss:$16 sps:$4 sm:$0xff]   ;;  %v4784_v28 = vld [vmem:[%s8624_s1 + $0x1a0] ss:$16 sps:$4 sm:$0xff]   ;;  %v4832_v51 = vld [vmem:[%s8624_s1 + $0xcc] ss:$16 sps:$4 sm:$0xff]  }
   0xf   :  { %702 = vmatpush1.bf16.msra.mxu1 %v4754_v7  ;;  %v4782_v27 = vld [vmem:[%s8624_s1 + $0x1a4] ss:$16 sps:$4 sm:$0xff]   ;;  %v4787_v30 = vld [vmem:[%s8624_s1 + $0x1c0] ss:$16 sps:$4 sm:$0xff]   ;;  %v4830_v54 = vld [vmem:[%s8624_s1 + $0xc8] ss:$16 sps:$4 sm:$0xff]  }
  0x10   :  { %703 = vmatprep.subr.bf16.mxu1 %v4755_v8  ;;  %v4785_v29 = vld [vmem:[%s8624_s1 + $0x1c4] ss:$16 sps:$4 sm:$0xff]   ;;  %v4790_v32 = vld [vmem:[%s8624_s1 + $0x1e0] ss:$16 sps:$4 sm:$0xff]   ;;  %v4838_v55 = vld [vmem:[%s8624_s1 + $0xec] ss:$16 sps:$4 sm:$0xff]  }
  0x11   :  { %v4788_v31 = vld [vmem:[%s8624_s1 + $0x1e4] ss:$16 sps:$4 sm:$0xff]   ;;  %v5457_v34 = vld [vmem:[%s8625_s0] ss:$8 sps:$4 sm:$0xff]   ;;  %v5481_v40 = vld [vmem:[%s8625_s0 + $0x10] ss:$8 sps:$4 sm:$0xff]  }
  0x12   :  { %v5486_v41 = vld [vmem:[%s8625_s0 + $0x24] ss:$8 sps:$4 sm:$0xff]   ;;  %v5505_v46 = vld [vmem:[%s8625_s0 + $0x20] ss:$8 sps:$4 sm:$0xff]   ;;  %v5510_v47 = vld [vmem:[%s8625_s0 + $0x34] ss:$8 sps:$4 sm:$0xff]  }
  0x13   :  { %704 = vmatpush1.bf16.msra.mxu1 %v4757_v9  ;;  %v5529_v52 = vld [vmem:[%s8625_s0 + $0x30] ss:$8 sps:$4 sm:$0xff]   ;;  %v5534_v53 = vld [vmem:[%s8625_s0 + $0x44] ss:$8 sps:$4 sm:$0xff]   ;;  %v5553_v58 = vld [vmem:[%s8625_s0 + $0x40] ss:$8 sps:$4 sm:$0xff]  }
  0x14   :  { %705 = vmatprep.subr.bf16.mxu1 %v4758_v10  ;;  %v4836_v56 = vld [vmem:[%s8624_s1 + $0xe8] ss:$16 sps:$4 sm:$0xff]   ;;  %v4844_v57 = vld [vmem:[%s8624_s1 + $0x10c] ss:$16 sps:$4 sm:$0xff]  }
  0x15   :  { %v5558_v59 = vld [vmem:[%s8625_s0 + $0x54] ss:$8 sps:$4 sm:$0xff]   ;;  %v4842_v60 = vld [vmem:[%s8624_s1 + $0x108] ss:$16 sps:$4 sm:$0xff]   ;;  %v5582_v1 = vld [vmem:[%s8625_s0 + $0x64] ss:$8 sps:$4 sm:$0xff]  }
  0x16   :  { %v4850_v61 = vld [vmem:[%s8624_s1 + $0x12c] ss:$16 sps:$4 sm:$0xff]   ;;  %v4848_v62 = vld [vmem:[%s8624_s1 + $0x128] ss:$16 sps:$4 sm:$0xff]  }
  0x17   :  { %706 = vmatpush1.bf16.msra.mxu1 %v4760_v11  ;;  %v4856_v63 = vld [vmem:[%s8624_s1 + $0x14c] ss:$16 sps:$4 sm:$0xff]   ;;  %v5577_v0 = vld [vmem:[%s8625_s0 + $0x50] ss:$8 sps:$4 sm:$0xff]   ;;  %v5601_v6 = vld [vmem:[%s8625_s0 + $0x60] ss:$8 sps:$4 sm:$0xff]  }
  0x18   :  { %707 = vmatprep.subr.bf16.mxu1 %v4761_v12  ;;  %v4854_v2 = vld [vmem:[%s8624_s1 + $0x148] ss:$16 sps:$4 sm:$0xff]   ;;  %v4862_v3 = vld [vmem:[%s8624_s1 + $0x16c] ss:$16 sps:$4 sm:$0xff]  }
  0x19   :  { %v4860_v4 = vld [vmem:[%s8624_s1 + $0x168] ss:$16 sps:$4 sm:$0xff]   ;;  %v4868_v5 = vld [vmem:[%s8624_s1 + $0x18c] ss:$16 sps:$4 sm:$0xff]  }
  0x1a   :  { %v5606_v7 = vld [vmem:[%s8625_s0 + $0x74] ss:$8 sps:$4 sm:$0xff]   ;;  %v4866_v8 = vld [vmem:[%s8624_s1 + $0x188] ss:$16 sps:$4 sm:$0xff]  }
  0x1b   :  { %708 = vmatpush1.bf16.msra.mxu1 %v4763_v14  ;;  %v4874_v9 = vld [vmem:[%s8624_s1 + $0x1ac] ss:$16 sps:$4 sm:$0xff]   ;;  %v4872_v10 = vld [vmem:[%s8624_s1 + $0x1a8] ss:$16 sps:$4 sm:$0xff]  }
  0x1c   :  { %709 = vmatprep.subr.bf16.mxu1 %v4764_v15  ;;  %v4880_v11 = vld [vmem:[%s8624_s1 + $0x1cc] ss:$16 sps:$4 sm:$0xff]   ;;  %v5625_v12 = vld [vmem:[%s8625_s0 + $0x70] ss:$8 sps:$4 sm:$0xff]  }
  0x1d   :  { %v4887_v14 = vld [vmem:[%s8626_s3 + $0x4] ss:$8 sps:$4 sm:$0xff]  }
  0x1e   :  { %v5633_v15 = vld [vmem:[%s8625_s0 + $0x84] ss:$8 sps:$4 sm:$0xff]   ;;  %2745 = vmatprep.subr.bf16.mxu0 %v4887_v14  ;;  %v4932_v14 = vld [vmem:[%s8626_s3 + $0xf4] ss:$8 sps:$4 sm:$0xff]  }
  0x1f   :  { %710 = vmatpush1.bf16.msra.mxu1 %v4766_v16  ;;  %v4878_v16 = vld [vmem:[%s8624_s1 + $0x1c8] ss:$16 sps:$4 sm:$0xff]  }
  0x20   :  { %711 = vmatprep.subr.bf16.mxu1 %v4767_v17  ;;  %v4886_v17 = vld [vmem:[%s8624_s1 + $0x1ec] ss:$16 sps:$4 sm:$0xff]  }
  0x23   :  { %712 = vmatpush1.bf16.msra.mxu1 %v4769_v18  ;;  %v4889_v18 = vld [vmem:[%s8626_s3] ss:$8 sps:$4 sm:$0xff]  }
  0x24   :  { %713 = vmatprep.subr.bf16.mxu1 %v4770_v19  ;;  %v4884_v19 = vld [vmem:[%s8624_s1 + $0x1e8] ss:$16 sps:$4 sm:$0xff]   ;;  %2746 = vmatpush1.bf16.msra.mxu0 %v4889_v18  ;;  %v4937_v18 = vld [vmem:[%s8626_s3 + $0x104] ss:$8 sps:$4 sm:$0xff]  }
  0x27   :  { %714 = vmatpush1.bf16.msra.mxu1 %v4772_v20  ;;  %v4890_v20 = vld [vmem:[%s8626_s3 + $0x14] ss:$8 sps:$4 sm:$0xff]  }
  0x28   :  { %715 = vmatprep.subr.bf16.mxu1 %v4773_v21  ;;  %v4892_v21 = vld [vmem:[%s8626_s3 + $0x10] ss:$8 sps:$4 sm:$0xff]   ;;  %2747 = vmatprep.subr.bf16.mxu0 %v4890_v20 }
  0x29   :  { %2748 = vmatpush1.bf16.msra.mxu0 %v4892_v21 }
  0x2b   :  { %716 = vmatpush1.bf16.msra.mxu1 %v4775_v22  ;;  %v4893_v22 = vld [vmem:[%s8626_s3 + $0x24] ss:$8 sps:$4 sm:$0xff]  }
  0x2c   :  { %717 = vmatprep.subr.bf16.mxu1 %v4776_v23  ;;  %v5661_v23 = vld [vmem:[%s8625_s0 + $0x80] ss:$8 sps:$4 sm:$0xff]   ;;  %2749 = vmatprep.subr.bf16.mxu0 %v4893_v22 }
  0x2f   :  { %718 = vmatpush1.bf16.msra.mxu1 %v4778_v24  ;;  %v5666_v24 = vld [vmem:[%s8625_s0 + $0x94] ss:$8 sps:$4 sm:$0xff]  }
  0x30   :  { %719 = vmatprep.subr.bf16.mxu1 %v4779_v25  ;;  %v4895_v25 = vld [vmem:[%s8626_s3 + $0x20] ss:$8 sps:$4 sm:$0xff]  }
  0x31   :  { %2750 = vmatpush1.bf16.msra.mxu0 %v4895_v25 }
  0x33   :  { %720 = vmatpush1.bf16.msra.mxu1 %v4781_v26  ;;  %v4896_v26 = vld [vmem:[%s8626_s3 + $0x34] ss:$8 sps:$4 sm:$0xff]  }
  0x34   :  { %721 = vmatprep.subr.bf16.mxu1 %v4782_v27  ;;  %v4898_v27 = vld [vmem:[%s8626_s3 + $0x30] ss:$8 sps:$4 sm:$0xff]   ;;  %2751 = vmatprep.subr.bf16.mxu0 %v4896_v26 }
  0x35   :  { %2752 = vmatpush1.bf16.msra.mxu0 %v4898_v27 }
  0x37   :  { %722 = vmatpush1.bf16.msra.mxu1 %v4784_v28  ;;  %v4899_v28 = vld [vmem:[%s8626_s3 + $0x44] ss:$8 sps:$4 sm:$0xff]  }
  0x38   :  { %723 = vmatprep.subr.bf16.mxu1 %v4785_v29  ;;  %v5685_v29 = vld [vmem:[%s8625_s0 + $0x90] ss:$8 sps:$4 sm:$0xff]   ;;  %2753 = vmatprep.subr.bf16.mxu0 %v4899_v28 }
  0x3b   :  { %724 = vmatpush1.bf16.msra.mxu1 %v4787_v30  ;;  %v5690_v30 = vld [vmem:[%s8625_s0 + $0xa4] ss:$8 sps:$4 sm:$0xff]  }
  0x3c   :  { %725 = vmatprep.subr.bf16.mxu1 %v4788_v31  ;;  %v4901_v31 = vld [vmem:[%s8626_s3 + $0x40] ss:$8 sps:$4 sm:$0xff]  }
  0x3d   :  { %2754 = vmatpush1.bf16.msra.mxu0 %v4901_v31 }
  0x3f   :  { %726 = vmatpush1.bf16.msra.mxu1 %v4790_v32  ;;  %v4902_v32 = vld [vmem:[%s8626_s3 + $0x54] ss:$8 sps:$4 sm:$0xff]  }
  0x40   :  { %888 = vmatprep.subr.bf16.mxu1 %v4796_v33  ;;  %v4904_v33 = vld [vmem:[%s8626_s3 + $0x50] ss:$8 sps:$4 sm:$0xff]   ;;  %2755 = vmatprep.subr.bf16.mxu0 %v4902_v32 }
  0x41   :  { %2756 = vmatpush1.bf16.msra.mxu0 %v4904_v33 }
  0x42   :  { %728 = vmatmul.mubr.bf16.vlgmr.msra.gmra.mrb[0].mxu1 %v5457_v34 }
  0x43   :  { %889 = vmatpush1.bf16.msra.mxu1 %v4794_v35  ;;  %737 = vmatprep.mubr.bf16.mxu1 %v5465_v36  ;;  %v4905_v35 = vld [vmem:[%s8626_s3 + $0x64] ss:$8 sps:$4 sm:$0xff]  }
  0x44   :  { %890 = vmatprep.subr.bf16.mxu1 %v4802_v37  ;;  %v5709_v37 = vld [vmem:[%s8625_s0 + $0xa0] ss:$8 sps:$4 sm:$0xff]   ;;  %2757 = vmatprep.subr.bf16.mxu0 %v4905_v35 }
  0x47   :  { %891 = vmatpush1.bf16.msra.mxu1 %v4800_v38  ;;  %v5714_v38 = vld [vmem:[%s8625_s0 + $0xb4] ss:$8 sps:$4 sm:$0xff]  }
  0x48   :  { %892 = vmatprep.subr.bf16.mxu1 %v4808_v39  ;;  %v4907_v39 = vld [vmem:[%s8626_s3 + $0x60] ss:$8 sps:$4 sm:$0xff]  }
  0x49   :  { %2758 = vmatpush1.bf16.msra.mxu0 %v4907_v39 }
  0x4a   :  { %738 = vmatmul.mubr.bf16.gmra.mrb[4].mxu1 %v5481_v40 }
  0x4b   :  { %747 = vmatprep.mubr.bf16.mxu1 %v5486_v41  ;;  %893 = vmatpush1.bf16.msra.mxu1 %v4806_v42  ;;  %v4908_v42 = vld [vmem:[%s8626_s3 + $0x74] ss:$8 sps:$4 sm:$0xff]  }
  0x4c   :  { %894 = vmatprep.subr.bf16.mxu1 %v4814_v43  ;;  %v4910_v43 = vld [vmem:[%s8626_s3 + $0x70] ss:$8 sps:$4 sm:$0xff]   ;;  %2759 = vmatprep.subr.bf16.mxu0 %v4908_v42 }
  0x4d   :  { %2760 = vmatpush1.bf16.msra.mxu0 %v4910_v43 }
  0x4f   :  { %895 = vmatpush1.bf16.msra.mxu1 %v4812_v44  ;;  %v5730_v44 = vld [vmem:[%s8625_s0 + $0xb0] ss:$8 sps:$4 sm:$0xff]  }
  0x50   :  { %896 = vmatprep.subr.bf16.mxu1 %v4820_v45  ;;  %v5735_v45 = vld [vmem:[%s8625_s0 + $0xc4] ss:$8 sps:$4 sm:$0xff]  }
  0x52   :  { %748 = vmatmul.mubr.bf16.gmra.mrb[8].mxu1 %v5505_v46 }
  0x53   :  { %757 = vmatprep.mubr.bf16.mxu1 %v5510_v47  ;;  %897 = vmatpush1.bf16.msra.mxu1 %v4818_v48  ;;  %v4911_v48 = vld [vmem:[%s8626_s3 + $0x84] ss:$8 sps:$4 sm:$0xff]  }
  0x54   :  { %898 = vmatprep.subr.bf16.mxu1 %v4826_v49  ;;  %v4913_v49 = vld [vmem:[%s8626_s3 + $0x80] ss:$8 sps:$4 sm:$0xff]   ;;  %2761 = vmatprep.subr.bf16.mxu0 %v4911_v48 }
  0x55   :  { %2762 = vmatpush1.bf16.msra.mxu0 %v4913_v49 }
  0x57   :  { %899 = vmatpush1.bf16.msra.mxu1 %v4824_v50  ;;  %v4914_v50 = vld [vmem:[%s8626_s3 + $0x94] ss:$8 sps:$4 sm:$0xff]  }
  0x58   :  { %900 = vmatprep.subr.bf16.mxu1 %v4832_v51  ;;  %v4916_v51 = vld [vmem:[%s8626_s3 + $0x90] ss:$8 sps:$4 sm:$0xff]   ;;  %2763 = vmatprep.subr.bf16.mxu0 %v4914_v50 }
  0x59   :  { %2764 = vmatpush1.bf16.msra.mxu0 %v4916_v51 }
  0x5a   :  { %758 = vmatmul.mubr.bf16.gmra.mrb[12].mxu1 %v5529_v52 }
  0x5b   :  { %767 = vmatprep.mubr.bf16.mxu1 %v5534_v53  ;;  %901 = vmatpush1.bf16.msra.mxu1 %v4830_v54  ;;  %v5754_v54 = vld [vmem:[%s8625_s0 + $0xc0] ss:$8 sps:$4 sm:$0xff]  }
  0x5c   :  { %902 = vmatprep.subr.bf16.mxu1 %v4838_v55  ;;  %v5759_v55 = vld [vmem:[%s8625_s0 + $0xd4] ss:$8 sps:$4 sm:$0xff]  }
  0x5f   :  { %903 = vmatpush1.bf16.msra.mxu1 %v4836_v56  ;;  %v4917_v56 = vld [vmem:[%s8626_s3 + $0xa4] ss:$8 sps:$4 sm:$0xff]  }
  0x60   :  { %904 = vmatprep.subr.bf16.mxu1 %v4844_v57  ;;  %v4919_v57 = vld [vmem:[%s8626_s3 + $0xa0] ss:$8 sps:$4 sm:$0xff]   ;;  %2765 = vmatprep.subr.bf16.mxu0 %v4917_v56 }
  0x61   :  { %2766 = vmatpush1.bf16.msra.mxu0 %v4919_v57 }
  0x62   :  { %768 = vmatmul.mubr.bf16.gmra.mrb[16].mxu1 %v5553_v58 }
  0x63   :  { %777 = vmatprep.mubr.bf16.mxu1 %v5558_v59  ;;  %905 = vmatpush1.bf16.msra.mxu1 %v4842_v60  ;;  %v4920_v60 = vld [vmem:[%s8626_s3 + $0xb4] ss:$8 sps:$4 sm:$0xff]  }
  0x64   :  { %906 = vmatprep.subr.bf16.mxu1 %v4850_v61  ;;  %v4922_v61 = vld [vmem:[%s8626_s3 + $0xb0] ss:$8 sps:$4 sm:$0xff]   ;;  %2767 = vmatprep.subr.bf16.mxu0 %v4920_v60 }
  0x65   :  { %2768 = vmatpush1.bf16.msra.mxu0 %v4922_v61 }
  0x67   :  { %907 = vmatpush1.bf16.msra.mxu1 %v4848_v62  ;;  %v5778_v62 = vld [vmem:[%s8625_s0 + $0xd0] ss:$8 sps:$4 sm:$0xff]  }
  0x68   :  { %908 = vmatprep.subr.bf16.mxu1 %v4856_v63  ;;  %v5783_v63 = vld [vmem:[%s8625_s0 + $0xe4] ss:$8 sps:$4 sm:$0xff]  }
  0x6a   :  { %778 = vmatmul.mubr.bf16.gmra.mrb[20].mxu1 %v5577_v0 }
  0x6b   :  { %787 = vmatprep.mubr.bf16.mxu1 %v5582_v1  ;;  %909 = vmatpush1.bf16.msra.mxu1 %v4854_v2  ;;  %v4923_v2 = vld [vmem:[%s8626_s3 + $0xc4] ss:$8 sps:$4 sm:$0xff]  }
  0x6c   :  { %910 = vmatprep.subr.bf16.mxu1 %v4862_v3  ;;  %v4925_v3 = vld [vmem:[%s8626_s3 + $0xc0] ss:$8 sps:$4 sm:$0xff]   ;;  %2769 = vmatprep.subr.bf16.mxu0 %v4923_v2 }
  0x6d   :  { %2770 = vmatpush1.bf16.msra.mxu0 %v4925_v3 }
  0x6f   :  { %911 = vmatpush1.bf16.msra.mxu1 %v4860_v4  ;;  %v4926_v4 = vld [vmem:[%s8626_s3 + $0xd4] ss:$8 sps:$4 sm:$0xff]  }
  0x70   :  { %912 = vmatprep.subr.bf16.mxu1 %v4868_v5  ;;  %v4928_v5 = vld [vmem:[%s8626_s3 + $0xd0] ss:$8 sps:$4 sm:$0xff]   ;;  %2771 = vmatprep.subr.bf16.mxu0 %v4926_v4 }
  0x71   :  { %2772 = vmatpush1.bf16.msra.mxu0 %v4928_v5 }
  0x72   :  { %788 = vmatmul.mubr.bf16.gmra.mrb[24].mxu1 %v5601_v6 }
  0x73   :  { %797 = vmatprep.mubr.bf16.mxu1 %v5606_v7  ;;  %913 = vmatpush1.bf16.msra.mxu1 %v4866_v8  ;;  %v5802_v8 = vld [vmem:[%s8625_s0 + $0xe0] ss:$8 sps:$4 sm:$0xff]  }
  0x74   :  { %914 = vmatprep.subr.bf16.mxu1 %v4874_v9  ;;  %v5807_v9 = vld [vmem:[%s8625_s0 + $0xf4] ss:$8 sps:$4 sm:$0xff]  }
  0x77   :  { %915 = vmatpush1.bf16.msra.mxu1 %v4872_v10  ;;  %v4929_v10 = vld [vmem:[%s8626_s3 + $0xe4] ss:$8 sps:$4 sm:$0xff]  }
  0x78   :  { %916 = vmatprep.subr.bf16.mxu1 %v4880_v11  ;;  %v4931_v11 = vld [vmem:[%s8626_s3 + $0xe0] ss:$8 sps:$4 sm:$0xff]   ;;  %2773 = vmatprep.subr.bf16.mxu0 %v4929_v10 }
  0x79   :  { %2774 = vmatpush1.bf16.msra.mxu0 %v4931_v11 }
  0x7a   :  { %798 = vmatmul.mubr.bf16.gmra.mrb[28].mxu1 %v5625_v12  ;;  %2775 = vmatprep.subr.bf16.mxu0 %v4932_v14 }
  0x7b   :  { %807 = vmatprep.mubr.bf16.mxu1 %v5633_v15  ;;  %917 = vmatpush1.bf16.msra.mxu1 %v4878_v16  ;;  %v4934_v16 = vld [vmem:[%s8626_s3 + $0xf0] ss:$8 sps:$4 sm:$0xff]  }
  0x7c   :  { %918 = vmatprep.subr.bf16.mxu1 %v4886_v17  ;;  %v5826_v17 = vld [vmem:[%s8625_s0 + $0xf0] ss:$8 sps:$4 sm:$0xff]  }
  0x7d   :  { %2776 = vmatpush1.bf16.msra.mxu0 %v4934_v16 }
  0x7e   :  { %2938 = vmatprep.subr.bf16.mxu0 %v4937_v18 }
  0x7f   :  { %919 = vmatpush1.bf16.msra.mxu1 %v4884_v19 }
  0x82   :  { %808 = vmatmul.mubr.bf16.gmra.mrb[32].mxu1 %v5661_v23 }
  0x83   :  { %817 = vmatprep.mubr.bf16.mxu1 %v5666_v24 }
  0x8a   :  { %818 = vmatmul.mubr.bf16.gmra.mrb[36].mxu1 %v5685_v29 }
  0x8b   :  { %827 = vmatprep.mubr.bf16.mxu1 %v5690_v30 }
  0x92   :  { %828 = vmatmul.mubr.bf16.gmra.mrb[40].mxu1 %v5709_v37 }
  0x93   :  { %837 = vmatprep.mubr.bf16.mxu1 %v5714_v38 }
  0x9a   :  { %838 = vmatmul.mubr.bf16.gmra.mrb[44].mxu1 %v5730_v44 }
  0x9b   :  { %847 = vmatprep.mubr.bf16.mxu1 %v5735_v45 }
  0xa2   :  { %848 = vmatmul.mubr.bf16.gmra.mrb[48].mxu1 %v5754_v54 }
  0xa3   :  { %857 = vmatprep.mubr.bf16.mxu1 %v5759_v55 }
  0xaa   :  { %858 = vmatmul.mubr.bf16.gmra.mrb[52].mxu1 %v5778_v62 }
  0xab   :  { %867 = vmatprep.mubr.bf16.mxu1 %v5783_v63 }
  0xb2   :  { %868 = vmatmul.mubr.bf16.gmra.mrb[56].mxu1 %v5802_v8 }
  0xb3   :  { %877 = vmatprep.mubr.bf16.mxu1 %v5807_v9 }
  0xba   :  { %878 = vmatmul.mubr.bf16.gmra.mrb[60].mxu1 %v5826_v17 }
  0xbb   :  { %920 = vmatprep.mubr.bf16.mxu1 %v5391_v13  ;;  %v195_v13 = vlaneseq }
  0xc2   :  { %921 = vmatmul.mubr.bf16.vlgmr.msra.gmra.mrb[64].mxu1 %v5457_v34  ;;  %v5852_v34 = vshrl.u32 %v195_v13, 7 }
  0xc3   :  { %930 = vmatprep.mubr.bf16.mxu1 %v5465_v36 }
  0xc4   :  { %v5856_v36 = vsub.s32 0, %v5852_v34 }
  0xc6   :  { %8677 = vst [vmem:[#allocation3_spill] sm:$0xff] %v5856_v36 }
  0xca   :  { %931 = vmatmul.mubr.bf16.gmra.mrb[68].mxu1 %v5481_v40  ;;  %v193_v40 = vld [vmem:[%s8627_s2] sm:$0xf] }
  0xcb   :  { %940 = vmatprep.mubr.bf16.mxu1 %v5486_v41  ;;  %v5862_v41 = vsub.s32 1, %v5852_v34 }
  0xcd   :  { %8678 = vst [vmem:[#allocation4_spill] sm:$0xff] %v5862_v41 }
  0xd2   :  { %941 = vmatmul.mubr.bf16.gmra.mrb[72].mxu1 %v5505_v46  ;;  %v5866_v46 = vrot.slane %v193_v40, %v5856_v36 }
  0xd3   :  { %950 = vmatprep.mubr.bf16.mxu1 %v5510_v47  ;;  %v5869_v47 = vrot.slane %v193_v40, %v5862_v41 }
  0xda   :  { %951 = vmatmul.mubr.bf16.gmra.mrb[76].mxu1 %v5529_v52 }
  0xdb   :  { %960 = vmatprep.mubr.bf16.mxu1 %v5534_v53 }
  0xe2   :  { %961 = vmatmul.mubr.bf16.gmra.mrb[80].mxu1 %v5553_v58 }
  0xe3   :  { %970 = vmatprep.mubr.bf16.mxu1 %v5558_v59 }
  0xea   :  { %971 = vmatmul.mubr.bf16.gmra.mrb[84].mxu1 %v5577_v0 }
  0xeb   :  { %980 = vmatprep.mubr.bf16.mxu1 %v5582_v1 }
  0xf2   :  { %981 = vmatmul.mubr.bf16.gmra.mrb[88].mxu1 %v5601_v6 }
  0xf3   :  { %990 = vmatprep.mubr.bf16.mxu1 %v5606_v7 }
  0xfa   :  { %991 = vmatmul.mubr.bf16.gmra.mrb[92].mxu1 %v5625_v12 }
  0xfb   :  { %1000 = vmatprep.mubr.bf16.mxu1 %v5633_v15 }
 0x102   :  { %1001 = vmatmul.mubr.bf16.gmra.mrb[96].mxu1 %v5661_v23 }
 0x103   :  { %1010 = vmatprep.mubr.bf16.mxu1 %v5666_v24 }
 0x10a   :  { %1011 = vmatmul.mubr.bf16.gmra.mrb[100].mxu1 %v5685_v29 }
 0x10b   :  { %1020 = vmatprep.mubr.bf16.mxu1 %v5690_v30 }
 0x112   :  { %1021 = vmatmul.mubr.bf16.gmra.mrb[104].mxu1 %v5709_v37 }
 0x113   :  { %1030 = vmatprep.mubr.bf16.mxu1 %v5714_v38 }
 0x115   :  { %v729_v52 = vpop.f32.mrb[0].mxu1 }
 0x116   :  { %v5873_v53 = vadd.f32 %v729_v52, %v5866_v46  ;;  %v731_v58 = vpop.f32.mrb[1].mxu1 }
 0x117   :  { %v5876_v59 = vadd.f32 %v731_v58, %v5869_v47  ;;  %v733_v0 = vpop.f32.mrb[2].mxu1 }
 0x118   :  { %v1081_v1 = vmul.f32 %v5873_v53, %v5873_v53  ;;  %v5881_v6 = vadd.f32 %v733_v0, %v5866_v46  ;;  %v735_v7 = vpop.f32.mrb[3].mxu1 }
 0x119   :  { %v1082_v12 = vmul.f32 %v5876_v59, %v5876_v59  ;;  %v5886_v15 = vadd.f32 %v735_v7, %v5869_v47 }
 0x11a   :  { %v1209_v19 = vmul.f32 %v1081_v1, %v5873_v53  ;;  %v1085_v20 = vmul.f32 %v5881_v6, %v5881_v6  ;;  %1031 = vmatmul.mubr.bf16.gmra.mrb[108].mxu1 %v5730_v44 }
 0x11b   :  { %v1210_v21 = vmul.f32 %v1082_v12, %v5876_v59  ;;  %v1086_v22 = vmul.f32 %v5886_v15, %v5886_v15  ;;  %1040 = vmatprep.mubr.bf16.mxu1 %v5735_v45 }
 0x11c   :  { %v1337_v23 = vmul.f32 0.044715, %v1209_v19  ;;  %v1213_v24 = vmul.f32 %v1085_v20, %v5881_v6 }
 0x11d   :  { %v1338_v25 = vmul.f32 0.044715, %v1210_v21  ;;  %v1214_v26 = vmul.f32 %v1086_v22, %v5886_v15  ;;  %v739_v27 = vpop.f32.mrb[4].mxu1 }
 0x11e   :  { %v1465_v28 = vadd.f32 %v1337_v23, %v5873_v53  ;;  %v1341_v29 = vmul.f32 0.044715, %v1213_v24  ;;  %v5900_v30 = vadd.f32 %v739_v27, %v5866_v46  ;;  %v741_v31 = vpop.f32.mrb[5].mxu1 }
 0x11f   :  { %v1342_v32 = vmul.f32 0.044715, %v1214_v26  ;;  %v5903_v33 = vadd.f32 %v741_v31, %v5869_v47  ;;  %v743_v35 = vpop.f32.mrb[6].mxu1  ;;  %v1466_v37 = vadd.f32 %v1338_v25, %v5876_v59 }
 0x120   :  { %v1593_v38 = vmul.f32 0.7978846, %v1465_v28  ;;  %v1469_v39 = vadd.f32 %v1341_v29, %v5881_v6  ;;  %v1089_v42 = vmul.f32 %v5900_v30, %v5900_v30  ;;  %v5910_v43 = vadd.f32 %v743_v35, %v5866_v46  ;;  %v745_v44 = vpop.f32.mrb[7].mxu1 }
 0x121   :  { %v1090_v45 = vmul.f32 %v5903_v33, %v5903_v33  ;;  %v5915_v48 = vadd.f32 %v745_v44, %v5869_v47  ;;  %v1470_v49 = vadd.f32 %v1342_v32, %v5886_v15  ;;  %v1594_v50 = vmul.f32 0.7978846, %v1466_v37 }
 0x122   :  { %4983 = vtanh.f32 %v1593_v38  ;;  %v1597_v51 = vmul.f32 0.7978846, %v1469_v39  ;;  %v1217_v56 = vmul.f32 %v1089_v42, %v5900_v30  ;;  %v1093_v57 = vmul.f32 %v5910_v43, %v5910_v43  ;;  %1041 = vmatmul.mubr.bf16.gmra.mrb[112].mxu1 %v5754_v54 }
 0x123   :  { %v1218_v60 = vmul.f32 %v1090_v45, %v5903_v33  ;;  %v1094_v61 = vmul.f32 %v5915_v48, %v5915_v48  ;;  %1050 = vmatprep.mubr.bf16.mxu1 %v5759_v55  ;;  %v1598_v2 = vmul.f32 0.7978846, %v1470_v49  ;;  %4985 = vtanh.f32 %v1594_v50 }
 0x124   :  { %4987 = vtanh.f32 %v1597_v51  ;;  %v1345_v3 = vmul.f32 0.044715, %v1217_v56  ;;  %v1221_v4 = vmul.f32 %v1093_v57, %v5910_v43 }
 0x125   :  { %v1346_v5 = vmul.f32 0.044715, %v1218_v60  ;;  %v1222_v10 = vmul.f32 %v1094_v61, %v5915_v48  ;;  %v749_v11 = vpop.f32.mrb[8].mxu1  ;;  %4989 = vtanh.f32 %v1598_v2 }
 0x126   :  { %v1473_v14 = vadd.f32 %v1345_v3, %v5900_v30  ;;  %v1349_v54 = vmul.f32 0.044715, %v1221_v4  ;;  %v5930_v16 = vadd.f32 %v749_v11, %v5866_v46  ;;  %v751_v18 = vpop.f32.mrb[9].mxu1 }
 0x127   :  { %v1474_v13 = vadd.f32 %v1346_v5, %v5903_v33  ;;  %v1350_v55 = vmul.f32 0.044715, %v1222_v10  ;;  %v5934_v40 = vadd.f32 %v751_v18, %v5869_v47  ;;  %v753_v52 = vpop.f32.mrb[10].mxu1 }
 0x128   :  { %v1601_v58 = vmul.f32 0.7978846, %v1473_v14  ;;  %v1477_v0 = vadd.f32 %v1349_v54, %v5910_v43  ;;  %v1097_v1 = vmul.f32 %v5930_v16, %v5930_v16  ;;  %v5940_v7 = vadd.f32 %v753_v52, %v5866_v46  ;;  %v755_v12 = vpop.f32.mrb[11].mxu1 }
 0x129   :  { %v1602_v19 = vmul.f32 0.7978846, %v1474_v13  ;;  %v1478_v20 = vadd.f32 %v1350_v55, %v5915_v48  ;;  %v1098_v21 = vmul.f32 %v5934_v40, %v5934_v40  ;;  %v5946_v22 = vadd.f32 %v755_v12, %v5869_v47 }
 0x12a   :  { %4991 = vtanh.f32 %v1601_v58  ;;  %v1605_v23 = vmul.f32 0.7978846, %v1477_v0  ;;  %v1225_v24 = vmul.f32 %v1097_v1, %v5930_v16  ;;  %v1101_v25 = vmul.f32 %v5940_v7, %v5940_v7  ;;  %1051 = vmatmul.mubr.bf16.gmra.mrb[116].mxu1 %v5778_v62 }
 0x12b   :  { %4993 = vtanh.f32 %v1602_v19  ;;  %v1606_v26 = vmul.f32 0.7978846, %v1478_v20  ;;  %v1226_v27 = vmul.f32 %v1098_v21, %v5934_v40  ;;  %v1102_v28 = vmul.f32 %v5946_v22, %v5946_v22  ;;  %1060 = vmatprep.mubr.bf16.mxu1 %v5783_v63 }
 0x12c   :  { %v4984_v29 = vpop.eup %4983  ;;  %4995 = vtanh.f32 %v1605_v23  ;;  %v1353_v31 = vmul.f32 0.044715, %v1225_v24  ;;  %v1229_v32 = vmul.f32 %v1101_v25, %v5940_v7 }
 0x12d   :  { %v4986_v35 = vpop.eup %4985  ;;  %4997 = vtanh.f32 %v1606_v26  ;;  %v1354_v37 = vmul.f32 0.044715, %v1226_v27  ;;  %v1230_v38 = vmul.f32 %v1102_v28, %v5946_v22  ;;  %v759_v62 = vpop.f32.mrb[12].mxu1  ;;  %v5958_v39 = vadd.f32 1.0, %v4984_v29 }
 0x12e   :  { %v4988_v42 = vpop.eup %4987  ;;  %v1481_v44 = vadd.f32 %v1353_v31, %v5930_v16  ;;  %v1357_v45 = vmul.f32 0.044715, %v1229_v32  ;;  %v5962_v49 = vadd.f32 %v759_v62, %v5866_v46  ;;  %v761_v63 = vpop.f32.mrb[13].mxu1  ;;  %v1850_v50 = vadd.f32 1.0, %v4986_v35 }
 0x12f   :  { %v1482_v51 = vadd.f32 %v1354_v37, %v5934_v40  ;;  %v1358_v56 = vmul.f32 0.044715, %v1230_v38  ;;  %v5966_v57 = vadd.f32 %v761_v63, %v5869_v47  ;;  %v763_v60 = vpop.f32.mrb[14].mxu1  ;;  %v5968_v61 = vadd.f32 1.0, %v4988_v42  ;;  %v4990_v11 = vpop.eup %4989 }
 0x130   :  { %v1609_v2 = vmul.f32 0.7978846, %v1481_v44  ;;  %v1485_v3 = vadd.f32 %v1357_v45, %v5940_v7  ;;  %v1105_v4 = vmul.f32 %v5962_v49, %v5962_v49  ;;  %v5974_v5 = vadd.f32 %v763_v60, %v5866_v46  ;;  %v765_v10 = vpop.f32.mrb[15].mxu1 }
 0x131   :  { %v1610_v14 = vmul.f32 0.7978846, %v1482_v51  ;;  %v1486_v54 = vadd.f32 %v1358_v56, %v5946_v22  ;;  %v1106_v18 = vmul.f32 %v5966_v57, %v5966_v57  ;;  %v5980_v13 = vadd.f32 %v765_v10, %v5869_v47 }
 0x132   :  { %4999 = vtanh.f32 %v1609_v2  ;;  %v1613_v55 = vmul.f32 0.7978846, %v1485_v3  ;;  %v1233_v52 = vmul.f32 %v1105_v4, %v5962_v49  ;;  %v1109_v58 = vmul.f32 %v5974_v5, %v5974_v5  ;;  %1061 = vmatmul.mubr.bf16.gmra.mrb[120].mxu1 %v5802_v8 }
 0x133   :  { %5001 = vtanh.f32 %v1610_v14  ;;  %v1614_v0 = vmul.f32 0.7978846, %v1486_v54  ;;  %v1234_v1 = vmul.f32 %v1106_v18, %v5966_v57  ;;  %v1110_v12 = vmul.f32 %v5980_v13, %v5980_v13  ;;  %1070 = vmatprep.mubr.bf16.mxu1 %v5807_v9 }
 0x134   :  { %v5990_v19 = vpop.eup %4991  ;;  %5003 = vtanh.f32 %v1613_v55  ;;  %v1361_v20 = vmul.f32 0.044715, %v1233_v52  ;;  %v1237_v21 = vmul.f32 %v1109_v58, %v5974_v5  ;;  %v1854_v23 = vadd.f32 1.0, %v4990_v11 }
 0x135   :  { %v5993_v24 = vpop.eup %4993  ;;  %5005 = vtanh.f32 %v1614_v0  ;;  %v1362_v8 = vmul.f32 0.044715, %v1234_v1  ;;  %v1238_v25 = vmul.f32 %v1110_v12, %v5980_v13  ;;  %v769_v26 = vpop.f32.mrb[16].mxu1  ;;  %v1978_v27 = vmul.f32 0.5, %v1850_v50 }
 0x136   :  { %v5996_v28 = vpop.eup %4995  ;;  %v1489_v29 = vadd.f32 %v1361_v20, %v5962_v49  ;;  %v1365_v9 = vmul.f32 0.044715, %v1237_v21  ;;  %v6000_v31 = vadd.f32 %v769_v26, %v5866_v46  ;;  %v771_v32 = vpop.f32.mrb[17].mxu1  ;;  %v1982_v35 = vmul.f32 0.5, %v1854_v23 }
 0x137   :  { %v6002_v37 = vpop.eup %4997  ;;  %v1490_v38 = vadd.f32 %v1362_v8, %v5966_v57  ;;  %v1366_v62 = vmul.f32 0.044715, %v1238_v25  ;;  %v6006_v42 = vadd.f32 %v771_v32, %v5869_v47  ;;  %v773_v44 = vpop.f32.mrb[18].mxu1  ;;  %v2106_v45 = vmul.f32 %v1978_v27, %v5876_v59 }
 0x138   :  { %v1617_v63 = vmul.f32 0.7978846, %v1489_v29  ;;  %v1493_v50 = vadd.f32 %v1365_v9, %v5974_v5  ;;  %v1113_v51 = vmul.f32 %v6000_v31, %v6000_v31  ;;  %v6013_v56 = vadd.f32 %v773_v44, %v5866_v46  ;;  %v775_v60 = vpop.f32.mrb[19].mxu1 }
 0x139   :  { %v1618_v2 = vmul.f32 0.7978846, %v1490_v38  ;;  %v1494_v3 = vadd.f32 %v1366_v62, %v5980_v13  ;;  %v1114_v4 = vmul.f32 %v6006_v42, %v6006_v42  ;;  %v6019_v10 = vadd.f32 %v775_v60, %v5869_v47 }
 0x13a   :  { %5007 = vtanh.f32 %v1617_v63  ;;  %v1621_v59 = vmul.f32 0.7978846, %v1493_v50  ;;  %v1241_v11 = vmul.f32 %v1113_v51, %v6000_v31  ;;  %v1117_v14 = vmul.f32 %v6013_v56, %v6013_v56  ;;  %1071 = vmatmul.mubr.bf16.gmra.mrb[124].mxu1 %v5826_v17 }
 0x13b   :  { %5009 = vtanh.f32 %v1618_v2  ;;  %v1622_v54 = vmul.f32 0.7978846, %v1494_v3  ;;  %v1242_v18 = vmul.f32 %v1114_v4, %v6006_v42  ;;  %v1118_v55 = vmul.f32 %v6019_v10, %v6019_v10 }
 0x13c   :  { %v6028_v52 = vpop.eup %4999  ;;  %5011 = vtanh.f32 %v1621_v59  ;;  %v1369_v58 = vmul.f32 0.044715, %v1241_v11  ;;  %v1245_v0 = vmul.f32 %v1117_v14, %v6013_v56  ;;  %v2110_v1 = vmul.f32 %v1982_v35, %v5886_v15  ;;  %v4940_v11 = vld [vmem:[%s8626_s3 + $0x114] ss:$8 sps:$4 sm:$0xff]  }
 0x13d   :  { %v6032_v12 = vpop.eup %5001  ;;  %5013 = vtanh.f32 %v1622_v54  ;;  %v1370_v20 = vmul.f32 0.044715, %v1242_v18  ;;  %v1246_v17 = vmul.f32 %v1118_v55, %v6019_v10  ;;  %v1977_v21 = vmul.f32 0.5, %v5958_v39  ;;  %v779_v23 = vpop.f32.mrb[20].mxu1 }
 0x13e   :  { %v6036_v8 = vpop.eup %5003  ;;  %v1497_v25 = vadd.f32 %v1369_v58, %v6000_v31  ;;  %v1373_v26 = vmul.f32 0.044715, %v1245_v0  ;;  %v2298_v27 = vpack.c.bf16 %v2110_v1, %v2106_v45  ;;  %v1981_v29 = vmul.f32 0.5, %v5968_v61  ;;  %v781_v9 = vpop.f32.mrb[21].mxu1 }
 0x13f   :  { %v6040_v32 = vpop.eup %5005  ;;  %v1498_v15 = vadd.f32 %v1370_v20, %v6006_v42  ;;  %v1374_v35 = vmul.f32 0.044715, %v1246_v17  ;;  %v2105_v38 = vmul.f32 %v1977_v21, %v5873_v53  ;;  %v6045_v62 = vadd.f32 %v779_v23, %v5866_v46  ;;  %v783_v39 = vpop.f32.mrb[22].mxu1  ;;  %v4935_v53 = vld [vmem:[%s8626_s3 + $0x100] ss:$8 sps:$4 sm:$0xff]  }
 0x140   :  { %v1625_v44 = vmul.f32 0.7978846, %v1497_v25  ;;  %v1501_v63 = vadd.f32 %v1373_v26, %v6013_v56  ;;  %2777 = vmatprep.mubr.bf16.mxu0 %v2298_v27  ;;  %v2109_v45 = vmul.f32 %v1981_v29, %v5881_v6  ;;  %v6050_v61 = vadd.f32 %v781_v9, %v5869_v47  ;;  %v785_v50 = vpop.f32.mrb[23].mxu1  ;;  %v4938_v20 = vld [vmem:[%s8626_s3 + $0x110] ss:$8 sps:$4 sm:$0xff]  }
 0x141   :  { %v1626_v51 = vmul.f32 0.7978846, %v1498_v15  ;;  %v1502_v60 = vadd.f32 %v1374_v35, %v6019_v10  ;;  %v1121_v2 = vmul.f32 %v6045_v62, %v6045_v62  ;;  %v6059_v3 = vadd.f32 %v783_v39, %v5866_v46  ;;  %v4943_v27 = vld [vmem:[%s8626_s3 + $0x124] ss:$8 sps:$4 sm:$0xff]  }
 0x142   :  { %5015 = vtanh.f32 %v1625_v44  ;;  %v1629_v4 = vmul.f32 0.7978846, %v1501_v63  ;;  %v2297_v6 = vpack.c.bf16 %v2109_v45, %v2105_v38  ;;  %v1122_v59 = vmul.f32 %v6050_v61, %v6050_v61 }
 0x143   :  { %5017 = vtanh.f32 %v1626_v51  ;;  %v1630_v14 = vmul.f32 0.7978846, %v1502_v60  ;;  %v1249_v54 = vmul.f32 %v1121_v2, %v6045_v62  ;;  %v1125_v18 = vmul.f32 %v6059_v3, %v6059_v3 }
 0x144   :  { %v6069_v55 = vpop.eup %5007  ;;  %5019 = vtanh.f32 %v1629_v4  ;;  %2778 = vmatmul.mubr.bf16.vlgmr.msra.gmra.mrb[0].mxu0 %v2297_v6  ;;  %v1250_v58 = vmul.f32 %v1122_v59, %v6050_v61  ;;  %v6073_v0 = vadd.f32 %v785_v50, %v5869_v47  ;;  %v1858_v1 = vadd.f32 1.0, %v5993_v24 }
 0x145   :  { %v6079_v17 = vpop.eup %5009  ;;  %5021 = vtanh.f32 %v1630_v14  ;;  %2939 = vmatpush1.bf16.msra.mxu0 %v4935_v53  ;;  %v1377_v21 = vmul.f32 0.044715, %v1249_v54  ;;  %v1253_v23 = vmul.f32 %v1125_v18, %v6059_v3  ;;  %v1862_v25 = vadd.f32 1.0, %v6002_v37  ;;  %v789_v26 = vpop.f32.mrb[24].mxu1 }
 0x146   :  { %v6086_v29 = vpop.eup %5011  ;;  %v1378_v24 = vmul.f32 0.044715, %v1250_v58  ;;  %v1126_v9 = vmul.f32 %v6073_v0, %v6073_v0  ;;  %v1986_v15 = vmul.f32 0.5, %v1858_v1  ;;  %v1857_v35 = vadd.f32 1.0, %v5990_v19  ;;  %2940 = vmatprep.subr.bf16.mxu0 %v4940_v11  ;;  %v791_v38 = vpop.f32.mrb[25].mxu1 }
 0x147   :  { %v6091_v39 = vpop.eup %5013  ;;  %v1505_v37 = vadd.f32 %v1377_v21, %v6045_v62  ;;  %v1381_v44 = vmul.f32 0.044715, %v1253_v23  ;;  %v1990_v63 = vmul.f32 0.5, %v1862_v25  ;;  %v1861_v45 = vadd.f32 1.0, %v5996_v28  ;;  %v793_v50 = vpop.f32.mrb[26].mxu1 }
 0x148   :  { %v1506_v51 = vadd.f32 %v1378_v24, %v6050_v61  ;;  %v1254_v60 = vmul.f32 %v1126_v9, %v6073_v0  ;;  %v2114_v53 = vmul.f32 %v1986_v15, %v5903_v33  ;;  %v1985_v2 = vmul.f32 0.5, %v1857_v35  ;;  %v795_v4 = vpop.f32.mrb[27].mxu1  ;;  %v4941_v28 = vld [vmem:[%s8626_s3 + $0x120] ss:$8 sps:$4 sm:$0xff]   ;;  %v4946_v33 = vld [vmem:[%s8626_s3 + $0x134] ss:$8 sps:$4 sm:$0xff]  }
 0x149   :  { %v1633_v19 = vmul.f32 0.7978846, %v1505_v37  ;;  %v1509_v6 = vadd.f32 %v1381_v44, %v6059_v3  ;;  %v2118_v59 = vmul.f32 %v1990_v63, %v5915_v48  ;;  %v1989_v11 = vmul.f32 0.5, %v1861_v45  ;;  %2941 = vmatpush1.bf16.msra.mxu0 %v4938_v20  ;;  %v4944_v15 = vld [vmem:[%s8626_s3 + $0x130] ss:$8 sps:$4 sm:$0xff]  }
 0x14a   :  { %v1634_v14 = vmul.f32 0.7978846, %v1506_v51  ;;  %v1382_v54 = vmul.f32 0.044715, %v1254_v60  ;;  %v2113_v18 = vmul.f32 %v1985_v2, %v5900_v30  ;;  %v6105_v58 = vadd.f32 %v789_v26, %v5866_v46  ;;  %2942 = vmatprep.subr.bf16.mxu0 %v4943_v27 }
 0x14b   :  { %5023 = vtanh.f32 %v1633_v19  ;;  %v1637_v48 = vmul.f32 0.7978846, %v1509_v6  ;;  %v2302_v1 = vpack.c.bf16 %v2118_v59, %v2114_v53  ;;  %v2117_v20 = vmul.f32 %v1989_v11, %v5910_v43 }
 0x14c   :  { %v6111_v21 = vpop.eup %5015  ;;  %5025 = vtanh.f32 %v1634_v14  ;;  %v1510_v23 = vadd.f32 %v1382_v54, %v6073_v0  ;;  %v1129_v30 = vmul.f32 %v6105_v58, %v6105_v58  ;;  %v6117_v25 = vadd.f32 %v791_v38, %v5869_v47 }
 0x14d   :  { %v6119_v26 = vpop.eup %5017  ;;  %5027 = vtanh.f32 %v1637_v48  ;;  %2787 = vmatprep.mubr.bf16.mxu0 %v2302_v1  ;;  %v2301_v27 = vpack.c.bf16 %v2117_v20, %v2113_v18  ;;  %v6122_v24 = vadd.f32 %v793_v50, %v5866_v46  ;;  %v6125_v43 = vadd.f32 %v795_v4, %v5869_v47  ;;  %2943 = vmatpush1.bf16.msra.mxu0 %v4941_v28  ;;  %v799_v9 = vpop.f32.mrb[28].mxu1  ;;  %v4949_v50 = vld [vmem:[%s8626_s3 + $0x144] ss:$8 sps:$4 sm:$0xff]   ;;  %v4952_v20 = vld [vmem:[%s8626_s3 + $0x154] ss:$8 sps:$4 sm:$0xff]  }
 0x14e   :  { %v6130_v35 = vpop.eup %5019  ;;  %v1638_v38 = vmul.f32 0.7978846, %v1510_v23  ;;  %v1257_v37 = vmul.f32 %v1129_v30, %v6105_v58  ;;  %v1130_v44 = vmul.f32 %v6117_v25, %v6117_v25  ;;  %v1866_v63 = vadd.f32 1.0, %v6032_v12  ;;  %v801_v45 = vpop.f32.mrb[29].mxu1  ;;  %2944 = vmatprep.subr.bf16.mxu0 %v4946_v33 }
 0x14f   :  { %v6139_v51 = vpop.eup %5021  ;;  %2788 = vmatmul.mubr.bf16.gmra.mrb[4].mxu0 %v2301_v27  ;;  %v1133_v60 = vmul.f32 %v6122_v24, %v6122_v24  ;;  %v1134_v53 = vmul.f32 %v6125_v43, %v6125_v43  ;;  %v1870_v2 = vadd.f32 1.0, %v6040_v32  ;;  %v1865_v4 = vadd.f32 1.0, %v6028_v52  ;;  %v803_v12 = vpop.f32.mrb[30].mxu1  ;;  %v4947_v32 = vld [vmem:[%s8626_s3 + $0x140] ss:$8 sps:$4 sm:$0xff]  }
 0x150   :  { %5029 = vtanh.f32 %v1638_v38  ;;  %v1385_v19 = vmul.f32 0.044715, %v1257_v37  ;;  %v1258_v6 = vmul.f32 %v1130_v44, %v6117_v25  ;;  %v1994_v59 = vmul.f32 0.5, %v1866_v63  ;;  %v805_v11 = vpop.f32.mrb[31].mxu1 }
 0x151   :  { %v1261_v28 = vmul.f32 %v1133_v60, %v6122_v24  ;;  %v1262_v14 = vmul.f32 %v1134_v53, %v6125_v43  ;;  %v1998_v54 = vmul.f32 0.5, %v1870_v2  ;;  %v1869_v18 = vadd.f32 1.0, %v6036_v8  ;;  %2945 = vmatpush1.bf16.msra.mxu0 %v4944_v15 }
 0x152   :  { %v1513_v52 = vadd.f32 %v1385_v19, %v6105_v58  ;;  %v1386_v33 = vmul.f32 0.044715, %v1258_v6  ;;  %v2122_v48 = vmul.f32 %v1994_v59, %v5934_v40  ;;  %v1993_v1 = vmul.f32 0.5, %v1865_v4  ;;  %2946 = vmatprep.subr.bf16.mxu0 %v4949_v50 }
 0x153   :  { %v1389_v23 = vmul.f32 0.044715, %v1261_v28  ;;  %v1390_v30 = vmul.f32 0.044715, %v1262_v14  ;;  %v2126_v8 = vmul.f32 %v1998_v54, %v5946_v22  ;;  %v1997_v27 = vmul.f32 0.5, %v1869_v18 }
 0x154   :  { %v1641_v15 = vmul.f32 0.7978846, %v1513_v52  ;;  %v1514_v38 = vadd.f32 %v1386_v33, %v6117_v25  ;;  %v2121_v37 = vmul.f32 %v1993_v1, %v5930_v16  ;;  %v6163_v44 = vadd.f32 %v799_v9, %v5866_v46  ;;  %v4950_v22 = vld [vmem:[%s8626_s3 + $0x150] ss:$8 sps:$4 sm:$0xff]  }
 0x155   :  { %v6165_v40 = vpop.eup %5023  ;;  %v1517_v63 = vadd.f32 %v1389_v23, %v6122_v24  ;;  %v1518_v50 = vadd.f32 %v1390_v30, %v6125_v43  ;;  %v2306_v60 = vpack.c.bf16 %v2126_v8, %v2122_v48  ;;  %v2125_v53 = vmul.f32 %v1997_v27, %v5940_v7  ;;  %v809_v2 = vpop.f32.mrb[32].mxu1  ;;  %2947 = vmatpush1.bf16.msra.mxu0 %v4947_v32  ;;  %v4955_v7 = vld [vmem:[%s8626_s3 + $0x164] ss:$8 sps:$4 sm:$0xff]   ;;  %v4953_v27 = vld [vmem:[%s8626_s3 + $0x160] ss:$8 sps:$4 sm:$0xff]  }
 0x156   :  { %v6173_v4 = vpop.eup %5025  ;;  %5031 = vtanh.f32 %v1641_v15  ;;  %v1642_v16 = vmul.f32 0.7978846, %v1514_v38  ;;  %v1137_v9 = vmul.f32 %v6163_v44, %v6163_v44  ;;  %v6178_v19 = vadd.f32 %v801_v45, %v5869_v47  ;;  %v6180_v6 = vpop.f32.mrb[33].mxu1  ;;  %2948 = vmatprep.subr.bf16.mxu0 %v4952_v20 }
 0x157   :  { %v6185_v59 = vpop.eup %5027  ;;  %v1645_v28 = vmul.f32 0.7978846, %v1517_v63  ;;  %v1646_v14 = vmul.f32 0.7978846, %v1518_v50  ;;  %2797 = vmatprep.mubr.bf16.mxu0 %v2306_v60  ;;  %v2305_v54 = vpack.c.bf16 %v2125_v53, %v2121_v37  ;;  %v6188_v18 = vadd.f32 %v803_v12, %v5866_v46  ;;  %v813_v32 = vpop.f32.mrb[34].mxu1 }
 0x158   :  { %5033 = vtanh.f32 %v1642_v16  ;;  %v1265_v45 = vmul.f32 %v1137_v9, %v6163_v44  ;;  %v1138_v52 = vmul.f32 %v6178_v19, %v6178_v19  ;;  %v6194_v33 = vadd.f32 %v805_v11, %v5869_v47  ;;  %v815_v48 = vpop.f32.mrb[35].mxu1  ;;  %v4958_v37 = vld [vmem:[%s8626_s3 + $0x174] ss:$8 sps:$4 sm:$0xff]  }
 0x159   :  { %5035 = vtanh.f32 %v1645_v28  ;;  %2798 = vmatmul.mubr.bf16.gmra.mrb[8].mxu0 %v2305_v54  ;;  %v1141_v1 = vmul.f32 %v6188_v18, %v6188_v18  ;;  %v1874_v20 = vadd.f32 1.0, %v6079_v17  ;;  %v1878_v12 = vadd.f32 1.0, %v6091_v39 }
 0x15a   :  { %v6200_v23 = vpop.eup %5029  ;;  %5037 = vtanh.f32 %v1646_v14  ;;  %v1393_v30 = vmul.f32 0.044715, %v1265_v45  ;;  %v1266_v8 = vmul.f32 %v1138_v52, %v6178_v19  ;;  %v1142_v11 = vmul.f32 %v6194_v33, %v6194_v33  ;;  %2949 = vmatpush1.bf16.msra.mxu0 %v4950_v22 }
 0x15b   :  { %v1269_v15 = vmul.f32 %v1141_v1, %v6188_v18  ;;  %v2002_v38 = vmul.f32 0.5, %v1874_v20  ;;  %v2006_v17 = vmul.f32 0.5, %v1878_v12  ;;  %v1873_v39 = vadd.f32 1.0, %v6069_v55  ;;  %2950 = vmatprep.subr.bf16.mxu0 %v4955_v7  ;;  %v4956_v55 = vld [vmem:[%s8626_s3 + $0x170] ss:$8 sps:$4 sm:$0xff]  }
 0x15c   :  { %v1521_v63 = vadd.f32 %v1393_v30, %v6163_v44  ;;  %v1394_v50 = vmul.f32 0.044715, %v1266_v8  ;;  %v1270_v60 = vmul.f32 %v1142_v11, %v6194_v33  ;;  %v1877_v53 = vadd.f32 1.0, %v6086_v29  ;;  %v4961_v30 = vld [vmem:[%s8626_s3 + $0x184] ss:$8 sps:$4 sm:$0xff]  }
 0x15d   :  { %v1397_v22 = vmul.f32 0.044715, %v1269_v15  ;;  %v2130_v16 = vmul.f32 %v2002_v38, %v5966_v57  ;;  %v2134_v9 = vmul.f32 %v2006_v17, %v5980_v13  ;;  %v2001_v28 = vmul.f32 0.5, %v1873_v39  ;;  %v6218_v14 = vpop.f32.mrb[36].mxu1 }
 0x15e   :  { %v1649_v7 = vmul.f32 0.7978846, %v1521_v63  ;;  %v1522_v54 = vadd.f32 %v1394_v50, %v6178_v19  ;;  %v1398_v45 = vmul.f32 0.044715, %v1270_v60  ;;  %v2005_v52 = vmul.f32 0.5, %v1877_v53  ;;  %v6224_v1 = vpop.f32.mrb[37].mxu1  ;;  %2951 = vmatpush1.bf16.msra.mxu0 %v4953_v27 }
 0x15f   :  { %v1525_v29 = vadd.f32 %v1397_v22, %v6188_v18  ;;  %v2310_v57 = vpack.c.bf16 %v2134_v9, %v2130_v16  ;;  %v2129_v13 = vmul.f32 %v2001_v28, %v5962_v49  ;;  %v6229_v20 = vadd.f32 %v809_v2, %v5866_v46  ;;  %v6231_v12 = vpop.f32.mrb[38].mxu1  ;;  %2952 = vmatprep.subr.bf16.mxu0 %v4958_v37  ;;  %v4959_v60 = vld [vmem:[%s8626_s3 + $0x180] ss:$8 sps:$4 sm:$0xff]  }
 0x160   :  { %v6236_v8 = vpop.eup %5031  ;;  %5039 = vtanh.f32 %v1649_v7  ;;  %v1650_v11 = vmul.f32 0.7978846, %v1522_v54  ;;  %v1526_v27 = vadd.f32 %v1398_v45, %v6194_v33  ;;  %v2133_v15 = vmul.f32 %v2005_v52, %v5974_v5  ;;  %v6240_v38 = vpop.f32.mrb[39].mxu1 }
 0x161   :  { %v1653_v49 = vmul.f32 0.7978846, %v1525_v29  ;;  %2807 = vmatprep.mubr.bf16.mxu0 %v2310_v57  ;;  %v1145_v2 = vmul.f32 %v6229_v20, %v6229_v20  ;;  %v6246_v17 = vadd.f32 %v6180_v6, %v5869_v47  ;;  %v6249_v39 = vadd.f32 %v813_v32, %v5866_v46  ;;  %v4962_v57 = vld [vmem:[%s8626_s3 + $0x190] ss:$8 sps:$4 sm:$0xff]  }
 0x162   :  { %v6251_v37 = vpop.eup %5033  ;;  %5041 = vtanh.f32 %v1650_v11  ;;  %v1654_v63 = vmul.f32 0.7978846, %v1526_v27  ;;  %v2309_v50 = vpack.c.bf16 %v2133_v15, %v2129_v13  ;;  %v6254_v5 = vadd.f32 %v815_v48, %v5869_v47  ;;  %2953 = vmatpush1.bf16.msra.mxu0 %v4956_v55  ;;  %v4964_v48 = vld [vmem:[%s8626_s3 + $0x194] ss:$8 sps:$4 sm:$0xff]   ;;  %v4967_v27 = vld [vmem:[%s8626_s3 + $0x1a4] ss:$8 sps:$4 sm:$0xff]  }
 0x163   :  { %v6259_v53 = vpop.eup %5035  ;;  %5043 = vtanh.f32 %v1653_v49  ;;  %v1273_v6 = vmul.f32 %v1145_v2, %v6229_v20  ;;  %v1146_v32 = vmul.f32 %v6246_v17, %v6246_v17  ;;  %v1149_v22 = vmul.f32 %v6249_v39, %v6249_v39  ;;  %2954 = vmatprep.subr.bf16.mxu0 %v4961_v30 }
 0x164   :  { %v6269_v16 = vpop.eup %5037  ;;  %5045 = vtanh.f32 %v1654_v63  ;;  %2808 = vmatmul.mubr.bf16.gmra.mrb[12].mxu0 %v2309_v50  ;;  %v1150_v9 = vmul.f32 %v6254_v5, %v6254_v5  ;;  %v1882_v28 = vadd.f32 1.0, %v6119_v26  ;;  %v1886_v55 = vadd.f32 1.0, %v6139_v51 }
 0x165   :  { %v1401_v7 = vmul.f32 0.044715, %v1273_v6  ;;  %v1274_v54 = vmul.f32 %v1146_v32, %v6246_v17  ;;  %v1277_v45 = vmul.f32 %v1149_v22, %v6249_v39  ;;  %v1881_v52 = vadd.f32 1.0, %v6111_v21  ;;  %v6278_v29 = vpop.f32.mrb[40].mxu1 }
 0x166   :  { %v1278_v13 = vmul.f32 %v1150_v9, %v6254_v5  ;;  %v2010_v30 = vmul.f32 0.5, %v1882_v28  ;;  %v2014_v11 = vmul.f32 0.5, %v1886_v55  ;;  %v1885_v26 = vadd.f32 1.0, %v6130_v35  ;;  %v6285_v51 = vpop.f32.mrb[41].mxu1  ;;  %2955 = vmatpush1.bf16.msra.mxu0 %v4959_v60 }
 0x167   :  { %v1529_v21 = vadd.f32 %v1401_v7, %v6229_v20  ;;  %v1402_v15 = vmul.f32 0.044715, %v1274_v54  ;;  %v1405_v49 = vmul.f32 0.044715, %v1277_v45  ;;  %v2009_v2 = vmul.f32 0.5, %v1881_v52  ;;  %v6291_v63 = vpop.f32.mrb[42].mxu1  ;;  %2956 = vmatprep.subr.bf16.mxu0 %v4964_v48 }
 0x168   :  { %v1406_v50 = vmul.f32 0.044715, %v1278_v13  ;;  %v2138_v6 = vmul.f32 %v2010_v30, %v6006_v42  ;;  %v2142_v35 = vmul.f32 %v2014_v11, %v6019_v10  ;;  %v2013_v32 = vmul.f32 0.5, %v1885_v26  ;;  %v6295_v22 = vpop.f32.mrb[43].mxu1 }
 0x169   :  { %v1657_v60 = vmul.f32 0.7978846, %v1529_v21  ;;  %v1530_v9 = vadd.f32 %v1402_v15, %v6246_v17  ;;  %v1533_v28 = vadd.f32 %v1405_v49, %v6249_v39  ;;  %v2137_v55 = vmul.f32 %v2009_v2, %v6000_v31  ;;  %v4965_v31 = vld [vmem:[%s8626_s3 + $0x1a0] ss:$8 sps:$4 sm:$0xff]  }
 0x16a   :  { %v6300_v7 = vpop.eup %5039  ;;  %v1534_v54 = vadd.f32 %v1406_v50, %v6254_v5  ;;  %v2314_v48 = vpack.c.bf16 %v2142_v35, %v2138_v6  ;;  %v2141_v45 = vmul.f32 %v2013_v32, %v6013_v56  ;;  %v6306_v42 = vadd.f32 %v6218_v14, %v5866_v46  ;;  %2957 = vmatpush1.bf16.msra.mxu0 %v4962_v57 }
 0x16b   :  { %5047 = vtanh.f32 %v1657_v60  ;;  %v1658_v10 = vmul.f32 0.7978846, %v1530_v9  ;;  %v1661_v52 = vmul.f32 0.7978846, %v1533_v28  ;;  %v6310_v13 = vadd.f32 %v6224_v1, %v5869_v47  ;;  %2958 = vmatprep.subr.bf16.mxu0 %v4967_v27  ;;  %v4970_v1 = vld [vmem:[%s8626_s3 + $0x1b4] ss:$8 sps:$4 sm:$0xff]  }
 0x16c   :  { %v6315_v30 = vpop.eup %5041  ;;  %v1662_v56 = vmul.f32 0.7978846, %v1534_v54  ;;  %2817 = vmatprep.mubr.bf16.mxu0 %v2314_v48  ;;  %v2313_v11 = vpack.c.bf16 %v2141_v45, %v2137_v55  ;;  %v1153_v14 = vmul.f32 %v6306_v42, %v6306_v42  ;;  %v6321_v57 = vadd.f32 %v6231_v12, %v5866_v46  ;;  %v4968_v9 = vld [vmem:[%s8626_s3 + $0x1b0] ss:$8 sps:$4 sm:$0xff]  }
 0x16d   :  { %v6326_v26 = vpop.eup %5043  ;;  %5049 = vtanh.f32 %v1658_v10  ;;  %v1154_v27 = vmul.f32 %v6310_v13, %v6310_v13  ;;  %v6332_v21 = vadd.f32 %v6240_v38, %v5869_v47  ;;  %v1890_v15 = vadd.f32 1.0, %v6173_v4  ;;  %v6335_v49 = vpop.f32.mrb[44].mxu1 }
 0x16e   :  { %v6337_v12 = vpop.eup %5045  ;;  %5051 = vtanh.f32 %v1661_v52  ;;  %2818 = vmatmul.mubr.bf16.gmra.mrb[16].mxu0 %v2313_v11  ;;  %v1281_v2 = vmul.f32 %v1153_v14, %v6306_v42  ;;  %v1157_v50 = vmul.f32 %v6321_v57, %v6321_v57  ;;  %v1894_v6 = vadd.f32 1.0, %v6200_v23  ;;  %v6343_v35 = vpop.f32.mrb[45].mxu1  ;;  %v4973_v23 = vld [vmem:[%s8626_s3 + $0x1c4] ss:$8 sps:$4 sm:$0xff]  }
 0x16f   :  { %5053 = vtanh.f32 %v1662_v56  ;;  %v1282_v38 = vmul.f32 %v1154_v27, %v6310_v13  ;;  %v1158_v4 = vmul.f32 %v6332_v21, %v6332_v21  ;;  %v2018_v32 = vmul.f32 0.5, %v1890_v15  ;;  %v6348_v60 = vpop.f32.mrb[46].mxu1  ;;  %2959 = vmatpush1.bf16.msra.mxu0 %v4965_v31 }
 0x170   :  { %v1409_v28 = vmul.f32 0.044715, %v1281_v2  ;;  %v1285_v55 = vmul.f32 %v1157_v50, %v6321_v57  ;;  %v2022_v54 = vmul.f32 0.5, %v1894_v6  ;;  %v1889_v48 = vadd.f32 1.0, %v6165_v40  ;;  %v6358_v45 = vpop.f32.mrb[47].mxu1  ;;  %2960 = vmatprep.subr.bf16.mxu0 %v4970_v1 }
 0x171   :  { %v1410_v10 = vmul.f32 0.044715, %v1282_v38  ;;  %v1286_v52 = vmul.f32 %v1158_v4, %v6332_v21  ;;  %v2146_v31 = vmul.f32 %v2018_v32, %v6050_v61  ;;  %v1893_v56 = vadd.f32 1.0, %v6185_v59  ;;  %v4971_v61 = vld [vmem:[%s8626_s3 + $0x1c0] ss:$8 sps:$4 sm:$0xff]  }
 0x172   :  { %v1537_v11 = vadd.f32 %v1409_v28, %v6306_v42  ;;  %v1413_v14 = vmul.f32 0.044715, %v1285_v55  ;;  %v2150_v27 = vmul.f32 %v2022_v54, %v6073_v0  ;;  %v2017_v15 = vmul.f32 0.5, %v1889_v48  ;;  %v4976_v4 = vld [vmem:[%s8626_s3 + $0x1d4] ss:$8 sps:$4 sm:$0xff]  }
 0x173   :  { %v1538_v2 = vadd.f32 %v1410_v10, %v6310_v13  ;;  %v1414_v50 = vmul.f32 0.044715, %v1286_v52  ;;  %v2021_v40 = vmul.f32 0.5, %v1893_v56  ;;  %v6368_v1 = vadd.f32 %v6278_v29, %v5866_v46  ;;  %2961 = vmatpush1.bf16.msra.mxu0 %v4968_v9 }
 0x174   :  { %v1665_v59 = vmul.f32 0.7978846, %v1537_v11  ;;  %v1541_v6 = vadd.f32 %v1413_v14, %v6321_v57  ;;  %v2318_v38 = vpack.c.bf16 %v2150_v27, %v2146_v31  ;;  %v2145_v0 = vmul.f32 %v2017_v15, %v6045_v62  ;;  %2962 = vmatprep.subr.bf16.mxu0 %v4973_v23 }
 0x175   :  { %v6378_v32 = vpop.eup %5047  ;;  %v1666_v29 = vmul.f32 0.7978846, %v1538_v2  ;;  %v1542_v9 = vadd.f32 %v1414_v50, %v6332_v21  ;;  %v2149_v28 = vmul.f32 %v2021_v40, %v6059_v3  ;;  %v1161_v55 = vmul.f32 %v6368_v1, %v6368_v1  ;;  %v6384_v54 = vpop.f32.mrb[48].mxu1  ;;  %v4979_v50 = vld [vmem:[%s8626_s3 + $0x1e4] ss:$8 sps:$4 sm:$0xff]  }
 0x176   :  { %5055 = vtanh.f32 %v1665_v59  ;;  %v1669_v48 = vmul.f32 0.7978846, %v1541_v6  ;;  %2827 = vmatprep.mubr.bf16.mxu0 %v2318_v38  ;;  %v6388_v62 = vadd.f32 %v6285_v51, %v5869_v47  ;;  %v6392_v23 = vadd.f32 %v6291_v63, %v5866_v46  ;;  %v6394_v10 = vpop.f32.mrb[49].mxu1  ;;  %v4974_v51 = vld [vmem:[%s8626_s3 + $0x1d0] ss:$8 sps:$4 sm:$0xff]  }
 0x177   :  { %v6396_v52 = vpop.eup %5049  ;;  %5057 = vtanh.f32 %v1666_v29  ;;  %v1670_v3 = vmul.f32 0.7978846, %v1542_v9  ;;  %v2317_v31 = vpack.c.bf16 %v2149_v28, %v2145_v0  ;;  %v1289_v56 = vmul.f32 %v1161_v55, %v6368_v1  ;;  %v6399_v11 = vpop.f32.mrb[50].mxu1  ;;  %2963 = vmatpush1.bf16.msra.mxu0 %v4971_v61  ;;  %v4977_v29 = vld [vmem:[%s8626_s3 + $0x1e0] ss:$8 sps:$4 sm:$0xff]  }
 0x178   :  { %v6404_v14 = vpop.eup %5051  ;;  %5059 = vtanh.f32 %v1669_v48  ;;  %v1162_v63 = vmul.f32 %v6388_v62, %v6388_v62  ;;  %v1165_v27 = vmul.f32 %v6392_v23, %v6392_v23  ;;  %v6412_v15 = vadd.f32 %v6295_v22, %v5869_v47  ;;  %v6414_v2 = vpop.f32.mrb[51].mxu1  ;;  %2964 = vmatprep.subr.bf16.mxu0 %v4976_v4 }
 0x179   :  { %v6419_v40 = vpop.eup %5053  ;;  %5061 = vtanh.f32 %v1670_v3  ;;  %2828 = vmatmul.mubr.bf16.gmra.mrb[20].mxu0 %v2317_v31  ;;  %v1417_v61 = vmul.f32 0.044715, %v1289_v56  ;;  %v1898_v59 = vadd.f32 1.0, %v6251_v37  ;;  %v1902_v6 = vadd.f32 1.0, %v6269_v16  ;;  %v4982_v16 = vld [vmem:[%s8626_s3 + $0x1f4] ss:$8 sps:$4 sm:$0xff]  }
 0x17a   :  { %v1290_v38 = vmul.f32 %v1162_v63, %v6388_v62  ;;  %v1293_v22 = vmul.f32 %v1165_v27, %v6392_v23  ;;  %v1166_v0 = vmul.f32 %v6412_v15, %v6412_v15  ;;  %v1897_v4 = vadd.f32 1.0, %v6236_v8 }
 0x17b   :  { %v1545_v9 = vadd.f32 %v1417_v61, %v6368_v1  ;;  %v2026_v28 = vmul.f32 0.5, %v1898_v59  ;;  %v2030_v55 = vmul.f32 0.5, %v1902_v6  ;;  %v1901_v37 = vadd.f32 1.0, %v6259_v53  ;;  %2965 = vmatpush1.bf16.msra.mxu0 %v4974_v51 }
 0x17c   :  { %v1418_v48 = vmul.f32 0.044715, %v1290_v38  ;;  %v1421_v3 = vmul.f32 0.044715, %v1293_v22  ;;  %v1294_v31 = vmul.f32 %v1166_v0, %v6412_v15  ;;  %v2025_v8 = vmul.f32 0.5, %v1897_v4  ;;  %2966 = vmatprep.subr.bf16.mxu0 %v4979_v50 }
 0x17d   :  { %v1673_v56 = vmul.f32 0.7978846, %v1545_v9  ;;  %v2154_v63 = vmul.f32 %v2026_v28, %v6117_v25  ;;  %v2158_v27 = vmul.f32 %v2030_v55, %v6125_v43  ;;  %v2029_v61 = vmul.f32 0.5, %v1901_v37  ;;  %v6439_v59 = vpop.f32.mrb[52].mxu1  ;;  %v4980_v4 = vld [vmem:[%s8626_s3 + $0x1f0] ss:$8 sps:$4 sm:$0xff]  }
 0x17e   :  { %v1546_v53 = vadd.f32 %v1418_v48, %v6388_v62  ;;  %v1549_v51 = vadd.f32 %v1421_v3, %v6392_v23  ;;  %v1422_v6 = vmul.f32 0.044715, %v1294_v31  ;;  %v2153_v38 = vmul.f32 %v2025_v8, %v6105_v58  ;;  %v6444_v22 = vpop.f32.mrb[53].mxu1 }
 0x17f   :  { %5063 = vtanh.f32 %v1673_v56  ;;  %v2322_v0 = vpack.c.bf16 %v2158_v27, %v2154_v63  ;;  %v2157_v50 = vmul.f32 %v2029_v61, %v6122_v24  ;;  %v6449_v25 = vadd.f32 %v6335_v49, %v5866_v46  ;;  %v6451_v43 = vpop.f32.mrb[54].mxu1  ;;  %2967 = vmatpush1.bf16.msra.mxu0 %v4977_v29 }
 0x180   :  { %v6456_v9 = vpop.eup %5055  ;;  %v1674_v58 = vmul.f32 0.7978846, %v1546_v53  ;;  %v1677_v28 = vmul.f32 0.7978846, %v1549_v51  ;;  %v1550_v55 = vadd.f32 %v1422_v6, %v6412_v15  ;;  %v6461_v24 = vadd.f32 %v6343_v35, %v5869_v47  ;;  %v6463_v37 = vpop.f32.mrb[55].mxu1  ;;  %2968 = vmatprep.subr.bf16.mxu0 %v4982_v16 }
 0x181   :  { %v6465_v49 = vpop.eup %5057  ;;  %2837 = vmatprep.mubr.bf16.mxu0 %v2322_v0  ;;  %v2321_v29 = vpack.c.bf16 %v2157_v50, %v2153_v38  ;;  %v1169_v48 = vmul.f32 %v6449_v25, %v6449_v25  ;;  %v6471_v3 = vadd.f32 %v6348_v60, %v5866_v46  ;;  %v6475_v31 = vadd.f32 %v6358_v45, %v5869_v47 }
 0x182   :  { %v6477_v35 = vpop.eup %5059  ;;  %5065 = vtanh.f32 %v1674_v58  ;;  %v1678_v8 = vmul.f32 0.7978846, %v1550_v55  ;;  %v1170_v16 = vmul.f32 %v6461_v24, %v6461_v24  ;;  %v1906_v56 = vadd.f32 1.0, %v6315_v30 }
 0x183   :  { %v6482_v63 = vpop.eup %5061  ;;  %5067 = vtanh.f32 %v1677_v28  ;;  %2838 = vmatmul.mubr.bf16.gmra.mrb[24].mxu0 %v2321_v29  ;;  %v1297_v60 = vmul.f32 %v1169_v48, %v6449_v25  ;;  %v1173_v27 = vmul.f32 %v6471_v3, %v6471_v3  ;;  %v1174_v45 = vmul.f32 %v6475_v31, %v6475_v31 }
 0x184   :  { %5069 = vtanh.f32 %v1678_v8  ;;  %v1298_v61 = vmul.f32 %v1170_v16, %v6461_v24  ;;  %v1910_v53 = vadd.f32 1.0, %v6337_v12  ;;  %v2034_v51 = vmul.f32 0.5, %v1906_v56  ;;  %2969 = vmatpush1.bf16.msra.mxu0 %v4980_v4 }
 0x185   :  { %v1425_v30 = vmul.f32 0.044715, %v1297_v60  ;;  %v1301_v6 = vmul.f32 %v1173_v27, %v6471_v3  ;;  %v1302_v38 = vmul.f32 %v1174_v45, %v6475_v31  ;;  %v1905_v0 = vadd.f32 1.0, %v6300_v7  ;;  %v6494_v50 = vpop.f32.mrb[56].mxu1 }
 0x186   :  { %v1426_v58 = vmul.f32 0.044715, %v1298_v61  ;;  %v2038_v28 = vmul.f32 0.5, %v1910_v53  ;;  %v2162_v55 = vmul.f32 %v2034_v51, %v6178_v19  ;;  %v1909_v29 = vadd.f32 1.0, %v6326_v26  ;;  %v6498_v48 = vpop.f32.mrb[57].mxu1 }
 0x187   :  { %v1553_v12 = vadd.f32 %v1425_v30, %v6449_v25  ;;  %v1429_v4 = vmul.f32 0.044715, %v1301_v6  ;;  %v1430_v8 = vmul.f32 0.044715, %v1302_v38  ;;  %v2033_v16 = vmul.f32 0.5, %v1905_v0  ;;  %v6501_v56 = vpop.f32.mrb[58].mxu1 }
 0x188   :  { %v1554_v60 = vadd.f32 %v1426_v58, %v6461_v24  ;;  %v2166_v7 = vmul.f32 %v2038_v28, %v6194_v33  ;;  %v2037_v27 = vmul.f32 0.5, %v1909_v29  ;;  %v6507_v45 = vadd.f32 %v6384_v54, %v5866_v46  ;;  %v6509_v19 = vpop.f32.mrb[59].mxu1 }
 0x189   :  { %v6511_v26 = vpop.eup %5063  ;;  %v1681_v61 = vmul.f32 0.7978846, %v1553_v12  ;;  %v1557_v53 = vadd.f32 %v1429_v4, %v6471_v3  ;;  %v1558_v51 = vadd.f32 %v1430_v8, %v6475_v31  ;;  %v2161_v30 = vmul.f32 %v2033_v16, %v6163_v44 }
 0x18a   :  { %v1682_v6 = vmul.f32 0.7978846, %v1554_v60  ;;  %v2326_v38 = vpack.c.bf16 %v2166_v7, %v2162_v55  ;;  %v2165_v33 = vmul.f32 %v2037_v27, %v6188_v18  ;;  %v1177_v0 = vmul.f32 %v6507_v45, %v6507_v45 }
 0x18b   :  { %5071 = vtanh.f32 %v1681_v61  ;;  %v1685_v54 = vmul.f32 0.7978846, %v1557_v53  ;;  %v1686_v58 = vmul.f32 0.7978846, %v1558_v51  ;;  %v6521_v28 = vadd.f32 %v6394_v10, %v5869_v47 }
 0x18c   :  { %v6523_v29 = vpop.eup %5065  ;;  %5073 = vtanh.f32 %v1682_v6  ;;  %2847 = vmatprep.mubr.bf16.mxu0 %v2326_v38  ;;  %v2325_v12 = vpack.c.bf16 %v2165_v33, %v2161_v30  ;;  %v1305_v44 = vmul.f32 %v1177_v0, %v6507_v45  ;;  %v6528_v18 = vadd.f32 %v6399_v11, %v5866_v46 }
 0x18d   :  { %v6530_v55 = vpop.eup %5067  ;;  %5075 = vtanh.f32 %v1685_v54  ;;  %v1178_v4 = vmul.f32 %v6521_v28, %v6521_v28  ;;  %v6536_v10 = vadd.f32 %v6414_v2, %v5869_v47  ;;  %v1914_v8 = vadd.f32 1.0, %v6396_v52  ;;  %v6539_v16 = vpop.f32.mrb[60].mxu1 }
 0x18e   :  { %8679 = vst [vmem:[#allocation5_spill] sm:$0xff] %v6528_v18  ;;  %v6541_v60 = vpop.eup %5069  ;;  %5077 = vtanh.f32 %v1686_v58  ;;  %2848 = vmatmul.mubr.bf16.gmra.mrb[28].mxu0 %v2325_v12  ;;  %v1433_v11 = vmul.f32 0.044715, %v1305_v44  ;;  %v1181_v7 = vmul.f32 %v6528_v18, %v6528_v18  ;;  %v1918_v27 = vadd.f32 1.0, %v6419_v40  ;;  %v6546_v61 = vpop.f32.mrb[61].mxu1 }
 0x18f   :  { %v1306_v53 = vmul.f32 %v1178_v4, %v6521_v28  ;;  %v1182_v2 = vmul.f32 %v6536_v10, %v6536_v10  ;;  %v2042_v52 = vmul.f32 0.5, %v1914_v8  ;;  %v1913_v51 = vadd.f32 1.0, %v6378_v32  ;;  %v6552_v30 = vpop.f32.mrb[62].mxu1 }
 0x190   :  { %v1561_v6 = vadd.f32 %v1433_v11, %v6507_v45  ;;  %v1309_v38 = vmul.f32 %v1181_v7, %v6528_v18  ;;  %v2046_v33 = vmul.f32 0.5, %v1918_v27  ;;  %v1917_v0 = vadd.f32 1.0, %v6404_v14  ;;  %v6557_v40 = vpop.f32.mrb[63].mxu1 }
 0x191   :  { %v1434_v54 = vmul.f32 0.044715, %v1306_v53  ;;  %v1310_v58 = vmul.f32 %v1182_v2, %v6536_v10  ;;  %v2170_v12 = vmul.f32 %v2042_v52, %v6246_v17  ;;  %v2041_v44 = vmul.f32 0.5, %v1913_v51 }
 0x192   :  { %v1689_v4 = vmul.f32 0.7978846, %v1561_v6  ;;  %v1437_v8 = vmul.f32 0.044715, %v1309_v38  ;;  %v2174_v32 = vmul.f32 %v2046_v33, %v6254_v5  ;;  %v2045_v41 = vmul.f32 0.5, %v1917_v0 }
 0x193   :  { %v1562_v11 = vadd.f32 %v1434_v54, %v6521_v28  ;;  %v1438_v36 = vmul.f32 0.044715, %v1310_v58  ;;  %v2169_v7 = vmul.f32 %v2041_v44, %v6229_v20  ;;  %v6566_v14 = vadd.f32 %v6439_v59, %v5866_v46 }
 0x194   :  { %5079 = vtanh.f32 %v1689_v4  ;;  %v1565_v27 = vadd.f32 %v1437_v8, %v6528_v18  ;;  %v2330_v53 = vpack.c.bf16 %v2174_v32, %v2170_v12  ;;  %v2173_v17 = vmul.f32 %v2045_v41, %v6249_v39 }
 0x195   :  { %v6570_v2 = vpop.eup %5071  ;;  %v1690_v52 = vmul.f32 0.7978846, %v1562_v11  ;;  %v1566_v5 = vadd.f32 %v1438_v36, %v6536_v10  ;;  %v1185_v51 = vmul.f32 %v6566_v14, %v6566_v14  ;;  %v6577_v20 = vadd.f32 %v6444_v22, %v5869_v47  ;;  %v6579_v59 = vpop.f32.mrb[64].mxu1 }
 0x196   :  { %v6581_v6 = vpop.eup %5073  ;;  %v1693_v38 = vmul.f32 0.7978846, %v1565_v27  ;;  %2857 = vmatprep.mubr.bf16.mxu0 %v2330_v53  ;;  %v2329_v33 = vpack.c.bf16 %v2173_v17, %v2169_v7  ;;  %v6585_v41 = vadd.f32 %v6451_v43, %v5866_v46  ;;  %v6589_v36 = vadd.f32 %v6463_v37, %v5869_v47  ;;  %v6591_v39 = vpop.f32.mrb[65].mxu1 }
 0x197   :  { %v6593_v0 = vpop.eup %5075  ;;  %5081 = vtanh.f32 %v1690_v52  ;;  %v1694_v22 = vmul.f32 0.7978846, %v1566_v5  ;;  %v1313_v54 = vmul.f32 %v1185_v51, %v6566_v14  ;;  %v1186_v58 = vmul.f32 %v6577_v20, %v6577_v20  ;;  %v6598_v12 = vpop.f32.mrb[66].mxu1 }
 0x198   :  { %v6600_v44 = vpop.eup %5077  ;;  %5083 = vtanh.f32 %v1693_v38  ;;  %2858 = vmatmul.mubr.bf16.gmra.mrb[32].mxu0 %v2329_v33  ;;  %v1189_v43 = vmul.f32 %v6585_v41, %v6585_v41  ;;  %v1190_v37 = vmul.f32 %v6589_v36, %v6589_v36  ;;  %v1922_v4 = vadd.f32 1.0, %v6465_v49  ;;  %v6607_v8 = vpop.f32.mrb[67].mxu1 }
 0x199   :  { %5085 = vtanh.f32 %v1694_v22  ;;  %v1441_v32 = vmul.f32 0.044715, %v1313_v54  ;;  %v1314_v11 = vmul.f32 %v1186_v58, %v6577_v20  ;;  %v1926_v7 = vadd.f32 1.0, %v6482_v63 }
 0x19a   :  { %v1317_v27 = vmul.f32 %v1189_v43, %v6585_v41  ;;  %v1318_v53 = vmul.f32 %v1190_v37, %v6589_v36  ;;  %v2050_v17 = vmul.f32 0.5, %v1922_v4  ;;  %v1921_v52 = vadd.f32 1.0, %v6456_v9 }
 0x19b   :  { %v1569_v5 = vadd.f32 %v1441_v32, %v6566_v14  ;;  %v1442_v51 = vmul.f32 0.044715, %v1314_v11  ;;  %v2054_v38 = vmul.f32 0.5, %v1926_v7  ;;  %v1925_v49 = vadd.f32 1.0, %v6477_v35 }
 0x19c   :  { %v1445_v33 = vmul.f32 0.044715, %v1317_v27  ;;  %v1446_v22 = vmul.f32 0.044715, %v1318_v53  ;;  %v2178_v54 = vmul.f32 %v2050_v17, %v6310_v13  ;;  %v2049_v58 = vmul.f32 0.5, %v1921_v52 }
 0x19d   :  { %v1697_v18 = vmul.f32 0.7978846, %v1569_v5  ;;  %v1570_v63 = vadd.f32 %v1442_v51, %v6577_v20  ;;  %v2182_v43 = vmul.f32 %v2054_v38, %v6332_v21  ;;  %v2053_v37 = vmul.f32 0.5, %v1925_v49  ;;  %v6619_v4 = vpop.f32.mrb[68].mxu1 }
 0x19e   :  { %v6621_v9 = vpop.eup %5079  ;;  %v1573_v32 = vadd.f32 %v1445_v33, %v6585_v41  ;;  %v1574_v11 = vadd.f32 %v1446_v22, %v6589_v36  ;;  %v2177_v35 = vmul.f32 %v2049_v58, %v6306_v42  ;;  %v6628_v13 = vadd.f32 %v6494_v50, %v5866_v46  ;;  %v6630_v7 = vpop.f32.mrb[69].mxu1 }
 0x19f   :  { %5087 = vtanh.f32 %v1697_v18  ;;  %v1698_v27 = vmul.f32 0.7978846, %v1570_v63  ;;  %v2334_v21 = vpack.c.bf16 %v2182_v43, %v2178_v54  ;;  %v2181_v53 = vmul.f32 %v2053_v37, %v6321_v57  ;;  %v6633_v17 = vpop.f32.mrb[70].mxu1 }
 0x1a0   :  { %v1701_v52 = vmul.f32 0.7978846, %v1573_v32  ;;  %v1702_v5 = vmul.f32 0.7978846, %v1574_v11  ;;  %v1193_v51 = vmul.f32 %v6628_v13, %v6628_v13  ;;  %v6639_v42 = vadd.f32 %v6498_v48, %v5869_v47  ;;  %v6641_v50 = vpop.f32.mrb[71].mxu1 }
 0x1a1   :  { %v6643_v38 = vpop.eup %5081  ;;  %5089 = vtanh.f32 %v1698_v27  ;;  %2867 = vmatprep.mubr.bf16.mxu0 %v2334_v21  ;;  %v2333_v18 = vpack.c.bf16 %v2181_v53, %v2177_v35  ;;  %v6647_v57 = vadd.f32 %v6501_v56, %v5866_v46  ;;  %v6651_v49 = vadd.f32 %v6509_v19, %v5869_v47 }
 0x1a2   :  { %v6653_v33 = vpop.eup %5083  ;;  %5091 = vtanh.f32 %v1701_v52  ;;  %v1321_v48 = vmul.f32 %v1193_v51, %v6628_v13  ;;  %v1194_v22 = vmul.f32 %v6639_v42, %v6639_v42  ;;  %v1930_v54 = vadd.f32 1.0, %v6523_v29 }
 0x1a3   :  { %v6659_v58 = vpop.eup %5085  ;;  %5093 = vtanh.f32 %v1702_v5  ;;  %2868 = vmatmul.mubr.bf16.gmra.mrb[36].mxu0 %v2333_v18  ;;  %v1197_v56 = vmul.f32 %v6647_v57, %v6647_v57  ;;  %v1198_v19 = vmul.f32 %v6651_v49, %v6651_v49  ;;  %v1934_v63 = vadd.f32 1.0, %v6541_v60 }
 0x1a4   :  { %v1449_v43 = vmul.f32 0.044715, %v1321_v48  ;;  %v1322_v37 = vmul.f32 %v1194_v22, %v6639_v42  ;;  %v2058_v32 = vmul.f32 0.5, %v1930_v54  ;;  %v1929_v11 = vadd.f32 1.0, %v6511_v26 }
 0x1a5   :  { %v1325_v29 = vmul.f32 %v1197_v56, %v6647_v57  ;;  %v1326_v35 = vmul.f32 %v1198_v19, %v6651_v49  ;;  %v2062_v27 = vmul.f32 0.5, %v1934_v63  ;;  %v1933_v21 = vadd.f32 1.0, %v6530_v55  ;;  %v6671_v53 = vpop.f32.mrb[72].mxu1 }
 0x1a6   :  { %v1577_v52 = vadd.f32 %v1449_v43, %v6628_v13  ;;  %v1450_v5 = vmul.f32 0.044715, %v1322_v37  ;;  %v2186_v60 = vmul.f32 %v2058_v32, %v6388_v62  ;;  %v2057_v51 = vmul.f32 0.5, %v1929_v11  ;;  %v6675_v18 = vpop.f32.mrb[73].mxu1 }
 0x1a7   :  { %v1453_v48 = vmul.f32 0.044715, %v1325_v29  ;;  %v1454_v22 = vmul.f32 0.044715, %v1326_v35  ;;  %v2190_v26 = vmul.f32 %v2062_v27, %v6412_v15  ;;  %v2061_v54 = vmul.f32 0.5, %v1933_v21  ;;  %v6678_v56 = vpop.f32.mrb[74].mxu1 }
 0x1a8   :  { %v1705_v19 = vmul.f32 0.7978846, %v1577_v52  ;;  %v1578_v55 = vadd.f32 %v1450_v5, %v6639_v42  ;;  %v2185_v63 = vmul.f32 %v2057_v51, %v6368_v1  ;;  %v6684_v43 = vadd.f32 %v6539_v16, %v5866_v46  ;;  %v6686_v62 = vpop.f32.mrb[75].mxu1 }
 0x1a9   :  { %v6688_v37 = vpop.eup %5087  ;;  %v1581_v32 = vadd.f32 %v1453_v48, %v6647_v57  ;;  %v1582_v15 = vadd.f32 %v1454_v22, %v6651_v49  ;;  %v2338_v11 = vpack.c.bf16 %v2190_v26, %v2186_v60  ;;  %v2189_v29 = vmul.f32 %v2061_v54, %v6392_v23 }
 0x1aa   :  { %8680 = vst [vmem:[#allocation6_spill] sm:$0xff] %v6684_v43  ;;  %5095 = vtanh.f32 %v1705_v19  ;;  %v1706_v35 = vmul.f32 0.7978846, %v1578_v55  ;;  %v1201_v1 = vmul.f32 %v6684_v43, %v6684_v43  ;;  %v6697_v16 = vadd.f32 %v6546_v61, %v5869_v47 }
 0x1ab   :  { %v6699_v27 = vpop.eup %5089  ;;  %v1709_v21 = vmul.f32 0.7978846, %v1581_v32  ;;  %v1710_v52 = vmul.f32 0.7978846, %v1582_v15  ;;  %2877 = vmatprep.mubr.bf16.mxu0 %v2338_v11  ;;  %v2337_v5 = vpack.c.bf16 %v2189_v29, %v2185_v63  ;;  %v6703_v60 = vadd.f32 %v6552_v30, %v5866_v46 }
 0x1ac   :  { %v6705_v23 = vpop.eup %5091  ;;  %5097 = vtanh.f32 %v1706_v35  ;;  %v1329_v51 = vmul.f32 %v1201_v1, %v6684_v43  ;;  %v1202_v48 = vmul.f32 %v6697_v16, %v6697_v16  ;;  %v6712_v61 = vadd.f32 %v6557_v40, %v5869_v47 }
 0x1ad   :  { %v6714_v22 = vpop.eup %5093  ;;  %5099 = vtanh.f32 %v1709_v21  ;;  %2878 = vmatmul.mubr.bf16.gmra.mrb[40].mxu0 %v2337_v5  ;;  %v1205_v46 = vmul.f32 %v6703_v60, %v6703_v60  ;;  %v1938_v30 = vadd.f32 1.0, %v6581_v6  ;;  %v1942_v26 = vadd.f32 1.0, %v6600_v44  ;;  %v6720_v54 = vpop.f32.mrb[76].mxu1 }
 0x1ae   :  { %5101 = vtanh.f32 %v1710_v52  ;;  %v1457_v19 = vmul.f32 0.044715, %v1329_v51  ;;  %v1330_v55 = vmul.f32 %v1202_v48, %v6697_v16  ;;  %v1206_v47 = vmul.f32 %v6712_v61, %v6712_v61  ;;  %v6725_v40 = vpop.f32.mrb[77].mxu1 }
 0x1af   :  { %v1333_v63 = vmul.f32 %v1205_v46, %v6703_v60  ;;  %v2066_v32 = vmul.f32 0.5, %v1938_v30  ;;  %v2070_v15 = vmul.f32 0.5, %v1942_v26  ;;  %v1937_v11 = vadd.f32 1.0, %v6570_v2  ;;  %v6729_v6 = vpop.f32.mrb[78].mxu1 }
 0x1b0   :  { %v1585_v44 = vadd.f32 %v1457_v19, %v6684_v43  ;;  %v1458_v29 = vmul.f32 0.044715, %v1330_v55  ;;  %v1334_v35 = vmul.f32 %v1206_v47, %v6712_v61  ;;  %v1941_v1 = vadd.f32 1.0, %v6593_v0  ;;  %v6734_v21 = vpop.f32.mrb[79].mxu1 }
 0x1b1   :  { %v1461_v52 = vmul.f32 0.044715, %v1333_v63  ;;  %v2194_v5 = vmul.f32 %v2066_v32, %v6461_v24  ;;  %v2198_v51 = vmul.f32 %v2070_v15, %v6475_v31  ;;  %v2065_v48 = vmul.f32 0.5, %v1937_v11  ;;  %v5303_v15 = vld [vmem:[%s8627_s2] sm:$0xf] }
 0x1b2   :  { %v1713_v46 = vmul.f32 0.7978846, %v1585_v44  ;;  %v1586_v2 = vadd.f32 %v1458_v29, %v6697_v16  ;;  %v1462_v30 = vmul.f32 0.044715, %v1334_v35  ;;  %v2069_v26 = vmul.f32 0.5, %v1941_v1 }
 0x1b3   :  { %v1589_v19 = vadd.f32 %v1461_v52, %v6703_v60  ;;  %v2342_v55 = vpack.c.bf16 %v2198_v51, %v2194_v5  ;;  %v2193_v47 = vmul.f32 %v2065_v48, %v6449_v25  ;;  %v205_v0 = vsub.s32 2, %v5852_v34 }
 0x1b4   :  { %v6742_v43 = vpop.eup %5095  ;;  %5103 = vtanh.f32 %v1713_v46  ;;  %v1714_v63 = vmul.f32 0.7978846, %v1586_v2  ;;  %v1590_v24 = vadd.f32 %v1462_v30, %v6712_v61  ;;  %v2197_v31 = vmul.f32 %v2069_v26, %v6471_v3 }
 0x1b5   :  { %v1717_v32 = vmul.f32 0.7978846, %v1589_v19  ;;  %2887 = vmatprep.mubr.bf16.mxu0 %v2342_v55  ;;  %v6749_v11 = vrot.slane %v5303_v15, %v205_v0  ;;  %v209_v25 = vsub.s32 3, %v5852_v34  ;;  %v1946_v44 = vadd.f32 1.0, %v6643_v38  ;;  %v6753_v29 = vpop.f32.mrb[80].mxu1 }
 0x1b6   :  { %v6755_v35 = vpop.eup %5097  ;;  %5105 = vtanh.f32 %v1714_v63  ;;  %v1718_v1 = vmul.f32 0.7978846, %v1590_v24  ;;  %v2341_v52 = vpack.c.bf16 %v2197_v31, %v2193_v47  ;;  %v1950_v3 = vadd.f32 1.0, %v6659_v58  ;;  %v6758_v5 = vpop.f32.mrb[81].mxu1 }
 0x1b7   :  { %v6760_v51 = vpop.eup %5099  ;;  %5107 = vtanh.f32 %v1717_v32  ;;  %v6764_v48 = vadd.f32 %v6579_v59, %v6749_v11  ;;  %v6766_v34 = vrot.slane %v5303_v15, %v209_v25  ;;  %v6770_v38 = vadd.f32 %v6598_v12, %v6749_v11  ;;  %v6772_v46 = vpop.f32.mrb[82].mxu1 }
 0x1b8   :  { %v6774_v2 = vpop.eup %5101  ;;  %5109 = vtanh.f32 %v1718_v1  ;;  %2888 = vmatmul.mubr.bf16.gmra.mrb[44].mxu0 %v2341_v52  ;;  %v2074_v58 = vmul.f32 0.5, %v1946_v44  ;;  %v2078_v30 = vmul.f32 0.5, %v1950_v3  ;;  %v1945_v26 = vadd.f32 1.0, %v6621_v9  ;;  %v6777_v19 = vpop.f32.mrb[83].mxu1 }
 0x1b9   :  { %v1083_v59 = vmul.f32 %v6764_v48, %v6764_v48  ;;  %v6783_v55 = vadd.f32 %v6591_v39, %v6766_v34  ;;  %v1087_v12 = vmul.f32 %v6770_v38, %v6770_v38  ;;  %v6789_v47 = vadd.f32 %v6607_v8, %v6766_v34 }
 0x1ba   :  { %v2202_v0 = vmul.f32 %v2074_v58, %v6521_v28  ;;  %v2206_v9 = vmul.f32 %v2078_v30, %v6536_v10  ;;  %v1949_v63 = vadd.f32 1.0, %v6653_v33  ;;  %v2073_v24 = vmul.f32 0.5, %v1945_v26  ;;  %v8682_v30 = vld [vmem:[#allocation5_spill] sm:$0xff] }
 0x1bb   :  { %8681 = vst [vmem:[#allocation7_spill] sm:$0xff] %v6789_v47  ;;  %v1211_v31 = vmul.f32 %v1083_v59, %v6764_v48  ;;  %v1084_v39 = vmul.f32 %v6783_v55, %v6783_v55  ;;  %v1215_v32 = vmul.f32 %v1087_v12, %v6770_v38  ;;  %v1088_v15 = vmul.f32 %v6789_v47, %v6789_v47 }
 0x1bc   :  { %v2346_v25 = vpack.c.bf16 %v2206_v9, %v2202_v0  ;;  %v2077_v8 = vmul.f32 0.5, %v1949_v63  ;;  %v2201_v44 = vmul.f32 %v2073_v24, %v6507_v45  ;;  %v6803_v28 = vadd.f32 %v6619_v4, %v6749_v11 }
 0x1bd   :  { %v1339_v10 = vmul.f32 0.044715, %v1211_v31  ;;  %v1212_v33 = vmul.f32 %v1084_v39, %v6783_v55  ;;  %v1343_v1 = vmul.f32 0.044715, %v1215_v32  ;;  %v1216_v52 = vmul.f32 %v1088_v15, %v6789_v47  ;;  %v6807_v3 = vpop.f32.mrb[84].mxu1 }
 0x1be   :  { %v6809_v58 = vpop.eup %5103  ;;  %2897 = vmatprep.mubr.bf16.mxu0 %v2346_v25  ;;  %v2205_v26 = vmul.f32 %v2077_v8, %v8682_v30  ;;  %v1091_v45 = vmul.f32 %v6803_v28, %v6803_v28  ;;  %v6816_v4 = vadd.f32 %v6630_v7, %v6766_v34  ;;  %v6820_v59 = vadd.f32 %v6633_v17, %v6749_v11  ;;  %v6822_v12 = vpop.f32.mrb[85].mxu1 }
 0x1bf   :  { %v1467_v0 = vadd.f32 %v1339_v10, %v6764_v48  ;;  %v1340_v9 = vmul.f32 0.044715, %v1212_v33  ;;  %v1471_v63 = vadd.f32 %v1343_v1, %v6770_v38  ;;  %v1344_v24 = vmul.f32 0.044715, %v1216_v52  ;;  %v6826_v31 = vpop.f32.mrb[86].mxu1 }
 0x1c0   :  { %8683 = vst [vmem:[#allocation5_spill] sm:$0xff] %v6826_v31  ;;  %v6828_v39 = vpop.eup %5105  ;;  %v2345_v32 = vpack.c.bf16 %v2205_v26, %v2201_v44  ;;  %v1219_v7 = vmul.f32 %v1091_v45, %v6803_v28  ;;  %v1092_v15 = vmul.f32 %v6816_v4, %v6816_v4  ;;  %v1095_v17 = vmul.f32 %v6820_v59, %v6820_v59  ;;  %v6835_v25 = vpop.f32.mrb[87].mxu1 }
 0x1c1   :  { %8684 = vst [vmem:[#allocation8_spill] sm:$0xff] %v6835_v25  ;;  %v6837_v8 = vpop.eup %5107  ;;  %v1595_v10 = vmul.f32 0.7978846, %v1467_v0  ;;  %v1468_v33 = vadd.f32 %v1340_v9, %v6783_v55  ;;  %v1599_v1 = vmul.f32 0.7978846, %v1471_v63  ;;  %v1472_v52 = vadd.f32 %v1344_v24, %v6789_v47 }
 0x1c2   :  { %v6841_v30 = vpop.eup %5109  ;;  %2898 = vmatmul.mubr.bf16.gmra.mrb[48].mxu0 %v2345_v32  ;;  %v1347_v44 = vmul.f32 0.044715, %v1219_v7  ;;  %v1220_v26 = vmul.f32 %v1092_v15, %v6816_v4  ;;  %v1223_v45 = vmul.f32 %v1095_v17, %v6820_v59  ;;  %v6847_v31 = vadd.f32 %v6641_v50, %v6766_v34 }
 0x1c3   :  { %5111 = vtanh.f32 %v1595_v10  ;;  %v1596_v25 = vmul.f32 0.7978846, %v1468_v33  ;;  %v1600_v0 = vmul.f32 0.7978846, %v1472_v52  ;;  %v1954_v9 = vadd.f32 1.0, %v6699_v27 }
 0x1c4   :  { %5113 = vtanh.f32 %v1599_v1  ;;  %v1475_v63 = vadd.f32 %v1347_v44, %v6803_v28  ;;  %v1348_v24 = vmul.f32 0.044715, %v1220_v26  ;;  %v1351_v47 = vmul.f32 0.044715, %v1223_v45 }
 0x1c5   :  { %5115 = vtanh.f32 %v1596_v25  ;;  %v1096_v32 = vmul.f32 %v6847_v31, %v6847_v31  ;;  %v1958_v7 = vadd.f32 1.0, %v6714_v22  ;;  %v2082_v15 = vmul.f32 0.5, %v1954_v9  ;;  %v6854_v17 = vpop.f32.mrb[88].mxu1 }
 0x1c6   :  { %5117 = vtanh.f32 %v1600_v0  ;;  %v1603_v50 = vmul.f32 0.7978846, %v1475_v63  ;;  %v1476_v10 = vadd.f32 %v1348_v24, %v6816_v4  ;;  %v1479_v27 = vadd.f32 %v1351_v47, %v6820_v59  ;;  %v6858_v33 = vpop.f32.mrb[89].mxu1 }
 0x1c7   :  { %v1224_v1 = vmul.f32 %v1096_v32, %v6847_v31  ;;  %v2086_v52 = vmul.f32 0.5, %v1958_v7  ;;  %v2210_v25 = vmul.f32 %v2082_v15, %v6577_v20  ;;  %v1953_v44 = vadd.f32 1.0, %v6688_v37  ;;  %v6863_v26 = vpop.f32.mrb[90].mxu1 }
 0x1c8   :  { %5119 = vtanh.f32 %v1603_v50  ;;  %v1604_v22 = vmul.f32 0.7978846, %v1476_v10  ;;  %v1607_v45 = vmul.f32 0.7978846, %v1479_v27  ;;  %v1957_v0 = vadd.f32 1.0, %v6705_v23  ;;  %v6866_v9 = vpop.f32.mrb[91].mxu1 }
 0x1c9   :  { %v1352_v63 = vmul.f32 0.044715, %v1224_v1  ;;  %v2214_v47 = vmul.f32 %v2086_v52, %v6589_v36  ;;  %v2081_v24 = vmul.f32 0.5, %v1953_v44  ;;  %v6871_v32 = vadd.f32 %v6671_v53, %v6749_v11 }
 0x1ca   :  { %5121 = vtanh.f32 %v1604_v22  ;;  %v2085_v20 = vmul.f32 0.5, %v1957_v0  ;;  %v6875_v37 = vadd.f32 %v6675_v18, %v6766_v34  ;;  %v6879_v7 = vadd.f32 %v6678_v56, %v6749_v11 }
 0x1cb   :  { %5123 = vtanh.f32 %v1607_v45  ;;  %v1480_v23 = vadd.f32 %v1352_v63, %v6847_v31  ;;  %v2350_v15 = vpack.c.bf16 %v2214_v47, %v2210_v25  ;;  %v2209_v36 = vmul.f32 %v2081_v24, %v6566_v14 }
 0x1cc   :  { %v2213_v50 = vmul.f32 %v2085_v20, %v6585_v41  ;;  %v1099_v53 = vmul.f32 %v6871_v32, %v6871_v32  ;;  %v1100_v10 = vmul.f32 %v6875_v37, %v6875_v37  ;;  %v1103_v18 = vmul.f32 %v6879_v7, %v6879_v7 }
 0x1cd   :  { %v5112_v27 = vpop.eup %5111  ;;  %v1608_v56 = vmul.f32 0.7978846, %v1480_v23  ;;  %2907 = vmatprep.mubr.bf16.mxu0 %v2350_v15  ;;  %v6892_v1 = vadd.f32 %v6686_v62, %v6766_v34  ;;  %v1962_v14 = vadd.f32 1.0, %v6755_v35  ;;  %v1966_v41 = vadd.f32 1.0, %v6774_v2  ;;  %v6896_v52 = vpop.f32.mrb[92].mxu1 }
 0x1ce   :  { %v5114_v25 = vpop.eup %5113  ;;  %v1851_v44 = vadd.f32 1.0, %v5112_v27  ;;  %v2349_v22 = vpack.c.bf16 %v2213_v50, %v2209_v36  ;;  %v1227_v45 = vmul.f32 %v1099_v53, %v6871_v32  ;;  %v1228_v0 = vmul.f32 %v1100_v10, %v6875_v37  ;;  %v6900_v63 = vpop.f32.mrb[93].mxu1 }
 0x1cf   :  { %8685 = vst [vmem:[#allocation9_spill] sm:$0xff] %v6900_v63  ;;  %v6902_v47 = vpop.eup %5115  ;;  %v1855_v24 = vadd.f32 1.0, %v5114_v25  ;;  %5125 = vtanh.f32 %v1608_v56  ;;  %v1231_v62 = vmul.f32 %v1103_v18, %v6879_v7  ;;  %v1104_v35 = vmul.f32 %v6892_v1, %v6892_v1  ;;  %v6907_v2 = vpop.f32.mrb[94].mxu1 }
 0x1d0   :  { %8686 = vst [vmem:[#allocation10_spill] sm:$0xff] %v6907_v2  ;;  %v6909_v20 = vpop.eup %5117  ;;  %v1979_v23 = vmul.f32 0.5, %v1851_v44  ;;  %2908 = vmatmul.mubr.bf16.gmra.mrb[52].mxu0 %v2349_v22  ;;  %v1355_v15 = vmul.f32 0.044715, %v1227_v45  ;;  %v1356_v36 = vmul.f32 0.044715, %v1228_v0 }
 0x1d1   :  { %v2090_v50 = vmul.f32 0.5, %v1962_v14  ;;  %v1983_v53 = vmul.f32 0.5, %v1855_v24  ;;  %v1359_v10 = vmul.f32 0.044715, %v1231_v62  ;;  %v1232_v27 = vmul.f32 %v1104_v35, %v6892_v1  ;;  %v6912_v56 = vpop.f32.mrb[95].mxu1 }
 0x1d2   :  { %v2094_v25 = vmul.f32 0.5, %v1966_v41  ;;  %v6914_v18 = vpop.eup %5119  ;;  %v6917_v63 = vmul.f32 %v1979_v23, %v6764_v48  ;;  %v1483_v2 = vadd.f32 %v1355_v15, %v6871_v32  ;;  %v1484_v44 = vadd.f32 %v1356_v36, %v6875_v37 }
 0x1d3   :  { %v2218_v22 = vmul.f32 %v2090_v50, %v6639_v42  ;;  %v6923_v14 = vmul.f32 %v1983_v53, %v6770_v38  ;;  %v1487_v45 = vadd.f32 %v1359_v10, %v6879_v7  ;;  %v1360_v0 = vmul.f32 0.044715, %v1232_v27 }
 0x1d4   :  { %v2222_v41 = vmul.f32 %v2094_v25, %v6651_v49  ;;  %v6927_v24 = vpop.eup %5121  ;;  %v1611_v62 = vmul.f32 0.7978846, %v1483_v2  ;;  %v1612_v35 = vmul.f32 0.7978846, %v1484_v44  ;;  %v1961_v48 = vadd.f32 1.0, %v6742_v43 }
 0x1d5   :  { %v1965_v23 = vadd.f32 1.0, %v6760_v51  ;;  %v6931_v15 = vpop.eup %5123  ;;  %v1615_v38 = vmul.f32 0.7978846, %v1487_v45  ;;  %v1488_v36 = vadd.f32 %v1360_v0, %v6892_v1  ;;  %v6936_v53 = vpop.f32.mrb[96].mxu1  ;;  %v6940_v2 = vadd.f32 %v6720_v54, %v6749_v11 }
 0x1d6   :  { %v2354_v50 = vpack.c.bf16 %v2222_v41, %v2218_v22  ;;  %5127 = vtanh.f32 %v1611_v62  ;;  %v2089_v49 = vmul.f32 0.5, %v1961_v48  ;;  %v6942_v43 = vpop.f32.mrb[97].mxu1  ;;  %v6946_v27 = vadd.f32 %v6725_v40, %v6766_v34 }
 0x1d7   :  { %v2093_v10 = vmul.f32 0.5, %v1965_v23  ;;  %5129 = vtanh.f32 %v1612_v35  ;;  %v1616_v51 = vmul.f32 0.7978846, %v1488_v36  ;;  %v6950_v25 = vadd.f32 %v6729_v6, %v6749_v11  ;;  %v6952_v44 = vpop.f32.mrb[98].mxu1 }
 0x1d8   :  { %2917 = vmatprep.mubr.bf16.mxu0 %v2354_v50  ;;  %5131 = vtanh.f32 %v1615_v38  ;;  %v2217_v22 = vmul.f32 %v2089_v49, %v6628_v13  ;;  %v1107_v45 = vmul.f32 %v6940_v2, %v6940_v2  ;;  %v6958_v0 = vpop.f32.mrb[99].mxu1  ;;  %v1108_v40 = vmul.f32 %v6946_v27, %v6946_v27 }
 0x1d9   :  { %v2221_v54 = vmul.f32 %v2093_v10, %v6647_v57  ;;  %v6960_v41 = vpop.eup %5125  ;;  %5133 = vtanh.f32 %v1616_v51  ;;  %v1111_v6 = vmul.f32 %v6950_v25, %v6950_v25  ;;  %v6968_v62 = vadd.f32 %v6734_v21, %v6766_v34 }
 0x1da   :  { %v1235_v57 = vmul.f32 %v1107_v45, %v6940_v2  ;;  %v1970_v35 = vadd.f32 1.0, %v6828_v39  ;;  %v1974_v48 = vadd.f32 1.0, %v6841_v30  ;;  %v1236_v23 = vmul.f32 %v1108_v40, %v6946_v27 }
 0x1db   :  { %v2353_v13 = vpack.c.bf16 %v2221_v54, %v2217_v22  ;;  %v1239_v38 = vmul.f32 %v1111_v6, %v6950_v25  ;;  %v1112_v36 = vmul.f32 %v6968_v62, %v6968_v62  ;;  %v1969_v50 = vadd.f32 1.0, %v6809_v58 }
 0x1dc   :  { %v1363_v49 = vmul.f32 0.044715, %v1235_v57  ;;  %v2098_v21 = vmul.f32 0.5, %v1970_v35  ;;  %v2102_v10 = vmul.f32 0.5, %v1974_v48  ;;  %v1973_v51 = vadd.f32 1.0, %v6837_v8  ;;  %v8687_v48 = vld [vmem:[#allocation6_spill] sm:$0xff] }
 0x1dd   :  { %2918 = vmatmul.mubr.bf16.gmra.mrb[56].mxu0 %v2353_v13  ;;  %v1364_v22 = vmul.f32 0.044715, %v1236_v23  ;;  %v1367_v54 = vmul.f32 0.044715, %v1239_v38  ;;  %v1240_v39 = vmul.f32 %v1112_v36, %v6968_v62  ;;  %v2097_v30 = vmul.f32 0.5, %v1969_v50  ;;  %v6980_v45 = vpop.f32.mrb[100].mxu1 }
 0x1de   :  { %v1491_v40 = vadd.f32 %v1363_v49, %v6940_v2  ;;  %v2226_v6 = vmul.f32 %v2098_v21, %v6697_v16  ;;  %v2230_v42 = vmul.f32 %v2102_v10, %v6712_v61  ;;  %v2101_v58 = vmul.f32 0.5, %v1973_v51  ;;  %v6985_v13 = vpop.f32.mrb[101].mxu1 }
 0x1df   :  { %v1492_v57 = vadd.f32 %v1364_v22, %v6946_v27  ;;  %v1495_v8 = vadd.f32 %v1367_v54, %v6950_v25  ;;  %v1368_v35 = vmul.f32 0.044715, %v1240_v39  ;;  %v2225_v23 = vmul.f32 %v2097_v30, %v8687_v48  ;;  %v6990_v38 = vpop.f32.mrb[102].mxu1 }
 0x1e0   :  { %v6992_v36 = vpop.eup %5127  ;;  %v1619_v50 = vmul.f32 0.7978846, %v1491_v40  ;;  %v2358_v49 = vpack.c.bf16 %v2230_v42, %v2226_v6  ;;  %v2229_v16 = vmul.f32 %v2101_v58, %v6703_v60  ;;  %v6997_v61 = vadd.f32 %v6753_v29, %v6749_v11  ;;  %v6999_v21 = vpop.f32.mrb[103].mxu1 }
 0x1e1   :  { %v7001_v10 = vpop.eup %5129  ;;  %v1620_v51 = vmul.f32 0.7978846, %v1492_v57  ;;  %v1623_v22 = vmul.f32 0.7978846, %v1495_v8  ;;  %v1496_v54 = vadd.f32 %v1368_v35, %v6968_v62  ;;  %v7006_v39 = vadd.f32 %v6758_v5, %v6766_v34 }
 0x1e2   :  { %v7008_v30 = vpop.eup %5131  ;;  %5135 = vtanh.f32 %v1619_v50  ;;  %2927 = vmatprep.mubr.bf16.mxu0 %v2358_v49  ;;  %v2357_v60 = vpack.c.bf16 %v2229_v16, %v2225_v23  ;;  %v1115_v29 = vmul.f32 %v6997_v61, %v6997_v61  ;;  %v7014_v42 = vadd.f32 %v6772_v46, %v6749_v11 }
 0x1e3   :  { %v7016_v40 = vpop.eup %5133  ;;  %5137 = vtanh.f32 %v1620_v51  ;;  %v1624_v6 = vmul.f32 0.7978846, %v1496_v54  ;;  %v1116_v5 = vmul.f32 %v7006_v39, %v7006_v39  ;;  %v7022_v58 = vadd.f32 %v6777_v19, %v6766_v34 }
 0x1e4   :  { %5139 = vtanh.f32 %v1623_v22  ;;  %v1243_v57 = vmul.f32 %v1115_v29, %v6997_v61  ;;  %v1119_v8 = vmul.f32 %v7014_v42, %v7014_v42  ;;  %v1852_v46 = vadd.f32 1.0, %v6902_v47 }
 0x1e5   :  { %2928 = vmatmul.mubr.bf16.gmra.mrb[60].mxu0 %v2357_v60  ;;  %5141 = vtanh.f32 %v1624_v6  ;;  %v1244_v35 = vmul.f32 %v1116_v5, %v7006_v39  ;;  %v1120_v48 = vmul.f32 %v7022_v58, %v7022_v58  ;;  %v1856_v23 = vadd.f32 1.0, %v6909_v20  ;;  %v7032_v50 = vpop.f32.mrb[104].mxu1 }
 0x1e6   :  { %8688 = vst [vmem:[#allocation6_spill] sm:$0xff] %v7032_v50  ;;  %v1371_v19 = vmul.f32 0.044715, %v1243_v57  ;;  %v1247_v49 = vmul.f32 %v1119_v8, %v7014_v42  ;;  %v1980_v16 = vmul.f32 0.5, %v1852_v46  ;;  %v7037_v51 = vadd.f32 %v6807_v3, %v6749_v11  ;;  %v7039_v22 = vpop.f32.mrb[105].mxu1 }
 0x1e7   :  { %8690 = vst [vmem:[#allocation12_spill] sm:$0xff] %v7039_v22  ;;  %v1372_v47 = vmul.f32 0.044715, %v1244_v35  ;;  %v1248_v54 = vmul.f32 %v1120_v48, %v7022_v58  ;;  %v1984_v60 = vmul.f32 0.5, %v1856_v23  ;;  %v7044_v29 = vadd.f32 %v6822_v12, %v6766_v34  ;;  %v7046_v20 = vpop.f32.mrb[106].mxu1  ;;  %v8693_v48 = vld [vmem:[#allocation7_spill] sm:$0xff] }
 0x1e8   :  { %8689 = vst [vmem:[#allocation11_spill] sm:$0xff] %v7037_v51  ;;  %8691 = vst [vmem:[#allocation13_spill] sm:$0xff] %v7046_v20  ;;  %v1499_v6 = vadd.f32 %v1371_v19, %v6997_v61  ;;  %v1375_v5 = vmul.f32 0.044715, %v1247_v49  ;;  %v2108_v57 = vmul.f32 %v1980_v16, %v6783_v55  ;;  %v1123_v3 = vmul.f32 %v7037_v51, %v7037_v51  ;;  %v7052_v8 = vpop.f32.mrb[107].mxu1  ;;  %v8694_v55 = vld [vmem:[#allocation5_spill] sm:$0xff] }
 0x1e9   :  { %8692 = vst [vmem:[#allocation14_spill] sm:$0xff] %v7052_v8  ;;  %v1500_v46 = vadd.f32 %v1372_v47, %v7006_v39  ;;  %v1376_v35 = vmul.f32 0.044715, %v1248_v54  ;;  %v2112_v23 = vmul.f32 %v1984_v60, %v8693_v48  ;;  %v1124_v12 = vmul.f32 %v7044_v29, %v7044_v29 }
 0x1ea   :  { %v1627_v22 = vmul.f32 0.7978846, %v1499_v6  ;;  %v1503_v20 = vadd.f32 %v1375_v5, %v7014_v42  ;;  %v1251_v19 = vmul.f32 %v1123_v3, %v7037_v51  ;;  %v7062_v49 = vadd.f32 %v8694_v55, %v6749_v11 }
 0x1eb   :  { %v1628_v16 = vmul.f32 0.7978846, %v1500_v46  ;;  %v1504_v8 = vadd.f32 %v1376_v35, %v7022_v58  ;;  %v2300_v50 = vpack.c.bf16 %v2112_v23, %v2108_v57  ;;  %v1252_v47 = vmul.f32 %v1124_v12, %v7044_v29  ;;  %v8695_v46 = vld [vmem:[#allocation8_spill] sm:$0xff] }
 0x1ec   :  { %v7066_v54 = vpop.eup %5135  ;;  %5143 = vtanh.f32 %v1627_v22  ;;  %v1631_v60 = vmul.f32 0.7978846, %v1503_v20  ;;  %v1379_v48 = vmul.f32 0.044715, %v1251_v19  ;;  %v1127_v6 = vmul.f32 %v7062_v49, %v7062_v49 }
 0x1ed   :  { %v7070_v5 = vpop.eup %5137  ;;  %5145 = vtanh.f32 %v1628_v16  ;;  %v1632_v3 = vmul.f32 0.7978846, %v1504_v8  ;;  %2970 = vmatprep.mubr.bf16.mxu0 %v2300_v50  ;;  %v1380_v55 = vmul.f32 0.044715, %v1252_v47  ;;  %v7074_v35 = vadd.f32 %v8695_v46, %v6766_v34  ;;  %v7076_v57 = vpop.f32.mrb[108].mxu1 }
 0x1ee   :  { %8696 = vst [vmem:[#allocation7_spill] sm:$0xff] %v7076_v57  ;;  %v7078_v23 = vpop.eup %5139  ;;  %5147 = vtanh.f32 %v1631_v60  ;;  %v8697_v22 = vpack.c.bf16 %v6923_v14, %v6917_v63  ;;  %v1507_v20 = vadd.f32 %v1379_v48, %v7037_v51  ;;  %v1255_v12 = vmul.f32 %v1127_v6, %v7062_v49  ;;  %v7086_v8 = vpop.f32.mrb[109].mxu1 }
 0x1ef   :  { %v1860_v50 = vadd.f32 1.0, %v6927_v24  ;;  %8698 = vst [vmem:[#allocation5_spill] sm:$0xff] %v7086_v8  ;;  %v7088_v19 = vpop.eup %5141  ;;  %5149 = vtanh.f32 %v1632_v3  ;;  %v1508_v16 = vadd.f32 %v1380_v55, %v7044_v29  ;;  %v1128_v47 = vmul.f32 %v7074_v35, %v7074_v35  ;;  %v7094_v63 = vpop.f32.mrb[110].mxu1 }
 0x1f0   :  { %2971 = vmatmul.mubr.bf16.vlgmr.msra.gmra.mrb[0].mxu0 %v8697_v22  ;;  %v1864_v60 = vadd.f32 1.0, %v6960_v41  ;;  %v1635_v14 = vmul.f32 0.7978846, %v1507_v20  ;;  %v1383_v48 = vmul.f32 0.044715, %v1255_v12  ;;  %v1859_v6 = vadd.f32 1.0, %v6914_v18 }
 0x1f1   :  { %v1988_v46 = vmul.f32 0.5, %v1860_v50  ;;  %v1636_v24 = vmul.f32 0.7978846, %v1508_v16  ;;  %v1256_v22 = vmul.f32 %v1128_v47, %v7074_v35  ;;  %v1863_v3 = vadd.f32 1.0, %v6931_v15  ;;  %v7099_v57 = vpop.f32.mrb[111].mxu1 }
 0x1f2   :  { %v1992_v8 = vmul.f32 0.5, %v1864_v60  ;;  %5151 = vtanh.f32 %v1635_v14  ;;  %v1511_v55 = vadd.f32 %v1383_v48, %v7062_v49  ;;  %v1987_v51 = vmul.f32 0.5, %v1859_v6 }
 0x1f3   :  { %v2116_v41 = vmul.f32 %v1988_v46, %v6816_v4  ;;  %5153 = vtanh.f32 %v1636_v24  ;;  %v1384_v20 = vmul.f32 0.044715, %v1256_v22  ;;  %v1991_v50 = vmul.f32 0.5, %v1863_v3 }
 0x1f4   :  { %v2120_v12 = vmul.f32 %v1992_v8, %v6847_v31  ;;  %v1639_v18 = vmul.f32 0.7978846, %v1511_v55  ;;  %v2115_v16 = vmul.f32 %v1987_v51, %v6803_v28  ;;  %v7107_v47 = vadd.f32 %v6854_v17, %v6749_v11 }
 0x1f5   :  { %v7111_v15 = vadd.f32 %v6858_v33, %v6766_v34  ;;  %v1512_v60 = vadd.f32 %v1384_v20, %v7074_v35  ;;  %v2119_v14 = vmul.f32 %v1991_v50, %v6820_v59  ;;  %v7117_v31 = vadd.f32 %v6863_v26, %v6749_v11  ;;  %v7119_v8 = vpop.f32.mrb[112].mxu1 }
 0x1f6   :  { %v2304_v4 = vpack.c.bf16 %v2120_v12, %v2116_v41  ;;  %v7121_v28 = vpop.eup %5143  ;;  %5155 = vtanh.f32 %v1639_v18  ;;  %v1131_v17 = vmul.f32 %v7107_v47, %v7107_v47  ;;  %v7129_v51 = vadd.f32 %v6866_v9, %v6766_v34  ;;  %v7131_v59 = vpop.f32.mrb[113].mxu1 }
 0x1f7   :  { %v1132_v33 = vmul.f32 %v7111_v15, %v7111_v15  ;;  %8699 = vst [vmem:[#allocation8_spill] sm:$0xff] %v7131_v59  ;;  %v7133_v48 = vpop.eup %5145  ;;  %v1640_v26 = vmul.f32 0.7978846, %v1512_v60  ;;  %v2303_v46 = vpack.c.bf16 %v2119_v14, %v2115_v16  ;;  %v1135_v6 = vmul.f32 %v7117_v31, %v7117_v31  ;;  %v7138_v22 = vpop.f32.mrb[114].mxu1 }
 0x1f8   :  { %2980 = vmatprep.mubr.bf16.mxu0 %v2304_v4  ;;  %v1868_v24 = vadd.f32 1.0, %v7001_v10  ;;  %8700 = vst [vmem:[#allocation15_spill] sm:$0xff] %v7138_v22  ;;  %v7140_v3 = vpop.eup %5147  ;;  %v1259_v55 = vmul.f32 %v1131_v17, %v7107_v47  ;;  %v1136_v41 = vmul.f32 %v7129_v51, %v7129_v51  ;;  %v1872_v20 = vadd.f32 1.0, %v7016_v40  ;;  %v7147_v12 = vpop.f32.mrb[115].mxu1 }
 0x1f9   :  { %v1260_v9 = vmul.f32 %v1132_v33, %v7111_v15  ;;  %8701 = vst [vmem:[#allocation16_spill] sm:$0xff] %v7147_v12  ;;  %v7149_v50 = vpop.eup %5149  ;;  %5157 = vtanh.f32 %v1640_v26  ;;  %2981 = vmatmul.mubr.bf16.gmra.mrb[4].mxu0 %v2303_v46  ;;  %v1263_v10 = vmul.f32 %v1135_v6, %v7117_v31  ;;  %v1867_v16 = vadd.f32 1.0, %v6992_v36 }
 0x1fa   :  { %v1996_v18 = vmul.f32 0.5, %v1868_v24  ;;  %v1387_v60 = vmul.f32 0.044715, %v1259_v55  ;;  %v1264_v14 = vmul.f32 %v1136_v41, %v7129_v51  ;;  %v2000_v17 = vmul.f32 0.5, %v1872_v20 }
 0x1fb   :  { %v1388_v4 = vmul.f32 0.044715, %v1260_v9  ;;  %v1391_v33 = vmul.f32 0.044715, %v1263_v10  ;;  %v1871_v40 = vadd.f32 1.0, %v7008_v30  ;;  %v1995_v12 = vmul.f32 0.5, %v1867_v16 }
 0x1fc   :  { %v2124_v22 = vmul.f32 %v1996_v18, %v6875_v37  ;;  %v7156_v59 = vpop.eup %5151  ;;  %v1515_v26 = vadd.f32 %v1387_v60, %v7107_v47  ;;  %v1392_v6 = vmul.f32 0.044715, %v1264_v14  ;;  %v2128_v36 = vmul.f32 %v2000_v17, %v6892_v1 }
 0x1fd   :  { %v1516_v46 = vadd.f32 %v1388_v4, %v7111_v15  ;;  %v7161_v24 = vpop.eup %5153  ;;  %v1519_v55 = vadd.f32 %v1391_v33, %v7117_v31  ;;  %v1999_v9 = vmul.f32 0.5, %v1871_v40  ;;  %v2123_v41 = vmul.f32 %v1995_v12, %v6871_v32  ;;  %v7169_v30 = vpop.f32.mrb[116].mxu1  ;;  %v8702_v32 = vld [vmem:[#allocation9_spill] sm:$0xff] }
 0x1fe   :  { %v7167_v37 = vadd.f32 %v6896_v52, %v6749_v11  ;;  %v1643_v20 = vmul.f32 0.7978846, %v1515_v26  ;;  %v1520_v18 = vadd.f32 %v1392_v6, %v7129_v51  ;;  %v2308_v16 = vpack.c.bf16 %v2128_v36, %v2124_v22  ;;  %v7172_v60 = vpop.f32.mrb[117].mxu1  ;;  %v8704_v22 = vld [vmem:[#allocation10_spill] sm:$0xff] }
 0x1ff   :  { %v1644_v10 = vmul.f32 0.7978846, %v1516_v46  ;;  %v1647_v1 = vmul.f32 0.7978846, %v1519_v55  ;;  %v2127_v4 = vmul.f32 %v1999_v9, %v6879_v7  ;;  %v7179_v12 = vadd.f32 %v8702_v32, %v6766_v34  ;;  %v7181_v52 = vpop.f32.mrb[118].mxu1 }
 0x200   :  { %v1139_v14 = vmul.f32 %v7167_v37, %v7167_v37  ;;  %8703 = vst [vmem:[#allocation9_spill] sm:$0xff] %v7181_v52  ;;  %v7183_v17 = vpop.eup %5155  ;;  %5159 = vtanh.f32 %v1643_v20  ;;  %v1648_v33 = vmul.f32 0.7978846, %v1520_v18  ;;  %2990 = vmatprep.mubr.bf16.mxu0 %v2308_v16  ;;  %v7187_v40 = vadd.f32 %v8704_v22, %v6749_v11  ;;  %v7193_v26 = vpop.f32.mrb[119].mxu1 }
 0x201   :  { %v7191_v7 = vadd.f32 %v6912_v56, %v6766_v34  ;;  %8705 = vst [vmem:[#allocation10_spill] sm:$0xff] %v7193_v26  ;;  %5161 = vtanh.f32 %v1644_v10  ;;  %v2307_v46 = vpack.c.bf16 %v2127_v4, %v2123_v41  ;;  %v1140_v36 = vmul.f32 %v7179_v12, %v7179_v12 }
 0x202   :  { %v1267_v6 = vmul.f32 %v1139_v14, %v7167_v37  ;;  %5163 = vtanh.f32 %v1647_v1  ;;  %v1143_v55 = vmul.f32 %v7187_v40, %v7187_v40  ;;  %v1876_v20 = vadd.f32 1.0, %v7070_v5 }
 0x203   :  { %v1144_v9 = vmul.f32 %v7191_v7, %v7191_v7  ;;  %v7203_v56 = vpop.eup %5157  ;;  %5165 = vtanh.f32 %v1648_v33  ;;  %2991 = vmatmul.mubr.bf16.gmra.mrb[8].mxu0 %v2307_v46  ;;  %v1268_v41 = vmul.f32 %v1140_v36, %v7179_v12  ;;  %v1880_v18 = vadd.f32 1.0, %v7088_v19 }
 0x204   :  { %v1395_v10 = vmul.f32 0.044715, %v1267_v6  ;;  %v1271_v16 = vmul.f32 %v1143_v55, %v7187_v40  ;;  %v2004_v4 = vmul.f32 0.5, %v1876_v20  ;;  %v1875_v14 = vadd.f32 1.0, %v7066_v54 }
 0x205   :  { %v1272_v1 = vmul.f32 %v1144_v9, %v7191_v7  ;;  %v1396_v22 = vmul.f32 0.044715, %v1268_v41  ;;  %v2008_v5 = vmul.f32 0.5, %v1880_v18  ;;  %v1879_v26 = vadd.f32 1.0, %v7078_v23  ;;  %v7212_v33 = vpop.f32.mrb[120].mxu1 }
 0x206   :  { %v1523_v32 = vadd.f32 %v1395_v10, %v7167_v37  ;;  %v1399_v46 = vmul.f32 0.044715, %v1271_v16  ;;  %v2132_v36 = vmul.f32 %v2004_v4, %v6946_v27  ;;  %v2003_v19 = vmul.f32 0.5, %v1875_v14  ;;  %v7215_v52 = vpop.f32.mrb[121].mxu1 }
 0x207   :  { %v1400_v6 = vmul.f32 0.044715, %v1272_v1  ;;  %v1524_v9 = vadd.f32 %v1396_v22, %v7179_v12  ;;  %v2136_v54 = vmul.f32 %v2008_v5, %v6968_v62  ;;  %v2007_v20 = vmul.f32 0.5, %v1879_v26  ;;  %v7219_v10 = vpop.f32.mrb[122].mxu1 }
 0x208   :  { %v1651_v55 = vmul.f32 0.7978846, %v1523_v32  ;;  %v1527_v41 = vadd.f32 %v1399_v46, %v7187_v40  ;;  %v2131_v18 = vmul.f32 %v2003_v19, %v6940_v2  ;;  %v7226_v27 = vadd.f32 %v6936_v53, %v6749_v11  ;;  %v7228_v16 = vpop.f32.mrb[123].mxu1 }
 0x209   :  { %v1528_v23 = vadd.f32 %v1400_v6, %v7191_v7  ;;  %v1652_v1 = vmul.f32 0.7978846, %v1524_v9  ;;  %v2312_v4 = vpack.c.bf16 %v2136_v54, %v2132_v36  ;;  %v2135_v62 = vmul.f32 %v2007_v20, %v6950_v25 }
 0x20a   :  { %5167 = vtanh.f32 %v1651_v55  ;;  %v7231_v26 = vpop.eup %5159  ;;  %v1655_v14 = vmul.f32 0.7978846, %v1527_v41  ;;  %v1147_v22 = vmul.f32 %v7226_v27, %v7226_v27  ;;  %v7237_v2 = vadd.f32 %v6942_v43, %v6766_v34 }
 0x20b   :  { %v1656_v32 = vmul.f32 0.7978846, %v1528_v23  ;;  %v7239_v53 = vpop.eup %5161  ;;  %5169 = vtanh.f32 %v1652_v1  ;;  %3000 = vmatprep.mubr.bf16.mxu0 %v2312_v4  ;;  %v2311_v5 = vpack.c.bf16 %v2135_v62, %v2131_v18  ;;  %v7243_v46 = vadd.f32 %v6952_v44, %v6749_v11 }
 0x20c   :  { %v7247_v25 = vadd.f32 %v6958_v0, %v6766_v34  ;;  %v7249_v6 = vpop.eup %5163  ;;  %5171 = vtanh.f32 %v1655_v14  ;;  %v1275_v36 = vmul.f32 %v1147_v22, %v7226_v27  ;;  %v1148_v43 = vmul.f32 %v7237_v2, %v7237_v2 }
 0x20d   :  { %v1884_v19 = vadd.f32 1.0, %v7133_v48  ;;  %v7255_v55 = vpop.eup %5165  ;;  %5173 = vtanh.f32 %v1656_v32  ;;  %3001 = vmatmul.mubr.bf16.gmra.mrb[12].mxu0 %v2311_v5  ;;  %v1151_v44 = vmul.f32 %v7243_v46, %v7243_v46  ;;  %v1888_v9 = vadd.f32 1.0, %v7149_v50  ;;  %v7262_v54 = vpop.f32.mrb[124].mxu1 }
 0x20e   :  { %v1152_v0 = vmul.f32 %v7247_v25, %v7247_v25  ;;  %8706 = vst [vmem:[#allocation17_spill] sm:$0xff] %v7262_v54  ;;  %v1403_v20 = vmul.f32 0.044715, %v1275_v36  ;;  %v1276_v41 = vmul.f32 %v1148_v43, %v7237_v2  ;;  %v1883_v48 = vadd.f32 1.0, %v7121_v28  ;;  %v7266_v18 = vpop.f32.mrb[125].mxu1 }
 0x20f   :  { %v2012_v23 = vmul.f32 0.5, %v1884_v19  ;;  %8707 = vst [vmem:[#allocation18_spill] sm:$0xff] %v7266_v18  ;;  %v1279_v1 = vmul.f32 %v1151_v44, %v7243_v46  ;;  %v2016_v62 = vmul.f32 0.5, %v1888_v9  ;;  %v1887_v14 = vadd.f32 1.0, %v7140_v3  ;;  %v7271_v32 = vpop.f32.mrb[126].mxu1 }
 0x210   :  { %v1280_v4 = vmul.f32 %v1152_v0, %v7247_v25  ;;  %v1531_v50 = vadd.f32 %v1403_v20, %v7226_v27  ;;  %v1404_v22 = vmul.f32 0.044715, %v1276_v41  ;;  %v2011_v36 = vmul.f32 0.5, %v1883_v48  ;;  %v7275_v43 = vpop.f32.mrb[127].mxu1 }
 0x211   :  { %v2140_v5 = vmul.f32 %v2012_v23, %v7006_v39  ;;  %v1407_v28 = vmul.f32 0.044715, %v1279_v1  ;;  %v2144_v18 = vmul.f32 %v2016_v62, %v7022_v58  ;;  %v2015_v44 = vmul.f32 0.5, %v1887_v14 }
 0x212   :  { %v1408_v19 = vmul.f32 0.044715, %v1280_v4  ;;  %v1659_v54 = vmul.f32 0.7978846, %v1531_v50  ;;  %v1532_v0 = vadd.f32 %v1404_v22, %v7237_v2  ;;  %v2139_v3 = vmul.f32 %v2011_v36, %v6997_v61 }
 0x213   :  { %v7282_v9 = vadd.f32 %v6980_v45, %v6749_v11  ;;  %v1535_v39 = vadd.f32 %v1407_v28, %v7243_v46  ;;  %v2316_v23 = vpack.c.bf16 %v2144_v18, %v2140_v5  ;;  %v2143_v48 = vmul.f32 %v2015_v44, %v7014_v42 }
 0x214   :  { %v7284_v20 = vpop.eup %5167  ;;  %v1536_v41 = vadd.f32 %v1408_v19, %v7247_v25  ;;  %5175 = vtanh.f32 %v1659_v54  ;;  %v1660_v58 = vmul.f32 0.7978846, %v1532_v0  ;;  %v7293_v61 = vadd.f32 %v6985_v13, %v6766_v34 }
 0x215   :  { %v1155_v1 = vmul.f32 %v7282_v9, %v7282_v9  ;;  %v7295_v45 = vpop.eup %5169  ;;  %v1663_v4 = vmul.f32 0.7978846, %v1535_v39  ;;  %3010 = vmatprep.mubr.bf16.mxu0 %v2316_v23  ;;  %v2315_v14 = vpack.c.bf16 %v2143_v48, %v2139_v3  ;;  %v7299_v18 = vadd.f32 %v6990_v38, %v6749_v11 }
 0x216   :  { %v1664_v62 = vmul.f32 0.7978846, %v1536_v41  ;;  %v7301_v42 = vpop.eup %5171  ;;  %5177 = vtanh.f32 %v1660_v58  ;;  %v1156_v50 = vmul.f32 %v7293_v61, %v7293_v61  ;;  %v7308_v13 = vadd.f32 %v6999_v21, %v6766_v34 }
 0x217   :  { %v1283_v54 = vmul.f32 %v1155_v1, %v7282_v9  ;;  %v7310_v22 = vpop.eup %5173  ;;  %5179 = vtanh.f32 %v1663_v4  ;;  %3011 = vmatmul.mubr.bf16.gmra.mrb[16].mxu0 %v2315_v14  ;;  %v1159_v38 = vmul.f32 %v7299_v18, %v7299_v18  ;;  %v1892_v5 = vadd.f32 1.0, %v7161_v24 }
 0x218   :  { %v1896_v36 = vadd.f32 1.0, %v7203_v56  ;;  %5181 = vtanh.f32 %v1664_v62  ;;  %v1284_v19 = vmul.f32 %v1156_v50, %v7293_v61  ;;  %v1160_v44 = vmul.f32 %v7308_v13, %v7308_v13 }
 0x219   :  { %v1411_v28 = vmul.f32 0.044715, %v1283_v54  ;;  %v1287_v21 = vmul.f32 %v1159_v38, %v7299_v18  ;;  %v2020_v0 = vmul.f32 0.5, %v1892_v5  ;;  %v1891_v39 = vadd.f32 1.0, %v7156_v59  ;;  %v8708_v5 = vld [vmem:[#allocation11_spill] sm:$0xff] }
 0x21a   :  { %v2024_v3 = vmul.f32 0.5, %v1896_v36  ;;  %v1412_v23 = vmul.f32 0.044715, %v1284_v19  ;;  %v1288_v24 = vmul.f32 %v1160_v44, %v7308_v13  ;;  %v1895_v56 = vadd.f32 1.0, %v7183_v17 }
 0x21b   :  { %v1539_v41 = vadd.f32 %v1411_v28, %v7282_v9  ;;  %v1415_v48 = vmul.f32 0.044715, %v1287_v21  ;;  %v2148_v58 = vmul.f32 %v2020_v0, %v7044_v29  ;;  %v2019_v4 = vmul.f32 0.5, %v1891_v39  ;;  %v8709_v28 = vld [vmem:[#allocation6_spill] sm:$0xff] }
 0x21c   :  { %v2152_v1 = vmul.f32 %v2024_v3, %v7074_v35  ;;  %v1540_v14 = vadd.f32 %v1412_v23, %v7293_v61  ;;  %v1416_v54 = vmul.f32 0.044715, %v1288_v24  ;;  %v2023_v50 = vmul.f32 0.5, %v1895_v56  ;;  %v8710_v3 = vld [vmem:[#allocation12_spill] sm:$0xff] }
 0x21d   :  { %v1667_v62 = vmul.f32 0.7978846, %v1539_v41  ;;  %v1543_v59 = vadd.f32 %v1415_v48, %v7299_v18  ;;  %v2147_v36 = vmul.f32 %v2019_v4, %v8708_v5  ;;  %v7331_v19 = vadd.f32 %v8709_v28, %v6749_v11  ;;  %v8711_v41 = vld [vmem:[#allocation13_spill] sm:$0xff] }
 0x21e   :  { %v2320_v38 = vpack.c.bf16 %v2152_v1, %v2148_v58  ;;  %v7333_v17 = vpop.eup %5175  ;;  %v1668_v29 = vmul.f32 0.7978846, %v1540_v14  ;;  %v1544_v35 = vadd.f32 %v1416_v54, %v7308_v13  ;;  %v2151_v44 = vmul.f32 %v2023_v50, %v7062_v49  ;;  %v8712_v49 = vld [vmem:[#allocation14_spill] sm:$0xff] }
 0x21f   :  { %5183 = vtanh.f32 %v1667_v62  ;;  %v1671_v21 = vmul.f32 0.7978846, %v1543_v59  ;;  %v1163_v0 = vmul.f32 %v7331_v19, %v7331_v19  ;;  %v7341_v39 = vadd.f32 %v8710_v3, %v6766_v34 }
 0x220   :  { %3020 = vmatprep.mubr.bf16.mxu0 %v2320_v38  ;;  %v7345_v23 = vadd.f32 %v8711_v41, %v6749_v11  ;;  %v7347_v24 = vpop.eup %5177  ;;  %5185 = vtanh.f32 %v1668_v29  ;;  %v1672_v56 = vmul.f32 0.7978846, %v1544_v35  ;;  %v2319_v48 = vpack.c.bf16 %v2151_v44, %v2147_v36 }
 0x221   :  { %v7351_v58 = vadd.f32 %v8712_v49, %v6766_v34  ;;  %v7353_v1 = vpop.eup %5179  ;;  %5187 = vtanh.f32 %v1671_v21  ;;  %v1291_v4 = vmul.f32 %v1163_v0, %v7331_v19  ;;  %v1164_v62 = vmul.f32 %v7341_v39, %v7341_v39 }
 0x222   :  { %v1167_v14 = vmul.f32 %v7345_v23, %v7345_v23  ;;  %v7360_v54 = vpop.eup %5181  ;;  %5189 = vtanh.f32 %v1672_v56  ;;  %3021 = vmatmul.mubr.bf16.gmra.mrb[20].mxu0 %v2319_v48  ;;  %v1900_v59 = vadd.f32 1.0, %v7239_v53  ;;  %v1904_v38 = vadd.f32 1.0, %v7255_v55 }
 0x223   :  { %v1168_v50 = vmul.f32 %v7351_v58, %v7351_v58  ;;  %v1419_v5 = vmul.f32 0.044715, %v1291_v4  ;;  %v1292_v36 = vmul.f32 %v1164_v62, %v7341_v39  ;;  %v1899_v29 = vadd.f32 1.0, %v7231_v26 }
 0x224   :  { %v1295_v28 = vmul.f32 %v1167_v14, %v7345_v23  ;;  %v2028_v44 = vmul.f32 0.5, %v1900_v59  ;;  %v2032_v21 = vmul.f32 0.5, %v1904_v38  ;;  %v1903_v0 = vadd.f32 1.0, %v7249_v6 }
 0x225   :  { %v1296_v35 = vmul.f32 %v1168_v50, %v7351_v58  ;;  %v1547_v3 = vadd.f32 %v1419_v5, %v7331_v19  ;;  %v1420_v41 = vmul.f32 0.044715, %v1292_v36  ;;  %v2027_v53 = vmul.f32 0.5, %v1899_v29  ;;  %v8713_v36 = vld [vmem:[#allocation7_spill] sm:$0xff]  ;;  %v8714_v29 = vld [vmem:[#allocation5_spill] sm:$0xff] }
 0x226   :  { %v1423_v56 = vmul.f32 0.044715, %v1295_v28  ;;  %v2156_v55 = vmul.f32 %v2028_v44, %v7111_v15  ;;  %v2160_v49 = vmul.f32 %v2032_v21, %v7129_v51  ;;  %v2031_v4 = vmul.f32 0.5, %v1903_v0 }
 0x227   :  { %v1424_v48 = vmul.f32 0.044715, %v1296_v35  ;;  %v1675_v62 = vmul.f32 0.7978846, %v1547_v3  ;;  %v1548_v26 = vadd.f32 %v1420_v41, %v7341_v39  ;;  %v2155_v50 = vmul.f32 %v2027_v53, %v7107_v47 }
 0x228   :  { %v1551_v14 = vadd.f32 %v1423_v56, %v7345_v23  ;;  %v2324_v38 = vpack.c.bf16 %v2160_v49, %v2156_v55  ;;  %v2159_v5 = vmul.f32 %v2031_v4, %v7117_v31  ;;  %v7383_v15 = vadd.f32 %v8713_v36, %v6749_v11 }
 0x229   :  { %v7377_v59 = vpop.eup %5183  ;;  %v1552_v6 = vadd.f32 %v1424_v48, %v7351_v58  ;;  %5191 = vtanh.f32 %v1675_v62  ;;  %v1676_v51 = vmul.f32 0.7978846, %v1548_v26  ;;  %v7387_v35 = vadd.f32 %v8714_v29, %v6766_v34 }
 0x22a   :  { %v1679_v28 = vmul.f32 0.7978846, %v1551_v14  ;;  %v7389_v44 = vpop.eup %5185  ;;  %3030 = vmatprep.mubr.bf16.mxu0 %v2324_v38  ;;  %v2323_v21 = vpack.c.bf16 %v2159_v5, %v2155_v50  ;;  %v1171_v0 = vmul.f32 %v7383_v15, %v7383_v15  ;;  %v7395_v31 = vadd.f32 %v7094_v63, %v6749_v11 }
 0x22b   :  { %v1680_v47 = vmul.f32 0.7978846, %v1552_v6  ;;  %v7397_v3 = vpop.eup %5187  ;;  %5193 = vtanh.f32 %v1676_v51  ;;  %v1172_v41 = vmul.f32 %v7387_v35, %v7387_v35  ;;  %v7403_v56 = vadd.f32 %v7099_v57, %v6766_v34 }
 0x22c   :  { %v1908_v53 = vadd.f32 1.0, %v7295_v45  ;;  %v7406_v48 = vpop.eup %5189  ;;  %5195 = vtanh.f32 %v1679_v28  ;;  %3031 = vmatmul.mubr.bf16.gmra.mrb[24].mxu0 %v2323_v21  ;;  %v1299_v55 = vmul.f32 %v1171_v0, %v7383_v15  ;;  %v1175_v63 = vmul.f32 %v7395_v31, %v7395_v31 }
 0x22d   :  { %v1912_v49 = vadd.f32 1.0, %v7310_v22  ;;  %5197 = vtanh.f32 %v1680_v47  ;;  %v1300_v4 = vmul.f32 %v1172_v41, %v7387_v35  ;;  %v1176_v57 = vmul.f32 %v7403_v56, %v7403_v56 }
 0x22e   :  { %v2036_v62 = vmul.f32 0.5, %v1908_v53  ;;  %v1427_v26 = vmul.f32 0.044715, %v1299_v55  ;;  %v1303_v45 = vmul.f32 %v1175_v63, %v7395_v31  ;;  %v1907_v50 = vadd.f32 1.0, %v7284_v20 }
 0x22f   :  { %v2040_v14 = vmul.f32 0.5, %v1912_v49  ;;  %v1428_v6 = vmul.f32 0.044715, %v1300_v4  ;;  %v1304_v38 = vmul.f32 %v1176_v57, %v7403_v56  ;;  %v1911_v22 = vadd.f32 1.0, %v7301_v42 }
 0x230   :  { %v2164_v5 = vmul.f32 %v2036_v62, %v7179_v12  ;;  %v1555_v36 = vadd.f32 %v1427_v26, %v7383_v15  ;;  %v1431_v51 = vmul.f32 0.044715, %v1303_v45  ;;  %v2035_v29 = vmul.f32 0.5, %v1907_v50  ;;  %v8716_v26 = vld [vmem:[#allocation15_spill] sm:$0xff] }
 0x231   :  { %v2168_v28 = vmul.f32 %v2040_v14, %v7191_v7  ;;  %v1556_v47 = vadd.f32 %v1428_v6, %v7387_v35  ;;  %v1432_v21 = vmul.f32 0.044715, %v1304_v38  ;;  %v2039_v0 = vmul.f32 0.5, %v1911_v22  ;;  %v8717_v22 = vld [vmem:[#allocation16_spill] sm:$0xff] }
 0x232   :  { %v7425_v20 = vadd.f32 %v7119_v8, %v6749_v11  ;;  %v1683_v41 = vmul.f32 0.7978846, %v1555_v36  ;;  %v1559_v53 = vadd.f32 %v1431_v51, %v7395_v31  ;;  %v2163_v42 = vmul.f32 %v2035_v29, %v7167_v37  ;;  %v8715_v8 = vld [vmem:[#allocation8_spill] sm:$0xff] }
 0x233   :  { %v2328_v12 = vpack.c.bf16 %v2168_v28, %v2164_v5  ;;  %v7429_v55 = vpop.eup %5191  ;;  %v1684_v63 = vmul.f32 0.7978846, %v1556_v47  ;;  %v1560_v7 = vadd.f32 %v1432_v21, %v7403_v56  ;;  %v2167_v49 = vmul.f32 %v2039_v0, %v7187_v40 }
 0x234   :  { %v1179_v4 = vmul.f32 %v7425_v20, %v7425_v20  ;;  %5199 = vtanh.f32 %v1683_v41  ;;  %v1687_v57 = vmul.f32 0.7978846, %v1559_v53  ;;  %v7437_v62 = vadd.f32 %v8715_v8, %v6766_v34 }
 0x235   :  { %3040 = vmatprep.mubr.bf16.mxu0 %v2328_v12  ;;  %v7441_v37 = vadd.f32 %v8716_v26, %v6749_v11  ;;  %v7443_v45 = vpop.eup %5193  ;;  %5201 = vtanh.f32 %v1684_v63  ;;  %v1688_v14 = vmul.f32 0.7978846, %v1560_v7  ;;  %v2327_v50 = vpack.c.bf16 %v2167_v49, %v2163_v42 }
 0x236   :  { %v1307_v40 = vmul.f32 %v1179_v4, %v7425_v20  ;;  %v7446_v6 = vpop.eup %5195  ;;  %5203 = vtanh.f32 %v1687_v57  ;;  %v1180_v38 = vmul.f32 %v7437_v62, %v7437_v62  ;;  %v7454_v36 = vadd.f32 %v8717_v22, %v6766_v34 }
 0x237   :  { %v1183_v5 = vmul.f32 %v7441_v37, %v7441_v37  ;;  %v7456_v51 = vpop.eup %5197  ;;  %5205 = vtanh.f32 %v1688_v14  ;;  %3041 = vmatmul.mubr.bf16.gmra.mrb[28].mxu0 %v2327_v50  ;;  %v1916_v29 = vadd.f32 1.0, %v7347_v24  ;;  %v1920_v47 = vadd.f32 1.0, %v7360_v54 }
 0x238   :  { %v1435_v28 = vmul.f32 0.044715, %v1307_v40  ;;  %v1308_v21 = vmul.f32 %v1180_v38, %v7437_v62  ;;  %v1184_v41 = vmul.f32 %v7454_v36, %v7454_v36  ;;  %v1915_v53 = vadd.f32 1.0, %v7333_v17 }
 0x239   :  { %v1311_v0 = vmul.f32 %v1183_v5, %v7441_v37  ;;  %v2044_v42 = vmul.f32 0.5, %v1916_v29  ;;  %v2048_v63 = vmul.f32 0.5, %v1920_v47  ;;  %v1919_v7 = vadd.f32 1.0, %v7353_v1 }
 0x23a   :  { %v1563_v12 = vadd.f32 %v1435_v28, %v7425_v20  ;;  %v1436_v49 = vmul.f32 0.044715, %v1308_v21  ;;  %v1312_v24 = vmul.f32 %v1184_v41, %v7454_v36  ;;  %v2043_v54 = vmul.f32 0.5, %v1915_v53  ;;  %v8719_v41 = vld [vmem:[#allocation10_spill] sm:$0xff] }
 0x23b   :  { %v1439_v4 = vmul.f32 0.044715, %v1311_v0  ;;  %v2172_v8 = vmul.f32 %v2044_v42, %v7237_v2  ;;  %v2176_v26 = vmul.f32 %v2048_v63, %v7247_v25  ;;  %v2047_v14 = vmul.f32 0.5, %v1919_v7 }
 0x23c   :  { %v1691_v57 = vmul.f32 0.7978846, %v1563_v12  ;;  %v1564_v50 = vadd.f32 %v1436_v49, %v7437_v62  ;;  %v1440_v40 = vmul.f32 0.044715, %v1312_v24  ;;  %v2171_v38 = vmul.f32 %v2043_v54, %v7226_v27 }
 0x23d   :  { %v1567_v17 = vadd.f32 %v1439_v4, %v7441_v37  ;;  %v2332_v1 = vpack.c.bf16 %v2176_v26, %v2172_v8  ;;  %v2175_v5 = vmul.f32 %v2047_v14, %v7243_v46  ;;  %v7476_v22 = vadd.f32 %v7169_v30, %v6749_v11  ;;  %v8718_v30 = vld [vmem:[#allocation9_spill] sm:$0xff] }
 0x23e   :  { %5207 = vtanh.f32 %v1691_v57  ;;  %v7478_v28 = vpop.eup %5199  ;;  %v1692_v2 = vmul.f32 0.7978846, %v1564_v50  ;;  %v1568_v29 = vadd.f32 %v1440_v40, %v7454_v36  ;;  %v7483_v47 = vadd.f32 %v7172_v60, %v6766_v34 }
 0x23f   :  { %v1695_v25 = vmul.f32 0.7978846, %v1567_v17  ;;  %v7485_v21 = vpop.eup %5201  ;;  %3050 = vmatprep.mubr.bf16.mxu0 %v2332_v1  ;;  %v2331_v27 = vpack.c.bf16 %v2175_v5, %v2171_v38  ;;  %v1187_v46 = vmul.f32 %v7476_v22, %v7476_v22  ;;  %v7491_v0 = vadd.f32 %v8718_v30, %v6749_v11 }
 0x240   :  { %v7495_v53 = vadd.f32 %v8719_v41, %v6766_v34  ;;  %v7497_v12 = vpop.eup %5203  ;;  %5209 = vtanh.f32 %v1692_v2  ;;  %v1696_v60 = vmul.f32 0.7978846, %v1568_v29  ;;  %v1188_v42 = vmul.f32 %v7483_v47, %v7483_v47 }
 0x241   :  { %v1924_v63 = vadd.f32 1.0, %v7389_v44  ;;  %v7502_v7 = vpop.eup %5205  ;;  %5211 = vtanh.f32 %v1695_v25  ;;  %3051 = vmatmul.mubr.bf16.gmra.mrb[32].mxu0 %v2331_v27  ;;  %v1315_v49 = vmul.f32 %v1187_v46, %v7476_v22  ;;  %v1191_v4 = vmul.f32 %v7491_v0, %v7491_v0 }
 0x242   :  { %v1192_v24 = vmul.f32 %v7495_v53, %v7495_v53  ;;  %5213 = vtanh.f32 %v1696_v60  ;;  %v1316_v54 = vmul.f32 %v1188_v42, %v7483_v47  ;;  %v1928_v57 = vadd.f32 1.0, %v7406_v48 }
 0x243   :  { %v2052_v8 = vmul.f32 0.5, %v1924_v63  ;;  %v1443_v26 = vmul.f32 0.044715, %v1315_v49  ;;  %v1319_v44 = vmul.f32 %v1191_v4, %v7491_v0  ;;  %v1923_v50 = vadd.f32 1.0, %v7377_v59 }
 0x244   :  { %v1320_v14 = vmul.f32 %v1192_v24, %v7495_v53  ;;  %v1444_v17 = vmul.f32 0.044715, %v1316_v54  ;;  %v2056_v40 = vmul.f32 0.5, %v1928_v57  ;;  %v1927_v1 = vadd.f32 1.0, %v7397_v3 }
 0x245   :  { %v2180_v38 = vmul.f32 %v2052_v8, %v7293_v61  ;;  %v1571_v5 = vadd.f32 %v1443_v26, %v7476_v22  ;;  %v1447_v2 = vmul.f32 0.044715, %v1319_v44  ;;  %v2051_v29 = vmul.f32 0.5, %v1923_v50 }
 0x246   :  { %v1448_v25 = vmul.f32 0.044715, %v1320_v14  ;;  %v1572_v48 = vadd.f32 %v1444_v17, %v7483_v47  ;;  %v2184_v27 = vmul.f32 %v2056_v40, %v7308_v13  ;;  %v2055_v46 = vmul.f32 0.5, %v1927_v1 }
 0x247   :  { %v7521_v30 = vadd.f32 %v7212_v33, %v6749_v11  ;;  %v1699_v41 = vmul.f32 0.7978846, %v1571_v5  ;;  %v1575_v61 = vadd.f32 %v1447_v2, %v7491_v0  ;;  %v2179_v60 = vmul.f32 %v2051_v29, %v7282_v9 }
 0x248   :  { %v7523_v59 = vpop.eup %5207  ;;  %v1576_v3 = vadd.f32 %v1448_v25, %v7495_v53  ;;  %v1700_v42 = vmul.f32 0.7978846, %v1572_v48  ;;  %v2336_v63 = vpack.c.bf16 %v2184_v27, %v2180_v38  ;;  %v2183_v49 = vmul.f32 %v2055_v46, %v7299_v18 }
 0x249   :  { %v1195_v13 = vmul.f32 %v7521_v30, %v7521_v30  ;;  %5215 = vtanh.f32 %v1699_v41  ;;  %v1703_v4 = vmul.f32 0.7978846, %v1575_v61  ;;  %v7533_v24 = vadd.f32 %v7215_v52, %v6766_v34 }
 0x24a   :  { %v1704_v33 = vmul.f32 0.7978846, %v1576_v3  ;;  %v7535_v54 = vpop.eup %5209  ;;  %5217 = vtanh.f32 %v1700_v42  ;;  %3060 = vmatprep.mubr.bf16.mxu0 %v2336_v63  ;;  %v2335_v57 = vpack.c.bf16 %v2183_v49, %v2179_v60  ;;  %v7540_v18 = vadd.f32 %v7219_v10, %v6749_v11  ;;  %v8720_v63 = vld [vmem:[#allocation17_spill] sm:$0xff] }
 0x24b   :  { %v1323_v9 = vmul.f32 %v1195_v13, %v7521_v30  ;;  %v7542_v8 = vpop.eup %5211  ;;  %5219 = vtanh.f32 %v1703_v4  ;;  %v1196_v26 = vmul.f32 %v7533_v24, %v7533_v24  ;;  %v7548_v52 = vadd.f32 %v7228_v16, %v6766_v34 }
 0x24c   :  { %v1932_v44 = vadd.f32 1.0, %v7443_v45  ;;  %v7551_v14 = vpop.eup %5213  ;;  %5221 = vtanh.f32 %v1704_v33  ;;  %3061 = vmatmul.mubr.bf16.gmra.mrb[36].mxu0 %v2335_v57  ;;  %v1199_v10 = vmul.f32 %v7540_v18, %v7540_v18  ;;  %v1936_v17 = vadd.f32 1.0, %v7456_v51 }
 0x24d   :  { %v1451_v50 = vmul.f32 0.044715, %v1323_v9  ;;  %v1324_v40 = vmul.f32 %v1196_v26, %v7533_v24  ;;  %v1200_v38 = vmul.f32 %v7548_v52, %v7548_v52  ;;  %v1931_v16 = vadd.f32 1.0, %v7429_v55 }
 0x24e   :  { %v2060_v1 = vmul.f32 0.5, %v1932_v44  ;;  %v1327_v5 = vmul.f32 %v1199_v10, %v7540_v18  ;;  %v2064_v2 = vmul.f32 0.5, %v1936_v17  ;;  %v1935_v25 = vadd.f32 1.0, %v7446_v6 }
 0x24f   :  { %v1579_v45 = vadd.f32 %v1451_v50, %v7521_v30  ;;  %v1452_v29 = vmul.f32 0.044715, %v1324_v40  ;;  %v1328_v48 = vmul.f32 %v1200_v38, %v7548_v52  ;;  %v2059_v27 = vmul.f32 0.5, %v1931_v16 }
 0x250   :  { %v2188_v51 = vmul.f32 %v2060_v1, %v7341_v39  ;;  %v1455_v41 = vmul.f32 0.044715, %v1327_v5  ;;  %v2192_v61 = vmul.f32 %v2064_v2, %v7351_v58  ;;  %v2063_v3 = vmul.f32 0.5, %v1935_v25 }
 0x251   :  { %v1707_v46 = vmul.f32 0.7978846, %v1579_v45  ;;  %v1580_v55 = vadd.f32 %v1452_v29, %v7533_v24  ;;  %v1456_v60 = vmul.f32 0.044715, %v1328_v48  ;;  %v2187_v42 = vmul.f32 %v2059_v27, %v7331_v19  ;;  %v8721_v19 = vld [vmem:[#allocation18_spill] sm:$0xff] }
 0x252   :  { %v7570_v49 = vadd.f32 %v8720_v63, %v6749_v11  ;;  %v1583_v6 = vadd.f32 %v1455_v41, %v7540_v18  ;;  %v2340_v13 = vpack.c.bf16 %v2192_v61, %v2188_v51  ;;  %v2191_v39 = vmul.f32 %v2063_v3, %v7345_v23 }
 0x253   :  { %5223 = vtanh.f32 %v1707_v46  ;;  %v7574_v4 = vpop.eup %5215  ;;  %v1708_v33 = vmul.f32 0.7978846, %v1580_v55  ;;  %v1584_v58 = vadd.f32 %v1456_v60, %v7548_v52  ;;  %v7581_v9 = vadd.f32 %v8721_v19, %v6766_v34 }
 0x254   :  { %v1203_v57 = vmul.f32 %v7570_v49, %v7570_v49  ;;  %v5218_v26 = vpop.eup %5217  ;;  %v1711_v44 = vmul.f32 0.7978846, %v1583_v6  ;;  %3070 = vmatprep.mubr.bf16.mxu0 %v2340_v13  ;;  %v2339_v50 = vpack.c.bf16 %v2191_v39, %v2187_v42  ;;  %v7585_v10 = vadd.f32 %v7271_v32, %v6749_v11 }
 0x255   :  { %v7589_v23 = vadd.f32 %v7275_v43, %v6766_v34  ;;  %v7591_v17 = vpop.eup %5219  ;;  %5225 = vtanh.f32 %v1708_v33  ;;  %v1712_v40 = vmul.f32 0.7978846, %v1584_v58  ;;  %v1204_v1 = vmul.f32 %v7581_v9, %v7581_v9 }
 0x256   :  { %v1331_v38 = vmul.f32 %v1203_v57, %v7570_v49  ;;  %v5222_v16 = vpop.eup %5221  ;;  %5227 = vtanh.f32 %v1711_v44  ;;  %3071 = vmatmul.mubr.bf16.gmra.mrb[40].mxu0 %v2339_v50  ;;  %v1207_v11 = vmul.f32 %v7585_v10, %v7585_v10  ;;  %v1940_v34 = vadd.f32 1.0, %v7485_v21 }
 0x257   :  { %v1208_v32 = vmul.f32 %v7589_v23, %v7589_v23  ;;  %5229 = vtanh.f32 %v1712_v40  ;;  %v1332_v45 = vmul.f32 %v1204_v1, %v7581_v9  ;;  %v1944_v5 = vadd.f32 1.0, %v7502_v7 }
 0x258   :  { %v1459_v43 = vmul.f32 0.044715, %v1331_v38  ;;  %v1335_v2 = vmul.f32 %v1207_v11, %v7585_v10  ;;  %v2068_v29 = vmul.f32 0.5, %v1940_v34  ;;  %v1939_v48 = vadd.f32 1.0, %v7478_v28 }
 0x259   :  { %v1336_v25 = vmul.f32 %v1208_v32, %v7589_v23  ;;  %v1460_v27 = vmul.f32 0.044715, %v1332_v45  ;;  %v2072_v46 = vmul.f32 0.5, %v1944_v5  ;;  %v1943_v41 = vadd.f32 1.0, %v7497_v12 }
 0x25a   :  { %v1587_v51 = vadd.f32 %v1459_v43, %v7570_v49  ;;  %v1463_v21 = vmul.f32 0.044715, %v1335_v2  ;;  %v2196_v3 = vmul.f32 %v2068_v29, %v7387_v35  ;;  %v2067_v55 = vmul.f32 0.5, %v1939_v48 }
 0x25b   :  { %v1464_v61 = vmul.f32 0.044715, %v1336_v25  ;;  %v1588_v7 = vadd.f32 %v1460_v27, %v7581_v9  ;;  %v2200_v42 = vmul.f32 %v2072_v46, %v7403_v56  ;;  %v2071_v63 = vmul.f32 0.5, %v1943_v41 }
 0x25c   :  { %v1715_v60 = vmul.f32 0.7978846, %v1587_v51  ;;  %v1591_v28 = vadd.f32 %v1463_v21, %v7585_v10  ;;  %v2195_v39 = vmul.f32 %v2067_v55, %v7383_v15  ;;  %v1948_v12 = vadd.f32 1.0, %v7535_v54 }
 0x25d   :  { %v5224_v6 = vpop.eup %5223  ;;  %v1592_v13 = vadd.f32 %v1464_v61, %v7589_v23  ;;  %v1716_v33 = vmul.f32 0.7978846, %v1588_v7  ;;  %v2344_v58 = vpack.c.bf16 %v2200_v42, %v2196_v3  ;;  %v2199_v35 = vmul.f32 %v2071_v63, %v7395_v31 }
 0x25e   :  { %5231 = vtanh.f32 %v1715_v60  ;;  %v1719_v57 = vmul.f32 0.7978846, %v1591_v28  ;;  %v1952_v44 = vadd.f32 1.0, %v7551_v14  ;;  %v2076_v56 = vmul.f32 0.5, %v1948_v12 }
 0x25f   :  { %v1720_v19 = vmul.f32 0.7978846, %v1592_v13  ;;  %v5226_v50 = vpop.eup %5225  ;;  %5233 = vtanh.f32 %v1716_v33  ;;  %3080 = vmatprep.mubr.bf16.mxu0 %v2344_v58  ;;  %v2343_v40 = vpack.c.bf16 %v2199_v35, %v2195_v39  ;;  %v1947_v38 = vadd.f32 1.0, %v7523_v59 }
 0x260   :  { %v1951_v15 = vadd.f32 1.0, %v7542_v8  ;;  %v5228_v1 = vpop.eup %5227  ;;  %5235 = vtanh.f32 %v1719_v57  ;;  %v2080_v54 = vmul.f32 0.5, %v1952_v44  ;;  %v2204_v11 = vmul.f32 %v2076_v56, %v7437_v62 }
 0x261   :  { %v1956_v32 = vadd.f32 1.0, %v5218_v26  ;;  %v5230_v31 = vpop.eup %5229  ;;  %5237 = vtanh.f32 %v1720_v19  ;;  %3081 = vmatmul.mubr.bf16.gmra.mrb[44].mxu0 %v2343_v40  ;;  %v2075_v34 = vmul.f32 0.5, %v1947_v38  ;;  %v1960_v43 = vadd.f32 1.0, %v5222_v16  ;;  %v3326_v40 = vld [vmem:[%s8628_s4] sm:$0x3] }
 0x262   :  { %v2079_v14 = vmul.f32 0.5, %v1951_v15  ;;  %v2208_v45 = vmul.f32 %v2080_v54, %v7454_v36  ;;  %v1955_v2 = vadd.f32 1.0, %v7574_v4  ;;  %v1959_v59 = vadd.f32 1.0, %v7591_v17  ;;  %v3403_v15 = vld [vmem:[%s8629_s5 + $0x8] sm:$0xff] }
 0x263   :  { %v2084_v5 = vmul.f32 0.5, %v1956_v32  ;;  %v2203_v8 = vmul.f32 %v2075_v34, %v7425_v20  ;;  %v2088_v29 = vmul.f32 0.5, %v1960_v43  ;;  %v1964_v62 = vadd.f32 1.0, %v5226_v50 }
 0x264   :  { %v2207_v25 = vmul.f32 %v2079_v14, %v7441_v37  ;;  %v2348_v26 = vpack.c.bf16 %v2208_v45, %v2204_v11  ;;  %v2083_v51 = vmul.f32 0.5, %v1955_v2  ;;  %v2087_v27 = vmul.f32 0.5, %v1959_v59 }
 0x265   :  { %v2212_v48 = vmul.f32 %v2084_v5, %v7483_v47  ;;  %v2216_v16 = vmul.f32 %v2088_v29, %v7495_v53  ;;  %v1968_v36 = vadd.f32 1.0, %v5230_v31  ;;  %v2092_v41 = vmul.f32 0.5, %v1964_v62 }
 0x266   :  { %v2347_v46 = vpack.c.bf16 %v2207_v25, %v2203_v8  ;;  %3090 = vmatprep.mubr.bf16.mxu0 %v2348_v26  ;;  %v2211_v4 = vmul.f32 %v2083_v51, %v7476_v22  ;;  %v2215_v17 = vmul.f32 %v2087_v27, %v7491_v0  ;;  %v1963_v20 = vadd.f32 1.0, %v5224_v6  ;;  %v3405_v51 = vld [vmem:[%s8629_s5 + $0x18] sm:$0xff] }
 0x267   :  { %v1967_v21 = vadd.f32 1.0, %v5228_v1  ;;  %v2352_v61 = vpack.c.bf16 %v2216_v16, %v2212_v48  ;;  %v2096_v3 = vmul.f32 0.5, %v1968_v36  ;;  %v2220_v53 = vmul.f32 %v2092_v41, %v7533_v24  ;;  %v3404_v48 = vld [vmem:[%s8629_s5 + $0x10] sm:$0xff] }
 0x268   :  { %v5232_v37 = vpop.eup %5231  ;;  %v2351_v55 = vpack.c.bf16 %v2215_v17, %v2211_v4  ;;  %v2091_v60 = vmul.f32 0.5, %v1963_v20  ;;  %v3436_v43 = vunpack.c.l.bf16 %v3403_v15  ;;  %v3437_v45 = vunpack.c.h.bf16 %v3403_v15  ;;  %v3409_v15 = vld [vmem:[%s8629_s5 + $0x38] sm:$0xff] }
 0x269   :  { %v2095_v47 = vmul.f32 0.5, %v1967_v21  ;;  %v1971_v7 = vadd.f32 1.0, %v5232_v37  ;;  %v5234_v42 = vpop.eup %5233  ;;  %3091 = vmatmul.mubr.bf16.gmra.mrb[48].mxu0 %v2347_v46  ;;  %v2224_v63 = vmul.f32 %v2096_v3, %v7548_v52  ;;  %v3438_v46 = vunpack.c.l.bf16 %v3404_v48 }
 0x26a   :  { %v5236_v28 = vpop.eup %5235  ;;  %3100 = vmatprep.mubr.bf16.mxu0 %v2352_v61  ;;  %v2219_v22 = vmul.f32 %v2091_v60, %v7521_v30  ;;  %v1972_v6 = vadd.f32 1.0, %v5234_v42  ;;  %v3439_v36 = vunpack.c.h.bf16 %v3404_v48  ;;  %v3440_v21 = vunpack.c.l.bf16 %v3405_v51 }
 0x26b   :  { %v2223_v0 = vmul.f32 %v2095_v47, %v7540_v18  ;;  %v5238_v13 = vpop.eup %5237  ;;  %v2356_v39 = vpack.c.bf16 %v2224_v63, %v2220_v53  ;;  %v1975_v12 = vadd.f32 1.0, %v5236_v28  ;;  %v2099_v33 = vmul.f32 0.5, %v1971_v7  ;;  %v3406_v63 = vld [vmem:[%s8629_s5 + $0x20] sm:$0xff]  ;;  %v3407_v28 = vld [vmem:[%s8629_s5 + $0x28] sm:$0xff] }
 0x26c   :  { %v1976_v35 = vadd.f32 1.0, %v5238_v13  ;;  %v2100_v57 = vmul.f32 0.5, %v1972_v6  ;;  %v3441_v37 = vunpack.c.h.bf16 %v3405_v51  ;;  %v3443_v6 = vunpack.c.h.bf16 %v3406_v63 }
 0x26d   :  { %v2355_v58 = vpack.c.bf16 %v2223_v0, %v2219_v22  ;;  %v2103_v19 = vmul.f32 0.5, %v1975_v12  ;;  %v2227_v24 = vmul.f32 %v2099_v33, %v7570_v49  ;;  %v3402_v49 = vld [vmem:[%s8629_s5] sm:$0xff]  ;;  %v3442_v22 = vunpack.c.l.bf16 %v3406_v63 }
 0x26e   :  { %v2104_v44 = vmul.f32 0.5, %v1976_v35  ;;  %v2228_v56 = vmul.f32 %v2100_v57, %v7581_v9  ;;  %v8723_v9 = vld [vmem:[#allocation4_spill] sm:$0xff]  ;;  %v3434_v1 = vunpack.c.l.bf16 %v3402_v49  ;;  %v3435_v11 = vunpack.c.h.bf16 %v3402_v49 }
 0x26f   :  { %v2231_v52 = vmul.f32 %v2103_v19, %v7585_v10  ;;  %v8722_v10 = vld [vmem:[#allocation3_spill] sm:$0xff]  ;;  %v3444_v33 = vunpack.c.l.bf16 %v3407_v28  ;;  %v3445_v57 = vunpack.c.h.bf16 %v3407_v28 }
 0x270   :  { %v2232_v30 = vmul.f32 %v2104_v44, %v7589_v23  ;;  %v7644_v38 = vrot.slane %v3326_v40, %v8722_v10  ;;  %v7647_v23 = vrot.slane %v3326_v40, %v8723_v9  ;;  %v3408_v40 = vld [vmem:[%s8629_s5 + $0x30] sm:$0xff] }
 0x271   :  { %3101 = vmatmul.mubr.bf16.gmra.mrb[52].mxu0 %v2351_v55  ;;  %v2359_v18 = vpack.c.bf16 %v2231_v52, %v2227_v24 }
 0x272   :  { %3110 = vmatprep.mubr.bf16.mxu0 %v2356_v39  ;;  %v2360_v50 = vpack.c.bf16 %v2232_v30, %v2228_v56 }
 0x279   :  { %3111 = vmatmul.mubr.bf16.gmra.mrb[56].mxu0 %v2355_v58 }
 0x27a   :  { %3120 = vmatprep.mubr.bf16.mxu0 %v2360_v50 }
 0x281   :  { %3121 = vmatmul.mubr.bf16.gmra.mrb[60].mxu0 %v2359_v18 }
 0x2c3   :  { %v2972_v54 = vpop.f32.mrb[0].mxu0 }
 0x2c4   :  { %v3338_v32 = vadd.f32 %v7644_v38, %v2972_v54  ;;  %v2974_v31 = vpop.f32.mrb[1].mxu0 }
 0x2c5   :  { %v3339_v34 = vadd.f32 %v7647_v23, %v2974_v31  ;;  %v2976_v14 = vpop.f32.mrb[2].mxu0 }
 0x2c6   :  { %v3340_v5 = vadd.f32 %v7644_v38, %v2976_v14  ;;  %v2978_v2 = vpop.f32.mrb[3].mxu0  ;;  %v7655_v59 = vadd.f32 %v3434_v1, %v3338_v32  ;;  %v3446_v1 = vunpack.c.l.bf16 %v3408_v40 }
 0x2c7   :  { %v3341_v8 = vadd.f32 %v7647_v23, %v2978_v2  ;;  %v7658_v25 = vadd.f32 %v3435_v11, %v3339_v34  ;;  %v3447_v11 = vunpack.c.h.bf16 %v3408_v40  ;;  %v3448_v34 = vunpack.c.l.bf16 %v3409_v15 }
 0x2c8   :  { %v7660_v29 = vadd.f32 %v3436_v43, %v3340_v5 }
 0x2c9   :  { %v7662_v62 = vadd.f32 %v3437_v45, %v3341_v8  ;;  %v3562_v26 = vadd.f32 %v7658_v25, %v7655_v59  ;;  %v3449_v45 = vunpack.c.h.bf16 %v3409_v15 }
 0x2cb   :  { %3563 = vadd.xlane.f32.xlu0 %v3562_v26  ;;  %v3565_v27 = vadd.f32 %v7662_v62, %v7660_v29 }
 0x2cc   :  { %v2982_v16 = vpop.f32.mrb[4].mxu0 }
 0x2cd   :  { %v3342_v41 = vadd.f32 %v7644_v38, %v2982_v16  ;;  %v2984_v4 = vpop.f32.mrb[5].mxu0  ;;  %v3410_v16 = vld [vmem:[%s8629_s5 + $0x40] sm:$0xff] }
 0x2ce   :  { %v3343_v17 = vadd.f32 %v7647_v23, %v2984_v4  ;;  %v2986_v20 = vpop.f32.mrb[6].mxu0  ;;  %v3450_v4 = vunpack.c.l.bf16 %v3410_v16 }
 0x2cf   :  { %3566 = vadd.xlane.f32.xlu0 %v3565_v27  ;;  %v3344_v61 = vadd.f32 %v7644_v38, %v2986_v20  ;;  %v2988_v3 = vpop.f32.mrb[7].mxu0  ;;  %v7677_v55 = vadd.f32 %v3438_v46, %v3342_v41  ;;  %v3411_v41 = vld [vmem:[%s8629_s5 + $0x48] sm:$0xff]  ;;  %v3451_v20 = vunpack.c.h.bf16 %v3410_v16 }
 0x2d0   :  { %v3345_v60 = vadd.f32 %v7647_v23, %v2988_v3  ;;  %v7680_v47 = vadd.f32 %v3439_v36, %v3343_v17 }
 0x2d1   :  { %v7682_v7 = vadd.f32 %v3440_v21, %v3344_v61  ;;  %v3452_v61 = vunpack.c.l.bf16 %v3411_v41 }
 0x2d2   :  { %v7684_v42 = vadd.f32 %v3441_v37, %v3345_v60  ;;  %v3568_v53 = vadd.f32 %v7680_v47, %v7677_v55 }
 0x2d4   :  { %3569 = vadd.xlane.f32.xlu1 %v3568_v53  ;;  %v3571_v13 = vadd.f32 %v7684_v42, %v7682_v7  ;;  %v3453_v53 = vunpack.c.h.bf16 %v3411_v41 }
 0x2d6   :  { %v2992_v0 = vpop.f32.mrb[8].mxu0 }
 0x2d7   :  { %v3346_v39 = vadd.f32 %v7644_v38, %v2992_v0  ;;  %v2994_v12 = vpop.f32.mrb[9].mxu0 }
 0x2d8   :  { %v3347_v58 = vadd.f32 %v7647_v23, %v2994_v12  ;;  %v2996_v35 = vpop.f32.mrb[10].mxu0  ;;  %3572 = vadd.xlane.f32.xlu1 %v3571_v13 }
 0x2d9   :  { %v7698_v19 = vadd.f32 %v3442_v22, %v3346_v39  ;;  %v3348_v44 = vadd.f32 %v7644_v38, %v2996_v35  ;;  %v2998_v24 = vpop.f32.mrb[11].mxu0  ;;  %v3413_v35 = vld [vmem:[%s8629_s5 + $0x58] sm:$0xff] }
 0x2da   :  { %v7701_v52 = vadd.f32 %v3443_v6, %v3347_v58  ;;  %v3349_v56 = vadd.f32 %v7647_v23, %v2998_v24  ;;  %v3456_v40 = vunpack.c.l.bf16 %v3413_v35 }
 0x2db   :  { %v7704_v30 = vadd.f32 %v3444_v33, %v3348_v44  ;;  %v3412_v33 = vld [vmem:[%s8629_s5 + $0x50] sm:$0xff] }
 0x2dc   :  { %v7706_v18 = vadd.f32 %v3445_v57, %v3349_v56  ;;  %v3574_v50 = vadd.f32 %v7701_v52, %v7698_v19  ;;  %v3454_v57 = vunpack.c.l.bf16 %v3412_v33  ;;  %v3455_v24 = vunpack.c.h.bf16 %v3412_v33  ;;  %v3416_v33 = vld [vmem:[%s8629_s5 + $0x70] sm:$0xff] }
 0x2de   :  { %3575 = vadd.xlane.f32.xlu0 %v3574_v50  ;;  %v3577_v49 = vadd.f32 %v7706_v18, %v7704_v30 }
 0x2e0   :  { %v3002_v54 = vpop.f32.mrb[12].mxu0  ;;  %3578 = vadd.xlane.f32.xlu1 %v3577_v49 }
 0x2e1   :  { %v3350_v32 = vadd.f32 %v7644_v38, %v3002_v54  ;;  %v3004_v31 = vpop.f32.mrb[13].mxu0 }
 0x2e2   :  { %v3351_v14 = vadd.f32 %v7647_v23, %v3004_v31  ;;  %v3006_v43 = vpop.f32.mrb[14].mxu0 }
 0x2e3   :  { %v7720_v5 = vadd.f32 %v3446_v1, %v3350_v32  ;;  %v3352_v2 = vadd.f32 %v7644_v38, %v3006_v43  ;;  %v3008_v8 = vpop.f32.mrb[15].mxu0  ;;  %v3457_v1 = vunpack.c.h.bf16 %v3413_v35  ;;  %v3417_v35 = vld [vmem:[%s8629_s5 + $0x78] sm:$0xff] }
 0x2e4   :  { %v7723_v26 = vadd.f32 %v3447_v11, %v3351_v14  ;;  %v3353_v48 = vadd.f32 %v7647_v23, %v3008_v8 }
 0x2e5   :  { %v7726_v51 = vadd.f32 %v3448_v34, %v3352_v2  ;;  %v3414_v2 = vld [vmem:[%s8629_s5 + $0x60] sm:$0xff] }
 0x2e6   :  { %v7728_v27 = vadd.f32 %v3449_v45, %v3353_v48  ;;  %v3580_v46 = vadd.f32 %v7723_v26, %v7720_v5  ;;  %v3415_v48 = vld [vmem:[%s8629_s5 + $0x68] sm:$0xff] }
 0x2e8   :  { %3581 = vadd.xlane.f32.xlu0 %v3580_v46  ;;  %v3583_v36 = vadd.f32 %v7728_v27, %v7726_v51  ;;  %v3458_v46 = vunpack.c.l.bf16 %v3414_v2 }
 0x2ea   :  { %v3012_v17 = vpop.f32.mrb[16].mxu0  ;;  %3584 = vadd.xlane.f32.xlu1 %v3583_v36  ;;  %v3459_v36 = vunpack.c.h.bf16 %v3414_v2 }
 0x2eb   :  { %v3354_v21 = vadd.f32 %v7644_v38, %v3012_v17  ;;  %v3014_v37 = vpop.f32.mrb[17].mxu0  ;;  %v3460_v17 = vunpack.c.l.bf16 %v3415_v48 }
 0x2ec   :  { %v3355_v3 = vadd.f32 %v7647_v23, %v3014_v37  ;;  %v3016_v60 = vpop.f32.mrb[18].mxu0  ;;  %v3461_v37 = vunpack.c.h.bf16 %v3415_v48 }
 0x2ed   :  { %v7742_v63 = vadd.f32 %v3450_v4, %v3354_v21  ;;  %v3356_v28 = vadd.f32 %v7644_v38, %v3016_v60  ;;  %v3018_v22 = vpop.f32.mrb[19].mxu0 }
 0x2ee   :  { %v7745_v0 = vadd.f32 %v3451_v20, %v3355_v3  ;;  %v3357_v6 = vadd.f32 %v7647_v23, %v3018_v22 }
 0x2ef   :  { %v7748_v13 = vadd.f32 %v3452_v61, %v3356_v28 }
 0x2f0   :  { %v7750_v39 = vadd.f32 %v3453_v53, %v3357_v6  ;;  %v3586_v12 = vadd.f32 %v7745_v0, %v7742_v63 }
 0x2f2   :  { %3587 = vadd.xlane.f32.xlu0 %v3586_v12  ;;  %v3589_v58 = vadd.f32 %v7750_v39, %v7748_v13 }
 0x2f4   :  { %3590 = vadd.xlane.f32.xlu1 %v3589_v58 }
 0x2f5   :  { %v3022_v44 = vpop.f32.mrb[20].mxu0 }
 0x2f6   :  { %v3358_v56 = vadd.f32 %v7644_v38, %v3022_v44  ;;  %v3024_v50 = vpop.f32.mrb[21].mxu0 }
 0x2f7   :  { %v3359_v49 = vadd.f32 %v7647_v23, %v3024_v50  ;;  %v3026_v15 = vpop.f32.mrb[22].mxu0 }
 0x2f8   :  { %v7764_v54 = vadd.f32 %v3454_v57, %v3358_v56  ;;  %v3360_v11 = vadd.f32 %v7644_v38, %v3026_v15  ;;  %v3028_v32 = vpop.f32.mrb[23].mxu0  ;;  %v3462_v57 = vunpack.c.l.bf16 %v3416_v33 }
 0x2f9   :  { %v7767_v31 = vadd.f32 %v3455_v24, %v3359_v49  ;;  %v3361_v34 = vadd.f32 %v7647_v23, %v3028_v32  ;;  %v3463_v24 = vunpack.c.h.bf16 %v3416_v33 }
 0x2fa   :  { %v7770_v14 = vadd.f32 %v3456_v40, %v3360_v11  ;;  %v3464_v40 = vunpack.c.l.bf16 %v3417_v35 }
 0x2fb   :  { %v7772_v43 = vadd.f32 %v3457_v1, %v3361_v34  ;;  %v3592_v45 = vadd.f32 %v7767_v31, %v7764_v54  ;;  %v3465_v1 = vunpack.c.h.bf16 %v3417_v35 }
 0x2fd   :  { %3593 = vadd.xlane.f32.xlu0 %v3592_v45  ;;  %v3595_v8 = vadd.f32 %v7772_v43, %v7770_v14 }
 0x2ff   :  { %v3032_v16 = vpop.f32.mrb[24].mxu0  ;;  %3596 = vadd.xlane.f32.xlu1 %v3595_v8 }
 0x300   :  { %v3362_v41 = vadd.f32 %v7644_v38, %v3032_v16  ;;  %v3034_v4 = vpop.f32.mrb[25].mxu0  ;;  %v3418_v16 = vld [vmem:[%s8629_s5 + $0x80] sm:$0xff] }
 0x301   :  { %v3363_v20 = vadd.f32 %v7647_v23, %v3034_v4  ;;  %v3036_v21 = vpop.f32.mrb[26].mxu0  ;;  %v3466_v4 = vunpack.c.l.bf16 %v3418_v16 }
 0x302   :  { %v7786_v61 = vadd.f32 %v3458_v46, %v3362_v41  ;;  %v3364_v3 = vadd.f32 %v7644_v38, %v3036_v21  ;;  %v3038_v60 = vpop.f32.mrb[27].mxu0  ;;  %v3419_v41 = vld [vmem:[%s8629_s5 + $0x88] sm:$0xff] }
 0x303   :  { %v7789_v53 = vadd.f32 %v3459_v36, %v3363_v20  ;;  %v3365_v28 = vadd.f32 %v7647_v23, %v3038_v60  ;;  %v3467_v20 = vunpack.c.h.bf16 %v3418_v16 }
 0x304   :  { %v7792_v22 = vadd.f32 %v3460_v17, %v3364_v3  ;;  %v3468_v3 = vunpack.c.l.bf16 %v3419_v41 }
 0x305   :  { %v7794_v6 = vadd.f32 %v3461_v37, %v3365_v28  ;;  %v3598_v12 = vadd.f32 %v7789_v53, %v7786_v61 }
 0x307   :  { %3599 = vadd.xlane.f32.xlu0 %v3598_v12  ;;  %v3601_v58 = vadd.f32 %v7794_v6, %v7792_v22  ;;  %v3469_v12 = vunpack.c.h.bf16 %v3419_v41 }
 0x309   :  { %3602 = vadd.xlane.f32.xlu1 %v3601_v58 }
 0x30a   :  { %v3042_v44 = vpop.f32.mrb[28].mxu0 }
 0x30b   :  { %v3366_v56 = vadd.f32 %v7644_v38, %v3042_v44  ;;  %v3044_v50 = vpop.f32.mrb[29].mxu0 }
 0x30c   :  { %v3367_v49 = vadd.f32 %v7647_v23, %v3044_v50  ;;  %v3046_v15 = vpop.f32.mrb[30].mxu0 }
 0x30d   :  { %v7808_v11 = vadd.f32 %v3462_v57, %v3366_v56  ;;  %v3368_v32 = vadd.f32 %v7644_v38, %v3046_v15  ;;  %v3048_v34 = vpop.f32.mrb[31].mxu0  ;;  %v3421_v15 = vld [vmem:[%s8629_s5 + $0x98] sm:$0xff] }
 0x30e   :  { %v7811_v45 = vadd.f32 %v3463_v24, %v3367_v49  ;;  %v3369_v2 = vadd.f32 %v7647_v23, %v3048_v34  ;;  %v3472_v16 = vunpack.c.l.bf16 %v3421_v15 }
 0x30f   :  { %v7814_v8 = vadd.f32 %v3464_v40, %v3368_v32  ;;  %v3420_v40 = vld [vmem:[%s8629_s5 + $0x90] sm:$0xff] }
 0x310   :  { %v7816_v48 = vadd.f32 %v3465_v1, %v3369_v2  ;;  %v3604_v46 = vadd.f32 %v7811_v45, %v7808_v11  ;;  %v3470_v1 = vunpack.c.l.bf16 %v3420_v40  ;;  %v3471_v34 = vunpack.c.h.bf16 %v3420_v40 }
 0x312   :  { %3605 = vadd.xlane.f32.xlu0 %v3604_v46  ;;  %v3607_v36 = vadd.f32 %v7816_v48, %v7814_v8 }
 0x314   :  { %v3052_v17 = vpop.f32.mrb[32].mxu0  ;;  %3608 = vadd.xlane.f32.xlu1 %v3607_v36 }
 0x315   :  { %v3370_v21 = vadd.f32 %v7644_v38, %v3052_v17  ;;  %v3054_v37 = vpop.f32.mrb[33].mxu0 }
 0x316   :  { %v3371_v60 = vadd.f32 %v7647_v23, %v3054_v37  ;;  %v3056_v28 = vpop.f32.mrb[34].mxu0 }
 0x317   :  { %v7830_v33 = vadd.f32 %v3466_v4, %v3370_v21  ;;  %v3372_v58 = vadd.f32 %v7644_v38, %v3056_v28  ;;  %v3058_v35 = vpop.f32.mrb[35].mxu0  ;;  %v3473_v4 = vunpack.c.h.bf16 %v3421_v15 }
 0x318   :  { %v7833_v57 = vadd.f32 %v3467_v20, %v3371_v60  ;;  %v3373_v44 = vadd.f32 %v7647_v23, %v3058_v35 }
 0x319   :  { %v7836_v24 = vadd.f32 %v3468_v3, %v3372_v58  ;;  %v3422_v58 = vld [vmem:[%s8629_s5 + $0xa0] sm:$0xff] }
 0x31a   :  { %v7838_v56 = vadd.f32 %v3469_v12, %v3373_v44  ;;  %v3610_v50 = vadd.f32 %v7833_v57, %v7830_v33  ;;  %v3423_v44 = vld [vmem:[%s8629_s5 + $0xa8] sm:$0xff] }
 0x31c   :  { %3611 = vadd.xlane.f32.xlu0 %v3610_v50  ;;  %v3613_v49 = vadd.f32 %v7838_v56, %v7836_v24  ;;  %v3474_v50 = vunpack.c.l.bf16 %v3422_v58 }
 0x31e   :  { %3614 = vadd.xlane.f32.xlu1 %v3613_v49  ;;  %v3475_v49 = vunpack.c.h.bf16 %v3422_v58  ;;  %v3424_v58 = vld [vmem:[%s8629_s5 + $0xb0] sm:$0xff] }
 0x31f   :  { %v3062_v32 = vpop.f32.mrb[36].mxu0 }
 0x320   :  { %v3374_v2 = vadd.f32 %v7644_v38, %v3062_v32  ;;  %v3064_v46 = vpop.f32.mrb[37].mxu0  ;;  %v3476_v32 = vunpack.c.l.bf16 %v3423_v44 }
 0x321   :  { %v3375_v36 = vadd.f32 %v7647_v23, %v3064_v46  ;;  %v3066_v41 = vpop.f32.mrb[38].mxu0  ;;  %v3477_v46 = vunpack.c.h.bf16 %v3423_v44  ;;  %v3425_v44 = vld [vmem:[%s8629_s5 + $0xb8] sm:$0xff] }
 0x322   :  { %v7852_v17 = vadd.f32 %v3470_v1, %v3374_v2  ;;  %v3376_v20 = vadd.f32 %v7644_v38, %v3066_v41  ;;  %v3068_v21 = vpop.f32.mrb[39].mxu0 }
 0x323   :  { %v7855_v37 = vadd.f32 %v3471_v34, %v3375_v36  ;;  %v3377_v3 = vadd.f32 %v7647_v23, %v3068_v21 }
 0x324   :  { %v7858_v60 = vadd.f32 %v3472_v16, %v3376_v20 }
 0x325   :  { %v7860_v28 = vadd.f32 %v3473_v4, %v3377_v3  ;;  %v3616_v12 = vadd.f32 %v7855_v37, %v7852_v17 }
 0x327   :  { %3617 = vadd.xlane.f32.xlu0 %v3616_v12  ;;  %v3619_v35 = vadd.f32 %v7860_v28, %v7858_v60 }
 0x329   :  { %v3072_v40 = vpop.f32.mrb[40].mxu0  ;;  %3620 = vadd.xlane.f32.xlu1 %v3619_v35 }
 0x32a   :  { %v3378_v15 = vadd.f32 %v7644_v38, %v3072_v40  ;;  %v3074_v1 = vpop.f32.mrb[41].mxu0 }
 0x32b   :  { %v3379_v34 = vadd.f32 %v7647_v23, %v3074_v1  ;;  %v3076_v2 = vpop.f32.mrb[42].mxu0 }
 0x32c   :  { %v7874_v16 = vadd.f32 %v3474_v50, %v3378_v15  ;;  %v3380_v36 = vadd.f32 %v7644_v38, %v3076_v2  ;;  %v3078_v41 = vpop.f32.mrb[43].mxu0  ;;  %v3478_v50 = vunpack.c.l.bf16 %v3424_v58 }
 0x32d   :  { %v7877_v4 = vadd.f32 %v3475_v49, %v3379_v34  ;;  %v3381_v20 = vadd.f32 %v7647_v23, %v3078_v41  ;;  %v3479_v49 = vunpack.c.h.bf16 %v3424_v58  ;;  %v3426_v58 = vld [vmem:[%s8629_s5 + $0xc0] sm:$0xff] }
 0x32e   :  { %v7880_v21 = vadd.f32 %v3476_v32, %v3380_v36  ;;  %v3480_v32 = vunpack.c.l.bf16 %v3425_v44 }
 0x32f   :  { %v7882_v3 = vadd.f32 %v3477_v46, %v3381_v20  ;;  %v3622_v12 = vadd.f32 %v7877_v4, %v7874_v16  ;;  %v3481_v46 = vunpack.c.h.bf16 %v3425_v44 }
 0x331   :  { %8724 = vst [vmem:[#allocation11_spill] sm:$0xff] %v7882_v3  ;;  %3623 = vadd.xlane.f32.xlu0 %v3622_v12  ;;  %v3625_v35 = vadd.f32 %v7882_v3, %v7880_v21 }
 0x333   :  { %3626 = vadd.xlane.f32.xlu1 %v3625_v35 }
 0x334   :  { %v3082_v40 = vpop.f32.mrb[44].mxu0 }
 0x335   :  { %v3382_v15 = vadd.f32 %v7644_v38, %v3082_v40  ;;  %v3084_v1 = vpop.f32.mrb[45].mxu0 }
 0x336   :  { %v3383_v34 = vadd.f32 %v7647_v23, %v3084_v1  ;;  %v3086_v2 = vpop.f32.mrb[46].mxu0  ;;  %v3483_v1 = vunpack.c.h.bf16 %v3426_v58 }
 0x337   :  { %v7896_v36 = vadd.f32 %v3478_v50, %v3382_v15  ;;  %v3384_v41 = vadd.f32 %v7644_v38, %v3086_v2  ;;  %v3088_v20 = vpop.f32.mrb[47].mxu0  ;;  %v3427_v50 = vld [vmem:[%s8629_s5 + $0xc8] sm:$0xff]  ;;  %v3482_v15 = vunpack.c.l.bf16 %v3426_v58 }
 0x338   :  { %v7899_v12 = vadd.f32 %v3479_v49, %v3383_v34  ;;  %v3385_v9 = vadd.f32 %v7647_v23, %v3088_v20  ;;  %v3485_v20 = vunpack.c.h.bf16 %v3427_v50 }
 0x339   :  { %8725 = vst [vmem:[#allocation6_spill] sm:$0xff] %v7896_v36  ;;  %v7905_v35 = vadd.f32 %v3480_v32, %v3384_v41  ;;  %v3484_v41 = vunpack.c.l.bf16 %v3427_v50 }
 0x33a   :  { %8726 = vst [vmem:[#allocation12_spill] sm:$0xff] %v7899_v12  ;;  %v7907_v40 = vadd.f32 %v3481_v46, %v3385_v9  ;;  %v3628_v44 = vadd.f32 %v7899_v12, %v7896_v36 }
 0x33b   :  { %8727 = vst [vmem:[#allocation13_spill] sm:$0xff] %v7905_v35 }
 0x33c   :  { %8728 = vst [vmem:[#allocation14_spill] sm:$0xff] %v7907_v40  ;;  %3629 = vadd.xlane.f32.xlu0 %v3628_v44  ;;  %v3092_v49 = vpop.f32.mrb[48].mxu0  ;;  %v3631_v34 = vadd.f32 %v7907_v40, %v7905_v35 }
 0x33d   :  { %v3386_v2 = vadd.f32 %v7644_v38, %v3092_v49  ;;  %v3094_v32 = vpop.f32.mrb[49].mxu0  ;;  %v3428_v49 = vld [vmem:[%s8629_s5 + $0xd0] sm:$0xff] }
 0x33e   :  { %v3387_v9 = vadd.f32 %v7647_v23, %v3094_v32  ;;  %3632 = vadd.xlane.f32.xlu1 %v3631_v34  ;;  %v3096_v46 = vpop.f32.mrb[50].mxu0  ;;  %v3486_v34 = vunpack.c.l.bf16 %v3428_v49 }
 0x33f   :  { %v7918_v10 = vadd.f32 %v3482_v15, %v3386_v2  ;;  %v3388_v12 = vadd.f32 %v7644_v38, %v3096_v46  ;;  %v3098_v36 = vpop.f32.mrb[51].mxu0  ;;  %v3429_v15 = vld [vmem:[%s8629_s5 + $0xd8] sm:$0xff]  ;;  %v3487_v2 = vunpack.c.h.bf16 %v3428_v49 }
 0x340   :  { %v7921_v44 = vadd.f32 %v3483_v1, %v3387_v9  ;;  %v3389_v58 = vadd.f32 %v7647_v23, %v3098_v36 }
 0x341   :  { %8729 = vst [vmem:[#allocation7_spill] sm:$0xff] %v7918_v10  ;;  %v7927_v40 = vadd.f32 %v3484_v41, %v3388_v12  ;;  %v3488_v41 = vunpack.c.l.bf16 %v3429_v15 }
 0x342   :  { %8730 = vst [vmem:[#allocation5_spill] sm:$0xff] %v7921_v44  ;;  %v7929_v35 = vadd.f32 %v3485_v20, %v3389_v58  ;;  %v3634_v50 = vadd.f32 %v7921_v44, %v7918_v10  ;;  %v3489_v20 = vunpack.c.h.bf16 %v3429_v15 }
 0x343   :  { %8731 = vst [vmem:[#allocation8_spill] sm:$0xff] %v7927_v40 }
 0x344   :  { %8732 = vst [vmem:[#allocation15_spill] sm:$0xff] %v7929_v35  ;;  %3635 = vadd.xlane.f32.xlu0 %v3634_v50  ;;  %v3102_v1 = vpop.f32.mrb[52].mxu0  ;;  %v3637_v36 = vadd.f32 %v7929_v35, %v7927_v40 }
 0x345   :  { %v3390_v32 = vadd.f32 %v7644_v38, %v3102_v1  ;;  %v3104_v12 = vpop.f32.mrb[53].mxu0  ;;  %v3430_v1 = vld [vmem:[%s8629_s5 + $0xe0] sm:$0xff] }
 0x346   :  { %v3391_v9 = vadd.f32 %v7647_v23, %v3104_v12  ;;  %3638 = vadd.xlane.f32.xlu1 %v3637_v36  ;;  %v3106_v46 = vpop.f32.mrb[54].mxu0  ;;  %v3490_v36 = vunpack.c.l.bf16 %v3430_v1 }
 0x347   :  { %v7940_v58 = vadd.f32 %v3486_v34, %v3390_v32  ;;  %v3392_v44 = vadd.f32 %v7644_v38, %v3106_v46  ;;  %v3108_v10 = vpop.f32.mrb[55].mxu0  ;;  %v3431_v34 = vld [vmem:[%s8629_s5 + $0xe8] sm:$0xff]  ;;  %v3491_v32 = vunpack.c.h.bf16 %v3430_v1 }
 0x348   :  { %v7943_v50 = vadd.f32 %v3487_v2, %v3391_v9  ;;  %v3393_v49 = vadd.f32 %v7647_v23, %v3108_v10 }
 0x349   :  { %8733 = vst [vmem:[#allocation16_spill] sm:$0xff] %v7940_v58  ;;  %v7949_v35 = vadd.f32 %v3488_v41, %v3392_v44  ;;  %v3492_v41 = vunpack.c.l.bf16 %v3431_v34 }
 0x34a   :  { %8734 = vst [vmem:[#allocation9_spill] sm:$0xff] %v7943_v50  ;;  %v7951_v40 = vadd.f32 %v3489_v20, %v3393_v49  ;;  %v3640_v15 = vadd.f32 %v7943_v50, %v7940_v58  ;;  %v3493_v20 = vunpack.c.h.bf16 %v3431_v34 }
 0x34b   :  { %8735 = vst [vmem:[#allocation10_spill] sm:$0xff] %v7949_v35 }
 0x34c   :  { %8736 = vst [vmem:[#allocation17_spill] sm:$0xff] %v7951_v40  ;;  %3641 = vadd.xlane.f32.xlu0 %v3640_v15  ;;  %v3112_v2 = vpop.f32.mrb[56].mxu0  ;;  %v3643_v10 = vadd.f32 %v7951_v40, %v7949_v35 }
 0x34d   :  { %v3394_v12 = vadd.f32 %v7644_v38, %v3112_v2  ;;  %v3114_v44 = vpop.f32.mrb[57].mxu0  ;;  %v3432_v2 = vld [vmem:[%s8629_s5 + $0xf0] sm:$0xff] }
 0x34e   :  { %v3395_v9 = vadd.f32 %v7647_v23, %v3114_v44  ;;  %3644 = vadd.xlane.f32.xlu1 %v3643_v10  ;;  %v3116_v46 = vpop.f32.mrb[58].mxu0  ;;  %v3494_v10 = vunpack.c.l.bf16 %v3432_v2 }
 0x34f   :  { %v7962_v49 = vadd.f32 %v3490_v36, %v3394_v12  ;;  %v3396_v50 = vadd.f32 %v7644_v38, %v3116_v46  ;;  %v3118_v58 = vpop.f32.mrb[59].mxu0  ;;  %v3433_v36 = vld [vmem:[%s8629_s5 + $0xf8] sm:$0xff]  ;;  %v3495_v12 = vunpack.c.h.bf16 %v3432_v2 }
 0x350   :  { %v7965_v15 = vadd.f32 %v3491_v32, %v3395_v9  ;;  %v3397_v1 = vadd.f32 %v7647_v23, %v3118_v58 }
 0x351   :  { %8737 = vst [vmem:[#allocation18_spill] sm:$0xff] %v7962_v49  ;;  %v7971_v40 = vadd.f32 %v3492_v41, %v3396_v50  ;;  %v3496_v41 = vunpack.c.l.bf16 %v3433_v36 }
 0x352   :  { %8738 = vst [vmem:[#allocation19_spill] sm:$0xff] %v7965_v15  ;;  %v7973_v35 = vadd.f32 %v3493_v20, %v3397_v1  ;;  %v3646_v34 = vadd.f32 %v7965_v15, %v7962_v49  ;;  %v3497_v20 = vunpack.c.h.bf16 %v3433_v36 }
 0x353   :  { %8739 = vst [vmem:[#allocation20_spill] sm:$0xff] %v7971_v40 }
 0x354   :  { %8740 = vst [vmem:[#allocation21_spill] sm:$0xff] %v7973_v35  ;;  %3647 = vadd.xlane.f32.xlu0 %v3646_v34  ;;  %v3122_v32 = vpop.f32.mrb[60].mxu0  ;;  %v3649_v58 = vadd.f32 %v7973_v35, %v7971_v40 }
 0x355   :  { %v3398_v44 = vadd.f32 %v7644_v38, %v3122_v32  ;;  %v3124_v50 = vpop.f32.mrb[61].mxu0 }
 0x356   :  { %v3399_v9 = vadd.f32 %v7647_v23, %v3124_v50  ;;  %3650 = vadd.xlane.f32.xlu1 %v3649_v58  ;;  %v3126_v46 = vpop.f32.mrb[62].mxu0 }
 0x357   :  { %v7984_v15 = vadd.f32 %v3494_v10, %v3398_v44  ;;  %v3400_v49 = vadd.f32 %v7644_v38, %v3126_v46  ;;  %v3128_v34 = vpop.f32.mrb[63].mxu0 }
 0x358   :  { %v3564_v1 = vpop.xlane.xlu0 %3563  ;;  %v7987_v2 = vadd.f32 %v3495_v12, %v3399_v9  ;;  %v3401_v35 = vadd.f32 %v7647_v23, %v3128_v34 }
 0x359   :  { %v3659_v3 = vmul.f32 0.00390625, %v3564_v1  ;;  %v7990_v40 = vadd.f32 %v3496_v41, %v3400_v49 }
 0x35a   :  { %v7998_v36 = vadd.f32 %v3497_v20, %v3401_v35  ;;  %v3652_v10 = vadd.f32 %v7987_v2, %v7984_v15 }
 0x35b   :  { %v7993_v32 = vsub.f32 %v7655_v59, %v3659_v3  ;;  %v7996_v58 = vsub.f32 %v7658_v25, %v3659_v3 }
 0x35c   :  { %v3567_v38 = vpop.xlane.xlu0 %3566  ;;  %3653 = vadd.xlane.f32.xlu0 %v3652_v10  ;;  %v3655_v59 = vadd.f32 %v7998_v36, %v7990_v40 }
 0x35d   :  { %v3660_v44 = vmul.f32 0.00390625, %v3567_v38  ;;  %v3755_v12 = vmul.f32 %v7993_v32, %v7993_v32  ;;  %v3756_v23 = vmul.f32 %v7996_v58, %v7996_v58 }
 0x35e   :  { %3656 = vadd.xlane.f32.xlu1 %v3655_v59 }
 0x35f   :  { %v8009_v25 = vsub.f32 %v7660_v29, %v3660_v44  ;;  %v8012_v3 = vsub.f32 %v7662_v62, %v3660_v44  ;;  %v3819_v35 = vadd.f32 %v3756_v23, %v3755_v12 }
 0x361   :  { %v3757_v49 = vmul.f32 %v8009_v25, %v8009_v25  ;;  %v3758_v50 = vmul.f32 %v8012_v3, %v8012_v3  ;;  %3820 = vadd.xlane.f32.xlu0 %v3819_v35  ;;  %v3570_v41 = vpop.xlane.xlu1 %3569 }
 0x362   :  { %v3661_v46 = vmul.f32 0.00390625, %v3570_v41 }
 0x363   :  { %v3822_v9 = vadd.f32 %v3758_v50, %v3757_v49 }
 0x364   :  { %v8019_v20 = vsub.f32 %v7677_v55, %v3661_v46  ;;  %v8022_v29 = vsub.f32 %v7680_v47, %v3661_v46 }
 0x365   :  { %3823 = vadd.xlane.f32.xlu1 %v3822_v9  ;;  %v3573_v62 = vpop.xlane.xlu1 %3572 }
 0x366   :  { %v3662_v1 = vmul.f32 0.00390625, %v3573_v62  ;;  %v3759_v34 = vmul.f32 %v8019_v20, %v8019_v20  ;;  %v3760_v10 = vmul.f32 %v8022_v29, %v8022_v29 }
 0x368   :  { %v8029_v38 = vsub.f32 %v7682_v7, %v3662_v1  ;;  %v8032_v44 = vsub.f32 %v7684_v42, %v3662_v1  ;;  %v3825_v12 = vadd.f32 %v3760_v10, %v3759_v34 }
 0x36a   :  { %3826 = vadd.xlane.f32.xlu0 %v3825_v12  ;;  %v3761_v55 = vmul.f32 %v8029_v38, %v8029_v38  ;;  %v3762_v47 = vmul.f32 %v8032_v44, %v8032_v44 }
 0x36b   :  { %v3576_v23 = vpop.xlane.xlu0 %3575 }
 0x36c   :  { %v3663_v59 = vmul.f32 0.00390625, %v3576_v23  ;;  %v3828_v35 = vadd.f32 %v3762_v47, %v3761_v55 }
 0x36d   :  { %v3579_v49 = vpop.xlane.xlu1 %3578 }
 0x36e   :  { %v8039_v50 = vsub.f32 %v7698_v19, %v3663_v59  ;;  %v8042_v7 = vsub.f32 %v7701_v52, %v3663_v59  ;;  %v3664_v42 = vmul.f32 0.00390625, %v3579_v49  ;;  %3829 = vadd.xlane.f32.xlu1 %v3828_v35 }
 0x370   :  { %v8045_v41 = vsub.f32 %v7704_v30, %v3664_v42  ;;  %v8048_v9 = vsub.f32 %v7706_v18, %v3664_v42  ;;  %v3763_v46 = vmul.f32 %v8039_v50, %v8039_v50  ;;  %v3764_v62 = vmul.f32 %v8042_v7, %v8042_v7 }
 0x372   :  { %v3831_v1 = vadd.f32 %v3764_v62, %v3763_v46  ;;  %v3765_v19 = vmul.f32 %v8045_v41, %v8045_v41  ;;  %v3766_v52 = vmul.f32 %v8048_v9, %v8048_v9 }
 0x374   :  { %3832 = vadd.xlane.f32.xlu0 %v3831_v1  ;;  %v3834_v34 = vadd.f32 %v3766_v52, %v3765_v19 }
 0x375   :  { %v3582_v30 = vpop.xlane.xlu0 %3581 }
 0x376   :  { %v3665_v10 = vmul.f32 0.00390625, %v3582_v30  ;;  %3835 = vadd.xlane.f32.xlu1 %v3834_v34 }
 0x377   :  { %v3585_v18 = vpop.xlane.xlu1 %3584 }
 0x378   :  { %v8059_v12 = vsub.f32 %v7720_v5, %v3665_v10  ;;  %v8062_v55 = vsub.f32 %v7723_v26, %v3665_v10  ;;  %v3666_v47 = vmul.f32 0.00390625, %v3585_v18 }
 0x37a   :  { %v8065_v23 = vsub.f32 %v7726_v51, %v3666_v47  ;;  %v8068_v59 = vsub.f32 %v7728_v27, %v3666_v47  ;;  %v3767_v35 = vmul.f32 %v8059_v12, %v8059_v12  ;;  %v3768_v49 = vmul.f32 %v8062_v55, %v8062_v55 }
 0x37c   :  { %v3837_v42 = vadd.f32 %v3768_v49, %v3767_v35  ;;  %v3769_v5 = vmul.f32 %v8065_v23, %v8065_v23  ;;  %v3770_v26 = vmul.f32 %v8068_v59, %v8068_v59 }
 0x37e   :  { %3838 = vadd.xlane.f32.xlu0 %v3837_v42  ;;  %v3840_v46 = vadd.f32 %v3770_v26, %v3769_v5 }
 0x37f   :  { %v3588_v51 = vpop.xlane.xlu0 %3587 }
 0x380   :  { %v3667_v62 = vmul.f32 0.00390625, %v3588_v51  ;;  %3841 = vadd.xlane.f32.xlu1 %v3840_v46 }
 0x381   :  { %v3591_v27 = vpop.xlane.xlu1 %3590 }
 0x382   :  { %v8079_v1 = vsub.f32 %v7742_v63, %v3667_v62  ;;  %v8082_v19 = vsub.f32 %v7745_v0, %v3667_v62  ;;  %v3668_v52 = vmul.f32 0.00390625, %v3591_v27 }
 0x384   :  { %v8085_v34 = vsub.f32 %v7748_v13, %v3668_v52  ;;  %v8088_v30 = vsub.f32 %v7750_v39, %v3668_v52  ;;  %v3771_v10 = vmul.f32 %v8079_v1, %v8079_v1  ;;  %v3772_v18 = vmul.f32 %v8082_v19, %v8082_v19 }
 0x386   :  { %v3843_v47 = vadd.f32 %v3772_v18, %v3771_v10  ;;  %v3773_v63 = vmul.f32 %v8085_v34, %v8085_v34  ;;  %v3774_v0 = vmul.f32 %v8088_v30, %v8088_v30 }
 0x388   :  { %3844 = vadd.xlane.f32.xlu0 %v3843_v47  ;;  %v3846_v35 = vadd.f32 %v3774_v0, %v3773_v63 }
 0x38a   :  { %v3594_v13 = vpop.xlane.xlu0 %3593  ;;  %3847 = vadd.xlane.f32.xlu1 %v3846_v35 }
 0x38b   :  { %v3669_v49 = vmul.f32 0.00390625, %v3594_v13 }
 0x38c   :  { %v3597_v39 = vpop.xlane.xlu1 %3596 }
 0x38d   :  { %v8099_v42 = vsub.f32 %v7764_v54, %v3669_v49  ;;  %v8102_v5 = vsub.f32 %v7767_v31, %v3669_v49  ;;  %v3670_v26 = vmul.f32 0.00390625, %v3597_v39 }
 0x38f   :  { %v8105_v46 = vsub.f32 %v7770_v14, %v3670_v26  ;;  %v8108_v51 = vsub.f32 %v7772_v43, %v3670_v26  ;;  %v3775_v62 = vmul.f32 %v8099_v42, %v8099_v42  ;;  %v3776_v27 = vmul.f32 %v8102_v5, %v8102_v5 }
 0x391   :  { %v3849_v52 = vadd.f32 %v3776_v27, %v3775_v62  ;;  %v3777_v54 = vmul.f32 %v8105_v46, %v8105_v46  ;;  %v3778_v31 = vmul.f32 %v8108_v51, %v8108_v51 }
 0x393   :  { %3850 = vadd.xlane.f32.xlu0 %v3849_v52  ;;  %v3852_v10 = vadd.f32 %v3778_v31, %v3777_v54 }
 0x394   :  { %v3600_v14 = vpop.xlane.xlu0 %3599 }
 0x395   :  { %v3671_v18 = vmul.f32 0.00390625, %v3600_v14  ;;  %3853 = vadd.xlane.f32.xlu1 %v3852_v10 }
 0x396   :  { %v3603_v43 = vpop.xlane.xlu1 %3602 }
 0x397   :  { %v8119_v47 = vsub.f32 %v7786_v61, %v3671_v18  ;;  %v8122_v63 = vsub.f32 %v7789_v53, %v3671_v18  ;;  %v3672_v0 = vmul.f32 0.00390625, %v3603_v43 }
 0x399   :  { %v8125_v35 = vsub.f32 %v7792_v22, %v3672_v0  ;;  %v8128_v13 = vsub.f32 %v7794_v6, %v3672_v0  ;;  %v3779_v49 = vmul.f32 %v8119_v47, %v8119_v47  ;;  %v3780_v39 = vmul.f32 %v8122_v63, %v8122_v63 }
 0x39b   :  { %v3855_v26 = vadd.f32 %v3780_v39, %v3779_v49  ;;  %v3781_v61 = vmul.f32 %v8125_v35, %v8125_v35  ;;  %v3782_v53 = vmul.f32 %v8128_v13, %v8128_v13 }
 0x39d   :  { %3856 = vadd.xlane.f32.xlu0 %v3855_v26  ;;  %v3858_v62 = vadd.f32 %v3782_v53, %v3781_v61 }
 0x39f   :  { %v3606_v22 = vpop.xlane.xlu0 %3605  ;;  %3859 = vadd.xlane.f32.xlu1 %v3858_v62 }
 0x3a0   :  { %v3673_v27 = vmul.f32 0.00390625, %v3606_v22 }
 0x3a1   :  { %v3609_v6 = vpop.xlane.xlu1 %3608 }
 0x3a2   :  { %v8139_v52 = vsub.f32 %v7808_v11, %v3673_v27  ;;  %v8142_v54 = vsub.f32 %v7811_v45, %v3673_v27  ;;  %v3674_v31 = vmul.f32 0.00390625, %v3609_v6 }
 0x3a4   :  { %v8145_v10 = vsub.f32 %v7814_v8, %v3674_v31  ;;  %v8148_v14 = vsub.f32 %v7816_v48, %v3674_v31  ;;  %v3783_v18 = vmul.f32 %v8139_v52, %v8139_v52  ;;  %v3784_v43 = vmul.f32 %v8142_v54, %v8142_v54 }
 0x3a6   :  { %v3861_v0 = vadd.f32 %v3784_v43, %v3783_v18  ;;  %v3785_v11 = vmul.f32 %v8145_v10, %v8145_v10  ;;  %v3786_v45 = vmul.f32 %v8148_v14, %v8148_v14 }
 0x3a8   :  { %3862 = vadd.xlane.f32.xlu0 %v3861_v0  ;;  %v3864_v49 = vadd.f32 %v3786_v45, %v3785_v11 }
 0x3a9   :  { %v3612_v8 = vpop.xlane.xlu0 %3611 }
 0x3aa   :  { %v3675_v39 = vmul.f32 0.00390625, %v3612_v8  ;;  %3865 = vadd.xlane.f32.xlu1 %v3864_v49 }
 0x3ab   :  { %v3615_v48 = vpop.xlane.xlu1 %3614 }
 0x3ac   :  { %v8159_v26 = vsub.f32 %v7830_v33, %v3675_v39  ;;  %v8162_v61 = vsub.f32 %v7833_v57, %v3675_v39  ;;  %v3676_v53 = vmul.f32 0.00390625, %v3615_v48 }
 0x3ae   :  { %v8165_v62 = vsub.f32 %v7836_v24, %v3676_v53  ;;  %v8168_v22 = vsub.f32 %v7838_v56, %v3676_v53  ;;  %v3787_v27 = vmul.f32 %v8159_v26, %v8159_v26  ;;  %v3788_v6 = vmul.f32 %v8162_v61, %v8162_v61 }
 0x3b0   :  { %v3867_v31 = vadd.f32 %v3788_v6, %v3787_v27  ;;  %v3789_v33 = vmul.f32 %v8165_v62, %v8165_v62  ;;  %v3790_v57 = vmul.f32 %v8168_v22, %v8168_v22 }
 0x3b2   :  { %3868 = vadd.xlane.f32.xlu0 %v3867_v31  ;;  %v3870_v18 = vadd.f32 %v3790_v57, %v3789_v33 }
 0x3b4   :  { %v3618_v24 = vpop.xlane.xlu0 %3617  ;;  %3871 = vadd.xlane.f32.xlu1 %v3870_v18 }
 0x3b5   :  { %v3677_v43 = vmul.f32 0.00390625, %v3618_v24  ;;  %v8741_v24 = vld [vmem:[#allocation11_spill] sm:$0xff] }
 0x3b6   :  { %v3621_v56 = vpop.xlane.xlu1 %3620 }
 0x3b7   :  { %v8179_v0 = vsub.f32 %v7852_v17, %v3677_v43  ;;  %v8182_v11 = vsub.f32 %v7855_v37, %v3677_v43  ;;  %v3678_v45 = vmul.f32 0.00390625, %v3621_v56 }
 0x3b9   :  { %v8185_v49 = vsub.f32 %v7858_v60, %v3678_v45  ;;  %v8188_v8 = vsub.f32 %v7860_v28, %v3678_v45  ;;  %v3791_v39 = vmul.f32 %v8179_v0, %v8179_v0  ;;  %v3792_v48 = vmul.f32 %v8182_v11, %v8182_v11 }
 0x3bb   :  { %v3873_v53 = vadd.f32 %v3792_v48, %v3791_v39  ;;  %v3793_v17 = vmul.f32 %v8185_v49, %v8185_v49  ;;  %v3794_v37 = vmul.f32 %v8188_v8, %v8188_v8 }
 0x3bd   :  { %3874 = vadd.xlane.f32.xlu0 %v3873_v53  ;;  %v3876_v27 = vadd.f32 %v3794_v37, %v3793_v17  ;;  %v8743_v37 = vld [vmem:[#allocation6_spill] sm:$0xff] }
 0x3be   :  { %v3624_v60 = vpop.xlane.xlu0 %3623 }
 0x3bf   :  { %v3679_v6 = vmul.f32 0.00390625, %v3624_v60  ;;  %3877 = vadd.xlane.f32.xlu1 %v3876_v27  ;;  %v8745_v60 = vld [vmem:[#allocation12_spill] sm:$0xff] }
 0x3c0   :  { %v3627_v28 = vpop.xlane.xlu1 %3626 }
 0x3c1   :  { %v8199_v31 = vsub.f32 %v7874_v16, %v3679_v6  ;;  %v8202_v33 = vsub.f32 %v7877_v4, %v3679_v6  ;;  %v3680_v57 = vmul.f32 0.00390625, %v3627_v28 }
 0x3c3   :  { %v8205_v18 = vsub.f32 %v7880_v21, %v3680_v57  ;;  %v8208_v43 = vsub.f32 %v8741_v24, %v3680_v57  ;;  %v3795_v56 = vmul.f32 %v8199_v31, %v8199_v31  ;;  %v3796_v45 = vmul.f32 %v8202_v33, %v8202_v33  ;;  %v8747_v57 = vld [vmem:[#allocation13_spill] sm:$0xff] }
 0x3c5   :  { %8742 = vst [vmem:[#allocation11_spill] sm:$0xff] %v8208_v43  ;;  %v3879_v39 = vadd.f32 %v3796_v45, %v3795_v56  ;;  %v3797_v16 = vmul.f32 %v8205_v18, %v8205_v18  ;;  %v3798_v4 = vmul.f32 %v8208_v43, %v8208_v43  ;;  %v8749_v56 = vld [vmem:[#allocation14_spill] sm:$0xff] }
 0x3c7   :  { %3880 = vadd.xlane.f32.xlu0 %v3879_v39  ;;  %v3882_v48 = vadd.f32 %v3798_v4, %v3797_v16 }
 0x3c9   :  { %v3630_v21 = vpop.xlane.xlu0 %3629  ;;  %3883 = vadd.xlane.f32.xlu1 %v3882_v48 }
 0x3ca   :  { %v3681_v53 = vmul.f32 0.00390625, %v3630_v21 }
 0x3cb   :  { %v3633_v17 = vpop.xlane.xlu1 %3632 }
 0x3cc   :  { %v8219_v27 = vsub.f32 %v8743_v37, %v3681_v53  ;;  %v8222_v6 = vsub.f32 %v8745_v60, %v3681_v53  ;;  %v3682_v28 = vmul.f32 0.00390625, %v3633_v17 }
 0x3ce   :  { %8744 = vst [vmem:[#allocation6_spill] sm:$0xff] %v8219_v27  ;;  %8746 = vst [vmem:[#allocation12_spill] sm:$0xff] %v8222_v6  ;;  %v8225_v24 = vsub.f32 %v8747_v57, %v3682_v28  ;;  %v8228_v45 = vsub.f32 %v8749_v56, %v3682_v28  ;;  %v3799_v39 = vmul.f32 %v8219_v27, %v8219_v27  ;;  %v8751_v28 = vld [vmem:[#allocation7_spill] sm:$0xff]  ;;  %v8753_v56 = vld [vmem:[#allocation5_spill] sm:$0xff] }
 0x3cf   :  { %v3800_v16 = vmul.f32 %v8222_v6, %v8222_v6 }
 0x3d0   :  { %8748 = vst [vmem:[#allocation13_spill] sm:$0xff] %v8225_v24  ;;  %8750 = vst [vmem:[#allocation14_spill] sm:$0xff] %v8228_v45  ;;  %v3801_v48 = vmul.f32 %v8225_v24, %v8225_v24  ;;  %v3802_v21 = vmul.f32 %v8228_v45, %v8228_v45  ;;  %v8757_v24 = vld [vmem:[#allocation15_spill] sm:$0xff] }
 0x3d1   :  { %v3885_v4 = vadd.f32 %v3800_v16, %v3799_v39  ;;  %v3636_v53 = vpop.xlane.xlu0 %3635  ;;  %v8755_v39 = vld [vmem:[#allocation8_spill] sm:$0xff] }
 0x3d2   :  { %v3683_v17 = vmul.f32 0.00390625, %v3636_v53  ;;  %v3888_v37 = vadd.f32 %v3802_v21, %v3801_v48 }
 0x3d3   :  { %3886 = vadd.xlane.f32.xlu0 %v3885_v4  ;;  %v3639_v60 = vpop.xlane.xlu1 %3638 }
 0x3d4   :  { %v8239_v57 = vsub.f32 %v8751_v28, %v3683_v17  ;;  %v8242_v27 = vsub.f32 %v8753_v56, %v3683_v17  ;;  %v3684_v43 = vmul.f32 0.00390625, %v3639_v60  ;;  %3889 = vadd.xlane.f32.xlu1 %v3888_v37 }
 0x3d6   :  { %8752 = vst [vmem:[#allocation7_spill] sm:$0xff] %v8239_v57  ;;  %8754 = vst [vmem:[#allocation5_spill] sm:$0xff] %v8242_v27  ;;  %v8245_v16 = vsub.f32 %v8755_v39, %v3684_v43  ;;  %v8248_v6 = vsub.f32 %v8757_v24, %v3684_v43  ;;  %v3803_v53 = vmul.f32 %v8239_v57, %v8239_v57  ;;  %v8759_v43 = vld [vmem:[#allocation16_spill] sm:$0xff]  ;;  %v8761_v39 = vld [vmem:[#allocation9_spill] sm:$0xff] }
 0x3d7   :  { %v3804_v4 = vmul.f32 %v8242_v27, %v8242_v27 }
 0x3d8   :  { %8756 = vst [vmem:[#allocation8_spill] sm:$0xff] %v8245_v16  ;;  %8758 = vst [vmem:[#allocation15_spill] sm:$0xff] %v8248_v6  ;;  %v3805_v21 = vmul.f32 %v8245_v16, %v8245_v16  ;;  %v3806_v17 = vmul.f32 %v8248_v6, %v8248_v6  ;;  %v8765_v16 = vld [vmem:[#allocation17_spill] sm:$0xff] }
 0x3d9   :  { %v3891_v48 = vadd.f32 %v3804_v4, %v3803_v53  ;;  %v3642_v37 = vpop.xlane.xlu0 %3641  ;;  %v8763_v53 = vld [vmem:[#allocation10_spill] sm:$0xff] }
 0x3da   :  { %v3685_v60 = vmul.f32 0.00390625, %v3642_v37  ;;  %v3894_v28 = vadd.f32 %v3806_v17, %v3805_v21 }
 0x3db   :  { %3892 = vadd.xlane.f32.xlu0 %v3891_v48  ;;  %v3645_v56 = vpop.xlane.xlu1 %3644 }
 0x3dc   :  { %v8259_v24 = vsub.f32 %v8759_v43, %v3685_v60  ;;  %v8262_v57 = vsub.f32 %v8761_v39, %v3685_v60  ;;  %v3686_v45 = vmul.f32 0.00390625, %v3645_v56  ;;  %3895 = vadd.xlane.f32.xlu1 %v3894_v28 }
 0x3de   :  { %8760 = vst [vmem:[#allocation16_spill] sm:$0xff] %v8259_v24  ;;  %8762 = vst [vmem:[#allocation9_spill] sm:$0xff] %v8262_v57  ;;  %v8265_v4 = vsub.f32 %v8763_v53, %v3686_v45  ;;  %v8268_v27 = vsub.f32 %v8765_v16, %v3686_v45  ;;  %v3807_v37 = vmul.f32 %v8259_v24, %v8259_v24  ;;  %v8766_v45 = vld [vmem:[#allocation18_spill] sm:$0xff]  ;;  %v8767_v53 = vld [vmem:[#allocation19_spill] sm:$0xff] }
 0x3df   :  { %v3808_v48 = vmul.f32 %v8262_v57, %v8262_v57 }
 0x3e0   :  { %8764 = vst [vmem:[#allocation10_spill] sm:$0xff] %v8265_v4  ;;  %v3809_v17 = vmul.f32 %v8265_v4, %v8265_v4  ;;  %v3810_v60 = vmul.f32 %v8268_v27, %v8268_v27  ;;  %v8771_v4 = vld [vmem:[#allocation21_spill] sm:$0xff] }
 0x3e1   :  { %v3897_v21 = vadd.f32 %v3808_v48, %v3807_v37  ;;  %v3648_v28 = vpop.xlane.xlu0 %3647  ;;  %v8769_v37 = vld [vmem:[#allocation20_spill] sm:$0xff] }
 0x3e2   :  { %v3687_v56 = vmul.f32 0.00390625, %v3648_v28  ;;  %v3900_v43 = vadd.f32 %v3810_v60, %v3809_v17 }
 0x3e3   :  { %3898 = vadd.xlane.f32.xlu0 %v3897_v21  ;;  %v3651_v39 = vpop.xlane.xlu1 %3650 }
 0x3e4   :  { %v8279_v16 = vsub.f32 %v8766_v45, %v3687_v56  ;;  %v8282_v24 = vsub.f32 %v8767_v53, %v3687_v56  ;;  %v3688_v6 = vmul.f32 0.00390625, %v3651_v39  ;;  %3901 = vadd.xlane.f32.xlu1 %v3900_v43 }
 0x3e6   :  { %8768 = vst [vmem:[#allocation17_spill] sm:$0xff] %v8282_v24  ;;  %v8285_v48 = vsub.f32 %v8769_v37, %v3688_v6  ;;  %v8288_v57 = vsub.f32 %v8771_v4, %v3688_v6  ;;  %v3811_v28 = vmul.f32 %v8279_v16, %v8279_v16  ;;  %v3812_v21 = vmul.f32 %v8282_v24, %v8282_v24 }
 0x3e8   :  { %8770 = vst [vmem:[#allocation18_spill] sm:$0xff] %v8285_v48  ;;  %8772 = vst [vmem:[#allocation19_spill] sm:$0xff] %v8288_v57  ;;  %v3903_v17 = vadd.f32 %v3812_v21, %v3811_v28  ;;  %v3813_v60 = vmul.f32 %v8285_v48, %v8285_v48  ;;  %v3814_v56 = vmul.f32 %v8288_v57, %v8288_v57 }
 0x3e9   :  { %v3654_v43 = vpop.xlane.xlu0 %3653 }
 0x3ea   :  { %v3689_v39 = vmul.f32 0.00390625, %v3654_v43  ;;  %3904 = vadd.xlane.f32.xlu0 %v3903_v17  ;;  %v3906_v45 = vadd.f32 %v3814_v56, %v3813_v60 }
 0x3eb   :  { %v3657_v53 = vpop.xlane.xlu1 %3656 }
 0x3ec   :  { %v8299_v6 = vsub.f32 %v7984_v15, %v3689_v39  ;;  %v8302_v4 = vsub.f32 %v7987_v2, %v3689_v39  ;;  %v3690_v37 = vmul.f32 0.00390625, %v3657_v53  ;;  %3907 = vadd.xlane.f32.xlu1 %v3906_v45 }
 0x3ee   :  { %8773 = vst [vmem:[#allocation20_spill] sm:$0xff] %v8299_v6  ;;  %8774 = vst [vmem:[#allocation21_spill] sm:$0xff] %v8302_v4  ;;  %v3821_v28 = vpop.xlane.xlu0 %3820  ;;  %v8305_v21 = vsub.f32 %v7990_v40, %v3690_v37  ;;  %v8308_v48 = vsub.f32 %v7998_v36, %v3690_v37  ;;  %v3815_v17 = vmul.f32 %v8299_v6, %v8299_v6 }
 0x3ef   :  { %v3816_v60 = vmul.f32 %v8302_v4, %v8302_v4  ;;  %v3915_v15 = vmul.f32 0.00390625, %v3821_v28  ;;  %v4075_v28 = vld [vmem:[%s8630_s6] sm:$0x3] }
 0x3f0   :  { %8775 = vst [vmem:[#allocation22_spill] sm:$0xff] %v8305_v21  ;;  %8776 = vst [vmem:[#allocation23_spill] sm:$0xff] %v8308_v48  ;;  %v3817_v2 = vmul.f32 %v8305_v21, %v8305_v21  ;;  %v3818_v43 = vmul.f32 %v8308_v48, %v8308_v48 }
 0x3f1   :  { %v3909_v56 = vadd.f32 %v3816_v60, %v3815_v17  ;;  %v3947_v40 = vadd.f32 1e-05, %v3915_v15  ;;  %v4151_v17 = vld [vmem:[%s8631_s7] sm:$0x3] }
 0x3f2   :  { %v3824_v39 = vpop.xlane.xlu1 %3823  ;;  %v3912_v36 = vadd.f32 %v3818_v43, %v3817_v2  ;;  %v8777_v15 = vld [vmem:[#allocation3_spill] sm:$0xff] }
 0x3f3   :  { %v3916_v45 = vmul.f32 0.00390625, %v3824_v39  ;;  %3910 = vadd.xlane.f32.xlu0 %v3909_v56  ;;  %5239 = vrsqrt.f32 %v3947_v40  ;;  %v8325_v39 = vrot.slane %v4075_v28, %v8777_v15  ;;  %v8778_v56 = vld [vmem:[#allocation4_spill] sm:$0xff] }
 0x3f4   :  { %3913 = vadd.xlane.f32.xlu1 %v3912_v36  ;;  %v8328_v2 = vrot.slane %v4075_v28, %v8778_v56  ;;  %v8334_v36 = vrot.slane %v4151_v17, %v8778_v56 }
 0x3f5   :  { %v3948_v53 = vadd.f32 1e-05, %v3916_v45  ;;  %v8331_v45 = vrot.slane %v4151_v17, %v8777_v15 }
 0x3f7   :  { %5241 = vrsqrt.f32 %v3948_v53  ;;  %v3827_v37 = vpop.xlane.xlu0 %3826 }
 0x3f8   :  { %v3917_v6 = vmul.f32 0.00390625, %v3827_v37 }
 0x3fa   :  { %v3949_v60 = vadd.f32 1e-05, %v3917_v6 }
 0x3fb   :  { %v3830_v48 = vpop.xlane.xlu1 %3829 }
 0x3fc   :  { %5243 = vrsqrt.f32 %v3949_v60  ;;  %v3918_v43 = vmul.f32 0.00390625, %v3830_v48 }
 0x3fd   :  { %v5240_v40 = vpop.eup %5239 }
 0x3fe   :  { %v4011_v53 = vmul.f32 %v5240_v40, %v7993_v32  ;;  %v4012_v6 = vmul.f32 %v5240_v40, %v7996_v58  ;;  %v3950_v37 = vadd.f32 1e-05, %v3918_v43 }
 0x400   :  { %v4087_v4 = vmul.f32 %v8325_v39, %v4011_v53  ;;  %v4088_v28 = vmul.f32 %v8328_v2, %v4012_v6  ;;  %5245 = vrsqrt.f32 %v3950_v37 }
 0x401   :  { %v5242_v21 = vpop.eup %5241  ;;  %v3833_v15 = vpop.xlane.xlu0 %3832 }
 0x402   :  { %v4013_v60 = vmul.f32 %v5242_v21, %v8009_v25  ;;  %v4014_v48 = vmul.f32 %v5242_v21, %v8012_v3  ;;  %v4163_v57 = vadd.f32 %v8331_v45, %v4087_v4  ;;  %v4164_v17 = vadd.f32 %v8334_v36, %v4088_v28 }
 0x403   :  { %v3919_v56 = vmul.f32 0.00390625, %v3833_v15  ;;  %v3836_v43 = vpop.xlane.xlu1 %3835 }
 0x404   :  { %v4089_v32 = vmul.f32 %v8325_v39, %v4013_v60  ;;  %v4090_v58 = vmul.f32 %v8328_v2, %v4014_v48  ;;  %v4647_v40 = vpack.c.bf16 %v4164_v17, %v4163_v57  ;;  %v3920_v25 = vmul.f32 0.00390625, %v3836_v43 }
 0x405   :  { %v3951_v24 = vadd.f32 1e-05, %v3919_v56 }
 0x406   :  { %v4165_v53 = vadd.f32 %v8331_v45, %v4089_v32  ;;  %v4166_v6 = vadd.f32 %v8334_v36, %v4090_v58  ;;  %v5244_v3 = vpop.eup %5243  ;;  %4419 = vst [vmem:[%s8632_s8] sm:$0xff] %v4647_v40  ;;  %v3952_v21 = vadd.f32 1e-05, %v3920_v25 }
 0x407   :  { %v4015_v37 = vmul.f32 %v5244_v3, %v8019_v20  ;;  %v4016_v28 = vmul.f32 %v5244_v3, %v8022_v29  ;;  %5247 = vrsqrt.f32 %v3951_v24 }
 0x408   :  { %v4648_v4 = vpack.c.bf16 %v4166_v6, %v4165_v53  ;;  %5249 = vrsqrt.f32 %v3952_v21 }
 0x409   :  { %v4091_v57 = vmul.f32 %v8325_v39, %v4015_v37  ;;  %v4092_v60 = vmul.f32 %v8328_v2, %v4016_v28 }
 0x40a   :  { %4420 = vst [vmem:[%s8632_s8 + $0x8] sm:$0xff] %v4648_v4  ;;  %v5246_v48 = vpop.eup %5245 }
 0x40b   :  { %v4167_v15 = vadd.f32 %v8331_v45, %v4091_v57  ;;  %v4168_v17 = vadd.f32 %v8334_v36, %v4092_v60  ;;  %v3839_v32 = vpop.xlane.xlu0 %3838  ;;  %v4017_v20 = vmul.f32 %v5246_v48, %v8029_v38  ;;  %v4018_v29 = vmul.f32 %v5246_v48, %v8032_v44 }
 0x40c   :  { %v3921_v24 = vmul.f32 0.00390625, %v3839_v32 }
 0x40d   :  { %v4649_v58 = vpack.c.bf16 %v4168_v17, %v4167_v15  ;;  %v3842_v56 = vpop.xlane.xlu1 %3841  ;;  %v4093_v43 = vmul.f32 %v8325_v39, %v4017_v20  ;;  %v4094_v40 = vmul.f32 %v8328_v2, %v4018_v29 }
 0x40e   :  { %v3953_v53 = vadd.f32 1e-05, %v3921_v24  ;;  %v3922_v6 = vmul.f32 0.00390625, %v3842_v56 }
 0x40f   :  { %4421 = vst [vmem:[%s8632_s8 + $0x10] sm:$0xff] %v4649_v58  ;;  %v4169_v25 = vadd.f32 %v8331_v45, %v4093_v43  ;;  %v4170_v3 = vadd.f32 %v8334_v36, %v4094_v40 }
 0x410   :  { %5251 = vrsqrt.f32 %v3953_v53  ;;  %v3954_v38 = vadd.f32 1e-05, %v3922_v6 }
 0x411   :  { %v5248_v44 = vpop.eup %5247  ;;  %v4650_v21 = vpack.c.bf16 %v4170_v3, %v4169_v25 }
 0x412   :  { %v5250_v4 = vpop.eup %5249  ;;  %v4019_v37 = vmul.f32 %v5248_v44, %v8039_v50  ;;  %v4020_v28 = vmul.f32 %v5248_v44, %v8042_v7  ;;  %5253 = vrsqrt.f32 %v3954_v38 }
 0x413   :  { %v4021_v57 = vmul.f32 %v5250_v4, %v8045_v41  ;;  %v4022_v60 = vmul.f32 %v5250_v4, %v8048_v9  ;;  %4422 = vst [vmem:[%s8632_s8 + $0x18] sm:$0xff] %v4650_v21 }
 0x414   :  { %v4095_v48 = vmul.f32 %v8325_v39, %v4019_v37  ;;  %v4096_v15 = vmul.f32 %v8328_v2, %v4020_v28 }
 0x415   :  { %v4097_v17 = vmul.f32 %v8325_v39, %v4021_v57  ;;  %v4098_v32 = vmul.f32 %v8328_v2, %v4022_v60  ;;  %v3845_v50 = vpop.xlane.xlu0 %3844 }
 0x416   :  { %v4171_v7 = vadd.f32 %v8331_v45, %v4095_v48  ;;  %v4172_v20 = vadd.f32 %v8334_v36, %v4096_v15  ;;  %v3923_v41 = vmul.f32 0.00390625, %v3845_v50 }
 0x417   :  { %v4173_v9 = vadd.f32 %v8331_v45, %v4097_v17  ;;  %v4174_v29 = vadd.f32 %v8334_v36, %v4098_v32  ;;  %v3848_v24 = vpop.xlane.xlu1 %3847 }
 0x418   :  { %v4651_v58 = vpack.c.bf16 %v4172_v20, %v4171_v7  ;;  %v3955_v56 = vadd.f32 1e-05, %v3923_v41  ;;  %v3924_v43 = vmul.f32 0.00390625, %v3848_v24 }
 0x419   :  { %v4652_v40 = vpack.c.bf16 %v4174_v29, %v4173_v9 }
 0x41a   :  { %v5252_v53 = vpop.eup %5251  ;;  %4423 = vst [vmem:[%s8632_s8 + $0x20] sm:$0xff] %v4651_v58  ;;  %5255 = vrsqrt.f32 %v3955_v56  ;;  %v3956_v6 = vadd.f32 1e-05, %v3924_v43 }
 0x41b   :  { %4424 = vst [vmem:[%s8632_s8 + $0x28] sm:$0xff] %v4652_v40  ;;  %v4023_v25 = vmul.f32 %v5252_v53, %v8059_v12  ;;  %v4024_v3 = vmul.f32 %v5252_v53, %v8062_v55 }
 0x41c   :  { %v5254_v38 = vpop.eup %5253  ;;  %5257 = vrsqrt.f32 %v3956_v6 }
 0x41d   :  { %v4099_v44 = vmul.f32 %v8325_v39, %v4023_v25  ;;  %v4100_v4 = vmul.f32 %v8328_v2, %v4024_v3  ;;  %v4025_v21 = vmul.f32 %v5254_v38, %v8065_v23  ;;  %v4026_v37 = vmul.f32 %v5254_v38, %v8068_v59 }
 0x41f   :  { %v4175_v28 = vadd.f32 %v8331_v45, %v4099_v44  ;;  %v4176_v57 = vadd.f32 %v8334_v36, %v4100_v4  ;;  %v4101_v60 = vmul.f32 %v8325_v39, %v4025_v21  ;;  %v4102_v12 = vmul.f32 %v8328_v2, %v4026_v37 }
 0x420   :  { %v3851_v48 = vpop.xlane.xlu0 %3850 }
 0x421   :  { %v4653_v55 = vpack.c.bf16 %v4176_v57, %v4175_v28  ;;  %v4177_v15 = vadd.f32 %v8331_v45, %v4101_v60  ;;  %v4178_v17 = vadd.f32 %v8334_v36, %v4102_v12  ;;  %v3925_v32 = vmul.f32 0.00390625, %v3851_v48 }
 0x422   :  { %v3854_v50 = vpop.xlane.xlu1 %3853 }
 0x423   :  { %4425 = vst [vmem:[%s8632_s8 + $0x30] sm:$0xff] %v4653_v55  ;;  %v4654_v23 = vpack.c.bf16 %v4178_v17, %v4177_v15  ;;  %v3957_v59 = vadd.f32 1e-05, %v3925_v32  ;;  %v3926_v7 = vmul.f32 0.00390625, %v3854_v50 }
 0x424   :  { %v5256_v20 = vpop.eup %5255 }
 0x425   :  { %4426 = vst [vmem:[%s8632_s8 + $0x38] sm:$0xff] %v4654_v23  ;;  %v4027_v41 = vmul.f32 %v5256_v20, %v8079_v1  ;;  %v4028_v9 = vmul.f32 %v5256_v20, %v8082_v19  ;;  %5259 = vrsqrt.f32 %v3957_v59  ;;  %v3958_v29 = vadd.f32 1e-05, %v3926_v7 }
 0x426   :  { %v5258_v24 = vpop.eup %5257 }
 0x427   :  { %v4103_v58 = vmul.f32 %v8325_v39, %v4027_v41  ;;  %v4104_v56 = vmul.f32 %v8328_v2, %v4028_v9  ;;  %v4029_v43 = vmul.f32 %v5258_v24, %v8085_v34  ;;  %v4030_v40 = vmul.f32 %v5258_v24, %v8088_v30 }
 0x428   :  { %5261 = vrsqrt.f32 %v3958_v29 }
 0x429   :  { %v4179_v53 = vadd.f32 %v8331_v45, %v4103_v58  ;;  %v4180_v6 = vadd.f32 %v8334_v36, %v4104_v56  ;;  %v4105_v1 = vmul.f32 %v8325_v39, %v4029_v43  ;;  %v4106_v19 = vmul.f32 %v8328_v2, %v4030_v40 }
 0x42a   :  { %v3857_v25 = vpop.xlane.xlu0 %3856 }
 0x42b   :  { %v4655_v3 = vpack.c.bf16 %v4180_v6, %v4179_v53  ;;  %v4181_v38 = vadd.f32 %v8331_v45, %v4105_v1  ;;  %v4182_v44 = vadd.f32 %v8334_v36, %v4106_v19  ;;  %v3927_v4 = vmul.f32 0.00390625, %v3857_v25 }
 0x42c   :  { %v3860_v21 = vpop.xlane.xlu1 %3859 }
 0x42d   :  { %4427 = vst [vmem:[%s8632_s8 + $0x40] sm:$0xff] %v4655_v3  ;;  %v4656_v34 = vpack.c.bf16 %v4182_v44, %v4181_v38  ;;  %v3959_v30 = vadd.f32 1e-05, %v3927_v4  ;;  %v3928_v37 = vmul.f32 0.00390625, %v3860_v21 }
 0x42f   :  { %v5260_v28 = vpop.eup %5259  ;;  %4428 = vst [vmem:[%s8632_s8 + $0x48] sm:$0xff] %v4656_v34  ;;  %5263 = vrsqrt.f32 %v3959_v30  ;;  %v3960_v57 = vadd.f32 1e-05, %v3928_v37 }
 0x430   :  { %v4031_v60 = vmul.f32 %v5260_v28, %v8099_v42  ;;  %v4032_v12 = vmul.f32 %v5260_v28, %v8102_v5 }
 0x431   :  { %5265 = vrsqrt.f32 %v3960_v57 }
 0x432   :  { %v5262_v48 = vpop.eup %5261  ;;  %v4107_v55 = vmul.f32 %v8325_v39, %v4031_v60  ;;  %v4108_v15 = vmul.f32 %v8328_v2, %v4032_v12 }
 0x433   :  { %v4033_v17 = vmul.f32 %v5262_v48, %v8105_v46  ;;  %v4034_v32 = vmul.f32 %v5262_v48, %v8108_v51 }
 0x434   :  { %v4183_v50 = vadd.f32 %v8331_v45, %v4107_v55  ;;  %v4184_v23 = vadd.f32 %v8334_v36, %v4108_v15 }
 0x435   :  { %v4109_v59 = vmul.f32 %v8325_v39, %v4033_v17  ;;  %v4110_v42 = vmul.f32 %v8328_v2, %v4034_v32  ;;  %v3863_v7 = vpop.xlane.xlu0 %3862 }
 0x436   :  { %v4657_v5 = vpack.c.bf16 %v4184_v23, %v4183_v50  ;;  %v3929_v20 = vmul.f32 0.00390625, %v3863_v7 }
 0x437   :  { %v4185_v41 = vadd.f32 %v8331_v45, %v4109_v59  ;;  %v4186_v9 = vadd.f32 %v8334_v36, %v4110_v42  ;;  %v3866_v29 = vpop.xlane.xlu1 %3865 }
 0x438   :  { %4429 = vst [vmem:[%s8632_s8 + $0x50] sm:$0xff] %v4657_v5  ;;  %v3961_v46 = vadd.f32 1e-05, %v3929_v20  ;;  %v3930_v51 = vmul.f32 0.00390625, %v3866_v29 }
 0x439   :  { %v5264_v24 = vpop.eup %5263  ;;  %v4658_v58 = vpack.c.bf16 %v4186_v9, %v4185_v41 }
 0x43a   :  { %v4035_v56 = vmul.f32 %v5264_v24, %v8119_v47  ;;  %v4036_v43 = vmul.f32 %v5264_v24, %v8122_v63  ;;  %5267 = vrsqrt.f32 %v3961_v46  ;;  %v3962_v40 = vadd.f32 1e-05, %v3930_v51 }
 0x43b   :  { %v5266_v53 = vpop.eup %5265  ;;  %4430 = vst [vmem:[%s8632_s8 + $0x58] sm:$0xff] %v4658_v58 }
 0x43c   :  { %v4111_v6 = vmul.f32 %v8325_v39, %v4035_v56  ;;  %v4112_v1 = vmul.f32 %v8328_v2, %v4036_v43  ;;  %v4037_v19 = vmul.f32 %v5266_v53, %v8125_v35  ;;  %v4038_v25 = vmul.f32 %v5266_v53, %v8128_v13 }
 0x43d   :  { %5269 = vrsqrt.f32 %v3962_v40 }
 0x43e   :  { %v4187_v47 = vadd.f32 %v8331_v45, %v4111_v6  ;;  %v4188_v63 = vadd.f32 %v8334_v36, %v4112_v1  ;;  %v4113_v3 = vmul.f32 %v8325_v39, %v4037_v19  ;;  %v4114_v38 = vmul.f32 %v8328_v2, %v4038_v25 }
 0x43f   :  { %v3869_v44 = vpop.xlane.xlu0 %3868 }
 0x440   :  { %v4659_v4 = vpack.c.bf16 %v4188_v63, %v4187_v47  ;;  %v4189_v21 = vadd.f32 %v8331_v45, %v4113_v3  ;;  %v4190_v34 = vadd.f32 %v8334_v36, %v4114_v38  ;;  %v3931_v30 = vmul.f32 0.00390625, %v3869_v44 }
 0x441   :  { %v3872_v37 = vpop.xlane.xlu1 %3871 }
 0x442   :  { %4431 = vst [vmem:[%s8632_s8 + $0x60] sm:$0xff] %v4659_v4  ;;  %v4660_v35 = vpack.c.bf16 %v4190_v34, %v4189_v21  ;;  %v3963_v13 = vadd.f32 1e-05, %v3931_v30  ;;  %v3932_v28 = vmul.f32 0.00390625, %v3872_v37 }
 0x444   :  { %v5268_v57 = vpop.eup %5267  ;;  %4432 = vst [vmem:[%s8632_s8 + $0x68] sm:$0xff] %v4660_v35  ;;  %5271 = vrsqrt.f32 %v3963_v13  ;;  %v3964_v60 = vadd.f32 1e-05, %v3932_v28 }
 0x445   :  { %v4039_v12 = vmul.f32 %v5268_v57, %v8139_v52  ;;  %v4040_v48 = vmul.f32 %v5268_v57, %v8142_v54 }
 0x446   :  { %5273 = vrsqrt.f32 %v3964_v60 }
 0x447   :  { %v5270_v55 = vpop.eup %5269  ;;  %v4115_v15 = vmul.f32 %v8325_v39, %v4039_v12  ;;  %v4116_v17 = vmul.f32 %v8328_v2, %v4040_v48 }
 0x448   :  { %v4041_v32 = vmul.f32 %v5270_v55, %v8145_v10  ;;  %v4042_v50 = vmul.f32 %v5270_v55, %v8148_v14 }
 0x449   :  { %v4191_v23 = vadd.f32 %v8331_v45, %v4115_v15  ;;  %v4192_v59 = vadd.f32 %v8334_v36, %v4116_v17 }
 0x44a   :  { %v4117_v42 = vmul.f32 %v8325_v39, %v4041_v32  ;;  %v4118_v52 = vmul.f32 %v8328_v2, %v4042_v50  ;;  %v3875_v7 = vpop.xlane.xlu0 %3874 }
 0x44b   :  { %v4661_v54 = vpack.c.bf16 %v4192_v59, %v4191_v23  ;;  %v3933_v5 = vmul.f32 0.00390625, %v3875_v7 }
 0x44c   :  { %v4193_v20 = vadd.f32 %v8331_v45, %v4117_v42  ;;  %v4194_v41 = vadd.f32 %v8334_v36, %v4118_v52  ;;  %v3878_v9 = vpop.xlane.xlu1 %3877 }
 0x44d   :  { %4433 = vst [vmem:[%s8632_s8 + $0x70] sm:$0xff] %v4661_v54  ;;  %v3965_v10 = vadd.f32 1e-05, %v3933_v5  ;;  %v3934_v14 = vmul.f32 0.00390625, %v3878_v9 }
 0x44e   :  { %v5272_v29 = vpop.eup %5271  ;;  %v4662_v46 = vpack.c.bf16 %v4194_v41, %v4193_v20 }
 0x44f   :  { %v4043_v51 = vmul.f32 %v5272_v29, %v8159_v26  ;;  %v4044_v24 = vmul.f32 %v5272_v29, %v8162_v61  ;;  %5275 = vrsqrt.f32 %v3965_v10  ;;  %v3966_v58 = vadd.f32 1e-05, %v3934_v14  ;;  %v8779_v10 = vld [vmem:[#allocation11_spill] sm:$0xff] }
 0x450   :  { %v5274_v56 = vpop.eup %5273  ;;  %4434 = vst [vmem:[%s8632_s8 + $0x78] sm:$0xff] %v4662_v46 }
 0x451   :  { %v4119_v43 = vmul.f32 %v8325_v39, %v4043_v51  ;;  %v4120_v40 = vmul.f32 %v8328_v2, %v4044_v24  ;;  %v4045_v53 = vmul.f32 %v5274_v56, %v8165_v62  ;;  %v4046_v6 = vmul.f32 %v5274_v56, %v8168_v22 }
 0x452   :  { %5277 = vrsqrt.f32 %v3966_v58 }
 0x453   :  { %v4195_v26 = vadd.f32 %v8331_v45, %v4119_v43  ;;  %v4196_v61 = vadd.f32 %v8334_v36, %v4120_v40  ;;  %v4121_v1 = vmul.f32 %v8325_v39, %v4045_v53  ;;  %v4122_v19 = vmul.f32 %v8328_v2, %v4046_v6 }
 0x454   :  { %v3881_v25 = vpop.xlane.xlu0 %3880 }
 0x455   :  { %v4663_v47 = vpack.c.bf16 %v4196_v61, %v4195_v26  ;;  %v4197_v63 = vadd.f32 %v8331_v45, %v4121_v1  ;;  %v4198_v3 = vadd.f32 %v8334_v36, %v4122_v19  ;;  %v3935_v38 = vmul.f32 0.00390625, %v3881_v25  ;;  %v8780_v1 = vld [vmem:[#allocation6_spill] sm:$0xff]  ;;  %v8781_v25 = vld [vmem:[#allocation12_spill] sm:$0xff] }
 0x456   :  { %v3884_v44 = vpop.xlane.xlu1 %3883 }
 0x457   :  { %4435 = vst [vmem:[%s8632_s8 + $0x80] sm:$0xff] %v4663_v47  ;;  %v4664_v62 = vpack.c.bf16 %v4198_v3, %v4197_v63  ;;  %v3967_v22 = vadd.f32 1e-05, %v3935_v38  ;;  %v3936_v4 = vmul.f32 0.00390625, %v3884_v44 }
 0x459   :  { %v5276_v21 = vpop.eup %5275  ;;  %4436 = vst [vmem:[%s8632_s8 + $0x88] sm:$0xff] %v4664_v62  ;;  %5279 = vrsqrt.f32 %v3967_v22  ;;  %v3968_v34 = vadd.f32 1e-05, %v3936_v4  ;;  %v8782_v4 = vld [vmem:[#allocation13_spill] sm:$0xff] }
 0x45a   :  { %v4047_v30 = vmul.f32 %v5276_v21, %v8179_v0  ;;  %v4048_v37 = vmul.f32 %v5276_v21, %v8182_v11 }
 0x45b   :  { %5281 = vrsqrt.f32 %v3968_v34  ;;  %v8783_v34 = vld [vmem:[#allocation14_spill] sm:$0xff] }
 0x45c   :  { %v5278_v35 = vpop.eup %5277  ;;  %v4123_v13 = vmul.f32 %v8325_v39, %v4047_v30  ;;  %v4124_v28 = vmul.f32 %v8328_v2, %v4048_v37 }
 0x45d   :  { %v4049_v57 = vmul.f32 %v5278_v35, %v8185_v49  ;;  %v4050_v60 = vmul.f32 %v5278_v35, %v8188_v8 }
 0x45e   :  { %v4199_v12 = vadd.f32 %v8331_v45, %v4123_v13  ;;  %v4200_v48 = vadd.f32 %v8334_v36, %v4124_v28 }
 0x45f   :  { %v4125_v55 = vmul.f32 %v8325_v39, %v4049_v57  ;;  %v4126_v0 = vmul.f32 %v8328_v2, %v4050_v60 }
 0x460   :  { %v3887_v15 = vpop.xlane.xlu0 %3886  ;;  %v4665_v11 = vpack.c.bf16 %v4200_v48, %v4199_v12 }
 0x461   :  { %v3937_v17 = vmul.f32 0.00390625, %v3887_v15  ;;  %v4201_v32 = vadd.f32 %v8331_v45, %v4125_v55  ;;  %v4202_v50 = vadd.f32 %v8334_v36, %v4126_v0  ;;  %v3890_v23 = vpop.xlane.xlu1 %3889 }
 0x462   :  { %4437 = vst [vmem:[%s8632_s8 + $0x90] sm:$0xff] %v4665_v11  ;;  %v3938_v8 = vmul.f32 0.00390625, %v3890_v23 }
 0x463   :  { %v3969_v49 = vadd.f32 1e-05, %v3937_v17  ;;  %v5280_v59 = vpop.eup %5279  ;;  %v4666_v42 = vpack.c.bf16 %v4202_v50, %v4201_v32  ;;  %v8784_v50 = vld [vmem:[#allocation7_spill] sm:$0xff] }
 0x464   :  { %v4051_v52 = vmul.f32 %v5280_v59, %v8199_v31  ;;  %v4052_v7 = vmul.f32 %v5280_v59, %v8202_v33  ;;  %v3970_v54 = vadd.f32 1e-05, %v3938_v8 }
 0x465   :  { %5283 = vrsqrt.f32 %v3969_v49  ;;  %v5282_v5 = vpop.eup %5281  ;;  %4438 = vst [vmem:[%s8632_s8 + $0x98] sm:$0xff] %v4666_v42  ;;  %v8785_v49 = vld [vmem:[#allocation5_spill] sm:$0xff]  ;;  %v8786_v42 = vld [vmem:[#allocation8_spill] sm:$0xff] }
 0x466   :  { %v4127_v20 = vmul.f32 %v8325_v39, %v4051_v52  ;;  %v4128_v41 = vmul.f32 %v8328_v2, %v4052_v7  ;;  %v4053_v9 = vmul.f32 %v5282_v5, %v8205_v18  ;;  %v4054_v14 = vmul.f32 %v5282_v5, %v8779_v10  ;;  %v8787_v7 = vld [vmem:[#allocation15_spill] sm:$0xff] }
 0x467   :  { %5285 = vrsqrt.f32 %v3970_v54 }
 0x468   :  { %v3893_v29 = vpop.xlane.xlu0 %3892  ;;  %v4203_v31 = vadd.f32 %v8331_v45, %v4127_v20  ;;  %v4204_v33 = vadd.f32 %v8334_v36, %v4128_v41  ;;  %v4129_v46 = vmul.f32 %v8325_v39, %v4053_v9  ;;  %v4130_v51 = vmul.f32 %v8328_v2, %v4054_v14 }
 0x469   :  { %v3939_v24 = vmul.f32 0.00390625, %v3893_v29  ;;  %v3896_v58 = vpop.xlane.xlu1 %3895 }
 0x46a   :  { %v4667_v56 = vpack.c.bf16 %v4204_v33, %v4203_v31  ;;  %v4205_v43 = vadd.f32 %v8331_v45, %v4129_v46  ;;  %v4206_v40 = vadd.f32 %v8334_v36, %v4130_v51  ;;  %v3940_v18 = vmul.f32 0.00390625, %v3896_v58 }
 0x46b   :  { %v3971_v53 = vadd.f32 1e-05, %v3939_v24 }
 0x46c   :  { %4439 = vst [vmem:[%s8632_s8 + $0xa0] sm:$0xff] %v4667_v56  ;;  %v4668_v6 = vpack.c.bf16 %v4206_v40, %v4205_v43  ;;  %v3972_v26 = vadd.f32 1e-05, %v3940_v18  ;;  %v8788_v40 = vld [vmem:[#allocation16_spill] sm:$0xff] }
 0x46d   :  { %5287 = vrsqrt.f32 %v3971_v53  ;;  %v8789_v53 = vld [vmem:[#allocation9_spill] sm:$0xff] }
 0x46e   :  { %4440 = vst [vmem:[%s8632_s8 + $0xa8] sm:$0xff] %v4668_v6  ;;  %5289 = vrsqrt.f32 %v3972_v26 }
 0x46f   :  { %v5284_v61 = vpop.eup %5283 }
 0x470   :  { %v4055_v19 = vmul.f32 %v5284_v61, %v8780_v1  ;;  %v4056_v47 = vmul.f32 %v5284_v61, %v8781_v25  ;;  %v3899_v63 = vpop.xlane.xlu0 %3898 }
 0x471   :  { %v3941_v3 = vmul.f32 0.00390625, %v3899_v63  ;;  %v5286_v38 = vpop.eup %5285  ;;  %v3902_v22 = vpop.xlane.xlu1 %3901 }
 0x472   :  { %v4131_v44 = vmul.f32 %v8325_v39, %v4055_v19  ;;  %v4132_v62 = vmul.f32 %v8328_v2, %v4056_v47  ;;  %v4057_v21 = vmul.f32 %v5286_v38, %v8782_v4  ;;  %v4058_v30 = vmul.f32 %v5286_v38, %v8783_v34  ;;  %v8790_v47 = vld [vmem:[#allocation10_spill] sm:$0xff] }
 0x473   :  { %v3973_v37 = vadd.f32 1e-05, %v3941_v3  ;;  %v3942_v35 = vmul.f32 0.00390625, %v3902_v22 }
 0x474   :  { %v4207_v13 = vadd.f32 %v8331_v45, %v4131_v44  ;;  %v4208_v28 = vadd.f32 %v8334_v36, %v4132_v62  ;;  %v4133_v57 = vmul.f32 %v8325_v39, %v4057_v21  ;;  %v4134_v60 = vmul.f32 %v8328_v2, %v4058_v30 }
 0x475   :  { %5291 = vrsqrt.f32 %v3973_v37  ;;  %v3974_v12 = vadd.f32 1e-05, %v3942_v35 }
 0x476   :  { %v4669_v48 = vpack.c.bf16 %v4208_v28, %v4207_v13  ;;  %v4209_v55 = vadd.f32 %v8331_v45, %v4133_v57  ;;  %v4210_v0 = vadd.f32 %v8334_v36, %v4134_v60  ;;  %v8791_v60 = vld [vmem:[#allocation17_spill] sm:$0xff] }
 0x477   :  { %5293 = vrsqrt.f32 %v3974_v12  ;;  %v5288_v15 = vpop.eup %5287  ;;  %v3905_v11 = vpop.xlane.xlu0 %3904 }
 0x478   :  { %4441 = vst [vmem:[%s8632_s8 + $0xb0] sm:$0xff] %v4669_v48  ;;  %v5290_v17 = vpop.eup %5289  ;;  %v4670_v32 = vpack.c.bf16 %v4210_v0, %v4209_v55  ;;  %v4059_v23 = vmul.f32 %v5288_v15, %v8784_v50  ;;  %v4060_v8 = vmul.f32 %v5288_v15, %v8785_v49  ;;  %v3943_v59 = vmul.f32 0.00390625, %v3905_v11  ;;  %v8792_v15 = vld [vmem:[#allocation18_spill] sm:$0xff] }
 0x479   :  { %v4061_v52 = vmul.f32 %v5290_v17, %v8786_v42  ;;  %v4062_v54 = vmul.f32 %v5290_v17, %v8787_v7  ;;  %v3908_v5 = vpop.xlane.xlu1 %3907  ;;  %v8793_v17 = vld [vmem:[#allocation19_spill] sm:$0xff] }
 0x47a   :  { %4442 = vst [vmem:[%s8632_s8 + $0xb8] sm:$0xff] %v4670_v32  ;;  %v4135_v20 = vmul.f32 %v8325_v39, %v4059_v23  ;;  %v4136_v41 = vmul.f32 %v8328_v2, %v4060_v8  ;;  %v3975_v9 = vadd.f32 1e-05, %v3943_v59  ;;  %v3944_v10 = vmul.f32 0.00390625, %v3908_v5 }
 0x47b   :  { %v4137_v14 = vmul.f32 %v8325_v39, %v4061_v52  ;;  %v4138_v29 = vmul.f32 %v8328_v2, %v4062_v54  ;;  %v8794_v54 = vld [vmem:[#allocation20_spill] sm:$0xff] }
 0x47c   :  { %v4211_v31 = vadd.f32 %v8331_v45, %v4135_v20  ;;  %v4212_v33 = vadd.f32 %v8334_v36, %v4136_v41  ;;  %5295 = vrsqrt.f32 %v3975_v9  ;;  %v3976_v46 = vadd.f32 1e-05, %v3944_v10  ;;  %v8795_v20 = vld [vmem:[#allocation21_spill] sm:$0xff] }
 0x47d   :  { %v4213_v51 = vadd.f32 %v8331_v45, %v4137_v14  ;;  %v4214_v24 = vadd.f32 %v8334_v36, %v4138_v29  ;;  %v8796_v29 = vld [vmem:[#allocation22_spill] sm:$0xff] }
 0x47e   :  { %v4671_v56 = vpack.c.bf16 %v4212_v33, %v4211_v31  ;;  %5297 = vrsqrt.f32 %v3976_v46  ;;  %v8797_v33 = vld [vmem:[#allocation23_spill] sm:$0xff] }
 0x47f   :  { %v5292_v58 = vpop.eup %5291  ;;  %v4672_v43 = vpack.c.bf16 %v4214_v24, %v4213_v51 }
 0x480   :  { %v4063_v18 = vmul.f32 %v5292_v58, %v8788_v40  ;;  %v4064_v6 = vmul.f32 %v5292_v58, %v8789_v53  ;;  %v3911_v26 = vpop.xlane.xlu0 %3910  ;;  %4443 = vst [vmem:[%s8632_s8 + $0xc0] sm:$0xff] %v4671_v56 }
 0x481   :  { %v5294_v61 = vpop.eup %5293  ;;  %v3945_v1 = vmul.f32 0.00390625, %v3911_v26  ;;  %4444 = vst [vmem:[%s8632_s8 + $0xc8] sm:$0xff] %v4672_v43  ;;  %v3914_v38 = vpop.xlane.xlu1 %3913 }
 0x482   :  { %v4139_v19 = vmul.f32 %v8325_v39, %v4063_v18  ;;  %v4140_v25 = vmul.f32 %v8328_v2, %v4064_v6  ;;  %v4065_v63 = vmul.f32 %v5294_v61, %v8790_v47  ;;  %v4066_v3 = vmul.f32 %v5294_v61, %v8268_v27 }
 0x483   :  { %v3977_v44 = vadd.f32 1e-05, %v3945_v1  ;;  %v3946_v62 = vmul.f32 0.00390625, %v3914_v38 }
 0x484   :  { %v4215_v22 = vadd.f32 %v8331_v45, %v4139_v19  ;;  %v4216_v4 = vadd.f32 %v8334_v36, %v4140_v25  ;;  %v4141_v21 = vmul.f32 %v8325_v39, %v4065_v63  ;;  %v4142_v34 = vmul.f32 %v8328_v2, %v4066_v3 }
 0x485   :  { %5299 = vrsqrt.f32 %v3977_v44  ;;  %v3978_v30 = vadd.f32 1e-05, %v3946_v62 }
 0x486   :  { %v4673_v37 = vpack.c.bf16 %v4216_v4, %v4215_v22  ;;  %v4217_v35 = vadd.f32 %v8331_v45, %v4141_v21  ;;  %v4218_v13 = vadd.f32 %v8334_v36, %v4142_v34  ;;  %v5296_v28 = vpop.eup %5295 }
 0x487   :  { %5301 = vrsqrt.f32 %v3978_v30  ;;  %v4067_v57 = vmul.f32 %v5296_v28, %v8279_v16  ;;  %v4068_v12 = vmul.f32 %v5296_v28, %v8791_v60 }
 0x488   :  { %4445 = vst [vmem:[%s8632_s8 + $0xd0] sm:$0xff] %v4673_v37  ;;  %v4674_v27 = vpack.c.bf16 %v4218_v13, %v4217_v35  ;;  %v5298_v48 = vpop.eup %5297 }
 0x489   :  { %v4143_v55 = vmul.f32 %v8325_v39, %v4067_v57  ;;  %v4144_v0 = vmul.f32 %v8328_v2, %v4068_v12  ;;  %v4069_v11 = vmul.f32 %v5298_v48, %v8792_v15  ;;  %v4070_v32 = vmul.f32 %v5298_v48, %v8793_v17 }
 0x48a   :  { %4446 = vst [vmem:[%s8632_s8 + $0xd8] sm:$0xff] %v4674_v27 }
 0x48b   :  { %v4219_v50 = vadd.f32 %v8331_v45, %v4143_v55  ;;  %v4220_v23 = vadd.f32 %v8334_v36, %v4144_v0  ;;  %v4145_v16 = vmul.f32 %v8325_v39, %v4069_v11  ;;  %v4146_v49 = vmul.f32 %v8328_v2, %v4070_v32 }
 0x48d   :  { %v4675_v8 = vpack.c.bf16 %v4220_v23, %v4219_v50  ;;  %v4221_v59 = vadd.f32 %v8331_v45, %v4145_v16  ;;  %v4222_v42 = vadd.f32 %v8334_v36, %v4146_v49 }
 0x48f   :  { %v5300_v52 = vpop.eup %5299  ;;  %4447 = vst [vmem:[%s8632_s8 + $0xe0] sm:$0xff] %v4675_v8  ;;  %v4676_v7 = vpack.c.bf16 %v4222_v42, %v4221_v59 }
 0x490   :  { %v4071_v5 = vmul.f32 %v5300_v52, %v8794_v54  ;;  %v4072_v41 = vmul.f32 %v5300_v52, %v8795_v20 }
 0x491   :  { %v5302_v9 = vpop.eup %5301  ;;  %4448 = vst [vmem:[%s8632_s8 + $0xe8] sm:$0xff] %v4676_v7 }
 0x492   :  { %v4147_v10 = vmul.f32 %v8325_v39, %v4071_v5  ;;  %v4148_v14 = vmul.f32 %v8328_v2, %v4072_v41  ;;  %v4073_v31 = vmul.f32 %v5302_v9, %v8796_v29  ;;  %v4074_v46 = vmul.f32 %v5302_v9, %v8797_v33 }
 0x494   :  { %v4223_v51 = vadd.f32 %v8331_v45, %v4147_v10  ;;  %v4224_v24 = vadd.f32 %v8334_v36, %v4148_v14  ;;  %v4149_v58 = vmul.f32 %v8325_v39, %v4073_v31  ;;  %v4150_v56 = vmul.f32 %v8328_v2, %v4074_v46 }
 0x496   :  { %v4677_v43 = vpack.c.bf16 %v4224_v24, %v4223_v51  ;;  %v4225_v40 = vadd.f32 %v8331_v45, %v4149_v58  ;;  %v4226_v18 = vadd.f32 %v8334_v36, %v4150_v56 }
 0x498   :  { %4449 = vst [vmem:[%s8632_s8 + $0xf0] sm:$0xff] %v4677_v43  ;;  %v4678_v53 = vpack.c.bf16 %v4226_v18, %v4225_v40 }
 0x49a   :  { %4450 = vst [vmem:[%s8632_s8 + $0xf8] sm:$0xff] %v4678_v53 }

</bundles_post_ra>
